<compile_context>
chip_gen: v7x
topology: tpu7x:2x2x1
jax: 0.10.0
libtpu: 0.0.40
codegen_flags: <defaults>
</compile_context>

<pallas_src>
import functools

import jax
import jax.numpy as jnp
from jax import lax
from jax.experimental import pallas as pl
from jax.experimental.pallas import tpu as pltpu


# ------------------------------ layout helpers ------------------------------ #

def _round_up(x, m):
    return ((x + m - 1) // m) * m


def _flat_dims(img):
    """Constants of the flat 'padded-conv' layout (all lane-aligned to 128)."""
    Hp = Wp = img + 2
    HpWp = Hp * Wp
    oc = HpWp + Wp + 1                        # flat offset of padded voxel (1,1,1)
    Q = (img - 1) * HpWp + (img - 1) * Wp + img   # conv-output flat extent
    Qp = _round_up(Q, 128)                    # lane-aligned window
    base = _round_up(oc, 128)                 # aligned interior offset in pad scratch
    Pbuf = _round_up(base + Qp + oc, 128)     # pad-scratch length (taps stay in range)
    return Hp, Wp, HpWp, oc, Q, Qp, base, Pbuf


# ------------------------- tiled projection matmul ------------------------- #

def _matmul_kernel(a_ref, b_ref, o_ref, acc_ref):
    @pl.when(pl.program_id(2) == 0)
    def _():
        acc_ref[...] = jnp.zeros_like(acc_ref)

    acc_ref[...] += jnp.dot(a_ref[...], b_ref[...],
                            preferred_element_type=jnp.float32)

    @pl.when(pl.program_id(2) == pl.num_programs(2) - 1)
    def _():
        o_ref[...] = acc_ref[...].astype(o_ref.dtype)


def _pick_tile(dim, preferred, granule):
    """Largest multiple of `granule` <= `preferred` dividing `dim`, else full dim."""
    if dim <= preferred:
        return dim
    t = (preferred // granule) * granule
    while t >= granule:
        if dim % t == 0:
            return t
        t -= granule
    return dim


def pallas_matmul(a, b, *, tm=256, tk=2048, tn=1024):
    """a: (M, K) bf16, b: (K, N) bf16 -> (M, N) f32, tiled MXU matmul."""
    M, K = a.shape
    K2, N = b.shape
    assert K == K2
    tm = _pick_tile(M, tm, 16)
    tk = _pick_tile(K, tk, 128)
    tn = _pick_tile(N, tn, 128)
    # Expose >= 2 blocks on a parallel axis so both TensorCores are used on
    # megacore parts (v7x); no effect on single-core chips.
    if (M // tm) * (N // tn) < 2 and N >= 256:
        tn = _pick_tile(N, max(128, (N // 2 // 128) * 128), 128)
    grid = (M // tm, N // tn, K // tk)
    return pl.pallas_call(
        _matmul_kernel,
        out_shape=jax.ShapeDtypeStruct((M, N), jnp.float32),
        grid_spec=pltpu.PrefetchScalarGridSpec(
            num_scalar_prefetch=0,
            grid=grid,
            in_specs=[
                pl.BlockSpec((tm, tk), lambda i, j, k: (i, k)),
                pl.BlockSpec((tk, tn), lambda i, j, k: (k, j)),
            ],
            out_specs=pl.BlockSpec((tm, tn), lambda i, j, k: (i, j)),
            scratch_shapes=[pltpu.VMEM((tm, tn), jnp.float32)],
        ),
        compiler_params=pltpu.CompilerParams(
            dimension_semantics=("parallel", "parallel", "arbitrary"),
            vmem_limit_bytes=48 * 1024 * 1024,
        ),
    )(a, b)


# ------------- fused refinement: 2x ResidualBlock3D in one kernel ----------- #

def _refine_kernel(x_ref, w_ref, mask_ref, o_ref, pad_buf, tap_buf, res_buf, *,
                   C, img, Qp, base):
    Hp = Wp = img + 2
    HpWp = Hp * Wp
    oc = HpWp + Wp + 1
    inv_cnt = 1.0 / float(img ** 3)
    mask = mask_ref[...]                                      # (1, Qp) valid voxels
    tap_offs = [kd * HpWp + kh * Wp + kw
                for kd in range(3) for kh in range(3) for kw in range(3)]

    # Zero the padded scratch ONCE per sample: only the halo must stay zero,
    # the interior [base, base+Qp) window is fully rewritten before every conv.
    pad_buf[...] = jnp.zeros_like(pad_buf)

    def put(v):
        # lane-aligned, full-width bf16 store of the next conv input
        pad_buf[:, pl.ds(base, Qp)] = v.astype(jnp.bfloat16)

    def conv_in_relu(layer, residual):
        # Conv3d(k=3, pad=1) as ONE MXU matmul: gather the 27 lane-shifted taps
        # into a stacked (27*C, Qp) bf16 slab, contract with the (C, 27*C) weights.
        for t, off in enumerate(tap_offs):
            tap_buf[pl.ds(t * C, C), :] = pad_buf[:, pl.ds(base - oc + off, Qp)]
        y = jnp.dot(w_ref[layer], tap_buf[...],
                    preferred_element_type=jnp.float32)       # (C, Qp) f32
        # conv bias dropped: InstanceNorm3d(affine=False) cancels it exactly.
        mean = jnp.sum(y * mask, axis=-1, keepdims=True) * inv_cnt
        cen = y - mean
        var = jnp.sum((cen * mask) ** 2, axis=-1, keepdims=True) * inv_cnt
        yn = cen * lax.rsqrt(var + 1e-5)
        if residual is not None:
            yn = yn + residual
        return jnp.maximum(yn, 0.0) * mask                    # zero the layout holes

    x = x_ref[0]                                              # (C, Qp) f32, block-1 identity

    # ---- ResidualBlock3D #1: relu(IN(conv1(x))) ; relu(IN(conv2(.)) + x) ----
    put(x)
    y = conv_in_relu(0, None)
    put(y)
    y = conv_in_relu(1, x)
    res_buf[...] = y                                          # block-2 identity (f32)

    # ---- ResidualBlock3D #2 ----
    put(y)
    y = conv_in_relu(2, None)
    put(y)
    y = conv_in_relu(3, res_buf[...])

    o_ref[0] = y.astype(jnp.bfloat16)                         # lane-dense full-width store


def pallas_refinement(vol_q, w_stacked, valid_mask, *, C, img):
    # NOTE: with C=4 the elementwise work only fills half of each vreg's
    # sublanes; packing 2 samples per grid step (block-diag weights) would
    # roughly double VPU utilization — left out for simplicity at these sizes.
    N = vol_q.shape[0]
    _, _, _, _, _, Qp, base, Pbuf = _flat_dims(img)
    kern = functools.partial(_refine_kernel, C=C, img=img, Qp=Qp, base=base)
    return pl.pallas_call(
        kern,
        out_shape=jax.ShapeDtypeStruct((N, C, Qp), jnp.bfloat16),
        grid=(N,),
        in_specs=[
            pl.BlockSpec((1, C, Qp), lambda n: (n, 0, 0)),
            pl.BlockSpec(w_stacked.shape, lambda n: (0, 0, 0)),
            pl.BlockSpec((1, Qp), lambda n: (0, 0)),
        ],
        out_specs=pl.BlockSpec((1, C, Qp), lambda n: (n, 0, 0)),
        scratch_shapes=[
            pltpu.VMEM((C, Pbuf), jnp.bfloat16),       # padded conv input
            pltpu.VMEM((27 * C, Qp), jnp.bfloat16),    # stacked taps (VMEM im2col)
            pltpu.VMEM((C, Qp), jnp.float32),          # block-1 output (residual)
        ],
        compiler_params=pltpu.CompilerParams(
            dimension_semantics=("parallel",),
            vmem_limit_bytes=48 * 1024 * 1024,
        ),
    )(vol_q, w_stacked, valid_mask)


# -------------------------------- forward pass ------------------------------ #

def geometry_transformation(projection_data, params):
    """projection_data: (N, C, num_proj_ap, S, S) -> (N, C, num_proj_aplt, S, S)."""
    N, C, P_ap, S, _ = projection_data.shape
    img = params["image_size"]
    P_aplt = params["num_proj_aplt"]
    Qp = params["bp_matrix"].shape[1]

    # backward projection: emits the flat padded-layout volume directly
    proj_flat = projection_data.reshape(N * C, P_ap * S * S).astype(jnp.bfloat16)
    vol_q = pallas_matmul(proj_flat, params["bp_matrix"])          # (N*C, Qp) f32
    vol_q = vol_q.reshape(N, C, Qp)

    # refinement model (2x ResidualBlock3D), fully fused; output stays in the
    # same flat layout as bf16 -> no pad / slice / cast passes over HBM
    refined = pallas_refinement(vol_q, params["w_stacked"], params["valid_mask"],
                                C=C, img=img)                      # (N, C, Qp) bf16

    # forward projection
    proj_out = pallas_matmul(refined.reshape(N * C, Qp), params["fp_matrix"])
    return proj_out.reshape(N, C, P_aplt, S, S)


# ----------------------------- parameter init ------------------------------ #

def init_params(key, channels, image_size, proj_size, num_proj_ap, num_proj_aplt):
    keys = jax.random.split(key, 6)
    C = channels
    D = H = W = image_size
    Hp, Wp, HpWp, _, Q, Qp, _, _ = _flat_dims(image_size)
    V = D * H * W

    # Conv weights for block1.conv1/2, block2.conv1/2 stacked as
    # (layer, Cout, 27*Cin) so each conv is one MXU matmul against the tap slab.
    # Conv biases are omitted: InstanceNorm3d(affine=False) cancels them exactly.
    w_stacked = []
    for i in range(4):
        fan_in = C * 27
        bound = fan_in ** -0.5
        w = jax.random.uniform(keys[i], (C, C, 3, 3, 3), jnp.float32, -bound, bound)
        # column index = tap*(Cin) + cin with tap = kd*9 + kh*3 + kw
        w_stacked.append(jnp.transpose(w, (0, 2, 3, 4, 1)).reshape(C, 27 * C))
    w_stacked = jnp.stack(w_stacked, axis=0).astype(jnp.bfloat16)   # (4, C, 27C)

    # valid-voxel mask over the flat conv-output window (zeros at layout holes)
    qi = jnp.arange(Qp)
    valid = (qi < Q) & ((qi // Wp) % Hp < H) & (qi % Wp < W)
    valid_mask = valid.astype(jnp.float32).reshape(1, Qp)

    # flat position of voxel (d, h, w) inside the conv-output window
    dd, hh, ww = jnp.meshgrid(jnp.arange(D), jnp.arange(H), jnp.arange(W),
                              indexing="ij")
    qpos = (dd * HpWp + hh * Wp + ww).reshape(-1)                   # (V,)

    # TODO(synk): task1.AP_AP_Operators / task1.AP_APLT_Operators (CT geometry)
    # are unavailable; stood in by dense matrices pre-scattered into the flat
    # layout (zero columns/rows at layout holes), applied via the Pallas matmul.
    K_bp = num_proj_ap * proj_size * proj_size
    K_fp = num_proj_aplt * proj_size * proj_size
    bp_v = jax.random.normal(keys[4], (K_bp, V), jnp.float32) / jnp.sqrt(float(K_bp))
    fp_v = jax.random.normal(keys[5], (V, K_fp), jnp.float32) / jnp.sqrt(float(V))
    bp_q = jnp.zeros((K_bp, Qp), jnp.float32).at[:, qpos].set(bp_v).astype(jnp.bfloat16)
    fp_q = jnp.zeros((Qp, K_fp), jnp.float32).at[qpos, :].set(fp_v).astype(jnp.bfloat16)

    return {
        "image_size": image_size,
        "num_proj_aplt": num_proj_aplt,
        "bp_matrix": bp_q,
        "fp_matrix": fp_q,
        "w_stacked": w_stacked,
        "valid_mask": valid_mask,
    }


# ---------------------------------- main ------------------------------------ #

if __name__ == "__main__":
    channels = 4
    image_size = 8
    proj_size = 8
    num_proj_ap = 6
    num_proj_aplt = 6
    batch = 2

    key = jax.random.PRNGKey(0)
    k_in, k_par = jax.random.split(key)

    params = init_params(k_par, channels, image_size, proj_size,
                         num_proj_ap, num_proj_aplt)
    projection_data = jax.random.normal(
        k_in, (batch, channels, num_proj_ap, proj_size, proj_size), jnp.float32
    )

    fn = jax.jit(functools.partial(geometry_transformation, params=params))
    out = fn(projection_data)
    jax.block_until_ready(out)

    assert out.shape == (batch, channels, num_proj_aplt, proj_size, proj_size)
    assert out.dtype == jnp.float32
    assert bool(jnp.all(jnp.isfinite(out)))
    print("KERNEL_OK")
</pallas_src>

<mosaic_0001>
module attributes {stable_mosaic.version = 11 : i64} {
  func.func @_matmul_kernel(%arg0: i32, %arg1: i32, %arg2: i32, %arg3: memref<8x384xbf16, #tpu.memory_space<vmem>>, %arg4: memref<384x128xbf16, #tpu.memory_space<vmem>>, %arg5: memref<8x128xf32, #tpu.memory_space<vmem>>, %arg6: memref<8x128xf32, #tpu.memory_space<vmem>>) attributes {dimension_semantics = [#tpu.dimension_semantics<parallel>, #tpu.dimension_semantics<parallel>, #tpu.dimension_semantics<arbitrary>], iteration_bounds = array<i64: 1, 7, 1>, scalar_prefetch = 0 : i64, scratch_operands = 1 : i64, tpu.core_type = #tpu.core_type<tc>, window_params = [{transform_indices = @transform_0, window_bounds = array<i64: 8, 384>}, {transform_indices = @transform_1, window_bounds = array<i64: 384, 128>}, {transform_indices = @transform_2, window_bounds = array<i64: 8, 128>}]} {
    %c0_i32 = arith.constant 0 : i32
    %0 = arith.cmpi eq, %arg2, %c0_i32 : i32
    %1 = arith.extui %0 : i1 to i32
    %c0_i32_0 = arith.constant 0 : i32
    %2 = arith.cmpi ne, %1, %c0_i32_0 : i32
    scf.if %2 {
      %cst_10 = arith.constant 0.000000e+00 : f32
      %12 = vector.broadcast %cst_10 : f32 to vector<8x128xf32>
      %c0_11 = arith.constant 0 : index
      %c0_12 = arith.constant 0 : index
      %13 = vector.load %arg6[%c0_11, %c0_12] : memref<8x128xf32, #tpu.memory_space<vmem>>, vector<8x128xf32>
      tpu.vector_store %arg6[%c0_11, %c0_12], %12 {strides = array<i32>} : memref<8x128xf32, #tpu.memory_space<vmem>>, vector<8x128xf32>,
    } else {
    }
    %c0 = arith.constant 0 : index
    %c0_1 = arith.constant 0 : index
    %3 = vector.load %arg6[%c0, %c0_1] : memref<8x128xf32, #tpu.memory_space<vmem>>, vector<8x128xf32>
    %c0_2 = arith.constant 0 : index
    %c0_3 = arith.constant 0 : index
    %4 = vector.load %arg3[%c0_2, %c0_3] : memref<8x384xbf16, #tpu.memory_space<vmem>>, vector<8x384xbf16>
    %c0_4 = arith.constant 0 : index
    %c0_5 = arith.constant 0 : index
    %5 = vector.load %arg4[%c0_4, %c0_5] : memref<384x128xbf16, #tpu.memory_space<vmem>>, vector<384x128xbf16>
    %cst = arith.constant dense<0.000000e+00> : vector<8x128xf32>
    %6 = tpu.matmul %4, %5, %cst {dimension_numbers = #tpu.dot_dimension_numbers<[1], [0], [0], [1], [0, 0, 1, 1], [], []>} : vector<8x384xbf16>, vector<384x128xbf16>, vector<8x128xf32> -> vector<8x128xf32>
    %7 = arith.addf %3, %6 : vector<8x128xf32>
    %c0_6 = arith.constant 0 : index
    %c0_7 = arith.constant 0 : index
    %8 = vector.load %arg6[%c0_6, %c0_7] : memref<8x128xf32, #tpu.memory_space<vmem>>, vector<8x128xf32>
    tpu.vector_store %arg6[%c0_6, %c0_7], %7 {strides = array<i32>} : memref<8x128xf32, #tpu.memory_space<vmem>>, vector<8x128xf32>,
    %c0_i32_8 = arith.constant 0 : i32
    %9 = arith.cmpi eq, %arg2, %c0_i32_8 : i32
    %10 = arith.extui %9 : i1 to i32
    %c0_i32_9 = arith.constant 0 : i32
    %11 = arith.cmpi ne, %10, %c0_i32_9 : i32
    scf.if %11 {
      %c0_10 = arith.constant 0 : index
      %c0_11 = arith.constant 0 : index
      %12 = vector.load %arg6[%c0_10, %c0_11] : memref<8x128xf32, #tpu.memory_space<vmem>>, vector<8x128xf32>
      %c0_12 = arith.constant 0 : index
      %c0_13 = arith.constant 0 : index
      %13 = vector.load %arg5[%c0_12, %c0_13] : memref<8x128xf32, #tpu.memory_space<vmem>>, vector<8x128xf32>
      tpu.vector_store %arg5[%c0_12, %c0_13], %12 {strides = array<i32>} : memref<8x128xf32, #tpu.memory_space<vmem>>, vector<8x128xf32>,
    } else {
    }
    return
  }
  func.func @transform_0(%arg0: i32, %arg1: i32, %arg2: i32) -> (i32, i32) {
    %c0_i32 = arith.constant 0 : i32
    return %arg0, %arg2 : i32, i32
  }
  func.func @transform_1(%arg0: i32, %arg1: i32, %arg2: i32) -> (i32, i32) {
    %c0_i32 = arith.constant 0 : i32
    return %arg2, %arg1 : i32, i32
  }
  func.func @transform_2(%arg0: i32, %arg1: i32, %arg2: i32) -> (i32, i32) {
    %c0_i32 = arith.constant 0 : i32
    return %arg0, %arg1 : i32, i32
  }
}

module attributes {stable_mosaic.version = 11 : i64} {
  func.func @_refine_kernel(%arg0: i32, %arg1: memref<1x4x896xf32, #tpu.memory_space<vmem>>, %arg2: memref<4x4x108xbf16, #tpu.memory_space<vmem>>, %arg3: memref<1x896xf32, #tpu.memory_space<vmem>>, %arg4: memref<1x4x896xbf16, #tpu.memory_space<vmem>>, %arg5: memref<4x1152xbf16, #tpu.memory_space<vmem>>, %arg6: memref<108x896xbf16, #tpu.memory_space<vmem>>, %arg7: memref<4x896xf32, #tpu.memory_space<vmem>>) attributes {dimension_semantics = [#tpu.dimension_semantics<parallel>], iteration_bounds = array<i64: 2>, scalar_prefetch = 0 : i64, scratch_operands = 3 : i64, tpu.core_type = #tpu.core_type<tc>, window_params = [{transform_indices = @transform_0, window_bounds = array<i64: 1, 4, 896>}, {pipeline_mode = #tpu.pipeline_mode<synchronous>, transform_indices = @transform_1, window_bounds = array<i64: 4, 4, 108>}, {pipeline_mode = #tpu.pipeline_mode<synchronous>, transform_indices = @transform_2, window_bounds = array<i64: 1, 896>}, {transform_indices = @transform_3, window_bounds = array<i64: 1, 4, 896>}]} {
    %c0 = arith.constant 0 : index
    %c0_0 = arith.constant 0 : index
    %0 = vector.load %arg3[%c0, %c0_0] : memref<1x896xf32, #tpu.memory_space<vmem>>, vector<1x896xf32>
    %cst = arith.constant 0.000000e+00 : bf16
    %1 = vector.broadcast %cst : bf16 to vector<4x1152xbf16>
    %c0_1 = arith.constant 0 : index
    %c0_2 = arith.constant 0 : index
    %2 = vector.load %arg5[%c0_1, %c0_2] : memref<4x1152xbf16, #tpu.memory_space<vmem>>, vector<4x1152xbf16>
    tpu.vector_store %arg5[%c0_1, %c0_2], %1 {strides = array<i32>} : memref<4x1152xbf16, #tpu.memory_space<vmem>>, vector<4x1152xbf16>,
    %c0_3 = arith.constant 0 : index
    %c0_4 = arith.constant 0 : index
    %c0_5 = arith.constant 0 : index
    %3 = vector.load %arg1[%c0_3, %c0_4, %c0_5] : memref<1x4x896xf32, #tpu.memory_space<vmem>>, vector<1x4x896xf32>
    %4 = vector.shape_cast %3 : vector<1x4x896xf32> to vector<4x896xf32>
    %5 = arith.truncf %4 : vector<4x896xf32> to vector<4x896xbf16>
    %c0_6 = arith.constant 0 : index
    %c128 = arith.constant 128 : index
    %6 = vector.load %arg5[%c0_6, %c128] : memref<4x1152xbf16, #tpu.memory_space<vmem>>, vector<4x896xbf16>
    tpu.vector_store %arg5[%c0_6, %c128], %5 {strides = array<i32>} : memref<4x1152xbf16, #tpu.memory_space<vmem>>, vector<4x896xbf16>,
    %c0_7 = arith.constant 0 : index
    %c17 = arith.constant 17 : index
    %7 = vector.load %arg5[%c0_7, %c17] : memref<4x1152xbf16, #tpu.memory_space<vmem>>, vector<4x896xbf16>
    %c0_8 = arith.constant 0 : index
    %c0_9 = arith.constant 0 : index
    %8 = vector.load %arg6[%c0_8, %c0_9] : memref<108x896xbf16, #tpu.memory_space<vmem>>, vector<4x896xbf16>
    tpu.vector_store %arg6[%c0_8, %c0_9], %7 {strides = array<i32>} : memref<108x896xbf16, #tpu.memory_space<vmem>>, vector<4x896xbf16>,
    %c0_10 = arith.constant 0 : index
    %c18 = arith.constant 18 : index
    %9 = vector.load %arg5[%c0_10, %c18] : memref<4x1152xbf16, #tpu.memory_space<vmem>>, vector<4x896xbf16>
    %c4 = arith.constant 4 : index
    %c0_11 = arith.constant 0 : index
    %10 = vector.load %arg6[%c4, %c0_11] : memref<108x896xbf16, #tpu.memory_space<vmem>>, vector<4x896xbf16>
    tpu.vector_store %arg6[%c4, %c0_11], %9 {strides = array<i32>} : memref<108x896xbf16, #tpu.memory_space<vmem>>, vector<4x896xbf16>,
    %c0_12 = arith.constant 0 : index
    %c19 = arith.constant 19 : index
    %11 = vector.load %arg5[%c0_12, %c19] : memref<4x1152xbf16, #tpu.memory_space<vmem>>, vector<4x896xbf16>
    %c8 = arith.constant 8 : index
    %c0_13 = arith.constant 0 : index
    %12 = vector.load %arg6[%c8, %c0_13] : memref<108x896xbf16, #tpu.memory_space<vmem>>, vector<4x896xbf16>
    tpu.vector_store %arg6[%c8, %c0_13], %11 {strides = array<i32>} : memref<108x896xbf16, #tpu.memory_space<vmem>>, vector<4x896xbf16>,
    %c0_14 = arith.constant 0 : index
    %c27 = arith.constant 27 : index
    %13 = vector.load %arg5[%c0_14, %c27] : memref<4x1152xbf16, #tpu.memory_space<vmem>>, vector<4x896xbf16>
    %c12 = arith.constant 12 : index
    %c0_15 = arith.constant 0 : index
    %14 = vector.load %arg6[%c12, %c0_15] : memref<108x896xbf16, #tpu.memory_space<vmem>>, vector<4x896xbf16>
    tpu.vector_store %arg6[%c12, %c0_15], %13 {strides = array<i32>} : memref<108x896xbf16, #tpu.memory_space<vmem>>, vector<4x896xbf16>,
    %c0_16 = arith.constant 0 : index
    %c28 = arith.constant 28 : index
    %15 = vector.load %arg5[%c0_16, %c28] : memref<4x1152xbf16, #tpu.memory_space<vmem>>, vector<4x896xbf16>
    %c16 = arith.constant 16 : index
    %c0_17 = arith.constant 0 : index
    %16 = vector.load %arg6[%c16, %c0_17] : memref<108x896xbf16, #tpu.memory_space<vmem>>, vector<4x896xbf16>
    tpu.vector_store %arg6[%c16, %c0_17], %15 {strides = array<i32>} : memref<108x896xbf16, #tpu.memory_space<vmem>>, vector<4x896xbf16>,
    %c0_18 = arith.constant 0 : index
    %c29 = arith.constant 29 : index
    %17 = vector.load %arg5[%c0_18, %c29] : memref<4x1152xbf16, #tpu.memory_space<vmem>>, vector<4x896xbf16>
    %c20 = arith.constant 20 : index
    %c0_19 = arith.constant 0 : index
    %18 = vector.load %arg6[%c20, %c0_19] : memref<108x896xbf16, #tpu.memory_space<vmem>>, vector<4x896xbf16>
    tpu.vector_store %arg6[%c20, %c0_19], %17 {strides = array<i32>} : memref<108x896xbf16, #tpu.memory_space<vmem>>, vector<4x896xbf16>,
    %c0_20 = arith.constant 0 : index
    %c37 = arith.constant 37 : index
    %19 = vector.load %arg5[%c0_20, %c37] : memref<4x1152xbf16, #tpu.memory_space<vmem>>, vector<4x896xbf16>
    %c24 = arith.constant 24 : index
    %c0_21 = arith.constant 0 : index
    %20 = vector.load %arg6[%c24, %c0_21] : memref<108x896xbf16, #tpu.memory_space<vmem>>, vector<4x896xbf16>
    tpu.vector_store %arg6[%c24, %c0_21], %19 {strides = array<i32>} : memref<108x896xbf16, #tpu.memory_space<vmem>>, vector<4x896xbf16>,
    %c0_22 = arith.constant 0 : index
    %c38 = arith.constant 38 : index
    %21 = vector.load %arg5[%c0_22, %c38] : memref<4x1152xbf16, #tpu.memory_space<vmem>>, vector<4x896xbf16>
    %c28_23 = arith.constant 28 : index
    %c0_24 = arith.constant 0 : index
    %22 = vector.load %arg6[%c28_23, %c0_24] : memref<108x896xbf16, #tpu.memory_space<vmem>>, vector<4x896xbf16>
    tpu.vector_store %arg6[%c28_23, %c0_24], %21 {strides = array<i32>} : memref<108x896xbf16, #tpu.memory_space<vmem>>, vector<4x896xbf16>,
    %c0_25 = arith.constant 0 : index
    %c39 = arith.constant 39 : index
    %23 = vector.load %arg5[%c0_25, %c39] : memref<4x1152xbf16, #tpu.memory_space<vmem>>, vector<4x896xbf16>
    %c32 = arith.constant 32 : index
    %c0_26 = arith.constant 0 : index
    %24 = vector.load %arg6[%c32, %c0_26] : memref<108x896xbf16, #tpu.memory_space<vmem>>, vector<4x896xbf16>
    tpu.vector_store %arg6[%c32, %c0_26], %23 {strides = array<i32>} : memref<108x896xbf16, #tpu.memory_space<vmem>>, vector<4x896xbf16>,
    %c0_27 = arith.constant 0 : index
    %c117 = arith.constant 117 : index
    %25 = vector.load %arg5[%c0_27, %c117] : memref<4x1152xbf16, #tpu.memory_space<vmem>>, vector<4x896xbf16>
    %c36 = arith.constant 36 : index
    %c0_28 = arith.constant 0 : index
    %26 = vector.load %arg6[%c36, %c0_28] : memref<108x896xbf16, #tpu.memory_space<vmem>>, vector<4x896xbf16>
    tpu.vector_store %arg6[%c36, %c0_28], %25 {strides = array<i32>} : memref<108x896xbf16, #tpu.memory_space<vmem>>, vector<4x896xbf16>,
    %c0_29 = arith.constant 0 : index
    %c118 = arith.constant 118 : index
    %27 = vector.load %arg5[%c0_29, %c118] : memref<4x1152xbf16, #tpu.memory_space<vmem>>, vector<4x896xbf16>
    %c40 = arith.constant 40 : index
    %c0_30 = arith.constant 0 : index
    %28 = vector.load %arg6[%c40, %c0_30] : memref<108x896xbf16, #tpu.memory_space<vmem>>, vector<4x896xbf16>
    tpu.vector_store %arg6[%c40, %c0_30], %27 {strides = array<i32>} : memref<108x896xbf16, #tpu.memory_space<vmem>>, vector<4x896xbf16>,
    %c0_31 = arith.constant 0 : index
    %c119 = arith.constant 119 : index
    %29 = vector.load %arg5[%c0_31, %c119] : memref<4x1152xbf16, #tpu.memory_space<vmem>>, vector<4x896xbf16>
    %c44 = arith.constant 44 : index
    %c0_32 = arith.constant 0 : index
    %30 = vector.load %arg6[%c44, %c0_32] : memref<108x896xbf16, #tpu.memory_space<vmem>>, vector<4x896xbf16>
    tpu.vector_store %arg6[%c44, %c0_32], %29 {strides = array<i32>} : memref<108x896xbf16, #tpu.memory_space<vmem>>, vector<4x896xbf16>,
    %c0_33 = arith.constant 0 : index
    %c127 = arith.constant 127 : index
    %31 = vector.load %arg5[%c0_33, %c127] : memref<4x1152xbf16, #tpu.memory_space<vmem>>, vector<4x896xbf16>
    %c48 = arith.constant 48 : index
    %c0_34 = arith.constant 0 : index
    %32 = vector.load %arg6[%c48, %c0_34] : memref<108x896xbf16, #tpu.memory_space<vmem>>, vector<4x896xbf16>
    tpu.vector_store %arg6[%c48, %c0_34], %31 {strides = array<i32>} : memref<108x896xbf16, #tpu.memory_space<vmem>>, vector<4x896xbf16>,
    %c0_35 = arith.constant 0 : index
    %c128_36 = arith.constant 128 : index
    %33 = vector.load %arg5[%c0_35, %c128_36] : memref<4x1152xbf16, #tpu.memory_space<vmem>>, vector<4x896xbf16>
    %c52 = arith.constant 52 : index
    %c0_37 = arith.constant 0 : index
    %34 = vector.load %arg6[%c52, %c0_37] : memref<108x896xbf16, #tpu.memory_space<vmem>>, vector<4x896xbf16>
    tpu.vector_store %arg6[%c52, %c0_37], %33 {strides = array<i32>} : memref<108x896xbf16, #tpu.memory_space<vmem>>, vector<4x896xbf16>,
    %c0_38 = arith.constant 0 : index
    %c129 = arith.constant 129 : index
    %35 = vector.load %arg5[%c0_38, %c129] : memref<4x1152xbf16, #tpu.memory_space<vmem>>, vector<4x896xbf16>
    %c56 = arith.constant 56 : index
    %c0_39 = arith.constant 0 : index
    %36 = vector.load %arg6[%c56, %c0_39] : memref<108x896xbf16, #tpu.memory_space<vmem>>, vector<4x896xbf16>
    tpu.vector_store %arg6[%c56, %c0_39], %35 {strides = array<i32>} : memref<108x896xbf16, #tpu.memory_space<vmem>>, vector<4x896xbf16>,
    %c0_40 = arith.constant 0 : index
    %c137 = arith.constant 137 : index
    %37 = vector.load %arg5[%c0_40, %c137] : memref<4x1152xbf16, #tpu.memory_space<vmem>>, vector<4x896xbf16>
    %c60 = arith.constant 60 : index
    %c0_41 = arith.constant 0 : index
    %38 = vector.load %arg6[%c60, %c0_41] : memref<108x896xbf16, #tpu.memory_space<vmem>>, vector<4x896xbf16>
    tpu.vector_store %arg6[%c60, %c0_41], %37 {strides = array<i32>} : memref<108x896xbf16, #tpu.memory_space<vmem>>, vector<4x896xbf16>,
    %c0_42 = arith.constant 0 : index
    %c138 = arith.constant 138 : index
    %39 = vector.load %arg5[%c0_42, %c138] : memref<4x1152xbf16, #tpu.memory_space<vmem>>, vector<4x896xbf16>
    %c64 = arith.constant 64 : index
    %c0_43 = arith.constant 0 : index
    %40 = vector.load %arg6[%c64, %c0_43] : memref<108x896xbf16, #tpu.memory_space<vmem>>, vector<4x896xbf16>
    tpu.vector_store %arg6[%c64, %c0_43], %39 {strides = array<i32>} : memref<108x896xbf16, #tpu.memory_space<vmem>>, vector<4x896xbf16>,
    %c0_44 = arith.constant 0 : index
    %c139 = arith.constant 139 : index
    %41 = vector.load %arg5[%c0_44, %c139] : memref<4x1152xbf16, #tpu.memory_space<vmem>>, vector<4x896xbf16>
    %c68 = arith.constant 68 : index
    %c0_45 = arith.constant 0 : index
    %42 = vector.load %arg6[%c68, %c0_45] : memref<108x896xbf16, #tpu.memory_space<vmem>>, vector<4x896xbf16>
    tpu.vector_store %arg6[%c68, %c0_45], %41 {strides = array<i32>} : memref<108x896xbf16, #tpu.memory_space<vmem>>, vector<4x896xbf16>,
    %c0_46 = arith.constant 0 : index
    %c217 = arith.constant 217 : index
    %43 = vector.load %arg5[%c0_46, %c217] : memref<4x1152xbf16, #tpu.memory_space<vmem>>, vector<4x896xbf16>
    %c72 = arith.constant 72 : index
    %c0_47 = arith.constant 0 : index
    %44 = vector.load %arg6[%c72, %c0_47] : memref<108x896xbf16, #tpu.memory_space<vmem>>, vector<4x896xbf16>
    tpu.vector_store %arg6[%c72, %c0_47], %43 {strides = array<i32>} : memref<108x896xbf16, #tpu.memory_space<vmem>>, vector<4x896xbf16>,
    %c0_48 = arith.constant 0 : index
    %c218 = arith.constant 218 : index
    %45 = vector.load %arg5[%c0_48, %c218] : memref<4x1152xbf16, #tpu.memory_space<vmem>>, vector<4x896xbf16>
    %c76 = arith.constant 76 : index
    %c0_49 = arith.constant 0 : index
    %46 = vector.load %arg6[%c76, %c0_49] : memref<108x896xbf16, #tpu.memory_space<vmem>>, vector<4x896xbf16>
    tpu.vector_store %arg6[%c76, %c0_49], %45 {strides = array<i32>} : memref<108x896xbf16, #tpu.memory_space<vmem>>, vector<4x896xbf16>,
    %c0_50 = arith.constant 0 : index
    %c219 = arith.constant 219 : index
    %47 = vector.load %arg5[%c0_50, %c219] : memref<4x1152xbf16, #tpu.memory_space<vmem>>, vector<4x896xbf16>
    %c80 = arith.constant 80 : index
    %c0_51 = arith.constant 0 : index
    %48 = vector.load %arg6[%c80, %c0_51] : memref<108x896xbf16, #tpu.memory_space<vmem>>, vector<4x896xbf16>
    tpu.vector_store %arg6[%c80, %c0_51], %47 {strides = array<i32>} : memref<108x896xbf16, #tpu.memory_space<vmem>>, vector<4x896xbf16>,
    %c0_52 = arith.constant 0 : index
    %c227 = arith.constant 227 : index
    %49 = vector.load %arg5[%c0_52, %c227] : memref<4x1152xbf16, #tpu.memory_space<vmem>>, vector<4x896xbf16>
    %c84 = arith.constant 84 : index
    %c0_53 = arith.constant 0 : index
    %50 = vector.load %arg6[%c84, %c0_53] : memref<108x896xbf16, #tpu.memory_space<vmem>>, vector<4x896xbf16>
    tpu.vector_store %arg6[%c84, %c0_53], %49 {strides = array<i32>} : memref<108x896xbf16, #tpu.memory_space<vmem>>, vector<4x896xbf16>,
    %c0_54 = arith.constant 0 : index
    %c228 = arith.constant 228 : index
    %51 = vector.load %arg5[%c0_54, %c228] : memref<4x1152xbf16, #tpu.memory_space<vmem>>, vector<4x896xbf16>
    %c88 = arith.constant 88 : index
    %c0_55 = arith.constant 0 : index
    %52 = vector.load %arg6[%c88, %c0_55] : memref<108x896xbf16, #tpu.memory_space<vmem>>, vector<4x896xbf16>
    tpu.vector_store %arg6[%c88, %c0_55], %51 {strides = array<i32>} : memref<108x896xbf16, #tpu.memory_space<vmem>>, vector<4x896xbf16>,
    %c0_56 = arith.constant 0 : index
    %c229 = arith.constant 229 : index
    %53 = vector.load %arg5[%c0_56, %c229] : memref<4x1152xbf16, #tpu.memory_space<vmem>>, vector<4x896xbf16>
    %c92 = arith.constant 92 : index
    %c0_57 = arith.constant 0 : index
    %54 = vector.load %arg6[%c92, %c0_57] : memref<108x896xbf16, #tpu.memory_space<vmem>>, vector<4x896xbf16>
    tpu.vector_store %arg6[%c92, %c0_57], %53 {strides = array<i32>} : memref<108x896xbf16, #tpu.memory_space<vmem>>, vector<4x896xbf16>,
    %c0_58 = arith.constant 0 : index
    %c237 = arith.constant 237 : index
    %55 = vector.load %arg5[%c0_58, %c237] : memref<4x1152xbf16, #tpu.memory_space<vmem>>, vector<4x896xbf16>
    %c96 = arith.constant 96 : index
    %c0_59 = arith.constant 0 : index
    %56 = vector.load %arg6[%c96, %c0_59] : memref<108x896xbf16, #tpu.memory_space<vmem>>, vector<4x896xbf16>
    tpu.vector_store %arg6[%c96, %c0_59], %55 {strides = array<i32>} : memref<108x896xbf16, #tpu.memory_space<vmem>>, vector<4x896xbf16>,
    %c0_60 = arith.constant 0 : index
    %c238 = arith.constant 238 : index
    %57 = vector.load %arg5[%c0_60, %c238] : memref<4x1152xbf16, #tpu.memory_space<vmem>>, vector<4x896xbf16>
    %c100 = arith.constant 100 : index
    %c0_61 = arith.constant 0 : index
    %58 = vector.load %arg6[%c100, %c0_61] : memref<108x896xbf16, #tpu.memory_space<vmem>>, vector<4x896xbf16>
    tpu.vector_store %arg6[%c100, %c0_61], %57 {strides = array<i32>} : memref<108x896xbf16, #tpu.memory_space<vmem>>, vector<4x896xbf16>,
    %c0_62 = arith.constant 0 : index
    %c239 = arith.constant 239 : index
    %59 = vector.load %arg5[%c0_62, %c239] : memref<4x1152xbf16, #tpu.memory_space<vmem>>, vector<4x896xbf16>
    %c104 = arith.constant 104 : index
    %c0_63 = arith.constant 0 : index
    %60 = vector.load %arg6[%c104, %c0_63] : memref<108x896xbf16, #tpu.memory_space<vmem>>, vector<4x896xbf16>
    tpu.vector_store %arg6[%c104, %c0_63], %59 {strides = array<i32>} : memref<108x896xbf16, #tpu.memory_space<vmem>>, vector<4x896xbf16>,
    %c0_64 = arith.constant 0 : index
    %c0_65 = arith.constant 0 : index
    %c0_66 = arith.constant 0 : index
    %61 = vector.load %arg2[%c0_64, %c0_65, %c0_66] : memref<4x4x108xbf16, #tpu.memory_space<vmem>>, vector<1x4x108xbf16>
    %62 = vector.shape_cast %61 : vector<1x4x108xbf16> to vector<4x108xbf16>
    %c0_67 = arith.constant 0 : index
    %c0_68 = arith.constant 0 : index
    %63 = vector.load %arg6[%c0_67, %c0_68] : memref<108x896xbf16, #tpu.memory_space<vmem>>, vector<108x896xbf16>
    %cst_69 = arith.constant dense<0.000000e+00> : vector<4x896xf32>
    %64 = tpu.matmul %62, %63, %cst_69 {dimension_numbers = #tpu.dot_dimension_numbers<[1], [0], [0], [1], [0, 0, 1, 1], [], []>} : vector<4x108xbf16>, vector<108x896xbf16>, vector<4x896xf32> -> vector<4x896xf32>
    %65 = vector.broadcast %0 : vector<1x896xf32> to vector<4x896xf32>
    %66 = arith.mulf %64, %65 : vector<4x896xf32>
    %cst_70 = arith.constant dense<0.000000e+00> : vector<4xf32>
    %67 = vector.multi_reduction <add>, %66, %cst_70 [1] : vector<4x896xf32> to vector<4xf32>
    %68 = vector.shape_cast %67 : vector<4xf32> to vector<4x1xf32>
    %cst_71 = arith.constant 0.001953125 : f32
    %69 = vector.broadcast %cst_71 : f32 to vector<4x1xf32>
    %70 = arith.mulf %68, %69 : vector<4x1xf32>
    %71 = vector.broadcast %70 : vector<4x1xf32> to vector<4x896xf32>
    %72 = arith.subf %64, %71 : vector<4x896xf32>
    %73 = vector.broadcast %0 : vector<1x896xf32> to vector<4x896xf32>
    %74 = arith.mulf %72, %73 : vector<4x896xf32>
    %75 = arith.mulf %74, %74 : vector<4x896xf32>
    %cst_72 = arith.constant dense<0.000000e+00> : vector<4xf32>
    %76 = vector.multi_reduction <add>, %75, %cst_72 [1] : vector<4x896xf32> to vector<4xf32>
    %77 = vector.shape_cast %76 : vector<4xf32> to vector<4x1xf32>
    %cst_73 = arith.constant 0.001953125 : f32
    %78 = vector.broadcast %cst_73 : f32 to vector<4x1xf32>
    %79 = arith.mulf %77, %78 : vector<4x1xf32>
    %cst_74 = arith.constant 9.99999974E-6 : f32
    %80 = vector.broadcast %cst_74 : f32 to vector<4x1xf32>
    %81 = arith.addf %79, %80 : vector<4x1xf32>
    %82 = math.rsqrt %81 : vector<4x1xf32>
    %83 = vector.broadcast %82 : vector<4x1xf32> to vector<4x896xf32>
    %84 = arith.mulf %72, %83 : vector<4x896xf32>
    %cst_75 = arith.constant 0.000000e+00 : f32
    %85 = vector.broadcast %cst_75 : f32 to vector<4x896xf32>
    %86 = arith.maximumf %84, %85 : vector<4x896xf32>
    %87 = vector.broadcast %0 : vector<1x896xf32> to vector<4x896xf32>
    %88 = arith.mulf %86, %87 : vector<4x896xf32>
    %89 = arith.truncf %88 : vector<4x896xf32> to vector<4x896xbf16>
    %c0_76 = arith.constant 0 : index
    %c128_77 = arith.constant 128 : index
    %90 = vector.load %arg5[%c0_76, %c128_77] : memref<4x1152xbf16, #tpu.memory_space<vmem>>, vector<4x896xbf16>
    tpu.vector_store %arg5[%c0_76, %c128_77], %89 {strides = array<i32>} : memref<4x1152xbf16, #tpu.memory_space<vmem>>, vector<4x896xbf16>,
    %c0_78 = arith.constant 0 : index
    %c17_79 = arith.constant 17 : index
    %91 = vector.load %arg5[%c0_78, %c17_79] : memref<4x1152xbf16, #tpu.memory_space<vmem>>, vector<4x896xbf16>
    %c0_80 = arith.constant 0 : index
    %c0_81 = arith.constant 0 : index
    %92 = vector.load %arg6[%c0_80, %c0_81] : memref<108x896xbf16, #tpu.memory_space<vmem>>, vector<4x896xbf16>
    tpu.vector_store %arg6[%c0_80, %c0_81], %91 {strides = array<i32>} : memref<108x896xbf16, #tpu.memory_space<vmem>>, vector<4x896xbf16>,
    %c0_82 = arith.constant 0 : index
    %c18_83 = arith.constant 18 : index
    %93 = vector.load %arg5[%c0_82, %c18_83] : memref<4x1152xbf16, #tpu.memory_space<vmem>>, vector<4x896xbf16>
    %c4_84 = arith.constant 4 : index
    %c0_85 = arith.constant 0 : index
    %94 = vector.load %arg6[%c4_84, %c0_85] : memref<108x896xbf16, #tpu.memory_space<vmem>>, vector<4x896xbf16>
    tpu.vector_store %arg6[%c4_84, %c0_85], %93 {strides = array<i32>} : memref<108x896xbf16, #tpu.memory_space<vmem>>, vector<4x896xbf16>,
    %c0_86 = arith.constant 0 : index
    %c19_87 = arith.constant 19 : index
    %95 = vector.load %arg5[%c0_86, %c19_87] : memref<4x1152xbf16, #tpu.memory_space<vmem>>, vector<4x896xbf16>
    %c8_88 = arith.constant 8 : index
    %c0_89 = arith.constant 0 : index
    %96 = vector.load %arg6[%c8_88, %c0_89] : memref<108x896xbf16, #tpu.memory_space<vmem>>, vector<4x896xbf16>
    tpu.vector_store %arg6[%c8_88, %c0_89], %95 {strides = array<i32>} : memref<108x896xbf16, #tpu.memory_space<vmem>>, vector<4x896xbf16>,
    %c0_90 = arith.constant 0 : index
    %c27_91 = arith.constant 27 : index
    %97 = vector.load %arg5[%c0_90, %c27_91] : memref<4x1152xbf16, #tpu.memory_space<vmem>>, vector<4x896xbf16>
    %c12_92 = arith.constant 12 : index
    %c0_93 = arith.constant 0 : index
    %98 = vector.load %arg6[%c12_92, %c0_93] : memref<108x896xbf16, #tpu.memory_space<vmem>>, vector<4x896xbf16>
    tpu.vector_store %arg6[%c12_92, %c0_93], %97 {strides = array<i32>} : memref<108x896xbf16, #tpu.memory_space<vmem>>, vector<4x896xbf16>,
    %c0_94 = arith.constant 0 : index
    %c28_95 = arith.constant 28 : index
    %99 = vector.load %arg5[%c0_94, %c28_95] : memref<4x1152xbf16, #tpu.memory_space<vmem>>, vector<4x896xbf16>
    %c16_96 = arith.constant 16 : index
    %c0_97 = arith.constant 0 : index
    %100 = vector.load %arg6[%c16_96, %c0_97] : memref<108x896xbf16, #tpu.memory_space<vmem>>, vector<4x896xbf16>
    tpu.vector_store %arg6[%c16_96, %c0_97], %99 {strides = array<i32>} : memref<108x896xbf16, #tpu.memory_space<vmem>>, vector<4x896xbf16>,
    %c0_98 = arith.constant 0 : index
    %c29_99 = arith.constant 29 : index
    %101 = vector.load %arg5[%c0_98, %c29_99] : memref<4x1152xbf16, #tpu.memory_space<vmem>>, vector<4x896xbf16>
    %c20_100 = arith.constant 20 : index
    %c0_101 = arith.constant 0 : index
    %102 = vector.load %arg6[%c20_100, %c0_101] : memref<108x896xbf16, #tpu.memory_space<vmem>>, vector<4x896xbf16>
    tpu.vector_store %arg6[%c20_100, %c0_101], %101 {strides = array<i32>} : memref<108x896xbf16, #tpu.memory_space<vmem>>, vector<4x896xbf16>,
    %c0_102 = arith.constant 0 : index
    %c37_103 = arith.constant 37 : index
    %103 = vector.load %arg5[%c0_102, %c37_103] : memref<4x1152xbf16, #tpu.memory_space<vmem>>, vector<4x896xbf16>
    %c24_104 = arith.constant 24 : index
    %c0_105 = arith.constant 0 : index
    %104 = vector.load %arg6[%c24_104, %c0_105] : memref<108x896xbf16, #tpu.memory_space<vmem>>, vector<4x896xbf16>
    tpu.vector_store %arg6[%c24_104, %c0_105], %103 {strides = array<i32>} : memref<108x896xbf16, #tpu.memory_space<vmem>>, vector<4x896xbf16>,
    %c0_106 = arith.constant 0 : index
    %c38_107 = arith.constant 38 : index
    %105 = vector.load %arg5[%c0_106, %c38_107] : memref<4x1152xbf16, #tpu.memory_space<vmem>>, vector<4x896xbf16>
    %c28_108 = arith.constant 28 : index
    %c0_109 = arith.constant 0 : index
    %106 = vector.load %arg6[%c28_108, %c0_109] : memref<108x896xbf16, #tpu.memory_space<vmem>>, vector<4x896xbf16>
    tpu.vector_store %arg6[%c28_108, %c0_109], %105 {strides = array<i32>} : memref<108x896xbf16, #tpu.memory_space<vmem>>, vector<4x896xbf16>,
    %c0_110 = arith.constant 0 : index
    %c39_111 = arith.constant 39 : index
    %107 = vector.load %arg5[%c0_110, %c39_111] : memref<4x1152xbf16, #tpu.memory_space<vmem>>, vector<4x896xbf16>
    %c32_112 = arith.constant 32 : index
    %c0_113 = arith.constant 0 : index
    %108 = vector.load %arg6[%c32_112, %c0_113] : memref<108x896xbf16, #tpu.memory_space<vmem>>, vector<4x896xbf16>
    tpu.vector_store %arg6[%c32_112, %c0_113], %107 {strides = array<i32>} : memref<108x896xbf16, #tpu.memory_space<vmem>>, vector<4x896xbf16>,
    %c0_114 = arith.constant 0 : index
    %c117_115 = arith.constant 117 : index
    %109 = vector.load %arg5[%c0_114, %c117_115] : memref<4x1152xbf16, #tpu.memory_space<vmem>>, vector<4x896xbf16>
    %c36_116 = arith.constant 36 : index
    %c0_117 = arith.constant 0 : index
    %110 = vector.load %arg6[%c36_116, %c0_117] : memref<108x896xbf16, #tpu.memory_space<vmem>>, vector<4x896xbf16>
    tpu.vector_store %arg6[%c36_116, %c0_117], %109 {strides = array<i32>} : memref<108x896xbf16, #tpu.memory_space<vmem>>, vector<4x896xbf16>,
    %c0_118 = arith.constant 0 : index
    %c118_119 = arith.constant 118 : index
    %111 = vector.load %arg5[%c0_118, %c118_119] : memref<4x1152xbf16, #tpu.memory_space<vmem>>, vector<4x896xbf16>
    %c40_120 = arith.constant 40 : index
    %c0_121 = arith.constant 0 : index
    %112 = vector.load %arg6[%c40_120, %c0_121] : memref<108x896xbf16, #tpu.memory_space<vmem>>, vector<4x896xbf16>
    tpu.vector_store %arg6[%c40_120, %c0_121], %111 {strides = array<i32>} : memref<108x896xbf16, #tpu.memory_space<vmem>>, vector<4x896xbf16>,
    %c0_122 = arith.constant 0 : index
    %c119_123 = arith.constant 119 : index
    %113 = vector.load %arg5[%c0_122, %c119_123] : memref<4x1152xbf16, #tpu.memory_space<vmem>>, vector<4x896xbf16>
    %c44_124 = arith.constant 44 : index
    %c0_125 = arith.constant 0 : index
    %114 = vector.load %arg6[%c44_124, %c0_125] : memref<108x896xbf16, #tpu.memory_space<vmem>>, vector<4x896xbf16>
    tpu.vector_store %arg6[%c44_124, %c0_125], %113 {strides = array<i32>} : memref<108x896xbf16, #tpu.memory_space<vmem>>, vector<4x896xbf16>,
    %c0_126 = arith.constant 0 : index
    %c127_127 = arith.constant 127 : index
    %115 = vector.load %arg5[%c0_126, %c127_127] : memref<4x1152xbf16, #tpu.memory_space<vmem>>, vector<4x896xbf16>
    %c48_128 = arith.constant 48 : index
    %c0_129 = arith.constant 0 : index
    %116 = vector.load %arg6[%c48_128, %c0_129] : memref<108x896xbf16, #tpu.memory_space<vmem>>, vector<4x896xbf16>
    tpu.vector_store %arg6[%c48_128, %c0_129], %115 {strides = array<i32>} : memref<108x896xbf16, #tpu.memory_space<vmem>>, vector<4x896xbf16>,
    %c0_130 = arith.constant 0 : index
    %c128_131 = arith.constant 128 : index
    %117 = vector.load %arg5[%c0_130, %c128_131] : memref<4x1152xbf16, #tpu.memory_space<vmem>>, vector<4x896xbf16>
    %c52_132 = arith.constant 52 : index
    %c0_133 = arith.constant 0 : index
    %118 = vector.load %arg6[%c52_132, %c0_133] : memref<108x896xbf16, #tpu.memory_space<vmem>>, vector<4x896xbf16>
    tpu.vector_store %arg6[%c52_132, %c0_133], %117 {strides = array<i32>} : memref<108x896xbf16, #tpu.memory_space<vmem>>, vector<4x896xbf16>,
    %c0_134 = arith.constant 0 : index
    %c129_135 = arith.constant 129 : index
    %119 = vector.load %arg5[%c0_134, %c129_135] : memref<4x1152xbf16, #tpu.memory_space<vmem>>, vector<4x896xbf16>
    %c56_136 = arith.constant 56 : index
    %c0_137 = arith.constant 0 : index
    %120 = vector.load %arg6[%c56_136, %c0_137] : memref<108x896xbf16, #tpu.memory_space<vmem>>, vector<4x896xbf16>
    tpu.vector_store %arg6[%c56_136, %c0_137], %119 {strides = array<i32>} : memref<108x896xbf16, #tpu.memory_space<vmem>>, vector<4x896xbf16>,
    %c0_138 = arith.constant 0 : index
    %c137_139 = arith.constant 137 : index
    %121 = vector.load %arg5[%c0_138, %c137_139] : memref<4x1152xbf16, #tpu.memory_space<vmem>>, vector<4x896xbf16>
    %c60_140 = arith.constant 60 : index
    %c0_141 = arith.constant 0 : index
    %122 = vector.load %arg6[%c60_140, %c0_141] : memref<108x896xbf16, #tpu.memory_space<vmem>>, vector<4x896xbf16>
    tpu.vector_store %arg6[%c60_140, %c0_141], %121 {strides = array<i32>} : memref<108x896xbf16, #tpu.memory_space<vmem>>, vector<4x896xbf16>,
    %c0_142 = arith.constant 0 : index
    %c138_143 = arith.constant 138 : index
    %123 = vector.load %arg5[%c0_142, %c138_143] : memref<4x1152xbf16, #tpu.memory_space<vmem>>, vector<4x896xbf16>
    %c64_144 = arith.constant 64 : index
    %c0_145 = arith.constant 0 : index
    %124 = vector.load %arg6[%c64_144, %c0_145] : memref<108x896xbf16, #tpu.memory_space<vmem>>, vector<4x896xbf16>
    tpu.vector_store %arg6[%c64_144, %c0_145], %123 {strides = array<i32>} : memref<108x896xbf16, #tpu.memory_space<vmem>>, vector<4x896xbf16>,
    %c0_146 = arith.constant 0 : index
    %c139_147 = arith.constant 139 : index
    %125 = vector.load %arg5[%c0_146, %c139_147] : memref<4x1152xbf16, #tpu.memory_space<vmem>>, vector<4x896xbf16>
    %c68_148 = arith.constant 68 : index
    %c0_149 = arith.constant 0 : index
    %126 = vector.load %arg6[%c68_148, %c0_149] : memref<108x896xbf16, #tpu.memory_space<vmem>>, vector<4x896xbf16>
    tpu.vector_store %arg6[%c68_148, %c0_149], %125 {strides = array<i32>} : memref<108x896xbf16, #tpu.memory_space<vmem>>, vector<4x896xbf16>,
    %c0_150 = arith.constant 0 : index
    %c217_151 = arith.constant 217 : index
    %127 = vector.load %arg5[%c0_150, %c217_151] : memref<4x1152xbf16, #tpu.memory_space<vmem>>, vector<4x896xbf16>
    %c72_152 = arith.constant 72 : index
    %c0_153 = arith.constant 0 : index
    %128 = vector.load %arg6[%c72_152, %c0_153] : memref<108x896xbf16, #tpu.memory_space<vmem>>, vector<4x896xbf16>
    tpu.vector_store %arg6[%c72_152, %c0_153], %127 {strides = array<i32>} : memref<108x896xbf16, #tpu.memory_space<vmem>>, vector<4x896xbf16>,
    %c0_154 = arith.constant 0 : index
    %c218_155 = arith.constant 218 : index
    %129 = vector.load %arg5[%c0_154, %c218_155] : memref<4x1152xbf16, #tpu.memory_space<vmem>>, vector<4x896xbf16>
    %c76_156 = arith.constant 76 : index
    %c0_157 = arith.constant 0 : index
    %130 = vector.load %arg6[%c76_156, %c0_157] : memref<108x896xbf16, #tpu.memory_space<vmem>>, vector<4x896xbf16>
    tpu.vector_store %arg6[%c76_156, %c0_157], %129 {strides = array<i32>} : memref<108x896xbf16, #tpu.memory_space<vmem>>, vector<4x896xbf16>,
    %c0_158 = arith.constant 0 : index
    %c219_159 = arith.constant 219 : index
    %131 = vector.load %arg5[%c0_158, %c219_159] : memref<4x1152xbf16, #tpu.memory_space<vmem>>, vector<4x896xbf16>
    %c80_160 = arith.constant 80 : index
    %c0_161 = arith.constant 0 : index
    %132 = vector.load %arg6[%c80_160, %c0_161] : memref<108x896xbf16, #tpu.memory_space<vmem>>, vector<4x896xbf16>
    tpu.vector_store %arg6[%c80_160, %c0_161], %131 {strides = array<i32>} : memref<108x896xbf16, #tpu.memory_space<vmem>>, vector<4x896xbf16>,
    %c0_162 = arith.constant 0 : index
    %c227_163 = arith.constant 227 : index
    %133 = vector.load %arg5[%c0_162, %c227_163] : memref<4x1152xbf16, #tpu.memory_space<vmem>>, vector<4x896xbf16>
    %c84_164 = arith.constant 84 : index
    %c0_165 = arith.constant 0 : index
    %134 = vector.load %arg6[%c84_164, %c0_165] : memref<108x896xbf16, #tpu.memory_space<vmem>>, vector<4x896xbf16>
    tpu.vector_store %arg6[%c84_164, %c0_165], %133 {strides = array<i32>} : memref<108x896xbf16, #tpu.memory_space<vmem>>, vector<4x896xbf16>,
    %c0_166 = arith.constant 0 : index
    %c228_167 = arith.constant 228 : index
    %135 = vector.load %arg5[%c0_166, %c228_167] : memref<4x1152xbf16, #tpu.memory_space<vmem>>, vector<4x896xbf16>
    %c88_168 = arith.constant 88 : index
    %c0_169 = arith.constant 0 : index
    %136 = vector.load %arg6[%c88_168, %c0_169] : memref<108x896xbf16, #tpu.memory_space<vmem>>, vector<4x896xbf16>
    tpu.vector_store %arg6[%c88_168, %c0_169], %135 {strides = array<i32>} : memref<108x896xbf16, #tpu.memory_space<vmem>>, vector<4x896xbf16>,
    %c0_170 = arith.constant 0 : index
    %c229_171 = arith.constant 229 : index
    %137 = vector.load %arg5[%c0_170, %c229_171] : memref<4x1152xbf16, #tpu.memory_space<vmem>>, vector<4x896xbf16>
    %c92_172 = arith.constant 92 : index
    %c0_173 = arith.constant 0 : index
    %138 = vector.load %arg6[%c92_172, %c0_173] : memref<108x896xbf16, #tpu.memory_space<vmem>>, vector<4x896xbf16>
    tpu.vector_store %arg6[%c92_172, %c0_173], %137 {strides = array<i32>} : memref<108x896xbf16, #tpu.memory_space<vmem>>, vector<4x896xbf16>,
    %c0_174 = arith.constant 0 : index
    %c237_175 = arith.constant 237 : index
    %139 = vector.load %arg5[%c0_174, %c237_175] : memref<4x1152xbf16, #tpu.memory_space<vmem>>, vector<4x896xbf16>
    %c96_176 = arith.constant 96 : index
    %c0_177 = arith.constant 0 : index
    %140 = vector.load %arg6[%c96_176, %c0_177] : memref<108x896xbf16, #tpu.memory_space<vmem>>, vector<4x896xbf16>
    tpu.vector_store %arg6[%c96_176, %c0_177], %139 {strides = array<i32>} : memref<108x896xbf16, #tpu.memory_space<vmem>>, vector<4x896xbf16>,
    %c0_178 = arith.constant 0 : index
    %c238_179 = arith.constant 238 : index
    %141 = vector.load %arg5[%c0_178, %c238_179] : memref<4x1152xbf16, #tpu.memory_space<vmem>>, vector<4x896xbf16>
    %c100_180 = arith.constant 100 : index
    %c0_181 = arith.constant 0 : index
    %142 = vector.load %arg6[%c100_180, %c0_181] : memref<108x896xbf16, #tpu.memory_space<vmem>>, vector<4x896xbf16>
    tpu.vector_store %arg6[%c100_180, %c0_181], %141 {strides = array<i32>} : memref<108x896xbf16, #tpu.memory_space<vmem>>, vector<4x896xbf16>,
    %c0_182 = arith.constant 0 : index
    %c239_183 = arith.constant 239 : index
    %143 = vector.load %arg5[%c0_182, %c239_183] : memref<4x1152xbf16, #tpu.memory_space<vmem>>, vector<4x896xbf16>
    %c104_184 = arith.constant 104 : index
    %c0_185 = arith.constant 0 : index
    %144 = vector.load %arg6[%c104_184, %c0_185] : memref<108x896xbf16, #tpu.memory_space<vmem>>, vector<4x896xbf16>
    tpu.vector_store %arg6[%c104_184, %c0_185], %143 {strides = array<i32>} : memref<108x896xbf16, #tpu.memory_space<vmem>>, vector<4x896xbf16>,
    %c1 = arith.constant 1 : index
    %c0_186 = arith.constant 0 : index
    %c0_187 = arith.constant 0 : index
    %145 = vector.load %arg2[%c1, %c0_186, %c0_187] : memref<4x4x108xbf16, #tpu.memory_space<vmem>>, vector<1x4x108xbf16>
    %146 = vector.shape_cast %145 : vector<1x4x108xbf16> to vector<4x108xbf16>
    %c0_188 = arith.constant 0 : index
    %c0_189 = arith.constant 0 : index
    %147 = vector.load %arg6[%c0_188, %c0_189] : memref<108x896xbf16, #tpu.memory_space<vmem>>, vector<108x896xbf16>
    %cst_190 = arith.constant dense<0.000000e+00> : vector<4x896xf32>
    %148 = tpu.matmul %146, %147, %cst_190 {dimension_numbers = #tpu.dot_dimension_numbers<[1], [0], [0], [1], [0, 0, 1, 1], [], []>} : vector<4x108xbf16>, vector<108x896xbf16>, vector<4x896xf32> -> vector<4x896xf32>
    %149 = vector.broadcast %0 : vector<1x896xf32> to vector<4x896xf32>
    %150 = arith.mulf %148, %149 : vector<4x896xf32>
    %cst_191 = arith.constant dense<0.000000e+00> : vector<4xf32>
    %151 = vector.multi_reduction <add>, %150, %cst_191 [1] : vector<4x896xf32> to vector<4xf32>
    %152 = vector.shape_cast %151 : vector<4xf32> to vector<4x1xf32>
    %cst_192 = arith.constant 0.001953125 : f32
    %153 = vector.broadcast %cst_192 : f32 to vector<4x1xf32>
    %154 = arith.mulf %152, %153 : vector<4x1xf32>
    %155 = vector.broadcast %154 : vector<4x1xf32> to vector<4x896xf32>
    %156 = arith.subf %148, %155 : vector<4x896xf32>
    %157 = vector.broadcast %0 : vector<1x896xf32> to vector<4x896xf32>
    %158 = arith.mulf %156, %157 : vector<4x896xf32>
    %159 = arith.mulf %158, %158 : vector<4x896xf32>
    %cst_193 = arith.constant dense<0.000000e+00> : vector<4xf32>
    %160 = vector.multi_reduction <add>, %159, %cst_193 [1] : vector<4x896xf32> to vector<4xf32>
    %161 = vector.shape_cast %160 : vector<4xf32> to vector<4x1xf32>
    %cst_194 = arith.constant 0.001953125 : f32
    %162 = vector.broadcast %cst_194 : f32 to vector<4x1xf32>
    %163 = arith.mulf %161, %162 : vector<4x1xf32>
    %cst_195 = arith.constant 9.99999974E-6 : f32
    %164 = vector.broadcast %cst_195 : f32 to vector<4x1xf32>
    %165 = arith.addf %163, %164 : vector<4x1xf32>
    %166 = math.rsqrt %165 : vector<4x1xf32>
    %167 = vector.broadcast %166 : vector<4x1xf32> to vector<4x896xf32>
    %168 = arith.mulf %156, %167 : vector<4x896xf32>
    %169 = arith.addf %168, %4 : vector<4x896xf32>
    %cst_196 = arith.constant 0.000000e+00 : f32
    %170 = vector.broadcast %cst_196 : f32 to vector<4x896xf32>
    %171 = arith.maximumf %169, %170 : vector<4x896xf32>
    %172 = vector.broadcast %0 : vector<1x896xf32> to vector<4x896xf32>
    %173 = arith.mulf %171, %172 : vector<4x896xf32>
    %c0_197 = arith.constant 0 : index
    %c0_198 = arith.constant 0 : index
    %174 = vector.load %arg7[%c0_197, %c0_198] : memref<4x896xf32, #tpu.memory_space<vmem>>, vector<4x896xf32>
    tpu.vector_store %arg7[%c0_197, %c0_198], %173 {strides = array<i32>} : memref<4x896xf32, #tpu.memory_space<vmem>>, vector<4x896xf32>,
    %175 = arith.truncf %173 : vector<4x896xf32> to vector<4x896xbf16>
    %c0_199 = arith.constant 0 : index
    %c128_200 = arith.constant 128 : index
    %176 = vector.load %arg5[%c0_199, %c128_200] : memref<4x1152xbf16, #tpu.memory_space<vmem>>, vector<4x896xbf16>
    tpu.vector_store %arg5[%c0_199, %c128_200], %175 {strides = array<i32>} : memref<4x1152xbf16, #tpu.memory_space<vmem>>, vector<4x896xbf16>,
    %c0_201 = arith.constant 0 : index
    %c17_202 = arith.constant 17 : index
    %177 = vector.load %arg5[%c0_201, %c17_202] : memref<4x1152xbf16, #tpu.memory_space<vmem>>, vector<4x896xbf16>
    %c0_203 = arith.constant 0 : index
    %c0_204 = arith.constant 0 : index
    %178 = vector.load %arg6[%c0_203, %c0_204] : memref<108x896xbf16, #tpu.memory_space<vmem>>, vector<4x896xbf16>
    tpu.vector_store %arg6[%c0_203, %c0_204], %177 {strides = array<i32>} : memref<108x896xbf16, #tpu.memory_space<vmem>>, vector<4x896xbf16>,
    %c0_205 = arith.constant 0 : index
    %c18_206 = arith.constant 18 : index
    %179 = vector.load %arg5[%c0_205, %c18_206] : memref<4x1152xbf16, #tpu.memory_space<vmem>>, vector<4x896xbf16>
    %c4_207 = arith.constant 4 : index
    %c0_208 = arith.constant 0 : index
    %180 = vector.load %arg6[%c4_207, %c0_208] : memref<108x896xbf16, #tpu.memory_space<vmem>>, vector<4x896xbf16>
    tpu.vector_store %arg6[%c4_207, %c0_208], %179 {strides = array<i32>} : memref<108x896xbf16, #tpu.memory_space<vmem>>, vector<4x896xbf16>,
    %c0_209 = arith.constant 0 : index
    %c19_210 = arith.constant 19 : index
    %181 = vector.load %arg5[%c0_209, %c19_210] : memref<4x1152xbf16, #tpu.memory_space<vmem>>, vector<4x896xbf16>
    %c8_211 = arith.constant 8 : index
    %c0_212 = arith.constant 0 : index
    %182 = vector.load %arg6[%c8_211, %c0_212] : memref<108x896xbf16, #tpu.memory_space<vmem>>, vector<4x896xbf16>
    tpu.vector_store %arg6[%c8_211, %c0_212], %181 {strides = array<i32>} : memref<108x896xbf16, #tpu.memory_space<vmem>>, vector<4x896xbf16>,
    %c0_213 = arith.constant 0 : index
    %c27_214 = arith.constant 27 : index
    %183 = vector.load %arg5[%c0_213, %c27_214] : memref<4x1152xbf16, #tpu.memory_space<vmem>>, vector<4x896xbf16>
    %c12_215 = arith.constant 12 : index
    %c0_216 = arith.constant 0 : index
    %184 = vector.load %arg6[%c12_215, %c0_216] : memref<108x896xbf16, #tpu.memory_space<vmem>>, vector<4x896xbf16>
    tpu.vector_store %arg6[%c12_215, %c0_216], %183 {strides = array<i32>} : memref<108x896xbf16, #tpu.memory_space<vmem>>, vector<4x896xbf16>,
    %c0_217 = arith.constant 0 : index
    %c28_218 = arith.constant 28 : index
    %185 = vector.load %arg5[%c0_217, %c28_218] : memref<4x1152xbf16, #tpu.memory_space<vmem>>, vector<4x896xbf16>
    %c16_219 = arith.constant 16 : index
    %c0_220 = arith.constant 0 : index
    %186 = vector.load %arg6[%c16_219, %c0_220] : memref<108x896xbf16, #tpu.memory_space<vmem>>, vector<4x896xbf16>
    tpu.vector_store %arg6[%c16_219, %c0_220], %185 {strides = array<i32>} : memref<108x896xbf16, #tpu.memory_space<vmem>>, vector<4x896xbf16>,
    %c0_221 = arith.constant 0 : index
    %c29_222 = arith.constant 29 : index
    %187 = vector.load %arg5[%c0_221, %c29_222] : memref<4x1152xbf16, #tpu.memory_space<vmem>>, vector<4x896xbf16>
    %c20_223 = arith.constant 20 : index
    %c0_224 = arith.constant 0 : index
    %188 = vector.load %arg6[%c20_223, %c0_224] : memref<108x896xbf16, #tpu.memory_space<vmem>>, vector<4x896xbf16>
    tpu.vector_store %arg6[%c20_223, %c0_224], %187 {strides = array<i32>} : memref<108x896xbf16, #tpu.memory_space<vmem>>, vector<4x896xbf16>,
    %c0_225 = arith.constant 0 : index
    %c37_226 = arith.constant 37 : index
    %189 = vector.load %arg5[%c0_225, %c37_226] : memref<4x1152xbf16, #tpu.memory_space<vmem>>, vector<4x896xbf16>
    %c24_227 = arith.constant 24 : index
    %c0_228 = arith.constant 0 : index
    %190 = vector.load %arg6[%c24_227, %c0_228] : memref<108x896xbf16, #tpu.memory_space<vmem>>, vector<4x896xbf16>
    tpu.vector_store %arg6[%c24_227, %c0_228], %189 {strides = array<i32>} : memref<108x896xbf16, #tpu.memory_space<vmem>>, vector<4x896xbf16>,
    %c0_229 = arith.constant 0 : index
    %c38_230 = arith.constant 38 : index
    %191 = vector.load %arg5[%c0_229, %c38_230] : memref<4x1152xbf16, #tpu.memory_space<vmem>>, vector<4x896xbf16>
    %c28_231 = arith.constant 28 : index
    %c0_232 = arith.constant 0 : index
    %192 = vector.load %arg6[%c28_231, %c0_232] : memref<108x896xbf16, #tpu.memory_space<vmem>>, vector<4x896xbf16>
    tpu.vector_store %arg6[%c28_231, %c0_232], %191 {strides = array<i32>} : memref<108x896xbf16, #tpu.memory_space<vmem>>, vector<4x896xbf16>,
    %c0_233 = arith.constant 0 : index
    %c39_234 = arith.constant 39 : index
    %193 = vector.load %arg5[%c0_233, %c39_234] : memref<4x1152xbf16, #tpu.memory_space<vmem>>, vector<4x896xbf16>
    %c32_235 = arith.constant 32 : index
    %c0_236 = arith.constant 0 : index
    %194 = vector.load %arg6[%c32_235, %c0_236] : memref<108x896xbf16, #tpu.memory_space<vmem>>, vector<4x896xbf16>
    tpu.vector_store %arg6[%c32_235, %c0_236], %193 {strides = array<i32>} : memref<108x896xbf16, #tpu.memory_space<vmem>>, vector<4x896xbf16>,
    %c0_237 = arith.constant 0 : index
    %c117_238 = arith.constant 117 : index
    %195 = vector.load %arg5[%c0_237, %c117_238] : memref<4x1152xbf16, #tpu.memory_space<vmem>>, vector<4x896xbf16>
    %c36_239 = arith.constant 36 : index
    %c0_240 = arith.constant 0 : index
    %196 = vector.load %arg6[%c36_239, %c0_240] : memref<108x896xbf16, #tpu.memory_space<vmem>>, vector<4x896xbf16>
    tpu.vector_store %arg6[%c36_239, %c0_240], %195 {strides = array<i32>} : memref<108x896xbf16, #tpu.memory_space<vmem>>, vector<4x896xbf16>,
    %c0_241 = arith.constant 0 : index
    %c118_242 = arith.constant 118 : index
    %197 = vector.load %arg5[%c0_241, %c118_242] : memref<4x1152xbf16, #tpu.memory_space<vmem>>, vector<4x896xbf16>
    %c40_243 = arith.constant 40 : index
    %c0_244 = arith.constant 0 : index
    %198 = vector.load %arg6[%c40_243, %c0_244] : memref<108x896xbf16, #tpu.memory_space<vmem>>, vector<4x896xbf16>
    tpu.vector_store %arg6[%c40_243, %c0_244], %197 {strides = array<i32>} : memref<108x896xbf16, #tpu.memory_space<vmem>>, vector<4x896xbf16>,
    %c0_245 = arith.constant 0 : index
    %c119_246 = arith.constant 119 : index
    %199 = vector.load %arg5[%c0_245, %c119_246] : memref<4x1152xbf16, #tpu.memory_space<vmem>>, vector<4x896xbf16>
    %c44_247 = arith.constant 44 : index
    %c0_248 = arith.constant 0 : index
    %200 = vector.load %arg6[%c44_247, %c0_248] : memref<108x896xbf16, #tpu.memory_space<vmem>>, vector<4x896xbf16>
    tpu.vector_store %arg6[%c44_247, %c0_248], %199 {strides = array<i32>} : memref<108x896xbf16, #tpu.memory_space<vmem>>, vector<4x896xbf16>,
    %c0_249 = arith.constant 0 : index
    %c127_250 = arith.constant 127 : index
    %201 = vector.load %arg5[%c0_249, %c127_250] : memref<4x1152xbf16, #tpu.memory_space<vmem>>, vector<4x896xbf16>
    %c48_251 = arith.constant 48 : index
    %c0_252 = arith.constant 0 : index
    %202 = vector.load %arg6[%c48_251, %c0_252] : memref<108x896xbf16, #tpu.memory_space<vmem>>, vector<4x896xbf16>
    tpu.vector_store %arg6[%c48_251, %c0_252], %201 {strides = array<i32>} : memref<108x896xbf16, #tpu.memory_space<vmem>>, vector<4x896xbf16>,
    %c0_253 = arith.constant 0 : index
    %c128_254 = arith.constant 128 : index
    %203 = vector.load %arg5[%c0_253, %c128_254] : memref<4x1152xbf16, #tpu.memory_space<vmem>>, vector<4x896xbf16>
    %c52_255 = arith.constant 52 : index
    %c0_256 = arith.constant 0 : index
    %204 = vector.load %arg6[%c52_255, %c0_256] : memref<108x896xbf16, #tpu.memory_space<vmem>>, vector<4x896xbf16>
    tpu.vector_store %arg6[%c52_255, %c0_256], %203 {strides = array<i32>} : memref<108x896xbf16, #tpu.memory_space<vmem>>, vector<4x896xbf16>,
    %c0_257 = arith.constant 0 : index
    %c129_258 = arith.constant 129 : index
    %205 = vector.load %arg5[%c0_257, %c129_258] : memref<4x1152xbf16, #tpu.memory_space<vmem>>, vector<4x896xbf16>
    %c56_259 = arith.constant 56 : index
    %c0_260 = arith.constant 0 : index
    %206 = vector.load %arg6[%c56_259, %c0_260] : memref<108x896xbf16, #tpu.memory_space<vmem>>, vector<4x896xbf16>
    tpu.vector_store %arg6[%c56_259, %c0_260], %205 {strides = array<i32>} : memref<108x896xbf16, #tpu.memory_space<vmem>>, vector<4x896xbf16>,
    %c0_261 = arith.constant 0 : index
    %c137_262 = arith.constant 137 : index
    %207 = vector.load %arg5[%c0_261, %c137_262] : memref<4x1152xbf16, #tpu.memory_space<vmem>>, vector<4x896xbf16>
    %c60_263 = arith.constant 60 : index
    %c0_264 = arith.constant 0 : index
    %208 = vector.load %arg6[%c60_263, %c0_264] : memref<108x896xbf16, #tpu.memory_space<vmem>>, vector<4x896xbf16>
    tpu.vector_store %arg6[%c60_263, %c0_264], %207 {strides = array<i32>} : memref<108x896xbf16, #tpu.memory_space<vmem>>, vector<4x896xbf16>,
    %c0_265 = arith.constant 0 : index
    %c138_266 = arith.constant 138 : index
    %209 = vector.load %arg5[%c0_265, %c138_266] : memref<4x1152xbf16, #tpu.memory_space<vmem>>, vector<4x896xbf16>
    %c64_267 = arith.constant 64 : index
    %c0_268 = arith.constant 0 : index
    %210 = vector.load %arg6[%c64_267, %c0_268] : memref<108x896xbf16, #tpu.memory_space<vmem>>, vector<4x896xbf16>
    tpu.vector_store %arg6[%c64_267, %c0_268], %209 {strides = array<i32>} : memref<108x896xbf16, #tpu.memory_space<vmem>>, vector<4x896xbf16>,
    %c0_269 = arith.constant 0 : index
    %c139_270 = arith.constant 139 : index
    %211 = vector.load %arg5[%c0_269, %c139_270] : memref<4x1152xbf16, #tpu.memory_space<vmem>>, vector<4x896xbf16>
    %c68_271 = arith.constant 68 : index
    %c0_272 = arith.constant 0 : index
    %212 = vector.load %arg6[%c68_271, %c0_272] : memref<108x896xbf16, #tpu.memory_space<vmem>>, vector<4x896xbf16>
    tpu.vector_store %arg6[%c68_271, %c0_272], %211 {strides = array<i32>} : memref<108x896xbf16, #tpu.memory_space<vmem>>, vector<4x896xbf16>,
    %c0_273 = arith.constant 0 : index
    %c217_274 = arith.constant 217 : index
    %213 = vector.load %arg5[%c0_273, %c217_274] : memref<4x1152xbf16, #tpu.memory_space<vmem>>, vector<4x896xbf16>
    %c72_275 = arith.constant 72 : index
    %c0_276 = arith.constant 0 : index
    %214 = vector.load %arg6[%c72_275, %c0_276] : memref<108x896xbf16, #tpu.memory_space<vmem>>, vector<4x896xbf16>
    tpu.vector_store %arg6[%c72_275, %c0_276], %213 {strides = array<i32>} : memref<108x896xbf16, #tpu.memory_space<vmem>>, vector<4x896xbf16>,
    %c0_277 = arith.constant 0 : index
    %c218_278 = arith.constant 218 : index
    %215 = vector.load %arg5[%c0_277, %c218_278] : memref<4x1152xbf16, #tpu.memory_space<vmem>>, vector<4x896xbf16>
    %c76_279 = arith.constant 76 : index
    %c0_280 = arith.constant 0 : index
    %216 = vector.load %arg6[%c76_279, %c0_280] : memref<108x896xbf16, #tpu.memory_space<vmem>>, vector<4x896xbf16>
    tpu.vector_store %arg6[%c76_279, %c0_280], %215 {strides = array<i32>} : memref<108x896xbf16, #tpu.memory_space<vmem>>, vector<4x896xbf16>,
    %c0_281 = arith.constant 0 : index
    %c219_282 = arith.constant 219 : index
    %217 = vector.load %arg5[%c0_281, %c219_282] : memref<4x1152xbf16, #tpu.memory_space<vmem>>, vector<4x896xbf16>
    %c80_283 = arith.constant 80 : index
    %c0_284 = arith.constant 0 : index
    %218 = vector.load %arg6[%c80_283, %c0_284] : memref<108x896xbf16, #tpu.memory_space<vmem>>, vector<4x896xbf16>
    tpu.vector_store %arg6[%c80_283, %c0_284], %217 {strides = array<i32>} : memref<108x896xbf16, #tpu.memory_space<vmem>>, vector<4x896xbf16>,
    %c0_285 = arith.constant 0 : index
    %c227_286 = arith.constant 227 : index
    %219 = vector.load %arg5[%c0_285, %c227_286] : memref<4x1152xbf16, #tpu.memory_space<vmem>>, vector<4x896xbf16>
    %c84_287 = arith.constant 84 : index
    %c0_288 = arith.constant 0 : index
    %220 = vector.load %arg6[%c84_287, %c0_288] : memref<108x896xbf16, #tpu.memory_space<vmem>>, vector<4x896xbf16>
    tpu.vector_store %arg6[%c84_287, %c0_288], %219 {strides = array<i32>} : memref<108x896xbf16, #tpu.memory_space<vmem>>, vector<4x896xbf16>,
    %c0_289 = arith.constant 0 : index
    %c228_290 = arith.constant 228 : index
    %221 = vector.load %arg5[%c0_289, %c228_290] : memref<4x1152xbf16, #tpu.memory_space<vmem>>, vector<4x896xbf16>
    %c88_291 = arith.constant 88 : index
    %c0_292 = arith.constant 0 : index
    %222 = vector.load %arg6[%c88_291, %c0_292] : memref<108x896xbf16, #tpu.memory_space<vmem>>, vector<4x896xbf16>
    tpu.vector_store %arg6[%c88_291, %c0_292], %221 {strides = array<i32>} : memref<108x896xbf16, #tpu.memory_space<vmem>>, vector<4x896xbf16>,
    %c0_293 = arith.constant 0 : index
    %c229_294 = arith.constant 229 : index
    %223 = vector.load %arg5[%c0_293, %c229_294] : memref<4x1152xbf16, #tpu.memory_space<vmem>>, vector<4x896xbf16>
    %c92_295 = arith.constant 92 : index
    %c0_296 = arith.constant 0 : index
    %224 = vector.load %arg6[%c92_295, %c0_296] : memref<108x896xbf16, #tpu.memory_space<vmem>>, vector<4x896xbf16>
    tpu.vector_store %arg6[%c92_295, %c0_296], %223 {strides = array<i32>} : memref<108x896xbf16, #tpu.memory_space<vmem>>, vector<4x896xbf16>,
    %c0_297 = arith.constant 0 : index
    %c237_298 = arith.constant 237 : index
    %225 = vector.load %arg5[%c0_297, %c237_298] : memref<4x1152xbf16, #tpu.memory_space<vmem>>, vector<4x896xbf16>
    %c96_299 = arith.constant 96 : index
    %c0_300 = arith.constant 0 : index
    %226 = vector.load %arg6[%c96_299, %c0_300] : memref<108x896xbf16, #tpu.memory_space<vmem>>, vector<4x896xbf16>
    tpu.vector_store %arg6[%c96_299, %c0_300], %225 {strides = array<i32>} : memref<108x896xbf16, #tpu.memory_space<vmem>>, vector<4x896xbf16>,
    %c0_301 = arith.constant 0 : index
    %c238_302 = arith.constant 238 : index
    %227 = vector.load %arg5[%c0_301, %c238_302] : memref<4x1152xbf16, #tpu.memory_space<vmem>>, vector<4x896xbf16>
    %c100_303 = arith.constant 100 : index
    %c0_304 = arith.constant 0 : index
    %228 = vector.load %arg6[%c100_303, %c0_304] : memref<108x896xbf16, #tpu.memory_space<vmem>>, vector<4x896xbf16>
    tpu.vector_store %arg6[%c100_303, %c0_304], %227 {strides = array<i32>} : memref<108x896xbf16, #tpu.memory_space<vmem>>, vector<4x896xbf16>,
    %c0_305 = arith.constant 0 : index
    %c239_306 = arith.constant 239 : index
    %229 = vector.load %arg5[%c0_305, %c239_306] : memref<4x1152xbf16, #tpu.memory_space<vmem>>, vector<4x896xbf16>
    %c104_307 = arith.constant 104 : index
    %c0_308 = arith.constant 0 : index
    %230 = vector.load %arg6[%c104_307, %c0_308] : memref<108x896xbf16, #tpu.memory_space<vmem>>, vector<4x896xbf16>
    tpu.vector_store %arg6[%c104_307, %c0_308], %229 {strides = array<i32>} : memref<108x896xbf16, #tpu.memory_space<vmem>>, vector<4x896xbf16>,
    %c2 = arith.constant 2 : index
    %c0_309 = arith.constant 0 : index
    %c0_310 = arith.constant 0 : index
    %231 = vector.load %arg2[%c2, %c0_309, %c0_310] : memref<4x4x108xbf16, #tpu.memory_space<vmem>>, vector<1x4x108xbf16>
    %232 = vector.shape_cast %231 : vector<1x4x108xbf16> to vector<4x108xbf16>
    %c0_311 = arith.constant 0 : index
    %c0_312 = arith.constant 0 : index
    %233 = vector.load %arg6[%c0_311, %c0_312] : memref<108x896xbf16, #tpu.memory_space<vmem>>, vector<108x896xbf16>
    %cst_313 = arith.constant dense<0.000000e+00> : vector<4x896xf32>
    %234 = tpu.matmul %232, %233, %cst_313 {dimension_numbers = #tpu.dot_dimension_numbers<[1], [0], [0], [1], [0, 0, 1, 1], [], []>} : vector<4x108xbf16>, vector<108x896xbf16>, vector<4x896xf32> -> vector<4x896xf32>
    %235 = vector.broadcast %0 : vector<1x896xf32> to vector<4x896xf32>
    %236 = arith.mulf %234, %235 : vector<4x896xf32>
    %cst_314 = arith.constant dense<0.000000e+00> : vector<4xf32>
    %237 = vector.multi_reduction <add>, %236, %cst_314 [1] : vector<4x896xf32> to vector<4xf32>
    %238 = vector.shape_cast %237 : vector<4xf32> to vector<4x1xf32>
    %cst_315 = arith.constant 0.001953125 : f32
    %239 = vector.broadcast %cst_315 : f32 to vector<4x1xf32>
    %240 = arith.mulf %238, %239 : vector<4x1xf32>
    %241 = vector.broadcast %240 : vector<4x1xf32> to vector<4x896xf32>
    %242 = arith.subf %234, %241 : vector<4x896xf32>
    %243 = vector.broadcast %0 : vector<1x896xf32> to vector<4x896xf32>
    %244 = arith.mulf %242, %243 : vector<4x896xf32>
    %245 = arith.mulf %244, %244 : vector<4x896xf32>
    %cst_316 = arith.constant dense<0.000000e+00> : vector<4xf32>
    %246 = vector.multi_reduction <add>, %245, %cst_316 [1] : vector<4x896xf32> to vector<4xf32>
    %247 = vector.shape_cast %246 : vector<4xf32> to vector<4x1xf32>
    %cst_317 = arith.constant 0.001953125 : f32
    %248 = vector.broadcast %cst_317 : f32 to vector<4x1xf32>
    %249 = arith.mulf %247, %248 : vector<4x1xf32>
    %cst_318 = arith.constant 9.99999974E-6 : f32
    %250 = vector.broadcast %cst_318 : f32 to vector<4x1xf32>
    %251 = arith.addf %249, %250 : vector<4x1xf32>
    %252 = math.rsqrt %251 : vector<4x1xf32>
    %253 = vector.broadcast %252 : vector<4x1xf32> to vector<4x896xf32>
    %254 = arith.mulf %242, %253 : vector<4x896xf32>
    %cst_319 = arith.constant 0.000000e+00 : f32
    %255 = vector.broadcast %cst_319 : f32 to vector<4x896xf32>
    %256 = arith.maximumf %254, %255 : vector<4x896xf32>
    %257 = vector.broadcast %0 : vector<1x896xf32> to vector<4x896xf32>
    %258 = arith.mulf %256, %257 : vector<4x896xf32>
    %259 = arith.truncf %258 : vector<4x896xf32> to vector<4x896xbf16>
    %c0_320 = arith.constant 0 : index
    %c128_321 = arith.constant 128 : index
    %260 = vector.load %arg5[%c0_320, %c128_321] : memref<4x1152xbf16, #tpu.memory_space<vmem>>, vector<4x896xbf16>
    tpu.vector_store %arg5[%c0_320, %c128_321], %259 {strides = array<i32>} : memref<4x1152xbf16, #tpu.memory_space<vmem>>, vector<4x896xbf16>,
    %c0_322 = arith.constant 0 : index
    %c0_323 = arith.constant 0 : index
    %261 = vector.load %arg7[%c0_322, %c0_323] : memref<4x896xf32, #tpu.memory_space<vmem>>, vector<4x896xf32>
    %c0_324 = arith.constant 0 : index
    %c17_325 = arith.constant 17 : index
    %262 = vector.load %arg5[%c0_324, %c17_325] : memref<4x1152xbf16, #tpu.memory_space<vmem>>, vector<4x896xbf16>
    %c0_326 = arith.constant 0 : index
    %c0_327 = arith.constant 0 : index
    %263 = vector.load %arg6[%c0_326, %c0_327] : memref<108x896xbf16, #tpu.memory_space<vmem>>, vector<4x896xbf16>
    tpu.vector_store %arg6[%c0_326, %c0_327], %262 {strides = array<i32>} : memref<108x896xbf16, #tpu.memory_space<vmem>>, vector<4x896xbf16>,
    %c0_328 = arith.constant 0 : index
    %c18_329 = arith.constant 18 : index
    %264 = vector.load %arg5[%c0_328, %c18_329] : memref<4x1152xbf16, #tpu.memory_space<vmem>>, vector<4x896xbf16>
    %c4_330 = arith.constant 4 : index
    %c0_331 = arith.constant 0 : index
    %265 = vector.load %arg6[%c4_330, %c0_331] : memref<108x896xbf16, #tpu.memory_space<vmem>>, vector<4x896xbf16>
    tpu.vector_store %arg6[%c4_330, %c0_331], %264 {strides = array<i32>} : memref<108x896xbf16, #tpu.memory_space<vmem>>, vector<4x896xbf16>,
    %c0_332 = arith.constant 0 : index
    %c19_333 = arith.constant 19 : index
    %266 = vector.load %arg5[%c0_332, %c19_333] : memref<4x1152xbf16, #tpu.memory_space<vmem>>, vector<4x896xbf16>
    %c8_334 = arith.constant 8 : index
    %c0_335 = arith.constant 0 : index
    %267 = vector.load %arg6[%c8_334, %c0_335] : memref<108x896xbf16, #tpu.memory_space<vmem>>, vector<4x896xbf16>
    tpu.vector_store %arg6[%c8_334, %c0_335], %266 {strides = array<i32>} : memref<108x896xbf16, #tpu.memory_space<vmem>>, vector<4x896xbf16>,
    %c0_336 = arith.constant 0 : index
    %c27_337 = arith.constant 27 : index
    %268 = vector.load %arg5[%c0_336, %c27_337] : memref<4x1152xbf16, #tpu.memory_space<vmem>>, vector<4x896xbf16>
    %c12_338 = arith.constant 12 : index
    %c0_339 = arith.constant 0 : index
    %269 = vector.load %arg6[%c12_338, %c0_339] : memref<108x896xbf16, #tpu.memory_space<vmem>>, vector<4x896xbf16>
    tpu.vector_store %arg6[%c12_338, %c0_339], %268 {strides = array<i32>} : memref<108x896xbf16, #tpu.memory_space<vmem>>, vector<4x896xbf16>,
    %c0_340 = arith.constant 0 : index
    %c28_341 = arith.constant 28 : index
    %270 = vector.load %arg5[%c0_340, %c28_341] : memref<4x1152xbf16, #tpu.memory_space<vmem>>, vector<4x896xbf16>
    %c16_342 = arith.constant 16 : index
    %c0_343 = arith.constant 0 : index
    %271 = vector.load %arg6[%c16_342, %c0_343] : memref<108x896xbf16, #tpu.memory_space<vmem>>, vector<4x896xbf16>
    tpu.vector_store %arg6[%c16_342, %c0_343], %270 {strides = array<i32>} : memref<108x896xbf16, #tpu.memory_space<vmem>>, vector<4x896xbf16>,
    %c0_344 = arith.constant 0 : index
    %c29_345 = arith.constant 29 : index
    %272 = vector.load %arg5[%c0_344, %c29_345] : memref<4x1152xbf16, #tpu.memory_space<vmem>>, vector<4x896xbf16>
    %c20_346 = arith.constant 20 : index
    %c0_347 = arith.constant 0 : index
    %273 = vector.load %arg6[%c20_346, %c0_347] : memref<108x896xbf16, #tpu.memory_space<vmem>>, vector<4x896xbf16>
    tpu.vector_store %arg6[%c20_346, %c0_347], %272 {strides = array<i32>} : memref<108x896xbf16, #tpu.memory_space<vmem>>, vector<4x896xbf16>,
    %c0_348 = arith.constant 0 : index
    %c37_349 = arith.constant 37 : index
    %274 = vector.load %arg5[%c0_348, %c37_349] : memref<4x1152xbf16, #tpu.memory_space<vmem>>, vector<4x896xbf16>
    %c24_350 = arith.constant 24 : index
    %c0_351 = arith.constant 0 : index
    %275 = vector.load %arg6[%c24_350, %c0_351] : memref<108x896xbf16, #tpu.memory_space<vmem>>, vector<4x896xbf16>
    tpu.vector_store %arg6[%c24_350, %c0_351], %274 {strides = array<i32>} : memref<108x896xbf16, #tpu.memory_space<vmem>>, vector<4x896xbf16>,
    %c0_352 = arith.constant 0 : index
    %c38_353 = arith.constant 38 : index
    %276 = vector.load %arg5[%c0_352, %c38_353] : memref<4x1152xbf16, #tpu.memory_space<vmem>>, vector<4x896xbf16>
    %c28_354 = arith.constant 28 : index
    %c0_355 = arith.constant 0 : index
    %277 = vector.load %arg6[%c28_354, %c0_355] : memref<108x896xbf16, #tpu.memory_space<vmem>>, vector<4x896xbf16>
    tpu.vector_store %arg6[%c28_354, %c0_355], %276 {strides = array<i32>} : memref<108x896xbf16, #tpu.memory_space<vmem>>, vector<4x896xbf16>,
    %c0_356 = arith.constant 0 : index
    %c39_357 = arith.constant 39 : index
    %278 = vector.load %arg5[%c0_356, %c39_357] : memref<4x1152xbf16, #tpu.memory_space<vmem>>, vector<4x896xbf16>
    %c32_358 = arith.constant 32 : index
    %c0_359 = arith.constant 0 : index
    %279 = vector.load %arg6[%c32_358, %c0_359] : memref<108x896xbf16, #tpu.memory_space<vmem>>, vector<4x896xbf16>
    tpu.vector_store %arg6[%c32_358, %c0_359], %278 {strides = array<i32>} : memref<108x896xbf16, #tpu.memory_space<vmem>>, vector<4x896xbf16>,
    %c0_360 = arith.constant 0 : index
    %c117_361 = arith.constant 117 : index
    %280 = vector.load %arg5[%c0_360, %c117_361] : memref<4x1152xbf16, #tpu.memory_space<vmem>>, vector<4x896xbf16>
    %c36_362 = arith.constant 36 : index
    %c0_363 = arith.constant 0 : index
    %281 = vector.load %arg6[%c36_362, %c0_363] : memref<108x896xbf16, #tpu.memory_space<vmem>>, vector<4x896xbf16>
    tpu.vector_store %arg6[%c36_362, %c0_363], %280 {strides = array<i32>} : memref<108x896xbf16, #tpu.memory_space<vmem>>, vector<4x896xbf16>,
    %c0_364 = arith.constant 0 : index
    %c118_365 = arith.constant 118 : index
    %282 = vector.load %arg5[%c0_364, %c118_365] : memref<4x1152xbf16, #tpu.memory_space<vmem>>, vector<4x896xbf16>
    %c40_366 = arith.constant 40 : index
    %c0_367 = arith.constant 0 : index
    %283 = vector.load %arg6[%c40_366, %c0_367] : memref<108x896xbf16, #tpu.memory_space<vmem>>, vector<4x896xbf16>
    tpu.vector_store %arg6[%c40_366, %c0_367], %282 {strides = array<i32>} : memref<108x896xbf16, #tpu.memory_space<vmem>>, vector<4x896xbf16>,
    %c0_368 = arith.constant 0 : index
    %c119_369 = arith.constant 119 : index
    %284 = vector.load %arg5[%c0_368, %c119_369] : memref<4x1152xbf16, #tpu.memory_space<vmem>>, vector<4x896xbf16>
    %c44_370 = arith.constant 44 : index
    %c0_371 = arith.constant 0 : index
    %285 = vector.load %arg6[%c44_370, %c0_371] : memref<108x896xbf16, #tpu.memory_space<vmem>>, vector<4x896xbf16>
    tpu.vector_store %arg6[%c44_370, %c0_371], %284 {strides = array<i32>} : memref<108x896xbf16, #tpu.memory_space<vmem>>, vector<4x896xbf16>,
    %c0_372 = arith.constant 0 : index
    %c127_373 = arith.constant 127 : index
    %286 = vector.load %arg5[%c0_372, %c127_373] : memref<4x1152xbf16, #tpu.memory_space<vmem>>, vector<4x896xbf16>
    %c48_374 = arith.constant 48 : index
    %c0_375 = arith.constant 0 : index
    %287 = vector.load %arg6[%c48_374, %c0_375] : memref<108x896xbf16, #tpu.memory_space<vmem>>, vector<4x896xbf16>
    tpu.vector_store %arg6[%c48_374, %c0_375], %286 {strides = array<i32>} : memref<108x896xbf16, #tpu.memory_space<vmem>>, vector<4x896xbf16>,
    %c0_376 = arith.constant 0 : index
    %c128_377 = arith.constant 128 : index
    %288 = vector.load %arg5[%c0_376, %c128_377] : memref<4x1152xbf16, #tpu.memory_space<vmem>>, vector<4x896xbf16>
    %c52_378 = arith.constant 52 : index
    %c0_379 = arith.constant 0 : index
    %289 = vector.load %arg6[%c52_378, %c0_379] : memref<108x896xbf16, #tpu.memory_space<vmem>>, vector<4x896xbf16>
    tpu.vector_store %arg6[%c52_378, %c0_379], %288 {strides = array<i32>} : memref<108x896xbf16, #tpu.memory_space<vmem>>, vector<4x896xbf16>,
    %c0_380 = arith.constant 0 : index
    %c129_381 = arith.constant 129 : index
    %290 = vector.load %arg5[%c0_380, %c129_381] : memref<4x1152xbf16, #tpu.memory_space<vmem>>, vector<4x896xbf16>
    %c56_382 = arith.constant 56 : index
    %c0_383 = arith.constant 0 : index
    %291 = vector.load %arg6[%c56_382, %c0_383] : memref<108x896xbf16, #tpu.memory_space<vmem>>, vector<4x896xbf16>
    tpu.vector_store %arg6[%c56_382, %c0_383], %290 {strides = array<i32>} : memref<108x896xbf16, #tpu.memory_space<vmem>>, vector<4x896xbf16>,
    %c0_384 = arith.constant 0 : index
    %c137_385 = arith.constant 137 : index
    %292 = vector.load %arg5[%c0_384, %c137_385] : memref<4x1152xbf16, #tpu.memory_space<vmem>>, vector<4x896xbf16>
    %c60_386 = arith.constant 60 : index
    %c0_387 = arith.constant 0 : index
    %293 = vector.load %arg6[%c60_386, %c0_387] : memref<108x896xbf16, #tpu.memory_space<vmem>>, vector<4x896xbf16>
    tpu.vector_store %arg6[%c60_386, %c0_387], %292 {strides = array<i32>} : memref<108x896xbf16, #tpu.memory_space<vmem>>, vector<4x896xbf16>,
    %c0_388 = arith.constant 0 : index
    %c138_389 = arith.constant 138 : index
    %294 = vector.load %arg5[%c0_388, %c138_389] : memref<4x1152xbf16, #tpu.memory_space<vmem>>, vector<4x896xbf16>
    %c64_390 = arith.constant 64 : index
    %c0_391 = arith.constant 0 : index
    %295 = vector.load %arg6[%c64_390, %c0_391] : memref<108x896xbf16, #tpu.memory_space<vmem>>, vector<4x896xbf16>
    tpu.vector_store %arg6[%c64_390, %c0_391], %294 {strides = array<i32>} : memref<108x896xbf16, #tpu.memory_space<vmem>>, vector<4x896xbf16>,
    %c0_392 = arith.constant 0 : index
    %c139_393 = arith.constant 139 : index
    %296 = vector.load %arg5[%c0_392, %c139_393] : memref<4x1152xbf16, #tpu.memory_space<vmem>>, vector<4x896xbf16>
    %c68_394 = arith.constant 68 : index
    %c0_395 = arith.constant 0 : index
    %297 = vector.load %arg6[%c68_394, %c0_395] : memref<108x896xbf16, #tpu.memory_space<vmem>>, vector<4x896xbf16>
    tpu.vector_store %arg6[%c68_394, %c0_395], %296 {strides = array<i32>} : memref<108x896xbf16, #tpu.memory_space<vmem>>, vector<4x896xbf16>,
    %c0_396 = arith.constant 0 : index
    %c217_397 = arith.constant 217 : index
    %298 = vector.load %arg5[%c0_396, %c217_397] : memref<4x1152xbf16, #tpu.memory_space<vmem>>, vector<4x896xbf16>
    %c72_398 = arith.constant 72 : index
    %c0_399 = arith.constant 0 : index
    %299 = vector.load %arg6[%c72_398, %c0_399] : memref<108x896xbf16, #tpu.memory_space<vmem>>, vector<4x896xbf16>
    tpu.vector_store %arg6[%c72_398, %c0_399], %298 {strides = array<i32>} : memref<108x896xbf16, #tpu.memory_space<vmem>>, vector<4x896xbf16>,
    %c0_400 = arith.constant 0 : index
    %c218_401 = arith.constant 218 : index
    %300 = vector.load %arg5[%c0_400, %c218_401] : memref<4x1152xbf16, #tpu.memory_space<vmem>>, vector<4x896xbf16>
    %c76_402 = arith.constant 76 : index
    %c0_403 = arith.constant 0 : index
    %301 = vector.load %arg6[%c76_402, %c0_403] : memref<108x896xbf16, #tpu.memory_space<vmem>>, vector<4x896xbf16>
    tpu.vector_store %arg6[%c76_402, %c0_403], %300 {strides = array<i32>} : memref<108x896xbf16, #tpu.memory_space<vmem>>, vector<4x896xbf16>,
    %c0_404 = arith.constant 0 : index
    %c219_405 = arith.constant 219 : index
    %302 = vector.load %arg5[%c0_404, %c219_405] : memref<4x1152xbf16, #tpu.memory_space<vmem>>, vector<4x896xbf16>
    %c80_406 = arith.constant 80 : index
    %c0_407 = arith.constant 0 : index
    %303 = vector.load %arg6[%c80_406, %c0_407] : memref<108x896xbf16, #tpu.memory_space<vmem>>, vector<4x896xbf16>
    tpu.vector_store %arg6[%c80_406, %c0_407], %302 {strides = array<i32>} : memref<108x896xbf16, #tpu.memory_space<vmem>>, vector<4x896xbf16>,
    %c0_408 = arith.constant 0 : index
    %c227_409 = arith.constant 227 : index
    %304 = vector.load %arg5[%c0_408, %c227_409] : memref<4x1152xbf16, #tpu.memory_space<vmem>>, vector<4x896xbf16>
    %c84_410 = arith.constant 84 : index
    %c0_411 = arith.constant 0 : index
    %305 = vector.load %arg6[%c84_410, %c0_411] : memref<108x896xbf16, #tpu.memory_space<vmem>>, vector<4x896xbf16>
    tpu.vector_store %arg6[%c84_410, %c0_411], %304 {strides = array<i32>} : memref<108x896xbf16, #tpu.memory_space<vmem>>, vector<4x896xbf16>,
    %c0_412 = arith.constant 0 : index
    %c228_413 = arith.constant 228 : index
    %306 = vector.load %arg5[%c0_412, %c228_413] : memref<4x1152xbf16, #tpu.memory_space<vmem>>, vector<4x896xbf16>
    %c88_414 = arith.constant 88 : index
    %c0_415 = arith.constant 0 : index
    %307 = vector.load %arg6[%c88_414, %c0_415] : memref<108x896xbf16, #tpu.memory_space<vmem>>, vector<4x896xbf16>
    tpu.vector_store %arg6[%c88_414, %c0_415], %306 {strides = array<i32>} : memref<108x896xbf16, #tpu.memory_space<vmem>>, vector<4x896xbf16>,
    %c0_416 = arith.constant 0 : index
    %c229_417 = arith.constant 229 : index
    %308 = vector.load %arg5[%c0_416, %c229_417] : memref<4x1152xbf16, #tpu.memory_space<vmem>>, vector<4x896xbf16>
    %c92_418 = arith.constant 92 : index
    %c0_419 = arith.constant 0 : index
    %309 = vector.load %arg6[%c92_418, %c0_419] : memref<108x896xbf16, #tpu.memory_space<vmem>>, vector<4x896xbf16>
    tpu.vector_store %arg6[%c92_418, %c0_419], %308 {strides = array<i32>} : memref<108x896xbf16, #tpu.memory_space<vmem>>, vector<4x896xbf16>,
    %c0_420 = arith.constant 0 : index
    %c237_421 = arith.constant 237 : index
    %310 = vector.load %arg5[%c0_420, %c237_421] : memref<4x1152xbf16, #tpu.memory_space<vmem>>, vector<4x896xbf16>
    %c96_422 = arith.constant 96 : index
    %c0_423 = arith.constant 0 : index
    %311 = vector.load %arg6[%c96_422, %c0_423] : memref<108x896xbf16, #tpu.memory_space<vmem>>, vector<4x896xbf16>
    tpu.vector_store %arg6[%c96_422, %c0_423], %310 {strides = array<i32>} : memref<108x896xbf16, #tpu.memory_space<vmem>>, vector<4x896xbf16>,
    %c0_424 = arith.constant 0 : index
    %c238_425 = arith.constant 238 : index
    %312 = vector.load %arg5[%c0_424, %c238_425] : memref<4x1152xbf16, #tpu.memory_space<vmem>>, vector<4x896xbf16>
    %c100_426 = arith.constant 100 : index
    %c0_427 = arith.constant 0 : index
    %313 = vector.load %arg6[%c100_426, %c0_427] : memref<108x896xbf16, #tpu.memory_space<vmem>>, vector<4x896xbf16>
    tpu.vector_store %arg6[%c100_426, %c0_427], %312 {strides = array<i32>} : memref<108x896xbf16, #tpu.memory_space<vmem>>, vector<4x896xbf16>,
    %c0_428 = arith.constant 0 : index
    %c239_429 = arith.constant 239 : index
    %314 = vector.load %arg5[%c0_428, %c239_429] : memref<4x1152xbf16, #tpu.memory_space<vmem>>, vector<4x896xbf16>
    %c104_430 = arith.constant 104 : index
    %c0_431 = arith.constant 0 : index
    %315 = vector.load %arg6[%c104_430, %c0_431] : memref<108x896xbf16, #tpu.memory_space<vmem>>, vector<4x896xbf16>
    tpu.vector_store %arg6[%c104_430, %c0_431], %314 {strides = array<i32>} : memref<108x896xbf16, #tpu.memory_space<vmem>>, vector<4x896xbf16>,
    %c3 = arith.constant 3 : index
    %c0_432 = arith.constant 0 : index
    %c0_433 = arith.constant 0 : index
    %316 = vector.load %arg2[%c3, %c0_432, %c0_433] : memref<4x4x108xbf16, #tpu.memory_space<vmem>>, vector<1x4x108xbf16>
    %317 = vector.shape_cast %316 : vector<1x4x108xbf16> to vector<4x108xbf16>
    %c0_434 = arith.constant 0 : index
    %c0_435 = arith.constant 0 : index
    %318 = vector.load %arg6[%c0_434, %c0_435] : memref<108x896xbf16, #tpu.memory_space<vmem>>, vector<108x896xbf16>
    %cst_436 = arith.constant dense<0.000000e+00> : vector<4x896xf32>
    %319 = tpu.matmul %317, %318, %cst_436 {dimension_numbers = #tpu.dot_dimension_numbers<[1], [0], [0], [1], [0, 0, 1, 1], [], []>} : vector<4x108xbf16>, vector<108x896xbf16>, vector<4x896xf32> -> vector<4x896xf32>
    %320 = vector.broadcast %0 : vector<1x896xf32> to vector<4x896xf32>
    %321 = arith.mulf %319, %320 : vector<4x896xf32>
    %cst_437 = arith.constant dense<0.000000e+00> : vector<4xf32>
    %322 = vector.multi_reduction <add>, %321, %cst_437 [1] : vector<4x896xf32> to vector<4xf32>
    %323 = vector.shape_cast %322 : vector<4xf32> to vector<4x1xf32>
    %cst_438 = arith.constant 0.001953125 : f32
    %324 = vector.broadcast %cst_438 : f32 to vector<4x1xf32>
    %325 = arith.mulf %323, %324 : vector<4x1xf32>
    %326 = vector.broadcast %325 : vector<4x1xf32> to vector<4x896xf32>
    %327 = arith.subf %319, %326 : vector<4x896xf32>
    %328 = vector.broadcast %0 : vector<1x896xf32> to vector<4x896xf32>
    %329 = arith.mulf %327, %328 : vector<4x896xf32>
    %330 = arith.mulf %329, %329 : vector<4x896xf32>
    %cst_439 = arith.constant dense<0.000000e+00> : vector<4xf32>
    %331 = vector.multi_reduction <add>, %330, %cst_439 [1] : vector<4x896xf32> to vector<4xf32>
    %332 = vector.shape_cast %331 : vector<4xf32> to vector<4x1xf32>
    %cst_440 = arith.constant 0.001953125 : f32
    %333 = vector.broadcast %cst_440 : f32 to vector<4x1xf32>
    %334 = arith.mulf %332, %333 : vector<4x1xf32>
    %cst_441 = arith.constant 9.99999974E-6 : f32
    %335 = vector.broadcast %cst_441 : f32 to vector<4x1xf32>
    %336 = arith.addf %334, %335 : vector<4x1xf32>
    %337 = math.rsqrt %336 : vector<4x1xf32>
    %338 = vector.broadcast %337 : vector<4x1xf32> to vector<4x896xf32>
    %339 = arith.mulf %327, %338 : vector<4x896xf32>
    %340 = arith.addf %339, %261 : vector<4x896xf32>
    %cst_442 = arith.constant 0.000000e+00 : f32
    %341 = vector.broadcast %cst_442 : f32 to vector<4x896xf32>
    %342 = arith.maximumf %340, %341 : vector<4x896xf32>
    %343 = vector.broadcast %0 : vector<1x896xf32> to vector<4x896xf32>
    %344 = arith.mulf %342, %343 : vector<4x896xf32>
    %345 = arith.truncf %344 : vector<4x896xf32> to vector<4x896xbf16>
    %c0_443 = arith.constant 0 : index
    %c0_444 = arith.constant 0 : index
    %c0_445 = arith.constant 0 : index
    %346 = vector.load %arg4[%c0_443, %c0_444, %c0_445] : memref<1x4x896xbf16, #tpu.memory_space<vmem>>, vector<1x4x896xbf16>
    %347 = vector.shape_cast %346 : vector<1x4x896xbf16> to vector<4x896xbf16>
    %348 = vector.shape_cast %345 : vector<4x896xbf16> to vector<1x4x896xbf16>
    tpu.vector_store %arg4[%c0_443, %c0_444, %c0_445], %348 {strides = array<i32>} : memref<1x4x896xbf16, #tpu.memory_space<vmem>>, vector<1x4x896xbf16>,
    return
  }
  func.func @transform_0(%arg0: i32) -> (i32, i32, i32) {
    %c0_i32 = arith.constant 0 : i32
    %c0_i32_0 = arith.constant 0 : i32
    %c0_i32_1 = arith.constant 0 : i32
    return %arg0, %c0_i32, %c0_i32_0 : i32, i32, i32
  }
  func.func @transform_1(%arg0: i32) -> (i32, i32, i32) {
    %c0_i32 = arith.constant 0 : i32
    %c0_i32_0 = arith.constant 0 : i32
    %c0_i32_1 = arith.constant 0 : i32
    %c0_i32_2 = arith.constant 0 : i32
    return %c0_i32, %c0_i32_0, %c0_i32_1 : i32, i32, i32
  }
  func.func @transform_2(%arg0: i32) -> (i32, i32) {
    %c0_i32 = arith.constant 0 : i32
    %c0_i32_0 = arith.constant 0 : i32
    %c0_i32_1 = arith.constant 0 : i32
    return %c0_i32, %c0_i32_0 : i32, i32
  }
  func.func @transform_3(%arg0: i32) -> (i32, i32, i32) {
    %c0_i32 = arith.constant 0 : i32
    %c0_i32_0 = arith.constant 0 : i32
    %c0_i32_1 = arith.constant 0 : i32
    return %arg0, %c0_i32, %c0_i32_0 : i32, i32, i32
  }
}

module attributes {stable_mosaic.version = 11 : i64} {
  func.func @_matmul_kernel(%arg0: i32, %arg1: i32, %arg2: i32, %arg3: memref<8x896xbf16, #tpu.memory_space<vmem>>, %arg4: memref<896x128xbf16, #tpu.memory_space<vmem>>, %arg5: memref<8x128xf32, #tpu.memory_space<vmem>>, %arg6: memref<8x128xf32, #tpu.memory_space<vmem>>) attributes {dimension_semantics = [#tpu.dimension_semantics<parallel>, #tpu.dimension_semantics<parallel>, #tpu.dimension_semantics<arbitrary>], iteration_bounds = array<i64: 1, 3, 1>, scalar_prefetch = 0 : i64, scratch_operands = 1 : i64, tpu.core_type = #tpu.core_type<tc>, window_params = [{transform_indices = @transform_0, window_bounds = array<i64: 8, 896>}, {transform_indices = @transform_1, window_bounds = array<i64: 896, 128>}, {transform_indices = @transform_2, window_bounds = array<i64: 8, 128>}]} {
    %c0_i32 = arith.constant 0 : i32
    %0 = arith.cmpi eq, %arg2, %c0_i32 : i32
    %1 = arith.extui %0 : i1 to i32
    %c0_i32_0 = arith.constant 0 : i32
    %2 = arith.cmpi ne, %1, %c0_i32_0 : i32
    scf.if %2 {
      %cst_10 = arith.constant 0.000000e+00 : f32
      %12 = vector.broadcast %cst_10 : f32 to vector<8x128xf32>
      %c0_11 = arith.constant 0 : index
      %c0_12 = arith.constant 0 : index
      %13 = vector.load %arg6[%c0_11, %c0_12] : memref<8x128xf32, #tpu.memory_space<vmem>>, vector<8x128xf32>
      tpu.vector_store %arg6[%c0_11, %c0_12], %12 {strides = array<i32>} : memref<8x128xf32, #tpu.memory_space<vmem>>, vector<8x128xf32>,
    } else {
    }
    %c0 = arith.constant 0 : index
    %c0_1 = arith.constant 0 : index
    %3 = vector.load %arg6[%c0, %c0_1] : memref<8x128xf32, #tpu.memory_space<vmem>>, vector<8x128xf32>
    %c0_2 = arith.constant 0 : index
    %c0_3 = arith.constant 0 : index
    %4 = vector.load %arg3[%c0_2, %c0_3] : memref<8x896xbf16, #tpu.memory_space<vmem>>, vector<8x896xbf16>
    %c0_4 = arith.constant 0 : index
    %c0_5 = arith.constant 0 : index
    %5 = vector.load %arg4[%c0_4, %c0_5] : memref<896x128xbf16, #tpu.memory_space<vmem>>, vector<896x128xbf16>
    %cst = arith.constant dense<0.000000e+00> : vector<8x128xf32>
    %6 = tpu.matmul %4, %5, %cst {dimension_numbers = #tpu.dot_dimension_numbers<[1], [0], [0], [1], [0, 0, 1, 1], [], []>} : vector<8x896xbf16>, vector<896x128xbf16>, vector<8x128xf32> -> vector<8x128xf32>
    %7 = arith.addf %3, %6 : vector<8x128xf32>
    %c0_6 = arith.constant 0 : index
    %c0_7 = arith.constant 0 : index
    %8 = vector.load %arg6[%c0_6, %c0_7] : memref<8x128xf32, #tpu.memory_space<vmem>>, vector<8x128xf32>
    tpu.vector_store %arg6[%c0_6, %c0_7], %7 {strides = array<i32>} : memref<8x128xf32, #tpu.memory_space<vmem>>, vector<8x128xf32>,
    %c0_i32_8 = arith.constant 0 : i32
    %9 = arith.cmpi eq, %arg2, %c0_i32_8 : i32
    %10 = arith.extui %9 : i1 to i32
    %c0_i32_9 = arith.constant 0 : i32
    %11 = arith.cmpi ne, %10, %c0_i32_9 : i32
    scf.if %11 {
      %c0_10 = arith.constant 0 : index
      %c0_11 = arith.constant 0 : index
      %12 = vector.load %arg6[%c0_10, %c0_11] : memref<8x128xf32, #tpu.memory_space<vmem>>, vector<8x128xf32>
      %c0_12 = arith.constant 0 : index
      %c0_13 = arith.constant 0 : index
      %13 = vector.load %arg5[%c0_12, %c0_13] : memref<8x128xf32, #tpu.memory_space<vmem>>, vector<8x128xf32>
      tpu.vector_store %arg5[%c0_12, %c0_13], %12 {strides = array<i32>} : memref<8x128xf32, #tpu.memory_space<vmem>>, vector<8x128xf32>,
    } else {
    }
    return
  }
  func.func @transform_0(%arg0: i32, %arg1: i32, %arg2: i32) -> (i32, i32) {
    %c0_i32 = arith.constant 0 : i32
    return %arg0, %arg2 : i32, i32
  }
  func.func @transform_1(%arg0: i32, %arg1: i32, %arg2: i32) -> (i32, i32) {
    %c0_i32 = arith.constant 0 : i32
    return %arg2, %arg1 : i32, i32
  }
  func.func @transform_2(%arg0: i32, %arg1: i32, %arg2: i32) -> (i32, i32) {
    %c0_i32 = arith.constant 0 : i32
    return %arg0, %arg1 : i32, i32
  }
}

</mosaic_0001>

<bundles_post_ra>
// kernel: geometry_transformation.3
= control target key start
LH: loop header
LB: loop body
LE: loop exit
PB: predicated region body
PF: predicated region fallthrough
CT: control target
= control target key end

     0   :  { %s1067_s9 = smov 0   ;;  %s1069_s10 = smov 0   ;;  %s1271_s0 = inlined_call_operand.vmem [shape: bf16[8,384], index: 0, kind: input, shape index: {}]   ;;  %s1272_s1 = inlined_call_operand.vmem [shape: bf16[384,896], index: 1, kind: input, shape index: {}]   ;;  %s1273_s2 = inlined_call_operand.vmem [shape: f32[8,896], index: 2, kind: output, shape index: {}]  }
   0x1   :  { %s1071_s11 = smov 0   ;;  %s1073_s12 = smov 0  }
   0x2   :  { %s1075_s13 = smov 0  }
   0x3 LB: > { %s27_s14 = sadd.s32 1, %s1044_s12  ;;  %p75_p1 = scmp.ne.s32.totalorder %s1036_s10, %s1032_s9  ;;  %s1048_s13 = sphi %s1075_s13, %s12_s13   ;;  %s1044_s12 = sphi %s1073_s12, %s1277_s12   ;;  %s1040_s11 = sphi %s1071_s11, %s1276_s11   ;;  %s1036_s10 = sphi %s1069_s10, %s1275_s10   ;;  %s1032_s9 = sphi %s1067_s9, %s1274_s9  }
   0x4   : > { %p29_p0 = scmp.ge.s32.totalorder %s27_s14, 7  ;;  %p76_p2 = scmp.eq.s32.totalorder %s1048_s13, 0 }
   0x5   : > { %s68_s16 = sadd.s32 1, %s1036_s10  ;;  %p855_p5 = scmp.ge.s32.totalorder %s1048_s13, 7 }
   0x6   : > { %s1279_s14 = smov (%p29_p0, %s27_s14), 0  ;;  %p77_p3 = por %p76_p2, %p75_p1 }
   0x7   : > { %s64_s15 = ssub.s32 %s1044_s12, %s1279_s14  ;;  %142 = sbr.rel (%p855_p5) target bundleno = 50 (0x32), region = 20 }
   0x8   : > { %p66_p4 = scmp.eq.s32.totalorder %s64_s15, 0 }
   0xa   : > { %s1102_s17 = scalar_select %p66_p4, %s1036_s10, %s68_s16  }
   0xe   : > { %145 = sbr.rel (!%p77_p3) target bundleno = 50 (0x32), region = 24  ;;  %s147_s18 = sand.u32 (%p77_p3), 1, %s1036_s10  }
   0xf   : > { %s856_s19 = sshll.u32 (%p77_p3), %s1044_s12, 2  ;;  %s939_s20 = smul.u32 (%p77_p3), 192, %s147_s18 }
  0x10   : > { %s1110_s23 = scalar_lea.vmem (%p77_p3), %s1272_s1, %s856_s19 }
  0x11   : > { %v170_v0 = vld [vmem:[%s1110_s23] sm:$0xf] (%p77_p3)  ;;  %v172_v1 = vld [vmem:[%s1110_s23 + $0x1c] sm:$0xf] (%p77_p3)  ;;  %v174_v2 = vld [vmem:[%s1110_s23 + $0x38] sm:$0xf] (%p77_p3) }
  0x12   : > { %v176_v3 = vld [vmem:[%s1110_s23 + $0x54] sm:$0xf] (%p77_p3)  ;;  %v178_v4 = vld [vmem:[%s1110_s23 + $0x70] sm:$0xf] (%p77_p3)  ;;  %s1117_s24 = scalar_lea.vmem (%p77_p3), [#allocation3], %s939_s20 }
  0x13   : > { %171 = vst [vmem:[%s1117_s24] sm:$0xf] (%p77_p3), %v170_v0  ;;  %173 = vst [vmem:[%s1117_s24 + $0x4] sm:$0xf] (%p77_p3), %v172_v1  ;;  %v180_v5 = vld [vmem:[%s1110_s23 + $0x8c] sm:$0xf] (%p77_p3) }
  0x14   : > { %175 = vst [vmem:[%s1117_s24 + $0x8] sm:$0xf] (%p77_p3), %v174_v2  ;;  %177 = vst [vmem:[%s1117_s24 + $0xc] sm:$0xf] (%p77_p3), %v176_v3  ;;  %v182_v6 = vld [vmem:[%s1110_s23 + $0xa8] sm:$0xf] (%p77_p3) }
  0x15   : > { %179 = vst [vmem:[%s1117_s24 + $0x10] sm:$0xf] %v178_v4  ;;  %v184_v7 = vld [vmem:[%s1110_s23 + $0xc4] sm:$0xf]  ;;  %181 = vst [vmem:[%s1117_s24 + $0x14] sm:$0xf] %v180_v5 }
  0x16   : > { %183 = vst [vmem:[%s1117_s24 + $0x18] sm:$0xf] %v182_v6  ;;  %185 = vst [vmem:[%s1117_s24 + $0x1c] sm:$0xf] %v184_v7  ;;  %v186_v8 = vld [vmem:[%s1110_s23 + $0xe0] sm:$0xf] }
  0x17   : > { %v188_v9 = vld [vmem:[%s1110_s23 + $0xfc] sm:$0xf]  ;;  %v190_v10 = vld [vmem:[%s1110_s23 + $0x118] sm:$0xf]  ;;  %187 = vst [vmem:[%s1117_s24 + $0x20] sm:$0xf] %v186_v8 }
  0x18   : > { %189 = vst [vmem:[%s1117_s24 + $0x24] sm:$0xf] %v188_v9  ;;  %191 = vst [vmem:[%s1117_s24 + $0x28] sm:$0xf] %v190_v10  ;;  %v192_v11 = vld [vmem:[%s1110_s23 + $0x134] sm:$0xf] }
  0x19   : > { %v194_v12 = vld [vmem:[%s1110_s23 + $0x150] sm:$0xf]  ;;  %v196_v13 = vld [vmem:[%s1110_s23 + $0x16c] sm:$0xf]  ;;  %193 = vst [vmem:[%s1117_s24 + $0x2c] sm:$0xf] %v192_v11 }
  0x1a   : > { %195 = vst [vmem:[%s1117_s24 + $0x30] sm:$0xf] %v194_v12  ;;  %197 = vst [vmem:[%s1117_s24 + $0x34] sm:$0xf] %v196_v13  ;;  %v198_v14 = vld [vmem:[%s1110_s23 + $0x188] sm:$0xf] }
  0x1b   : > { %v200_v15 = vld [vmem:[%s1110_s23 + $0x1a4] sm:$0xf]  ;;  %v202_v16 = vld [vmem:[%s1110_s23 + $0x1c0] sm:$0xf]  ;;  %199 = vst [vmem:[%s1117_s24 + $0x38] sm:$0xf] %v198_v14 }
  0x1c   : > { %201 = vst [vmem:[%s1117_s24 + $0x3c] sm:$0xf] %v200_v15  ;;  %203 = vst [vmem:[%s1117_s24 + $0x40] sm:$0xf] %v202_v16  ;;  %v204_v17 = vld [vmem:[%s1110_s23 + $0x1dc] sm:$0xf] }
  0x1d   : > { %v206_v18 = vld [vmem:[%s1110_s23 + $0x1f8] sm:$0xf]  ;;  %v208_v19 = vld [vmem:[%s1110_s23 + $0x214] sm:$0xf]  ;;  %205 = vst [vmem:[%s1117_s24 + $0x44] sm:$0xf] %v204_v17 }
  0x1e   : > { %207 = vst [vmem:[%s1117_s24 + $0x48] sm:$0xf] %v206_v18  ;;  %209 = vst [vmem:[%s1117_s24 + $0x4c] sm:$0xf] %v208_v19  ;;  %v210_v20 = vld [vmem:[%s1110_s23 + $0x230] sm:$0xf] }
  0x1f   : > { %v212_v21 = vld [vmem:[%s1110_s23 + $0x24c] sm:$0xf]  ;;  %v214_v22 = vld [vmem:[%s1110_s23 + $0x268] sm:$0xf]  ;;  %211 = vst [vmem:[%s1117_s24 + $0x50] sm:$0xf] %v210_v20 }
  0x20   : > { %213 = vst [vmem:[%s1117_s24 + $0x54] sm:$0xf] %v212_v21  ;;  %215 = vst [vmem:[%s1117_s24 + $0x58] sm:$0xf] %v214_v22  ;;  %v216_v23 = vld [vmem:[%s1110_s23 + $0x284] sm:$0xf] }
  0x21   : > { %v218_v24 = vld [vmem:[%s1110_s23 + $0x2a0] sm:$0xf]  ;;  %v220_v25 = vld [vmem:[%s1110_s23 + $0x2bc] sm:$0xf]  ;;  %217 = vst [vmem:[%s1117_s24 + $0x5c] sm:$0xf] %v216_v23 }
  0x22   : > { %219 = vst [vmem:[%s1117_s24 + $0x60] sm:$0xf] %v218_v24  ;;  %221 = vst [vmem:[%s1117_s24 + $0x64] sm:$0xf] %v220_v25  ;;  %v222_v26 = vld [vmem:[%s1110_s23 + $0x2d8] sm:$0xf] }
  0x23   : > { %v224_v27 = vld [vmem:[%s1110_s23 + $0x2f4] sm:$0xf]  ;;  %v226_v28 = vld [vmem:[%s1110_s23 + $0x310] sm:$0xf]  ;;  %223 = vst [vmem:[%s1117_s24 + $0x68] sm:$0xf] %v222_v26 }
  0x24   : > { %225 = vst [vmem:[%s1117_s24 + $0x6c] sm:$0xf] %v224_v27  ;;  %227 = vst [vmem:[%s1117_s24 + $0x70] sm:$0xf] %v226_v28  ;;  %v228_v29 = vld [vmem:[%s1110_s23 + $0x32c] sm:$0xf] }
  0x25   : > { %v230_v30 = vld [vmem:[%s1110_s23 + $0x348] sm:$0xf]  ;;  %v232_v31 = vld [vmem:[%s1110_s23 + $0x364] sm:$0xf]  ;;  %229 = vst [vmem:[%s1117_s24 + $0x74] sm:$0xf] %v228_v29 }
  0x26   : > { %231 = vst [vmem:[%s1117_s24 + $0x78] sm:$0xf] %v230_v30  ;;  %233 = vst [vmem:[%s1117_s24 + $0x7c] sm:$0xf] %v232_v31  ;;  %v234_v32 = vld [vmem:[%s1110_s23 + $0x380] sm:$0xf] }
  0x27   : > { %v236_v33 = vld [vmem:[%s1110_s23 + $0x39c] sm:$0xf]  ;;  %v238_v34 = vld [vmem:[%s1110_s23 + $0x3b8] sm:$0xf]  ;;  %235 = vst [vmem:[%s1117_s24 + $0x80] sm:$0xf] %v234_v32 }
  0x28   : > { %237 = vst [vmem:[%s1117_s24 + $0x84] sm:$0xf] %v236_v33  ;;  %239 = vst [vmem:[%s1117_s24 + $0x88] sm:$0xf] %v238_v34  ;;  %v240_v35 = vld [vmem:[%s1110_s23 + $0x3d4] sm:$0xf] }
  0x29   : > { %v242_v36 = vld [vmem:[%s1110_s23 + $0x3f0] sm:$0xf]  ;;  %v244_v37 = vld [vmem:[%s1110_s23 + $0x40c] sm:$0xf]  ;;  %241 = vst [vmem:[%s1117_s24 + $0x8c] sm:$0xf] %v240_v35 }
  0x2a   : > { %243 = vst [vmem:[%s1117_s24 + $0x90] sm:$0xf] %v242_v36  ;;  %245 = vst [vmem:[%s1117_s24 + $0x94] sm:$0xf] %v244_v37  ;;  %v246_v38 = vld [vmem:[%s1110_s23 + $0x428] sm:$0xf] }
  0x2b   : > { %v248_v39 = vld [vmem:[%s1110_s23 + $0x444] sm:$0xf]  ;;  %v250_v40 = vld [vmem:[%s1110_s23 + $0x460] sm:$0xf]  ;;  %247 = vst [vmem:[%s1117_s24 + $0x98] sm:$0xf] %v246_v38 }
  0x2c   : > { %249 = vst [vmem:[%s1117_s24 + $0x9c] sm:$0xf] %v248_v39  ;;  %251 = vst [vmem:[%s1117_s24 + $0xa0] sm:$0xf] %v250_v40  ;;  %v252_v41 = vld [vmem:[%s1110_s23 + $0x47c] sm:$0xf] }
  0x2d   : > { %v254_v42 = vld [vmem:[%s1110_s23 + $0x498] sm:$0xf]  ;;  %v256_v43 = vld [vmem:[%s1110_s23 + $0x4b4] sm:$0xf]  ;;  %253 = vst [vmem:[%s1117_s24 + $0xa4] sm:$0xf] %v252_v41 }
  0x2e   : > { %255 = vst [vmem:[%s1117_s24 + $0xa8] sm:$0xf] %v254_v42  ;;  %257 = vst [vmem:[%s1117_s24 + $0xac] sm:$0xf] %v256_v43  ;;  %v258_v44 = vld [vmem:[%s1110_s23 + $0x4d0] sm:$0xf] }
  0x2f   : > { %v260_v45 = vld [vmem:[%s1110_s23 + $0x4ec] sm:$0xf]  ;;  %v262_v46 = vld [vmem:[%s1110_s23 + $0x508] sm:$0xf]  ;;  %259 = vst [vmem:[%s1117_s24 + $0xb0] sm:$0xf] %v258_v44 }
  0x30   : > { %261 = vst [vmem:[%s1117_s24 + $0xb4] sm:$0xf] %v260_v45  ;;  %263 = vst [vmem:[%s1117_s24 + $0xb8] sm:$0xf] %v262_v46  ;;  %v264_v47 = vld [vmem:[%s1110_s23 + $0x524] sm:$0xf] }
  0x31   : > { %265 = vst [vmem:[%s1117_s24 + $0xbc] sm:$0xf] %v264_v47 }
  0x32 PF: > { %p857_p6 = scmp.ge.s32.totalorder %s1048_s13, 1  ;;  %p383_p7 = scmp.lt.s32.totalorder %s1048_s13, 8 }
  0x34   : > { %p384_p8 = pnand %p857_p6, %p383_p7 }
  0x35   : > { %s390_s25 = sand.u32 (!%p384_p8), 1, %s1032_s9   ;;  %v1216_v48 = vld [vmem:[%s1271_s0] sm:$0xff] (!%p384_p8)  ;;  %v1050_v49 = vmov (!%p384_p8), 0.0   ;;  %vm1051_vm0 = vmmov (!%p384_p8), 0   ;;  %v1009_v12 = vld [vmem:[%s1271_s0 + $0x8] ss:$0 sps:$4 sm:$0xff] (!%p384_p8)  }
  0x36   : > { %387 = sbr.rel (%p384_p8) target bundleno = 309 (0x135), region = 65  ;;  %919 = vmatprep.subr.bf16.mxu1 (!%p384_p8), %v1050_v49  ;;  %v860_v50 = vcombine.high (!%p384_p8), %v1216_v48, %v1216_v48  ;;  %935 = vmatprep.mubr.msk.bf16.mxu1 (!%p384_p8), %vm1051_vm0, %v1050_v49  ;;  %v859_v11 = vcombine.low (!%p384_p8), %v1216_v48, %v1216_v48  ;;  %p436_p9 = scmp.lt.s32.totalorder (!%p384_p8), %s1040_s11, 6 }
  0x37   : > { %s940_s28 = smul.u32 (!%p384_p8), 192, %s390_s25 }
  0x38   : > { %686 = vmatprep.mubr.bf16.mxu0 (!%p384_p8), %v860_v50 }
  0x39   : > { %s1220_s29 = scalar_lea.vmem (!%p384_p8), [#allocation3], %s940_s28 }
  0x3a   : > { %v983_v51 = vld [vmem:[%s1220_s29 + $0x40] sm:$0xff] (!%p384_p8)   ;;  %v986_v54 = vld [vmem:[%s1220_s29 + $0x48] sm:$0xff] (!%p384_p8)   ;;  %v989_v57 = vld [vmem:[%s1220_s29 + $0x50] sm:$0xff] (!%p384_p8)  }
  0x3b   : > { %v984_v52 = vld [vmem:[%s1220_s29] sm:$0xff] (!%p384_p8)   ;;  %888 = vmatprep.subr.bf16.mxu0 (!%p384_p8), %v983_v51  ;;  %v987_v55 = vld [vmem:[%s1220_s29 + $0x8] sm:$0xff] (!%p384_p8)   ;;  %v990_v58 = vld [vmem:[%s1220_s29 + $0x10] sm:$0xff] (!%p384_p8)  }
  0x3c   : > { %v985_v53 = vld [vmem:[%s1220_s29 + $0x80] sm:$0xff] (!%p384_p8)   ;;  %889 = vmatpush3.bf16.msra.mxu0 (!%p384_p8), %v984_v52  ;;  %v988_v56 = vld [vmem:[%s1220_s29 + $0x88] sm:$0xff] (!%p384_p8)   ;;  %v991_v59 = vld [vmem:[%s1220_s29 + $0x90] sm:$0xff] (!%p384_p8)  }
  0x3d   : > { %920 = vmatpush3.bf16.msra.mxu1 %v985_v53  ;;  %890 = vmatprep.subr.bf16.mxu0 %v986_v54  ;;  %v992_v60 = vld [vmem:[%s1220_s29 + $0x58] sm:$0xff]   ;;  %v995_v63 = vld [vmem:[%s1220_s29 + $0x60] sm:$0xff]   ;;  %v998_v2 = vld [vmem:[%s1220_s29 + $0x68] sm:$0xff]   ;;  %s1281_s11 = smov (!%p436_p9, %s1040_s11), 6 }
  0x3e   : > { %921 = vmatprep.subr.bf16.mxu1 %v1050_v49  ;;  %v993_v61 = vld [vmem:[%s1220_s29 + $0x18] sm:$0xff]   ;;  %v996_v0 = vld [vmem:[%s1220_s29 + $0x20] sm:$0xff]   ;;  %v999_v3 = vld [vmem:[%s1220_s29 + $0x28] sm:$0xff]   ;;  %s858_s4 = sshll.u32 %s1281_s11, 3 }
  0x3f   : > { %v994_v62 = vld [vmem:[%s1220_s29 + $0x98] sm:$0xff]   ;;  %v997_v1 = vld [vmem:[%s1220_s29 + $0xa0] sm:$0xff]   ;;  %v1000_v4 = vld [vmem:[%s1220_s29 + $0xa8] sm:$0xff]   ;;  %s441_s7 = scalar_lea.vmem %s1273_s2, %s858_s4 }
  0x40   : > { %891 = vmatpush3.bf16.msra.mxu0 %v987_v55  ;;  %v1001_v5 = vld [vmem:[%s1220_s29 + $0x70] sm:$0xff]   ;;  %v1004_v8 = vld [vmem:[%s1220_s29 + $0x78] sm:$0xff]  }
  0x41   : > { %922 = vmatpush3.bf16.msra.mxu1 %v988_v56  ;;  %892 = vmatprep.subr.bf16.mxu0 %v989_v57  ;;  %v1002_v6 = vld [vmem:[%s1220_s29 + $0x30] sm:$0xff]   ;;  %v1005_v9 = vld [vmem:[%s1220_s29 + $0x38] sm:$0xff]  }
  0x42   : > { %923 = vmatprep.subr.bf16.mxu1 %v1050_v49  ;;  %v1003_v7 = vld [vmem:[%s1220_s29 + $0xb0] sm:$0xff]   ;;  %v1006_v10 = vld [vmem:[%s1220_s29 + $0xb8] sm:$0xff]  }
  0x44   : > { %893 = vmatpush3.bf16.msra.mxu0 %v990_v58 }
  0x45   : > { %924 = vmatpush3.bf16.msra.mxu1 %v991_v59  ;;  %894 = vmatprep.subr.bf16.mxu0 %v992_v60 }
  0x46   : > { %925 = vmatprep.subr.bf16.mxu1 %v1050_v49 }
  0x48   : > { %895 = vmatpush3.bf16.msra.mxu0 %v993_v61 }
  0x49   : > { %926 = vmatpush3.bf16.msra.mxu1 %v994_v62  ;;  %896 = vmatprep.subr.bf16.mxu0 %v995_v63 }
  0x4a   : > { %927 = vmatprep.subr.bf16.mxu1 %v1050_v49 }
  0x4c   : > { %897 = vmatpush3.bf16.msra.mxu0 %v996_v0 }
  0x4d   : > { %928 = vmatpush3.bf16.msra.mxu1 %v997_v1  ;;  %898 = vmatprep.subr.bf16.mxu0 %v998_v2 }
  0x4e   : > { %929 = vmatprep.subr.bf16.mxu1 %v1050_v49 }
  0x50   : > { %899 = vmatpush3.bf16.msra.mxu0 %v999_v3 }
  0x51   : > { %930 = vmatpush3.bf16.msra.mxu1 %v1000_v4  ;;  %900 = vmatprep.subr.bf16.mxu0 %v1001_v5 }
  0x52   : > { %931 = vmatprep.subr.bf16.mxu1 %v1050_v49 }
  0x54   : > { %901 = vmatpush3.bf16.msra.mxu0 %v1002_v6 }
  0x55   : > { %932 = vmatpush3.bf16.msra.mxu1 %v1003_v7  ;;  %902 = vmatprep.subr.bf16.mxu0 %v1004_v8 }
  0x56   : > { %933 = vmatprep.subr.bf16.mxu1 %v1050_v49 }
  0x58   : > { %903 = vmatpush3.bf16.msra.mxu0 %v1005_v9 }
  0x59   : > { %934 = vmatpush3.bf16.msra.mxu1 %v1006_v10 }
  0x5b   : > { %687 = vmatmul.mubr.bf16.vlgmr.msra.gmra.mrb[0].mxu0 %v859_v11 }
  0x5c   : > { %936 = vmatmul.mubr.bf16.vlgmr.msra.gmra.mrb[0].mxu1 %v1009_v12 }
 0x12e   : > { %v904_v13 = vpop.f32.mrb[0].mxu0 }
 0x12f   : > { %v728_v14 = vpop.f32.mrb[0].mxu1  ;;  %v905_v15 = vpop.f32.mrb[1].mxu0 }
 0x130   : > { %v906_v16 = vadd.f32 %v905_v15, %v904_v13  ;;  %v937_v17 = vpop.f32.mrb[1].mxu1  ;;  %v907_v18 = vpop.f32.mrb[2].mxu0 }
 0x131   : > { %v731_v19 = vpop.f32.mrb[2].mxu1  ;;  %v908_v20 = vpop.f32.mrb[3].mxu0 }
 0x132   : > { %v729_v21 = vadd.f32 %v906_v16, %v728_v14  ;;  %v938_v22 = vpop.f32.mrb[3].mxu1 }
 0x134   : > { %740 = vst [vmem:[%s441_s7] sm:$0xff] %v729_v21 }
 0x135 PF: > { %s12_s13 = sadd.s32 1, %s1048_s13   ;;  %s1274_s9 = smov %s1036_s10 }
 0x136   : > { %p9_p10 = scmp.ge.s32.totalorder %s12_s13, 9   ;;  %s1275_s10 = smov %s1102_s17 }
 0x137   : > { %s1276_s11 = smov %s1044_s12  ;;  %s1277_s12 = smov %s1279_s14 }
 0x138   :  { %11 = sbr.rel (!%p9_p10) target bundleno = 3 (0x3), region = 115 }

// kernel: geometry_transformation.5
= control target key start
LH: loop header
LB: loop body
LE: loop exit
PB: predicated region body
PF: predicated region fallthrough
CT: control target
= control target key end

     0   :  { %s1791_s9 = smov 0   ;;  %s1793_s10 = smov 0   ;;  %s2173_s0 = inlined_call_operand.vmem [shape: bf16[8,896], index: 0, kind: input, shape index: {}]   ;;  %s2174_s1 = inlined_call_operand.vmem [shape: bf16[896,384], index: 1, kind: input, shape index: {}]   ;;  %s2175_s2 = inlined_call_operand.vmem [shape: f32[8,384], index: 2, kind: output, shape index: {}]  }
   0x1   :  { %s1795_s11 = smov 0   ;;  %s1797_s12 = smov 0  }
   0x2   :  { %s1799_s13 = smov 0  }
   0x3 LB: > { %s27_s14 = sadd.s32 1, %s1768_s12  ;;  %p75_p1 = scmp.ne.s32.totalorder %s1760_s10, %s1756_s9  ;;  %s1772_s13 = sphi %s1799_s13, %s12_s13   ;;  %s1768_s12 = sphi %s1797_s12, %s2179_s12   ;;  %s1764_s11 = sphi %s1795_s11, %s2178_s11   ;;  %s1760_s10 = sphi %s1793_s10, %s2177_s10   ;;  %s1756_s9 = sphi %s1791_s9, %s2176_s9  }
   0x4   : > { %p29_p0 = scmp.ge.s32.totalorder %s27_s14, 3  ;;  %p76_p2 = scmp.eq.s32.totalorder %s1772_s13, 0 }
   0x5   : > { %s68_s16 = sadd.s32 1, %s1760_s10  ;;  %p1463_p5 = scmp.ge.s32.totalorder %s1772_s13, 3 }
   0x6   : > { %s2181_s14 = smov (%p29_p0, %s27_s14), 0  ;;  %p77_p3 = por %p76_p2, %p75_p1 }
   0x7   : > { %s64_s15 = ssub.s32 %s1768_s12, %s2181_s14  ;;  %142 = sbr.rel (%p1463_p5) target bundleno = 93 (0x5d), region = 20 }
   0x8   : > { %p66_p4 = scmp.eq.s32.totalorder %s64_s15, 0 }
   0xa   : > { %s1826_s17 = scalar_select %p66_p4, %s1760_s10, %s68_s16  }
   0xe   : > { %145 = sbr.rel (!%p77_p3) target bundleno = 93 (0x5d), region = 24  ;;  %s147_s18 = sand.u32 (%p77_p3), 1, %s1760_s10  }
   0xf   : > { %s1464_s19 = sshll.u32 (%p77_p3), %s1768_s12, 2  ;;  %s1627_s20 = smul.u32 (%p77_p3), 448, %s147_s18 }
  0x10   : > { %s1834_s23 = scalar_lea.vmem (%p77_p3), %s2174_s1, %s1464_s19 }
  0x11   : > { %v170_v0 = vld [vmem:[%s1834_s23] sm:$0xf] (%p77_p3)  ;;  %v172_v1 = vld [vmem:[%s1834_s23 + $0xc] sm:$0xf] (%p77_p3)  ;;  %v174_v2 = vld [vmem:[%s1834_s23 + $0x18] sm:$0xf] (%p77_p3) }
  0x12   : > { %v176_v3 = vld [vmem:[%s1834_s23 + $0x24] sm:$0xf] (%p77_p3)  ;;  %v178_v4 = vld [vmem:[%s1834_s23 + $0x30] sm:$0xf] (%p77_p3)  ;;  %s1841_s24 = scalar_lea.vmem (%p77_p3), [#allocation3], %s1627_s20 }
  0x13   : > { %171 = vst [vmem:[%s1841_s24] sm:$0xf] (%p77_p3), %v170_v0  ;;  %173 = vst [vmem:[%s1841_s24 + $0x4] sm:$0xf] (%p77_p3), %v172_v1  ;;  %v180_v5 = vld [vmem:[%s1834_s23 + $0x3c] sm:$0xf] (%p77_p3) }
  0x14   : > { %175 = vst [vmem:[%s1841_s24 + $0x8] sm:$0xf] (%p77_p3), %v174_v2  ;;  %177 = vst [vmem:[%s1841_s24 + $0xc] sm:$0xf] (%p77_p3), %v176_v3  ;;  %v182_v6 = vld [vmem:[%s1834_s23 + $0x48] sm:$0xf] (%p77_p3) }
  0x15   : > { %179 = vst [vmem:[%s1841_s24 + $0x10] sm:$0xf] %v178_v4  ;;  %v184_v7 = vld [vmem:[%s1834_s23 + $0x54] sm:$0xf]  ;;  %181 = vst [vmem:[%s1841_s24 + $0x14] sm:$0xf] %v180_v5 }
  0x16   : > { %183 = vst [vmem:[%s1841_s24 + $0x18] sm:$0xf] %v182_v6  ;;  %185 = vst [vmem:[%s1841_s24 + $0x1c] sm:$0xf] %v184_v7  ;;  %v186_v8 = vld [vmem:[%s1834_s23 + $0x60] sm:$0xf] }
  0x17   : > { %v188_v9 = vld [vmem:[%s1834_s23 + $0x6c] sm:$0xf]  ;;  %v190_v10 = vld [vmem:[%s1834_s23 + $0x78] sm:$0xf]  ;;  %187 = vst [vmem:[%s1841_s24 + $0x20] sm:$0xf] %v186_v8 }
  0x18   : > { %189 = vst [vmem:[%s1841_s24 + $0x24] sm:$0xf] %v188_v9  ;;  %191 = vst [vmem:[%s1841_s24 + $0x28] sm:$0xf] %v190_v10  ;;  %v192_v11 = vld [vmem:[%s1834_s23 + $0x84] sm:$0xf] }
  0x19   : > { %v194_v12 = vld [vmem:[%s1834_s23 + $0x90] sm:$0xf]  ;;  %v196_v13 = vld [vmem:[%s1834_s23 + $0x9c] sm:$0xf]  ;;  %193 = vst [vmem:[%s1841_s24 + $0x2c] sm:$0xf] %v192_v11 }
  0x1a   : > { %195 = vst [vmem:[%s1841_s24 + $0x30] sm:$0xf] %v194_v12  ;;  %197 = vst [vmem:[%s1841_s24 + $0x34] sm:$0xf] %v196_v13  ;;  %v198_v14 = vld [vmem:[%s1834_s23 + $0xa8] sm:$0xf] }
  0x1b   : > { %v200_v15 = vld [vmem:[%s1834_s23 + $0xb4] sm:$0xf]  ;;  %v202_v16 = vld [vmem:[%s1834_s23 + $0xc0] sm:$0xf]  ;;  %199 = vst [vmem:[%s1841_s24 + $0x38] sm:$0xf] %v198_v14 }
  0x1c   : > { %201 = vst [vmem:[%s1841_s24 + $0x3c] sm:$0xf] %v200_v15  ;;  %203 = vst [vmem:[%s1841_s24 + $0x40] sm:$0xf] %v202_v16  ;;  %v204_v17 = vld [vmem:[%s1834_s23 + $0xcc] sm:$0xf] }
  0x1d   : > { %v206_v18 = vld [vmem:[%s1834_s23 + $0xd8] sm:$0xf]  ;;  %v208_v19 = vld [vmem:[%s1834_s23 + $0xe4] sm:$0xf]  ;;  %205 = vst [vmem:[%s1841_s24 + $0x44] sm:$0xf] %v204_v17 }
  0x1e   : > { %207 = vst [vmem:[%s1841_s24 + $0x48] sm:$0xf] %v206_v18  ;;  %209 = vst [vmem:[%s1841_s24 + $0x4c] sm:$0xf] %v208_v19  ;;  %v210_v20 = vld [vmem:[%s1834_s23 + $0xf0] sm:$0xf] }
  0x1f   : > { %v212_v21 = vld [vmem:[%s1834_s23 + $0xfc] sm:$0xf]  ;;  %v214_v22 = vld [vmem:[%s1834_s23 + $0x108] sm:$0xf]  ;;  %211 = vst [vmem:[%s1841_s24 + $0x50] sm:$0xf] %v210_v20 }
  0x20   : > { %213 = vst [vmem:[%s1841_s24 + $0x54] sm:$0xf] %v212_v21  ;;  %215 = vst [vmem:[%s1841_s24 + $0x58] sm:$0xf] %v214_v22  ;;  %v216_v23 = vld [vmem:[%s1834_s23 + $0x114] sm:$0xf] }
  0x21   : > { %v218_v24 = vld [vmem:[%s1834_s23 + $0x120] sm:$0xf]  ;;  %v220_v25 = vld [vmem:[%s1834_s23 + $0x12c] sm:$0xf]  ;;  %217 = vst [vmem:[%s1841_s24 + $0x5c] sm:$0xf] %v216_v23 }
  0x22   : > { %219 = vst [vmem:[%s1841_s24 + $0x60] sm:$0xf] %v218_v24  ;;  %221 = vst [vmem:[%s1841_s24 + $0x64] sm:$0xf] %v220_v25  ;;  %v222_v26 = vld [vmem:[%s1834_s23 + $0x138] sm:$0xf] }
  0x23   : > { %v224_v27 = vld [vmem:[%s1834_s23 + $0x144] sm:$0xf]  ;;  %v226_v28 = vld [vmem:[%s1834_s23 + $0x150] sm:$0xf]  ;;  %223 = vst [vmem:[%s1841_s24 + $0x68] sm:$0xf] %v222_v26 }
  0x24   : > { %225 = vst [vmem:[%s1841_s24 + $0x6c] sm:$0xf] %v224_v27  ;;  %227 = vst [vmem:[%s1841_s24 + $0x70] sm:$0xf] %v226_v28  ;;  %v228_v29 = vld [vmem:[%s1834_s23 + $0x15c] sm:$0xf] }
  0x25   : > { %v230_v30 = vld [vmem:[%s1834_s23 + $0x168] sm:$0xf]  ;;  %v232_v31 = vld [vmem:[%s1834_s23 + $0x174] sm:$0xf]  ;;  %229 = vst [vmem:[%s1841_s24 + $0x74] sm:$0xf] %v228_v29 }
  0x26   : > { %231 = vst [vmem:[%s1841_s24 + $0x78] sm:$0xf] %v230_v30  ;;  %233 = vst [vmem:[%s1841_s24 + $0x7c] sm:$0xf] %v232_v31  ;;  %v234_v32 = vld [vmem:[%s1834_s23 + $0x180] sm:$0xf] }
  0x27   : > { %v236_v33 = vld [vmem:[%s1834_s23 + $0x18c] sm:$0xf]  ;;  %v238_v34 = vld [vmem:[%s1834_s23 + $0x198] sm:$0xf]  ;;  %235 = vst [vmem:[%s1841_s24 + $0x80] sm:$0xf] %v234_v32 }
  0x28   : > { %237 = vst [vmem:[%s1841_s24 + $0x84] sm:$0xf] %v236_v33  ;;  %239 = vst [vmem:[%s1841_s24 + $0x88] sm:$0xf] %v238_v34  ;;  %v240_v35 = vld [vmem:[%s1834_s23 + $0x1a4] sm:$0xf] }
  0x29   : > { %v242_v36 = vld [vmem:[%s1834_s23 + $0x1b0] sm:$0xf]  ;;  %v244_v37 = vld [vmem:[%s1834_s23 + $0x1bc] sm:$0xf]  ;;  %241 = vst [vmem:[%s1841_s24 + $0x8c] sm:$0xf] %v240_v35 }
  0x2a   : > { %243 = vst [vmem:[%s1841_s24 + $0x90] sm:$0xf] %v242_v36  ;;  %245 = vst [vmem:[%s1841_s24 + $0x94] sm:$0xf] %v244_v37  ;;  %v246_v38 = vld [vmem:[%s1834_s23 + $0x1c8] sm:$0xf] }
  0x2b   : > { %v248_v39 = vld [vmem:[%s1834_s23 + $0x1d4] sm:$0xf]  ;;  %v250_v40 = vld [vmem:[%s1834_s23 + $0x1e0] sm:$0xf]  ;;  %247 = vst [vmem:[%s1841_s24 + $0x98] sm:$0xf] %v246_v38 }
  0x2c   : > { %249 = vst [vmem:[%s1841_s24 + $0x9c] sm:$0xf] %v248_v39  ;;  %251 = vst [vmem:[%s1841_s24 + $0xa0] sm:$0xf] %v250_v40  ;;  %v252_v41 = vld [vmem:[%s1834_s23 + $0x1ec] sm:$0xf] }
  0x2d   : > { %v254_v42 = vld [vmem:[%s1834_s23 + $0x1f8] sm:$0xf]  ;;  %v256_v43 = vld [vmem:[%s1834_s23 + $0x204] sm:$0xf]  ;;  %253 = vst [vmem:[%s1841_s24 + $0xa4] sm:$0xf] %v252_v41 }
  0x2e   : > { %255 = vst [vmem:[%s1841_s24 + $0xa8] sm:$0xf] %v254_v42  ;;  %257 = vst [vmem:[%s1841_s24 + $0xac] sm:$0xf] %v256_v43  ;;  %v258_v44 = vld [vmem:[%s1834_s23 + $0x210] sm:$0xf] }
  0x2f   : > { %v260_v45 = vld [vmem:[%s1834_s23 + $0x21c] sm:$0xf]  ;;  %v262_v46 = vld [vmem:[%s1834_s23 + $0x228] sm:$0xf]  ;;  %259 = vst [vmem:[%s1841_s24 + $0xb0] sm:$0xf] %v258_v44 }
  0x30   : > { %261 = vst [vmem:[%s1841_s24 + $0xb4] sm:$0xf] %v260_v45  ;;  %263 = vst [vmem:[%s1841_s24 + $0xb8] sm:$0xf] %v262_v46  ;;  %v264_v47 = vld [vmem:[%s1834_s23 + $0x234] sm:$0xf] }
  0x31   : > { %v266_v48 = vld [vmem:[%s1834_s23 + $0x240] sm:$0xf]  ;;  %v268_v49 = vld [vmem:[%s1834_s23 + $0x24c] sm:$0xf]  ;;  %265 = vst [vmem:[%s1841_s24 + $0xbc] sm:$0xf] %v264_v47 }
  0x32   : > { %267 = vst [vmem:[%s1841_s24 + $0xc0] sm:$0xf] %v266_v48  ;;  %269 = vst [vmem:[%s1841_s24 + $0xc4] sm:$0xf] %v268_v49  ;;  %v270_v50 = vld [vmem:[%s1834_s23 + $0x258] sm:$0xf] }
  0x33   : > { %v272_v51 = vld [vmem:[%s1834_s23 + $0x264] sm:$0xf]  ;;  %v274_v52 = vld [vmem:[%s1834_s23 + $0x270] sm:$0xf]  ;;  %271 = vst [vmem:[%s1841_s24 + $0xc8] sm:$0xf] %v270_v50 }
  0x34   : > { %273 = vst [vmem:[%s1841_s24 + $0xcc] sm:$0xf] %v272_v51  ;;  %275 = vst [vmem:[%s1841_s24 + $0xd0] sm:$0xf] %v274_v52  ;;  %v276_v53 = vld [vmem:[%s1834_s23 + $0x27c] sm:$0xf] }
  0x35   : > { %v278_v54 = vld [vmem:[%s1834_s23 + $0x288] sm:$0xf]  ;;  %v280_v55 = vld [vmem:[%s1834_s23 + $0x294] sm:$0xf]  ;;  %277 = vst [vmem:[%s1841_s24 + $0xd4] sm:$0xf] %v276_v53 }
  0x36   : > { %279 = vst [vmem:[%s1841_s24 + $0xd8] sm:$0xf] %v278_v54  ;;  %281 = vst [vmem:[%s1841_s24 + $0xdc] sm:$0xf] %v280_v55  ;;  %v282_v56 = vld [vmem:[%s1834_s23 + $0x2a0] sm:$0xf] }
  0x37   : > { %v284_v57 = vld [vmem:[%s1834_s23 + $0x2ac] sm:$0xf]  ;;  %v286_v58 = vld [vmem:[%s1834_s23 + $0x2b8] sm:$0xf]  ;;  %283 = vst [vmem:[%s1841_s24 + $0xe0] sm:$0xf] %v282_v56 }
  0x38   : > { %285 = vst [vmem:[%s1841_s24 + $0xe4] sm:$0xf] %v284_v57  ;;  %287 = vst [vmem:[%s1841_s24 + $0xe8] sm:$0xf] %v286_v58  ;;  %v288_v59 = vld [vmem:[%s1834_s23 + $0x2c4] sm:$0xf] }
  0x39   : > { %v290_v60 = vld [vmem:[%s1834_s23 + $0x2d0] sm:$0xf]  ;;  %v292_v61 = vld [vmem:[%s1834_s23 + $0x2dc] sm:$0xf]  ;;  %289 = vst [vmem:[%s1841_s24 + $0xec] sm:$0xf] %v288_v59 }
  0x3a   : > { %291 = vst [vmem:[%s1841_s24 + $0xf0] sm:$0xf] %v290_v60  ;;  %293 = vst [vmem:[%s1841_s24 + $0xf4] sm:$0xf] %v292_v61  ;;  %v294_v62 = vld [vmem:[%s1834_s23 + $0x2e8] sm:$0xf] }
  0x3b   : > { %v296_v63 = vld [vmem:[%s1834_s23 + $0x2f4] sm:$0xf]  ;;  %v298_v0 = vld [vmem:[%s1834_s23 + $0x300] sm:$0xf]  ;;  %295 = vst [vmem:[%s1841_s24 + $0xf8] sm:$0xf] %v294_v62 }
  0x3c   : > { %297 = vst [vmem:[%s1841_s24 + $0xfc] sm:$0xf] %v296_v63  ;;  %299 = vst [vmem:[%s1841_s24 + $0x100] sm:$0xf] %v298_v0  ;;  %v300_v1 = vld [vmem:[%s1834_s23 + $0x30c] sm:$0xf] }
  0x3d   : > { %v302_v2 = vld [vmem:[%s1834_s23 + $0x318] sm:$0xf]  ;;  %v304_v3 = vld [vmem:[%s1834_s23 + $0x324] sm:$0xf]  ;;  %301 = vst [vmem:[%s1841_s24 + $0x104] sm:$0xf] %v300_v1 }
  0x3e   : > { %303 = vst [vmem:[%s1841_s24 + $0x108] sm:$0xf] %v302_v2  ;;  %305 = vst [vmem:[%s1841_s24 + $0x10c] sm:$0xf] %v304_v3  ;;  %v306_v4 = vld [vmem:[%s1834_s23 + $0x330] sm:$0xf] }
  0x3f   : > { %v308_v5 = vld [vmem:[%s1834_s23 + $0x33c] sm:$0xf]  ;;  %v310_v6 = vld [vmem:[%s1834_s23 + $0x348] sm:$0xf]  ;;  %307 = vst [vmem:[%s1841_s24 + $0x110] sm:$0xf] %v306_v4 }
  0x40   : > { %309 = vst [vmem:[%s1841_s24 + $0x114] sm:$0xf] %v308_v5  ;;  %311 = vst [vmem:[%s1841_s24 + $0x118] sm:$0xf] %v310_v6  ;;  %v312_v7 = vld [vmem:[%s1834_s23 + $0x354] sm:$0xf] }
  0x41   : > { %v314_v8 = vld [vmem:[%s1834_s23 + $0x360] sm:$0xf]  ;;  %v316_v9 = vld [vmem:[%s1834_s23 + $0x36c] sm:$0xf]  ;;  %313 = vst [vmem:[%s1841_s24 + $0x11c] sm:$0xf] %v312_v7 }
  0x42   : > { %315 = vst [vmem:[%s1841_s24 + $0x120] sm:$0xf] %v314_v8  ;;  %317 = vst [vmem:[%s1841_s24 + $0x124] sm:$0xf] %v316_v9  ;;  %v318_v10 = vld [vmem:[%s1834_s23 + $0x378] sm:$0xf] }
  0x43   : > { %v320_v11 = vld [vmem:[%s1834_s23 + $0x384] sm:$0xf]  ;;  %v322_v12 = vld [vmem:[%s1834_s23 + $0x390] sm:$0xf]  ;;  %319 = vst [vmem:[%s1841_s24 + $0x128] sm:$0xf] %v318_v10 }
  0x44   : > { %321 = vst [vmem:[%s1841_s24 + $0x12c] sm:$0xf] %v320_v11  ;;  %323 = vst [vmem:[%s1841_s24 + $0x130] sm:$0xf] %v322_v12  ;;  %v324_v13 = vld [vmem:[%s1834_s23 + $0x39c] sm:$0xf] }
  0x45   : > { %v326_v14 = vld [vmem:[%s1834_s23 + $0x3a8] sm:$0xf]  ;;  %v328_v15 = vld [vmem:[%s1834_s23 + $0x3b4] sm:$0xf]  ;;  %325 = vst [vmem:[%s1841_s24 + $0x134] sm:$0xf] %v324_v13 }
  0x46   : > { %327 = vst [vmem:[%s1841_s24 + $0x138] sm:$0xf] %v326_v14  ;;  %329 = vst [vmem:[%s1841_s24 + $0x13c] sm:$0xf] %v328_v15  ;;  %v330_v16 = vld [vmem:[%s1834_s23 + $0x3c0] sm:$0xf] }
  0x47   : > { %v332_v17 = vld [vmem:[%s1834_s23 + $0x3cc] sm:$0xf]  ;;  %v334_v18 = vld [vmem:[%s1834_s23 + $0x3d8] sm:$0xf]  ;;  %331 = vst [vmem:[%s1841_s24 + $0x140] sm:$0xf] %v330_v16 }
  0x48   : > { %333 = vst [vmem:[%s1841_s24 + $0x144] sm:$0xf] %v332_v17  ;;  %335 = vst [vmem:[%s1841_s24 + $0x148] sm:$0xf] %v334_v18  ;;  %v336_v19 = vld [vmem:[%s1834_s23 + $0x3e4] sm:$0xf] }
  0x49   : > { %v338_v20 = vld [vmem:[%s1834_s23 + $0x3f0] sm:$0xf]  ;;  %v340_v21 = vld [vmem:[%s1834_s23 + $0x3fc] sm:$0xf]  ;;  %337 = vst [vmem:[%s1841_s24 + $0x14c] sm:$0xf] %v336_v19 }
  0x4a   : > { %339 = vst [vmem:[%s1841_s24 + $0x150] sm:$0xf] %v338_v20  ;;  %341 = vst [vmem:[%s1841_s24 + $0x154] sm:$0xf] %v340_v21  ;;  %v342_v22 = vld [vmem:[%s1834_s23 + $0x408] sm:$0xf] }
  0x4b   : > { %v344_v23 = vld [vmem:[%s1834_s23 + $0x414] sm:$0xf]  ;;  %v346_v24 = vld [vmem:[%s1834_s23 + $0x420] sm:$0xf]  ;;  %343 = vst [vmem:[%s1841_s24 + $0x158] sm:$0xf] %v342_v22 }
  0x4c   : > { %345 = vst [vmem:[%s1841_s24 + $0x15c] sm:$0xf] %v344_v23  ;;  %347 = vst [vmem:[%s1841_s24 + $0x160] sm:$0xf] %v346_v24  ;;  %v348_v25 = vld [vmem:[%s1834_s23 + $0x42c] sm:$0xf] }
  0x4d   : > { %v350_v26 = vld [vmem:[%s1834_s23 + $0x438] sm:$0xf]  ;;  %v352_v27 = vld [vmem:[%s1834_s23 + $0x444] sm:$0xf]  ;;  %349 = vst [vmem:[%s1841_s24 + $0x164] sm:$0xf] %v348_v25 }
  0x4e   : > { %351 = vst [vmem:[%s1841_s24 + $0x168] sm:$0xf] %v350_v26  ;;  %353 = vst [vmem:[%s1841_s24 + $0x16c] sm:$0xf] %v352_v27  ;;  %v354_v28 = vld [vmem:[%s1834_s23 + $0x450] sm:$0xf] }
  0x4f   : > { %v356_v29 = vld [vmem:[%s1834_s23 + $0x45c] sm:$0xf]  ;;  %v358_v30 = vld [vmem:[%s1834_s23 + $0x468] sm:$0xf]  ;;  %355 = vst [vmem:[%s1841_s24 + $0x170] sm:$0xf] %v354_v28 }
  0x50   : > { %357 = vst [vmem:[%s1841_s24 + $0x174] sm:$0xf] %v356_v29  ;;  %359 = vst [vmem:[%s1841_s24 + $0x178] sm:$0xf] %v358_v30  ;;  %v360_v31 = vld [vmem:[%s1834_s23 + $0x474] sm:$0xf] }
  0x51   : > { %v362_v32 = vld [vmem:[%s1834_s23 + $0x480] sm:$0xf]  ;;  %v364_v33 = vld [vmem:[%s1834_s23 + $0x48c] sm:$0xf]  ;;  %361 = vst [vmem:[%s1841_s24 + $0x17c] sm:$0xf] %v360_v31 }
  0x52   : > { %363 = vst [vmem:[%s1841_s24 + $0x180] sm:$0xf] %v362_v32  ;;  %365 = vst [vmem:[%s1841_s24 + $0x184] sm:$0xf] %v364_v33  ;;  %v366_v34 = vld [vmem:[%s1834_s23 + $0x498] sm:$0xf] }
  0x53   : > { %v368_v35 = vld [vmem:[%s1834_s23 + $0x4a4] sm:$0xf]  ;;  %v370_v36 = vld [vmem:[%s1834_s23 + $0x4b0] sm:$0xf]  ;;  %367 = vst [vmem:[%s1841_s24 + $0x188] sm:$0xf] %v366_v34 }
  0x54   : > { %369 = vst [vmem:[%s1841_s24 + $0x18c] sm:$0xf] %v368_v35  ;;  %371 = vst [vmem:[%s1841_s24 + $0x190] sm:$0xf] %v370_v36  ;;  %v372_v37 = vld [vmem:[%s1834_s23 + $0x4bc] sm:$0xf] }
  0x55   : > { %v374_v38 = vld [vmem:[%s1834_s23 + $0x4c8] sm:$0xf]  ;;  %v376_v39 = vld [vmem:[%s1834_s23 + $0x4d4] sm:$0xf]  ;;  %373 = vst [vmem:[%s1841_s24 + $0x194] sm:$0xf] %v372_v37 }
  0x56   : > { %375 = vst [vmem:[%s1841_s24 + $0x198] sm:$0xf] %v374_v38  ;;  %377 = vst [vmem:[%s1841_s24 + $0x19c] sm:$0xf] %v376_v39  ;;  %v378_v40 = vld [vmem:[%s1834_s23 + $0x4e0] sm:$0xf] }
  0x57   : > { %v380_v41 = vld [vmem:[%s1834_s23 + $0x4ec] sm:$0xf]  ;;  %v382_v42 = vld [vmem:[%s1834_s23 + $0x4f8] sm:$0xf]  ;;  %379 = vst [vmem:[%s1841_s24 + $0x1a0] sm:$0xf] %v378_v40 }
  0x58   : > { %381 = vst [vmem:[%s1841_s24 + $0x1a4] sm:$0xf] %v380_v41  ;;  %383 = vst [vmem:[%s1841_s24 + $0x1a8] sm:$0xf] %v382_v42  ;;  %v384_v43 = vld [vmem:[%s1834_s23 + $0x504] sm:$0xf] }
  0x59   : > { %v386_v44 = vld [vmem:[%s1834_s23 + $0x510] sm:$0xf]  ;;  %v388_v45 = vld [vmem:[%s1834_s23 + $0x51c] sm:$0xf]  ;;  %385 = vst [vmem:[%s1841_s24 + $0x1ac] sm:$0xf] %v384_v43 }
  0x5a   : > { %387 = vst [vmem:[%s1841_s24 + $0x1b0] sm:$0xf] %v386_v44  ;;  %389 = vst [vmem:[%s1841_s24 + $0x1b4] sm:$0xf] %v388_v45  ;;  %v390_v46 = vld [vmem:[%s1834_s23 + $0x528] sm:$0xf] }
  0x5b   : > { %v392_v47 = vld [vmem:[%s1834_s23 + $0x534] sm:$0xf]  ;;  %391 = vst [vmem:[%s1841_s24 + $0x1b8] sm:$0xf] %v390_v46 }
  0x5c   : > { %393 = vst [vmem:[%s1841_s24 + $0x1bc] sm:$0xf] %v392_v47 }
  0x5d PF: > { %p1465_p6 = scmp.ge.s32.totalorder %s1772_s13, 1  ;;  %p639_p7 = scmp.lt.s32.totalorder %s1772_s13, 4 }
  0x5f   : > { %p640_p8 = pnand %p1465_p6, %p639_p7 }
  0x60   : > { %s646_s25 = sand.u32 (!%p640_p8), 1, %s1756_s9   ;;  %v2068_v48 = vld [vmem:[%s2173_s0] sm:$0xff] (!%p640_p8)  ;;  %v2073_v49 = vld [vmem:[%s2173_s0 + $0x8] sm:$0xff] (!%p640_p8)  ;;  %v2114_v18 = vld [vmem:[%s2173_s0 + $0x10] sm:$0xff] (!%p640_p8)  ;;  %v1774_v25 = vmov (!%p640_p8), 0.0   ;;  %vm1775_vm0 = vmmov (!%p640_p8), 0  }
  0x61   : > { %643 = sbr.rel (%p640_p8) target bundleno = 387 (0x183), region = 65  ;;  %v1468_v50 = vcombine.high (!%p640_p8), %v2068_v48, %v2068_v48  ;;  %v1470_v51 = vcombine.high (!%p640_p8), %v2073_v49, %v2073_v49  ;;  %v1467_v21 = vcombine.low (!%p640_p8), %v2068_v48, %v2068_v48  ;;  %v1469_v22 = vcombine.low (!%p640_p8), %v2073_v49, %v2073_v49  ;;  %p692_p9 = scmp.lt.s32.totalorder (!%p640_p8), %s1764_s11, 2 }
  0x62   : > { %s1628_s30 = smul.u32 (!%p640_p8), 448, %s646_s25  ;;  %v1472_v27 = vcombine.high (!%p640_p8), %v2114_v18, %v2114_v18  ;;  %v1471_v49 = vcombine.low (!%p640_p8), %v2114_v18, %v2114_v18 }
  0x63   : > { %1214 = vmatprep.mubr.bf16.mxu0 (!%p640_p8), %v1468_v50  ;;  %1254 = vmatprep.mubr.bf16.mxu1 (!%p640_p8), %v1470_v51  ;;  %v1733_v50 = vld [vmem:[%s2173_s0 + $0x18] ss:$0 sps:$4 sm:$0xff] (!%p640_p8)  }
  0x64   : > { %s2079_s3 = scalar_lea.vmem (!%p640_p8), [#allocation3], %s1628_s30 }
  0x65   : > { %v1671_v52 = vld [vmem:[%s2079_s3 + $0x40] sm:$0xff] (!%p640_p8)   ;;  %v1675_v56 = vld [vmem:[%s2079_s3 + $0x48] sm:$0xff] (!%p640_p8)   ;;  %v1679_v60 = vld [vmem:[%s2079_s3 + $0x50] sm:$0xff] (!%p640_p8)  }
  0x66   : > { %v1672_v53 = vld [vmem:[%s2079_s3 + $0xc0] sm:$0xff] (!%p640_p8)   ;;  %1532 = vmatprep.subr.bf16.mxu0 (!%p640_p8), %v1671_v52  ;;  %v1676_v57 = vld [vmem:[%s2079_s3 + $0xc8] sm:$0xff] (!%p640_p8)   ;;  %v1680_v61 = vld [vmem:[%s2079_s3 + $0xd0] sm:$0xff] (!%p640_p8)  }
  0x67   : > { %v1673_v54 = vld [vmem:[%s2079_s3] sm:$0xff] (!%p640_p8)   ;;  %1554 = vmatprep.subr.bf16.mxu1 (!%p640_p8), %v1672_v53  ;;  %v1677_v58 = vld [vmem:[%s2079_s3 + $0x8] sm:$0xff] (!%p640_p8)   ;;  %v1681_v62 = vld [vmem:[%s2079_s3 + $0x10] sm:$0xff] (!%p640_p8)  }
  0x68   : > { %v1674_v55 = vld [vmem:[%s2079_s3 + $0x80] sm:$0xff]   ;;  %1533 = vmatpush3.bf16.msra.mxu0 %v1673_v54  ;;  %v1678_v59 = vld [vmem:[%s2079_s3 + $0x88] sm:$0xff]   ;;  %v1682_v63 = vld [vmem:[%s2079_s3 + $0x90] sm:$0xff]   ;;  %s2183_s11 = smov (!%p692_p9, %s1764_s11), 2 }
  0x69   : > { %1555 = vmatpush3.bf16.msra.mxu1 %v1674_v55  ;;  %1534 = vmatprep.subr.bf16.mxu0 %v1675_v56  ;;  %v1683_v0 = vld [vmem:[%s2079_s3 + $0x58] sm:$0xff]   ;;  %v1687_v4 = vld [vmem:[%s2079_s3 + $0x60] sm:$0xff]   ;;  %v1691_v8 = vld [vmem:[%s2079_s3 + $0x68] sm:$0xff]   ;;  %s1466_s8 = sshll.u32 %s2183_s11, 3 }
  0x6a   : > { %1556 = vmatprep.subr.bf16.mxu1 %v1676_v57  ;;  %v1684_v1 = vld [vmem:[%s2079_s3 + $0xd8] sm:$0xff]   ;;  %v1688_v5 = vld [vmem:[%s2079_s3 + $0xe0] sm:$0xff]   ;;  %v1692_v9 = vld [vmem:[%s2079_s3 + $0xe8] sm:$0xff]   ;;  %s697_s16 = scalar_lea.vmem %s2175_s2, %s1466_s8 }
  0x6b   : > { %v1685_v2 = vld [vmem:[%s2079_s3 + $0x18] sm:$0xff]   ;;  %v1689_v6 = vld [vmem:[%s2079_s3 + $0x20] sm:$0xff]   ;;  %v1693_v10 = vld [vmem:[%s2079_s3 + $0x28] sm:$0xff]  }
  0x6c   : > { %1535 = vmatpush3.bf16.msra.mxu0 %v1677_v58  ;;  %v1686_v3 = vld [vmem:[%s2079_s3 + $0x98] sm:$0xff]   ;;  %v1690_v7 = vld [vmem:[%s2079_s3 + $0xa0] sm:$0xff]   ;;  %v1694_v11 = vld [vmem:[%s2079_s3 + $0xa8] sm:$0xff]  }
  0x6d   : > { %1557 = vmatpush3.bf16.msra.mxu1 %v1678_v59  ;;  %1536 = vmatprep.subr.bf16.mxu0 %v1679_v60  ;;  %v1695_v12 = vld [vmem:[%s2079_s3 + $0x70] sm:$0xff]   ;;  %v1699_v16 = vld [vmem:[%s2079_s3 + $0x78] sm:$0xff]   ;;  %v1707_v23 = vld [vmem:[%s2079_s3 + $0x140] sm:$0xff]  }
  0x6e   : > { %1558 = vmatprep.subr.bf16.mxu1 %v1680_v61  ;;  %v1696_v13 = vld [vmem:[%s2079_s3 + $0xf0] sm:$0xff]   ;;  %v1700_v17 = vld [vmem:[%s2079_s3 + $0xf8] sm:$0xff]   ;;  %v1708_v24 = vld [vmem:[%s2079_s3 + $0x100] sm:$0xff]  }
  0x6f   : > { %v1697_v14 = vld [vmem:[%s2079_s3 + $0x30] sm:$0xff]   ;;  %v1701_v19 = vld [vmem:[%s2079_s3 + $0x38] sm:$0xff]   ;;  %v1709_v26 = vld [vmem:[%s2079_s3 + $0x180] sm:$0xff]  }
  0x70   : > { %1537 = vmatpush3.bf16.msra.mxu0 %v1681_v62  ;;  %v1698_v15 = vld [vmem:[%s2079_s3 + $0xb0] sm:$0xff]   ;;  %v1702_v20 = vld [vmem:[%s2079_s3 + $0xb8] sm:$0xff]   ;;  %v1710_v28 = vld [vmem:[%s2079_s3 + $0x148] sm:$0xff]  }
  0x71   : > { %1559 = vmatpush3.bf16.msra.mxu1 %v1682_v63  ;;  %1538 = vmatprep.subr.bf16.mxu0 %v1683_v0  ;;  %v1711_v29 = vld [vmem:[%s2079_s3 + $0x108] sm:$0xff]   ;;  %v1713_v31 = vld [vmem:[%s2079_s3 + $0x150] sm:$0xff]   ;;  %v1716_v34 = vld [vmem:[%s2079_s3 + $0x158] sm:$0xff]  }
  0x72   : > { %1560 = vmatprep.subr.bf16.mxu1 %v1684_v1  ;;  %v1712_v30 = vld [vmem:[%s2079_s3 + $0x188] sm:$0xff]   ;;  %v1714_v32 = vld [vmem:[%s2079_s3 + $0x110] sm:$0xff]   ;;  %v1717_v35 = vld [vmem:[%s2079_s3 + $0x118] sm:$0xff]  }
  0x73   : > { %v1715_v33 = vld [vmem:[%s2079_s3 + $0x190] sm:$0xff]   ;;  %v1718_v36 = vld [vmem:[%s2079_s3 + $0x198] sm:$0xff]   ;;  %v1719_v37 = vld [vmem:[%s2079_s3 + $0x160] sm:$0xff]  }
  0x74   : > { %1539 = vmatpush3.bf16.msra.mxu0 %v1685_v2  ;;  %v1720_v38 = vld [vmem:[%s2079_s3 + $0x120] sm:$0xff]   ;;  %v1722_v40 = vld [vmem:[%s2079_s3 + $0x168] sm:$0xff]   ;;  %v1725_v43 = vld [vmem:[%s2079_s3 + $0x170] sm:$0xff]  }
  0x75   : > { %1561 = vmatpush3.bf16.msra.mxu1 %v1686_v3  ;;  %1540 = vmatprep.subr.bf16.mxu0 %v1687_v4  ;;  %v1721_v39 = vld [vmem:[%s2079_s3 + $0x1a0] sm:$0xff]   ;;  %v1723_v41 = vld [vmem:[%s2079_s3 + $0x128] sm:$0xff]   ;;  %v1726_v44 = vld [vmem:[%s2079_s3 + $0x130] sm:$0xff]  }
  0x76   : > { %1562 = vmatprep.subr.bf16.mxu1 %v1688_v5  ;;  %v1724_v42 = vld [vmem:[%s2079_s3 + $0x1a8] sm:$0xff]   ;;  %v1727_v45 = vld [vmem:[%s2079_s3 + $0x1b0] sm:$0xff]   ;;  %v1728_v46 = vld [vmem:[%s2079_s3 + $0x178] sm:$0xff]  }
  0x77   : > { %v1729_v47 = vld [vmem:[%s2079_s3 + $0x138] sm:$0xff]  }
  0x78   : > { %1541 = vmatpush3.bf16.msra.mxu0 %v1689_v6  ;;  %v1732_v48 = vld [vmem:[%s2079_s3 + $0x1b8] sm:$0xff]  }
  0x79   : > { %1563 = vmatpush3.bf16.msra.mxu1 %v1690_v7  ;;  %1542 = vmatprep.subr.bf16.mxu0 %v1691_v8 }
  0x7a   : > { %1564 = vmatprep.subr.bf16.mxu1 %v1692_v9 }
  0x7c   : > { %1543 = vmatpush3.bf16.msra.mxu0 %v1693_v10 }
  0x7d   : > { %1565 = vmatpush3.bf16.msra.mxu1 %v1694_v11  ;;  %1544 = vmatprep.subr.bf16.mxu0 %v1695_v12 }
  0x7e   : > { %1566 = vmatprep.subr.bf16.mxu1 %v1696_v13 }
  0x80   : > { %1545 = vmatpush3.bf16.msra.mxu0 %v1697_v14 }
  0x81   : > { %1567 = vmatpush3.bf16.msra.mxu1 %v1698_v15  ;;  %1546 = vmatprep.subr.bf16.mxu0 %v1699_v16 }
  0x82   : > { %1568 = vmatprep.subr.bf16.mxu1 %v1700_v17 }
  0x84   : > { %1547 = vmatpush3.bf16.msra.mxu0 %v1701_v19 }
  0x85   : > { %1569 = vmatpush3.bf16.msra.mxu1 %v1702_v20  ;;  %1576 = vmatprep.subr.bf16.mxu0 %v1707_v23 }
  0x86   : > { %1607 = vmatprep.subr.bf16.mxu1 %v1774_v25 }
  0x87   : > { %1215 = vmatmul.mubr.bf16.vlgmr.msra.gmra.mrb[0].mxu0 %v1467_v21 }
  0x88   : > { %1255 = vmatmul.mubr.bf16.vlgmr.msra.gmra.mrb[0].mxu1 %v1469_v22  ;;  %1577 = vmatpush3.bf16.msra.mxu0 %v1708_v24 }
  0x89   : > { %1608 = vmatpush3.bf16.msra.mxu1 %v1709_v26  ;;  %1578 = vmatprep.subr.bf16.mxu0 %v1710_v28 }
  0x8a   : > { %1609 = vmatprep.subr.bf16.mxu1 %v1774_v25  ;;  %1294 = vmatprep.mubr.bf16.mxu0 %v1472_v27 }
  0x8b   : > { %1623 = vmatprep.mubr.msk.bf16.mxu1 %vm1775_vm0, %v1774_v25 }
  0x8c   : > { %1579 = vmatpush3.bf16.msra.mxu0 %v1711_v29 }
  0x8d   : > { %1610 = vmatpush3.bf16.msra.mxu1 %v1712_v30  ;;  %1580 = vmatprep.subr.bf16.mxu0 %v1713_v31 }
  0x8e   : > { %1611 = vmatprep.subr.bf16.mxu1 %v1774_v25 }
  0x90   : > { %1581 = vmatpush3.bf16.msra.mxu0 %v1714_v32 }
  0x91   : > { %1612 = vmatpush3.bf16.msra.mxu1 %v1715_v33  ;;  %1582 = vmatprep.subr.bf16.mxu0 %v1716_v34 }
  0x92   : > { %1613 = vmatprep.subr.bf16.mxu1 %v1774_v25 }
  0x94   : > { %1583 = vmatpush3.bf16.msra.mxu0 %v1717_v35 }
  0x95   : > { %1614 = vmatpush3.bf16.msra.mxu1 %v1718_v36  ;;  %1584 = vmatprep.subr.bf16.mxu0 %v1719_v37 }
  0x96   : > { %1615 = vmatprep.subr.bf16.mxu1 %v1774_v25 }
  0x98   : > { %1585 = vmatpush3.bf16.msra.mxu0 %v1720_v38 }
  0x99   : > { %1616 = vmatpush3.bf16.msra.mxu1 %v1721_v39  ;;  %1586 = vmatprep.subr.bf16.mxu0 %v1722_v40 }
  0x9a   : > { %1617 = vmatprep.subr.bf16.mxu1 %v1774_v25 }
  0x9c   : > { %1587 = vmatpush3.bf16.msra.mxu0 %v1723_v41 }
  0x9d   : > { %1618 = vmatpush3.bf16.msra.mxu1 %v1724_v42  ;;  %1588 = vmatprep.subr.bf16.mxu0 %v1725_v43 }
  0x9e   : > { %1619 = vmatprep.subr.bf16.mxu1 %v1774_v25 }
  0xa0   : > { %1589 = vmatpush3.bf16.msra.mxu0 %v1726_v44 }
  0xa1   : > { %1620 = vmatpush3.bf16.msra.mxu1 %v1727_v45  ;;  %1590 = vmatprep.subr.bf16.mxu0 %v1728_v46 }
  0xa2   : > { %1621 = vmatprep.subr.bf16.mxu1 %v1774_v25 }
  0xa4   : > { %1591 = vmatpush3.bf16.msra.mxu0 %v1729_v47 }
  0xa5   : > { %1622 = vmatpush3.bf16.msra.mxu1 %v1732_v48 }
  0xa7   : > { %1295 = vmatmul.mubr.bf16.vlgmr.msra.gmra.mrb[4].mxu0 %v1471_v49 }
  0xa8   : > { %1624 = vmatmul.mubr.bf16.vlgmr.msra.gmra.mrb[4].mxu1 %v1733_v50 }
 0x15a   : > { %v1548_v51 = vpop.f32.mrb[0].mxu0 }
 0x15b   : > { %v1570_v52 = vpop.f32.mrb[0].mxu1  ;;  %v1549_v53 = vpop.f32.mrb[1].mxu0 }
 0x15c   : > { %v1550_v54 = vadd.f32 %v1549_v53, %v1548_v51  ;;  %v1571_v55 = vpop.f32.mrb[1].mxu1  ;;  %v1551_v56 = vpop.f32.mrb[2].mxu0 }
 0x15d   : > { %v1572_v57 = vadd.f32 %v1571_v55, %v1570_v52  ;;  %v1552_v58 = vpop.f32.mrb[3].mxu0  ;;  %v1573_v59 = vpop.f32.mrb[2].mxu1 }
 0x15e   : > { %v1574_v60 = vpop.f32.mrb[3].mxu1 }
 0x15f   : > { %v1257_v61 = vadd.f32 %v1572_v57, %v1550_v54 }
 0x17a   : > { %v1592_v62 = vpop.f32.mrb[4].mxu0 }
 0x17b   : > { %v1593_v63 = vpop.f32.mrb[5].mxu0  ;;  %v1336_v0 = vpop.f32.mrb[4].mxu1 }
 0x17c   : > { %v1594_v1 = vadd.f32 %v1593_v63, %v1592_v62  ;;  %v1595_v2 = vpop.f32.mrb[6].mxu0  ;;  %v1625_v3 = vpop.f32.mrb[5].mxu1 }
 0x17d   : > { %v1596_v4 = vpop.f32.mrb[7].mxu0  ;;  %v1339_v5 = vpop.f32.mrb[6].mxu1 }
 0x17e   : > { %v1297_v6 = vadd.f32 %v1594_v1, %v1257_v61  ;;  %v1626_v7 = vpop.f32.mrb[7].mxu1 }
 0x180   : > { %v1337_v8 = vadd.f32 %v1336_v0, %v1297_v6 }
 0x182   : > { %1348 = vst [vmem:[%s697_s16] sm:$0xff] %v1337_v8 }
 0x183 PF: > { %s12_s13 = sadd.s32 1, %s1772_s13   ;;  %s2176_s9 = smov %s1760_s10 }
 0x184   : > { %p9_p10 = scmp.ge.s32.totalorder %s12_s13, 5   ;;  %s2177_s10 = smov %s1826_s17 }
 0x185   : > { %s2178_s11 = smov %s1768_s12  ;;  %s2179_s12 = smov %s2181_s14 }
 0x186   :  { %11 = sbr.rel (!%p9_p10) target bundleno = 3 (0x3), region = 115 }

// kernel: geometry_transformation.4
= control target key start
LH: loop header
LB: loop body
LE: loop exit
PB: predicated region body
PF: predicated region fallthrough
CT: control target
= control target key end

     0   :  { %s10207_s12 = smov 0   ;;  %s13253_s0 = inlined_call_operand.vmem [shape: f32[2,4,896], index: 0, kind: input, shape index: {}]   ;;  %s13254_s1 = inlined_call_operand.vmem [shape: bf16[4,4,108], index: 1, kind: input, shape index: {}]   ;;  %s13255_s2 = inlined_call_operand.vmem [shape: f32[1,896], index: 2, kind: input, shape index: {}]   ;;  %s13256_s3 = inlined_call_operand.vmem [shape: bf16[2,4,896], index: 3, kind: output, shape index: {}]  }
   0x1 LB: > { %s9411_s13 = sadd.s32 4294967295, %s10155_s12   ;;  %p9415_p0 = scmp.ge.s32.totalorder %s10155_s12, 1  ;;  %s10155_s12 = sphi %s10207_s12, %s13_s12  }
   0x2   : > { %p137_p1 = scmp.lt.s32.totalorder %s10155_s12, 3 }
   0x4   : > { %p138_p2 = pnand %p9415_p0, %p137_p1 }
   0x6   : > { %141 = sbr.rel (%p138_p2) target bundleno = 3640 (0xe38), region = 32 }
   0xd   : > { %p161_p3 = scmp.lt.s32.totalorder %s9411_s13, 1  ;;  %v208_v0 = vlaneseq  ;;  %v13306_v1 = vmov 0   ;;  %v10158_v2 = vmov 1983009808   ;;  %s10159_s18 = smov 110   ;;  %vm286_vm0 = vcmask 1043456  }
   0xe   : > { %173 = vst [vmem:[#allocation2] sm:$0xff] %v13306_v1  ;;  %174 = vst [vmem:[#allocation2 + $0x8] sm:$0xff] %v13306_v1  ;;  %v206_v3 = vunpack.c.l.s4 %v10158_v2  ;;  %2255 = vmatprep.mubr.bf16.mxu0 %v13306_v1  ;;  %2296 = vmatprep.mubr.bf16.mxu1 %v13306_v1  ;;  %s10160_s19 = smov 111   ;;  %s10161_s20 = smov 101   ;;  %vm350_vm1 = vcmask 900096   ;;  %vm13284_vm2 = vcmask 891904  }
   0xf   : > { %175 = vst [vmem:[#allocation2 + $0x10] sm:$0x3] %v13306_v1  ;;  %s13741_s13 = smov (!%p161_p3, %s9411_s13), 1  ;;  %v10223_v5 = vshrl.u32 %v208_v0, 7  ;;  %s13376_s21 = smov 109   ;;  %vm13289_vm3 = vcmask 908288  }
  0x10   : > { %s9782_s14 = smul.u32 28, %s13741_s13  ;;  %v207_v4 = vunpack.c.0.s8 %v206_v3  ;;  %s13346_s22 = smov 99   ;;  %vm474_vm4 = vcmask 826368   ;;  %vm13292_vm5 = vcmask 818176   ;;  %vm598_vm6 = vcmask 809984  }
  0x11   : > { %s10164_s23 = smov 100   ;;  %s13374_s24 = smov 91   ;;  %vm13291_vm7 = vcmask 744448   ;;  %vm722_vm8 = vcmask 736256   ;;  %vm13290_vm9 = vcmask 728064   ;;  %vm846_vm10 = vcmask 89088  }
  0x12   : > { %s10228_s17 = scalar_lea.vmem %s13253_s0, %s9782_s14  ;;  %v10241_v13 = vsub.s32 %v207_v4, %v10223_v5  ;;  %s13300_s25 = smov 90   ;;  %vm13268_vm11 = vcmask 80896   ;;  %vm13293_vm12 = vcmask 72704   ;;  %vm13265_vm13 = vcmask 7168  }
  0x13   : > { %v176_v6 = vld [vmem:[%s10228_s17] sm:$0xff]  ;;  %v177_v7 = vld [vmem:[%s10228_s17 + $0x8] sm:$0xff]  ;;  %v178_v8 = vld [vmem:[%s10228_s17 + $0x10] sm:$0xff]  ;;  %s10167_s26 = smov 89   ;;  %s10168_s27 = smov 11   ;;  %vm13267_vm14 = vcmask 1039360  }
  0x14   : > { %v179_v9 = vld [vmem:[%s10228_s17 + $0x18] sm:$0xf]  ;;  %v10234_v10 = vcombine.high %v176_v6, %v176_v6  ;;  %v10236_v11 = vcombine.high %v177_v7, %v177_v7  ;;  %v10238_v12 = vcombine.high %v178_v8, %v178_v8  ;;  %13402 = vst [vmem:[#allocation8_spill] sm:$0xff] %v10241_v13  ;;  %s10169_s28 = smov 10   ;;  %s10170_s29 = smov 9   ;;  %vm13266_vm15 = vcmask 973824  }
  0x15   : > { %v195_v14 = vpack.c.bf16 %v179_v9, %v179_v9  ;;  %s13370_s30 = smov 1   ;;  %s13298_s4 = smov 127  }
  0x16   : > { %13399 = vst [vmem:[#allocation5_spill] sm:$0xff] %v10234_v10  ;;  %13400 = vst [vmem:[#allocation6_spill] sm:$0xff] %v10236_v11  ;;  %v9418_v15 = vpack.c.bf16 %v10234_v10, %v176_v6  ;;  %v9419_v16 = vpack.c.bf16 %v10236_v11, %v177_v7  ;;  %v9420_v17 = vpack.c.bf16 %v10238_v12, %v178_v8  ;;  %s13302_s5 = smov 119   ;;  %s13344_s6 = smov 118  }
  0x17   : > { %13401 = vst [vmem:[#allocation7_spill] sm:$0xff] %v10238_v12  ;;  %v234_v18 = vrot.slane %v195_v14, %v10241_v13  ;;  %s13261_s7 = smov 117   ;;  %s13296_s8 = smov 39  }
  0x18   : > { %v10248_v19 = vrot.slane %v9418_v15, %v10241_v13  ;;  %v10251_v20 = vrot.slane %v9419_v16, %v10241_v13  ;;  %v227_v21 = vrot.slane %v9420_v17, %v10241_v13  ;;  %s13263_s9 = smov 38   ;;  %s13372_s10 = smov 37  }
  0x19   : > { %s13259_s11 = smov 29   ;;  %s13341_s14 = smov 28  }
  0x1a   : > { %v10256_v22 = vcombine.low %v10248_v19, %v10251_v20  ;;  %v235_v23 = vcombine.low %v227_v21, %v234_v18  ;;  %v10141_v36 = vcombine.low %v10251_v20, %v10251_v20  ;;  %v10142_v39 = vcombine.low %v10248_v19, %v10248_v19  ;;  %s13257_s15 = smov 27   ;;  %s13339_s16 = smov 19  }
  0x1c   : > { %238 = vst [vmem:[#allocation2 + $0x2] sm:$0xff] %v10256_v22  ;;  %239 = vst [vmem:[#allocation2 + $0xa] sm:$0x3f] %v235_v23  ;;  %v10333_v37 = vrot.slane %v10141_v36, %v10241_v13  ;;  %v10337_v38 = vrot.slane %v10256_v22, %v10241_v13  ;;  %v10346_v40 = vrot.slane %v10142_v39, %v10241_v13 }
  0x23   : > { %v303_v24 = vld [vmem:[#allocation2] sm:$0xff]  ;;  %v10266_v26 = vld [vmem:[#allocation2 + $0x8] sm:$0xff] }
  0x24   : > { %v10260_v25 = vrot.slane %v303_v24, %v10241_v13  ;;  %v10274_v27 = vrot.slane %v10266_v26, %v10241_v13  ;;  %v307_v28 = vcombine.low %v303_v24, %v303_v24  ;;  %v369_v30 = vcombine.high %v303_v24, %v303_v24  ;;  %v1047_v34 = vld [vmem:[#allocation2 + $0x2] sm:$0xff]  ;;  %v10348_v41 = vld [vmem:[#allocation2 + $0xa] sm:$0xff] }
  0x25   : > { %v322_v32 = vcombine.low %v10266_v26, %v10266_v26  ;;  %v1051_v35 = vcombine.low %v1047_v34, %v1047_v34  ;;  %9422 = vst.sshfl [vmem:[#allocation3 + $0xb0] sm:$0xf0 pattern:$0x76325410] %v1047_v34  ;;  %v10356_v42 = vrot.slane %v10348_v41, %v10241_v13  ;;  %v1170_v43 = vcombine.low %v10348_v41, %v10348_v41 }
  0x26   : > { %339 = vrot.lane.b32.xlu1 %v10260_v25, %s10159_s18  ;;  %274 = vrot.lane.b32.xlu0 %v10260_v25, %s10160_s19  ;;  %v314_v29 = vrot.slane %v307_v28, %v10241_v13  ;;  %v383_v31 = vrot.slane %v369_v30, %v10241_v13 }
  0x27   : > { %v329_v33 = vrot.slane %v322_v32, %v10241_v13  ;;  %9421 = vst.sshfl [vmem:[#allocation3 + $0xa8] sm:$0xf0 pattern:$0x76325410] %v1051_v35  ;;  %v10365_v44 = vrot.slane %v1170_v43, %v10241_v13 }
  0x2a   : > { %463 = vrot.lane.b32.xlu1 %v10260_v25, %s10161_s20  ;;  %399 = vrot.lane.b32.xlu0 %v10260_v25, %s13376_s21 }
  0x2e   : > { %587 = vrot.lane.b32.xlu1 %v10260_v25, %s13346_s22  ;;  %278 = vrot.lane.b32.xlu0 %v10274_v27, %s10160_s19 }
  0x32   : > { %337 = vrot.lane.b32.xlu1 %v314_v29, %s10159_s18  ;;  %403 = vrot.lane.b32.xlu0 %v10274_v27, %s13376_s21 }
  0x36   : > { %401 = vrot.lane.b32.xlu1 %v383_v31, %s13376_s21  ;;  %523 = vrot.lane.b32.xlu0 %v10260_v25, %s10164_s23 }
  0x3a   : > { %341 = vrot.lane.b32.xlu1 %v329_v33, %s10159_s18  ;;  %276 = vrot.lane.b32.xlu0 %v383_v31, %s10160_s19 }
  0x3e   : > { %465 = vrot.lane.b32.xlu1 %v329_v33, %s10161_s20  ;;  %461 = vrot.lane.b32.xlu0 %v314_v29, %s10161_s20 }
  0x42   : > { %525 = vrot.lane.b32.xlu1 %v383_v31, %s10164_s23  ;;  %585 = vrot.lane.b32.xlu0 %v314_v29, %s13346_s22 }
  0x46   : > { %649 = vrot.lane.b32.xlu1 %v383_v31, %s13374_s24  ;;  %647 = vrot.lane.b32.xlu0 %v10260_v25, %s13374_s24 }
  0x4a   : > { %711 = vrot.lane.b32.xlu1 %v10260_v25, %s13300_s25  ;;  %709 = vrot.lane.b32.xlu0 %v314_v29, %s13300_s25 }
  0x4e   : > { %589 = vrot.lane.b32.xlu1 %v329_v33, %s13346_s22  ;;  %527 = vrot.lane.b32.xlu0 %v10274_v27, %s10164_s23 }
  0x52   : > { %713 = vrot.lane.b32.xlu1 %v329_v33, %s13300_s25  ;;  %651 = vrot.lane.b32.xlu0 %v10274_v27, %s13374_s24 }
  0x56   : > { %773 = vrot.lane.b32.xlu1 %v383_v31, %s10167_s26  ;;  %771 = vrot.lane.b32.xlu0 %v10260_v25, %s10167_s26 }
  0x5a   : > { %835 = vrot.lane.b32.xlu1 %v10260_v25, %s10168_s27  ;;  %833 = vrot.lane.b32.xlu0 %v314_v29, %s10168_s27 }
  0x5e   : > { %897 = vrot.lane.b32.xlu1 %v383_v31, %s10169_s28  ;;  %895 = vrot.lane.b32.xlu0 %v10260_v25, %s10169_s28 }
  0x62   : > { %959 = vrot.lane.b32.xlu1 %v10260_v25, %s10170_s29  ;;  %957 = vrot.lane.b32.xlu0 %v314_v29, %s10170_s29 }
  0x66   : > { %837 = vrot.lane.b32.xlu1 %v329_v33, %s10168_s27  ;;  %775 = vrot.lane.b32.xlu0 %v10274_v27, %s10167_s26 }
  0x6a   : > { %961 = vrot.lane.b32.xlu1 %v329_v33, %s10170_s29  ;;  %899 = vrot.lane.b32.xlu0 %v10274_v27, %s10169_s28 }
  0x6e   : > { %1021 = vrot.lane.b32.xlu1 %v383_v31, %s13370_s30  ;;  %1019 = vrot.lane.b32.xlu0 %v10260_v25, %s13370_s30  ;;  %v259_v25 = vcombine.high %v10266_v26, %v10266_v26 }
  0x70   : > { %v10476_v39 = vrot.slane %v259_v25, %v10241_v13 }
  0x72   : > { %1125 = vrot.lane.b32.xlu1 %v10333_v37, %s13298_s4  ;;  %1123 = vrot.lane.b32.xlu0 %v10337_v38, %s13298_s4 }
  0x76   : > { %1187 = vrot.lane.b32.xlu1 %v10337_v38, %s13302_s5  ;;  %1185 = vrot.lane.b32.xlu0 %v10346_v40, %s13302_s5 }
  0x7a   : > { %1127 = vrot.lane.b32.xlu1 %v10356_v42, %s13298_s4  ;;  %1023 = vrot.lane.b32.xlu0 %v10274_v27, %s13370_s30 }
  0x7e   : > { %1247 = vrot.lane.b32.xlu1 %v10337_v38, %s13344_s6  ;;  %1189 = vrot.lane.b32.xlu0 %v10365_v44, %s13302_s5 }
  0x82   : > { %1309 = vrot.lane.b32.xlu1 %v10346_v40, %s13261_s7  ;;  %1249 = vrot.lane.b32.xlu0 %v10333_v37, %s13344_s6 }
  0x86   : > { %1371 = vrot.lane.b32.xlu1 %v10337_v38, %s13296_s8  ;;  %1311 = vrot.lane.b32.xlu0 %v10337_v38, %s13261_s7 }
  0x8a   : > { %1433 = vrot.lane.b32.xlu1 %v10346_v40, %s13263_s9  ;;  %1373 = vrot.lane.b32.xlu0 %v10333_v37, %s13296_s8 }
  0x8e   : > { %1251 = vrot.lane.b32.xlu1 %v10356_v42, %s13344_s6  ;;  %1435 = vrot.lane.b32.xlu0 %v10337_v38, %s13263_s9 }
  0x92   : > { %1375 = vrot.lane.b32.xlu1 %v10356_v42, %s13296_s8  ;;  %1313 = vrot.lane.b32.xlu0 %v10365_v44, %s13261_s7 }
  0x96   : > { %1495 = vrot.lane.b32.xlu1 %v10337_v38, %s13372_s10  ;;  %1437 = vrot.lane.b32.xlu0 %v10365_v44, %s13263_s9 }
  0x98   : > { %v340_v45 = vpop.permute.xlu1 %339  ;;  %v275_v46 = vpop.permute.xlu0 %274 }
  0x99   : > { %v346_v53 = vrot.slane %v340_v45, 4  ;;  %v282_v6 = vrot.slane %v275_v46, 4 }
  0x9a   : > { %1557 = vrot.lane.b32.xlu1 %v10346_v40, %s13259_s11  ;;  %1497 = vrot.lane.b32.xlu0 %v10333_v37, %s13372_s10 }
  0x9c   : > { %v10399_v47 = vpop.permute.xlu1 %463  ;;  %v400_v48 = vpop.permute.xlu0 %399 }
  0x9d   : > { %v407_v59 = vrot.slane %v400_v48, 4  ;;  %v470_v22 = vrot.slane %v10399_v47, 4 }
  0x9e   : > { %1619 = vrot.lane.b32.xlu1 %v10337_v38, %s13341_s14  ;;  %1559 = vrot.lane.b32.xlu0 %v10337_v38, %s13259_s11 }
  0xa0   : > { %v10405_v49 = vpop.permute.xlu1 %587  ;;  %v10407_v50 = vpop.permute.xlu0 %278 }
  0xa1   : > { %v284_v7 = vrot.slane %v10407_v50, 4  ;;  %v594_v34 = vrot.slane %v10405_v49, 4 }
  0xa2   : > { %1681 = vrot.lane.b32.xlu1 %v10346_v40, %s13257_s15  ;;  %1621 = vrot.lane.b32.xlu0 %v10333_v37, %s13341_s14 }
  0xa4   : > { %v338_v51 = vpop.permute.xlu1 %337  ;;  %v10413_v52 = vpop.permute.xlu0 %403 }
  0xa5   : > { %v345_v54 = vrot.slane %v338_v51, 4  ;;  %v409_v60 = vrot.slane %v10413_v52, 4 }
  0xa6   : > { %1499 = vrot.lane.b32.xlu1 %v10356_v42, %s13372_s10  ;;  %1683 = vrot.lane.b32.xlu0 %v10337_v38, %s13257_s15 }
  0xa7   : > { %v349_v55 = vsel %vm286_vm0, %v345_v54, %v346_v53 }
  0xa8   : > { %v351_v56 = vsel %vm350_vm1, %v338_v51, %v349_v55  ;;  %v402_v57 = vpop.permute.xlu1 %401  ;;  %v10421_v58 = vpop.permute.xlu0 %523 }
  0xa9   : > { %361 = vst [vmem:[#allocation3] sm:$0xcc] %v351_v56  ;;  %v408_v61 = vrot.slane %v402_v57, 4  ;;  %v531_v35 = vrot.slane %v10421_v58, 4 }
  0xaa   : > { %1623 = vrot.lane.b32.xlu1 %v10356_v42, %s13341_s14  ;;  %1561 = vrot.lane.b32.xlu0 %v10365_v44, %s13259_s11  ;;  %s13287_s11 = smov 17  }
  0xab   : > { %v411_v62 = vsel %vm286_vm0, %v407_v59, %v408_v61  ;;  %v414_v63 = vsel %vm286_vm0, %v408_v61, %v409_v60 }
  0xac   : > { %v413_v0 = vsel %vm13284_vm2, %v400_v48, %v411_v62  ;;  %v415_v2 = vsel %vm13284_vm2, %v402_v57, %v414_v63  ;;  %v10434_v3 = vpop.permute.xlu1 %341  ;;  %v277_v4 = vpop.permute.xlu0 %276 }
  0xad   : > { %423 = vst [vmem:[#allocation3 + $0x1c] sm:$0x33] %v413_v0  ;;  %424 = vst [vmem:[#allocation3 + $0x24] sm:$0x33] %v415_v2  ;;  %v347_v8 = vrot.slane %v10434_v3, 4  ;;  %v283_v9 = vrot.slane %v277_v4, 4 }
  0xae   : > { %1743 = vrot.lane.b32.xlu1 %v10337_v38, %s13339_s16  ;;  %1685 = vrot.lane.b32.xlu0 %v10365_v44, %s13257_s15  ;;  %s13285_s15 = smov 18  }
  0xaf   : > { %v352_v14 = vsel %vm286_vm0, %v346_v53, %v347_v8  ;;  %v287_v15 = vsel %vm286_vm0, %v282_v6, %v283_v9  ;;  %v290_v16 = vsel %vm286_vm0, %v283_v9, %v284_v7 }
  0xb0   : > { %v353_v17 = vsel %vm350_vm1, %v340_v45, %v352_v14  ;;  %v289_v18 = vsel %vm13289_vm3, %v275_v46, %v287_v15  ;;  %v291_v19 = vsel %vm13289_vm3, %v277_v4, %v290_v16  ;;  %v10452_v20 = vpop.permute.xlu1 %465  ;;  %v462_v21 = vpop.permute.xlu0 %461 }
  0xb1   : > { %362 = vst [vmem:[#allocation3 + $0x8] sm:$0xcc] %v353_v17  ;;  %299 = vst [vmem:[#allocation3] sm:$0x33] %v289_v18  ;;  %v471_v23 = vrot.slane %v10452_v20, 4  ;;  %v469_v24 = vrot.slane %v462_v21, 4 }
  0xb2   : > { %300 = vst [vmem:[#allocation3 + $0x8] sm:$0x33] %v291_v19  ;;  %1805 = vrot.lane.b32.xlu1 %v10346_v40, %s13285_s15  ;;  %1745 = vrot.lane.b32.xlu0 %v10333_v37, %s13339_s16 }
  0xb3   : > { %v476_v28 = vsel %vm286_vm0, %v470_v22, %v471_v23  ;;  %v473_v29 = vsel %vm286_vm0, %v469_v24, %v470_v22 }
  0xb4   : > { %v477_v30 = vsel %vm474_vm4, %v10399_v47, %v476_v28  ;;  %v475_v31 = vsel %vm474_vm4, %v462_v21, %v473_v29  ;;  %v526_v32 = vpop.permute.xlu1 %525  ;;  %v586_v33 = vpop.permute.xlu0 %585 }
  0xb5   : > { %486 = vst [vmem:[#allocation3 + $0x24] sm:$0xcc] %v477_v30  ;;  %485 = vst [vmem:[#allocation3 + $0x1c] sm:$0xcc] %v475_v31  ;;  %v532_v26 = vrot.slane %v526_v32, 4  ;;  %v593_v36 = vrot.slane %v586_v33, 4 }
  0xb6   : > { %1867 = vrot.lane.b32.xlu1 %v10337_v38, %s13287_s11  ;;  %1807 = vrot.lane.b32.xlu0 %v10337_v38, %s13285_s15 }
  0xb7   : > { %v535_v40 = vsel %vm286_vm0, %v531_v35, %v532_v26  ;;  %v597_v43 = vsel %vm286_vm0, %v593_v36, %v594_v34 }
  0xb8   : > { %v537_v45 = vsel %vm13292_vm5, %v10421_v58, %v535_v40  ;;  %v599_v46 = vsel %vm598_vm6, %v586_v33, %v597_v43  ;;  %v650_v47 = vpop.permute.xlu1 %649  ;;  %v648_v48 = vpop.permute.xlu0 %647 }
  0xb9   : > { %547 = vst [vmem:[#allocation3 + $0x38] sm:$0x33] %v537_v45  ;;  %609 = vst [vmem:[#allocation3 + $0x38] sm:$0xcc] %v599_v46  ;;  %v656_v51 = vrot.slane %v650_v47, 4  ;;  %v655_v53 = vrot.slane %v648_v48, 4 }
  0xba   : > { %280 = vrot.lane.b32.xlu1 %v10476_v39, %s10160_s19  ;;  %1869 = vrot.lane.b32.xlu0 %v10333_v37, %s13287_s11 }
  0xbb   : > { %v659_v38 = vsel %vm286_vm0, %v655_v53, %v656_v51 }
  0xbc   : > { %v661_v54 = vsel %vm13291_vm7, %v648_v48, %v659_v38  ;;  %v712_v55 = vpop.permute.xlu1 %711  ;;  %v710_v56 = vpop.permute.xlu0 %709  ;;  %v9830_v57 = vld [vmem:[#allocation3 + $0x4] ss:$28 sps:$4 sm:$0xff]   ;;  %v9832_v61 = vld [vmem:[#allocation3 + $0xc] ss:$28 sps:$4 sm:$0xff]  }
  0xbd   : > { %671 = vst [vmem:[#allocation3 + $0x54] sm:$0x33] %v661_v54  ;;  %v718_v58 = vrot.slane %v712_v55, 4  ;;  %v717_v59 = vrot.slane %v710_v56, 4  ;;  %v9834_v62 = vld [vmem:[#allocation3] ss:$28 sps:$4 sm:$0xff]   ;;  %2223 = vmatprep.subr.bf16.mxu0 %v9830_v57  ;;  %2264 = vmatprep.subr.bf16.mxu1 %v9832_v61 }
  0xbe   : > { %405 = vrot.lane.b32.xlu1 %v10476_v39, %s13376_s21  ;;  %343 = vrot.lane.b32.xlu0 %v10274_v27, %s10159_s18  ;;  %v9835_v37 = vld [vmem:[#allocation3 + $0x8] ss:$28 sps:$4 sm:$0xff]  }
  0xbf   : > { %v721_v63 = vsel %vm286_vm0, %v717_v59, %v718_v58  ;;  %2224 = vmatpush1.bf16.msra.mxu0 %v9834_v62  ;;  %2265 = vmatpush1.bf16.msra.mxu1 %v9835_v37 }
  0xc0   : > { %v723_v0 = vsel %vm722_vm8, %v710_v56, %v721_v63  ;;  %v10495_v2 = vpop.permute.xlu1 %589  ;;  %v10497_v4 = vpop.permute.xlu0 %527  ;;  %v1108_v56 = vcombine.high %v10348_v41, %v10348_v41 }
  0xc1   : > { %733 = vst [vmem:[#allocation3 + $0x54] sm:$0xcc] %v723_v0  ;;  %v595_v6 = vrot.slane %v10495_v2, 4  ;;  %v533_v9 = vrot.slane %v10497_v4, 4 }
  0xc2   : > { %1747 = vrot.lane.b32.xlu1 %v10356_v42, %s13339_s16  ;;  %467 = vrot.lane.b32.xlu0 %v10274_v27, %s10161_s20  ;;  %v10560_v41 = vrot.slane %v1108_v56, %v10241_v13 }
  0xc3   : > { %v600_v14 = vsel %vm286_vm0, %v594_v34, %v595_v6  ;;  %v538_v15 = vsel %vm286_vm0, %v532_v26, %v533_v9 }
  0xc4   : > { %v601_v16 = vsel %vm598_vm6, %v10405_v49, %v600_v14  ;;  %v539_v17 = vsel %vm13292_vm5, %v526_v32, %v538_v15  ;;  %v10514_v18 = vpop.permute.xlu1 %713  ;;  %v10516_v19 = vpop.permute.xlu0 %651 }
  0xc5   : > { %610 = vst [vmem:[#allocation3 + $0x40] sm:$0xcc] %v601_v16  ;;  %548 = vst [vmem:[#allocation3 + $0x40] sm:$0x33] %v539_v17  ;;  %v719_v21 = vrot.slane %v10514_v18, 4  ;;  %v657_v22 = vrot.slane %v10516_v19, 4 }
  0xc6   : > { %1871 = vrot.lane.b32.xlu1 %v10356_v42, %s13287_s11  ;;  %1809 = vrot.lane.b32.xlu0 %v10365_v44, %s13285_s15 }
  0xc7   : > { %v724_v49 = vsel %vm286_vm0, %v718_v58, %v719_v21  ;;  %v662_v24 = vsel %vm286_vm0, %v656_v51, %v657_v22 }
  0xc8   : > { %v725_v25 = vsel %vm722_vm8, %v712_v55, %v724_v49  ;;  %v663_v28 = vsel %vm13291_vm7, %v650_v47, %v662_v24  ;;  %v10532_v29 = vpop.permute.xlu1 %773  ;;  %v772_v30 = vpop.permute.xlu0 %771  ;;  %v9836_v31 = vld [vmem:[#allocation3 + $0x3c] ss:$28 sps:$4 sm:$0xff]  }
  0xc9   : > { %v9838_v32 = vld [vmem:[#allocation3 + $0x38] ss:$28 sps:$4 sm:$0xff]   ;;  %734 = vst [vmem:[#allocation3 + $0x5c] sm:$0xcc] %v725_v25  ;;  %672 = vst [vmem:[#allocation3 + $0x5c] sm:$0x33] %v663_v28  ;;  %2225 = vmatprep.subr.bf16.mxu0 %v9836_v31 }
  0xca   : > { %v780_v44 = vrot.slane %v10532_v29, 4  ;;  %v779_v33 = vrot.slane %v772_v30, 4  ;;  %591 = vrot.lane.b32.xlu1 %v10274_v27, %s13346_s22  ;;  %529 = vrot.lane.b32.xlu0 %v10476_v39, %s10164_s23  ;;  %v1048_v55 = vld [vmem:[#allocation2 + $0xa] sm:$0x3f] }
  0xcb   : > { %2226 = vmatpush1.bf16.msra.mxu0 %v9838_v32  ;;  %9424 = vst.sshfl [vmem:[#allocation3 + $0xc0] sm:$0x30 pattern:$0x76325410] %v1048_v55  ;;  %v1066_v57 = vcombine.low %v1048_v55, %v1048_v55 }
  0xcc   : > { %v783_v34 = vsel %vm286_vm0, %v779_v33, %v780_v44  ;;  %v836_v26 = vpop.permute.xlu1 %835  ;;  %v834_v36 = vpop.permute.xlu0 %833 }
  0xcd   : > { %v785_v35 = vsel %vm13290_vm9, %v772_v30, %v783_v34  ;;  %v842_v40 = vrot.slane %v836_v26, 4  ;;  %v841_v43 = vrot.slane %v834_v36, 4  ;;  %9423 = vst.sshfl [vmem:[#allocation3 + $0xb8] sm:$0xf0 pattern:$0x76325410] %v1066_v57 }
  0xce   : > { %795 = vst [vmem:[#allocation3 + $0x70] sm:$0x33] %v785_v35  ;;  %715 = vrot.lane.b32.xlu1 %v10274_v27, %s13300_s25  ;;  %653 = vrot.lane.b32.xlu0 %v10476_v39, %s13374_s24 }
  0xcf   : > { %v845_v45 = vsel %vm286_vm0, %v841_v43, %v842_v40 }
  0xd0   : > { %v847_v46 = vsel %vm846_vm10, %v834_v36, %v845_v45  ;;  %v898_v47 = vpop.permute.xlu1 %897  ;;  %v896_v48 = vpop.permute.xlu0 %895  ;;  %v9839_v51 = vld [vmem:[#allocation3 + $0x44] ss:$28 sps:$4 sm:$0xff]  }
  0xd1   : > { %v9841_v53 = vld [vmem:[#allocation3 + $0x40] ss:$28 sps:$4 sm:$0xff]   ;;  %857 = vst [vmem:[#allocation3 + $0x70] sm:$0xcc] %v847_v46  ;;  %v904_v38 = vrot.slane %v898_v47, 4  ;;  %v903_v54 = vrot.slane %v896_v48, 4  ;;  %2266 = vmatprep.subr.bf16.mxu1 %v9839_v51 }
  0xd2   : > { %839 = vrot.lane.b32.xlu1 %v10274_v27, %s10168_s27  ;;  %777 = vrot.lane.b32.xlu0 %v10476_v39, %s10167_s26 }
  0xd3   : > { %v907_v58 = vsel %vm286_vm0, %v903_v54, %v904_v38  ;;  %2267 = vmatpush1.bf16.msra.mxu1 %v9841_v53 }
  0xd4   : > { %v909_v59 = vsel %vm13268_vm11, %v896_v48, %v907_v58  ;;  %v960_v61 = vpop.permute.xlu1 %959  ;;  %v958_v62 = vpop.permute.xlu0 %957 }
  0xd5   : > { %919 = vst [vmem:[#allocation3 + $0x8c] sm:$0x33] %v909_v59  ;;  %v966_v37 = vrot.slane %v960_v61, 4  ;;  %v965_v63 = vrot.slane %v958_v62, 4 }
  0xd6   : > { %963 = vrot.lane.b32.xlu1 %v10274_v27, %s10170_s29  ;;  %901 = vrot.lane.b32.xlu0 %v10476_v39, %s10169_s28 }
  0xd7   : > { %v969_v0 = vsel %vm286_vm0, %v965_v63, %v966_v37 }
  0xd8   : > { %v971_v14 = vsel %vm13293_vm12, %v958_v62, %v969_v0  ;;  %v10564_v15 = vpop.permute.xlu1 %837  ;;  %v10566_v16 = vpop.permute.xlu0 %775 }
  0xd9   : > { %981 = vst [vmem:[#allocation3 + $0x8c] sm:$0xcc] %v971_v14  ;;  %v843_v17 = vrot.slane %v10564_v15, 4  ;;  %v781_v49 = vrot.slane %v10566_v16, 4 }
  0xda   : > { %1129 = vrot.lane.b32.xlu1 %v10560_v41, %s13298_s4  ;;  %1025 = vrot.lane.b32.xlu0 %v10476_v39, %s13370_s30 }
  0xdb   : > { %v848_v27 = vsel %vm286_vm0, %v842_v40, %v843_v17  ;;  %v786_v24 = vsel %vm286_vm0, %v780_v44, %v781_v49 }
  0xdc   : > { %v849_v25 = vsel %vm846_vm10, %v836_v26, %v848_v27  ;;  %v787_v28 = vsel %vm13290_vm9, %v10532_v29, %v786_v24  ;;  %v10583_v30 = vpop.permute.xlu1 %961  ;;  %v10585_v31 = vpop.permute.xlu0 %899 }
  0xdd   : > { %858 = vst [vmem:[#allocation3 + $0x78] sm:$0xcc] %v849_v25  ;;  %796 = vst [vmem:[#allocation3 + $0x78] sm:$0x33] %v787_v28  ;;  %v967_v39 = vrot.slane %v10583_v30, 4  ;;  %v905_v32 = vrot.slane %v10585_v31, 4 }
  0xde   : > { %1253 = vrot.lane.b32.xlu1 %v10560_v41, %s13344_s6  ;;  %1191 = vrot.lane.b32.xlu0 %v10356_v42, %s13302_s5 }
  0xdf   : > { %v972_v29 = vsel %vm286_vm0, %v966_v37, %v967_v39  ;;  %v910_v44 = vsel %vm286_vm0, %v904_v38, %v905_v32 }
  0xe0   : > { %v973_v33 = vsel %vm13293_vm12, %v960_v61, %v972_v29  ;;  %v911_v34 = vsel %vm13268_vm11, %v898_v47, %v910_v44  ;;  %v1022_v35 = vpop.permute.xlu1 %1021  ;;  %v1020_v26 = vpop.permute.xlu0 %1019  ;;  %v9843_v36 = vld [vmem:[#allocation3 + $0x74] ss:$28 sps:$4 sm:$0xff]   ;;  %vm13271_vm11 = vcmask 310272  }
  0xe1   : > { %v9845_v40 = vld [vmem:[#allocation3 + $0x70] ss:$28 sps:$4 sm:$0xff]   ;;  %982 = vst [vmem:[#allocation3 + $0x94] sm:$0xcc] %v973_v33  ;;  %920 = vst [vmem:[#allocation3 + $0x94] sm:$0x33] %v911_v34  ;;  %2227 = vmatprep.subr.bf16.mxu0 %v9843_v36 }
  0xe2   : > { %v1028_v43 = vrot.slane %v1022_v35, 4  ;;  %v1027_v45 = vrot.slane %v1020_v26, 4  ;;  %1377 = vrot.lane.b32.xlu1 %v10560_v41, %s13296_s8  ;;  %1315 = vrot.lane.b32.xlu0 %v10356_v42, %s13261_s7  ;;  %s13403_s7 = smov 29  }
  0xe3   : > { %2228 = vmatpush1.bf16.msra.mxu0 %v9845_v40 }
  0xe4   : > { %v1031_v46 = vsel %vm286_vm0, %v1027_v45, %v1028_v43  ;;  %v1126_v48 = vpop.permute.xlu1 %1125  ;;  %v1124_v51 = vpop.permute.xlu0 %1123 }
  0xe5   : > { %v1033_v47 = vsel %vm13265_vm13, %v1020_v26, %v1031_v46  ;;  %v1132_v53 = vrot.slane %v1126_v48, 4  ;;  %v1131_v38 = vrot.slane %v1124_v51, 4 }
  0xe6   : > { %1043 = vst [vmem:[#allocation3 + $0xa8] sm:$0x33] %v1033_v47  ;;  %1501 = vrot.lane.b32.xlu1 %v10560_v41, %s13372_s10  ;;  %1439 = vrot.lane.b32.xlu0 %v10356_v42, %s13263_s9  ;;  %s13404_s9 = smov 27  }
  0xe7   : > { %v1135_v54 = vsel %vm286_vm0, %v1131_v38, %v1132_v53 }
  0xe8   : > { %v1137_v55 = vsel %vm13267_vm14, %v1124_v51, %v1135_v54  ;;  %v1188_v56 = vpop.permute.xlu1 %1187  ;;  %v1186_v57 = vpop.permute.xlu0 %1185  ;;  %v9846_v58 = vld [vmem:[#allocation3 + $0x7c] ss:$28 sps:$4 sm:$0xff]  }
  0xe9   : > { %v9848_v59 = vld [vmem:[#allocation3 + $0x78] ss:$28 sps:$4 sm:$0xff]   ;;  %1147 = vst [vmem:[#allocation3 + $0xc4] sm:$0x33] %v1137_v55  ;;  %v1194_v61 = vrot.slane %v1188_v56, 4  ;;  %v1193_v62 = vrot.slane %v1186_v57, 4  ;;  %2268 = vmatprep.subr.bf16.mxu1 %v9846_v58 }
  0xea   : > { %1625 = vrot.lane.b32.xlu1 %v10560_v41, %s13341_s14  ;;  %1563 = vrot.lane.b32.xlu0 %v10356_v42, %s13403_s7 }
  0xeb   : > { %v1197_v37 = vsel %vm286_vm0, %v1193_v62, %v1194_v61  ;;  %2269 = vmatpush1.bf16.msra.mxu1 %v9848_v59 }
  0xec   : > { %v1199_v63 = vsel %vm13266_vm15, %v1186_v57, %v1197_v37  ;;  %v10619_v0 = vpop.permute.xlu1 %1127  ;;  %v10621_v14 = vpop.permute.xlu0 %1023 }
  0xed   : > { %1209 = vst [vmem:[#allocation3 + $0xc4] sm:$0xcc] %v1199_v63  ;;  %v1133_v27 = vrot.slane %v10619_v0, 4  ;;  %v1029_v24 = vrot.slane %v10621_v14, 4  ;;  %v1920_v45 = vld [vmem:[#allocation3 + $0xa8] sm:$0xff] }
  0xee   : > { %1749 = vrot.lane.b32.xlu1 %v10560_v41, %s13339_s16  ;;  %1687 = vrot.lane.b32.xlu0 %v10356_v42, %s13404_s9 }
  0xef   : > { %v1138_v25 = vsel %vm286_vm0, %v1132_v53, %v1133_v27  ;;  %v1034_v28 = vsel %vm286_vm0, %v1028_v43, %v1029_v24 }
  0xf0   : > { %v1139_v29 = vsel %vm13267_vm14, %v1126_v48, %v1138_v25  ;;  %v1035_v44 = vsel %vm13265_vm13, %v1022_v35, %v1034_v28  ;;  %v1248_v33 = vpop.permute.xlu1 %1247  ;;  %v10637_v34 = vpop.permute.xlu0 %1189  ;;  %vm13272_vm13 = vcmask 965632   ;;  %vm13270_vm14 = vcmask 318464  }
  0xf1   : > { %1148 = vst [vmem:[#allocation3 + $0xcc] sm:$0x33] %v1139_v29  ;;  %1044 = vst [vmem:[#allocation3 + $0xb0] sm:$0x33] %v1035_v44  ;;  %v13283_v26 = vrot.slane %v10637_v34, 4  ;;  %v1255_v48 = vrot.slane %v1248_v33, 4 }
  0xf2   : > { %1873 = vrot.lane.b32.xlu1 %v10560_v41, %s13287_s11  ;;  %1811 = vrot.lane.b32.xlu0 %v10356_v42, %s13285_s15  ;;  %s13442_s11 = smov 117   ;;  %s13443_s15 = smov 38  }
  0xf3   : > { %v1200_v36 = vsel %vm286_vm0, %v1194_v61, %v13283_v26 }
  0xf4   : > { %v1201_v40 = vsel %vm13266_vm15, %v1188_v56, %v1200_v36  ;;  %v1310_v35 = vpop.permute.xlu1 %1309  ;;  %v1250_v43 = vpop.permute.xlu0 %1249  ;;  %v1924_v46 = vld [vmem:[#allocation3 + $0xc4] sm:$0xff]  ;;  %vm13269_vm15 = vcmask 957440  }
  0xf5   : > { %v9850_v47 = vld [vmem:[#allocation3 + $0xac] ss:$28 sps:$4 sm:$0xff]   ;;  %1210 = vst [vmem:[#allocation3 + $0xcc] sm:$0xcc] %v1201_v40  ;;  %v1256_v51 = vrot.slane %v1250_v43, 4  ;;  %v9446_v53 = vcombine.low %v1920_v45, %v1924_v46  ;;  %v1317_v55 = vrot.slane %v1310_v35, 4 }
  0xf6   : > { %2229 = vmatprep.subr.bf16.mxu0 %v9850_v47 }
  0xf7   : > { %v1259_v41 = vsel %vm286_vm0, %v1255_v48, %v1256_v51  ;;  %2230 = vmatpush1.bf16.msra.mxu0 %v9446_v53 }
  0xf8   : > { %v1261_v42 = vsel %vm13272_vm13, %v1248_v33, %v1259_v41  ;;  %v1372_v38 = vpop.permute.xlu1 %1371  ;;  %v1312_v54 = vpop.permute.xlu0 %1311 }
  0xf9   : > { %1271 = vst [vmem:[#allocation3 + $0xe0] sm:$0x33] %v1261_v42  ;;  %v1318_v56 = vrot.slane %v1312_v54, 4  ;;  %v1379_v63 = vrot.slane %v1372_v38, 4 }
  0xfb   : > { %v1321_v57 = vsel %vm286_vm0, %v1317_v55, %v1318_v56 }
  0xfc   : > { %v1323_v58 = vsel %vm13269_vm15, %v1310_v35, %v1321_v57  ;;  %v1434_v59 = vpop.permute.xlu1 %1433  ;;  %v1374_v61 = vpop.permute.xlu0 %1373  ;;  %v9852_v62 = vld [vmem:[#allocation3 + $0xb4] ss:$28 sps:$4 sm:$0xff]  }
  0xfd   : > { %v9854_v37 = vld [vmem:[#allocation3 + $0xb0] ss:$28 sps:$4 sm:$0xff]   ;;  %1333 = vst [vmem:[#allocation3 + $0xe0] sm:$0xcc] %v1323_v58  ;;  %v1380_v25 = vrot.slane %v1374_v61, 4  ;;  %2270 = vmatprep.subr.bf16.mxu1 %v9852_v62  ;;  %v1441_v36 = vrot.slane %v1434_v59, 4 }
  0xfe   : > { %2271 = vmatpush1.bf16.msra.mxu1 %v9854_v37 }
  0xff   : > { %v1383_v28 = vsel %vm286_vm0, %v1379_v63, %v1380_v25 }
 0x100   : > { %v1385_v29 = vsel %vm13270_vm14, %v1372_v38, %v1383_v28  ;;  %v10654_v44 = vpop.permute.xlu1 %1251  ;;  %v1436_v33 = vpop.permute.xlu0 %1435 }
 0x101   : > { %1395 = vst [vmem:[#allocation3 + $0xfc] sm:$0x33] %v1385_v29  ;;  %v1257_v40 = vrot.slane %v10654_v44, 4  ;;  %v1442_v35 = vrot.slane %v1436_v33, 4 }
 0x103   : > { %v1262_v45 = vsel %vm286_vm0, %v1256_v51, %v1257_v40  ;;  %v1445_v46 = vsel %vm286_vm0, %v1441_v36, %v1442_v35 }
 0x104   : > { %v1263_v47 = vsel %vm13272_vm13, %v1250_v43, %v1262_v45  ;;  %v1447_v48 = vsel %vm13271_vm11, %v1434_v59, %v1445_v46  ;;  %v10663_v53 = vpop.permute.xlu1 %1375  ;;  %v10665_v41 = vpop.permute.xlu0 %1313  ;;  %vm13277_vm13 = vcmask 220160  }
 0x105   : > { %1272 = vst [vmem:[#allocation3 + $0xe8] sm:$0x33] %v1263_v47  ;;  %1457 = vst [vmem:[#allocation3 + $0xfc] sm:$0xcc] %v1447_v48  ;;  %v13282_v42 = vrot.slane %v10663_v53, 4  ;;  %v13280_v38 = vrot.slane %v10665_v41, 4 }
 0x107   : > { %v1386_v51 = vsel %vm286_vm0, %v1380_v25, %v13282_v42  ;;  %v1324_v43 = vsel %vm286_vm0, %v1318_v56, %v13280_v38 }
 0x108   : > { %v1387_v55 = vsel %vm13270_vm14, %v1374_v61, %v1386_v51  ;;  %v1325_v57 = vsel %vm13269_vm15, %v1312_v54, %v1324_v43  ;;  %v1496_v58 = vpop.permute.xlu1 %1495  ;;  %v10677_v59 = vpop.permute.xlu0 %1437  ;;  %vm13343_vm15 = vcmask 302080   ;;  %vm13276_vm14 = vcmask 236544  }
 0x109   : > { %1396 = vst [vmem:[#allocation3 + $0x104] sm:$0x33] %v1387_v55  ;;  %1334 = vst [vmem:[#allocation3 + $0xe8] sm:$0xcc] %v1325_v57  ;;  %v13274_v62 = vrot.slane %v10677_v59, 4  ;;  %v1503_v61 = vrot.slane %v1496_v58, 4 }
 0x10b   : > { %v1448_v37 = vsel %vm286_vm0, %v1442_v35, %v13274_v62 }
 0x10c   : > { %v1449_v63 = vsel %vm13271_vm11, %v1436_v33, %v1448_v37  ;;  %v1558_v25 = vpop.permute.xlu1 %1557  ;;  %v1498_v28 = vpop.permute.xlu0 %1497  ;;  %v9855_v56 = vld [vmem:[#allocation3 + $0xe4] ss:$28 sps:$4 sm:$0xff]   ;;  %vm13281_vm11 = vcmask 228352  }
 0x10d   : > { %v9857_v29 = vld [vmem:[#allocation3 + $0xe0] ss:$28 sps:$4 sm:$0xff]   ;;  %1458 = vst [vmem:[#allocation3 + $0x104] sm:$0xcc] %v1449_v63  ;;  %v1504_v54 = vrot.slane %v1498_v28, 4  ;;  %2231 = vmatprep.subr.bf16.mxu0 %v9855_v56  ;;  %v1565_v48 = vrot.slane %v1558_v25, 4 }
 0x10e   : > { %2232 = vmatpush1.bf16.msra.mxu0 %v9857_v29 }
 0x10f   : > { %v1507_v36 = vsel %vm286_vm0, %v1503_v61, %v1504_v54 }
 0x110   : > { %v1509_v45 = vsel %vm13343_vm15, %v1496_v58, %v1507_v36  ;;  %v1620_v46 = vpop.permute.xlu1 %1619  ;;  %v1560_v47 = vpop.permute.xlu0 %1559 }
 0x111   : > { %1519 = vst [vmem:[#allocation3 + $0x118] sm:$0x33] %v1509_v45  ;;  %v1566_v33 = vrot.slane %v1560_v47, 4  ;;  %v1627_v63 = vrot.slane %v1620_v46, 4 }
 0x113   : > { %v1569_v35 = vsel %vm286_vm0, %v1565_v48, %v1566_v33 }
 0x114   : > { %v1571_v51 = vsel %vm13276_vm14, %v1558_v25, %v1569_v35  ;;  %v1682_v43 = vpop.permute.xlu1 %1681  ;;  %v1622_v55 = vpop.permute.xlu0 %1621  ;;  %v9858_v57 = vld [vmem:[#allocation3 + $0xec] ss:$28 sps:$4 sm:$0xff]  }
 0x115   : > { %v9860_v37 = vld [vmem:[#allocation3 + $0xe8] ss:$28 sps:$4 sm:$0xff]   ;;  %1581 = vst [vmem:[#allocation3 + $0x118] sm:$0xcc] %v1571_v51  ;;  %v1628_v56 = vrot.slane %v1622_v55, 4  ;;  %2272 = vmatprep.subr.bf16.mxu1 %v9858_v57  ;;  %v1689_v45 = vrot.slane %v1682_v43, 4 }
 0x116   : > { %2273 = vmatpush1.bf16.msra.mxu1 %v9860_v37 }
 0x117   : > { %v1631_v58 = vsel %vm286_vm0, %v1627_v63, %v1628_v56 }
 0x118   : > { %v1633_v29 = vsel %vm13281_vm11, %v1620_v46, %v1631_v58  ;;  %v10690_v61 = vpop.permute.xlu1 %1499  ;;  %v1684_v36 = vpop.permute.xlu0 %1683 }
 0x119   : > { %1643 = vst [vmem:[#allocation3 + $0x134] sm:$0x33] %v1633_v29  ;;  %v13279_v25 = vrot.slane %v10690_v61, 4  ;;  %v1690_v48 = vrot.slane %v1684_v36, 4 }
 0x11b   : > { %v1510_v35 = vsel %vm286_vm0, %v1504_v54, %v13279_v25  ;;  %v1693_v51 = vsel %vm286_vm0, %v1689_v45, %v1690_v48 }
 0x11c   : > { %v1511_v57 = vsel %vm13343_vm15, %v1498_v28, %v1510_v35  ;;  %v1695_v37 = vsel %vm13277_vm13, %v1682_v43, %v1693_v51  ;;  %v10699_v46 = vpop.permute.xlu1 %1623  ;;  %v10701_v63 = vpop.permute.xlu0 %1561 }
 0x11d   : > { %1520 = vst [vmem:[#allocation3 + $0x120] sm:$0x33] %v1511_v57  ;;  %1705 = vst [vmem:[#allocation3 + $0x134] sm:$0xcc] %v1695_v37  ;;  %v13273_v58 = vrot.slane %v10699_v46, 4  ;;  %v13275_v29 = vrot.slane %v10701_v63, 4 }
 0x11f   : > { %v1634_v54 = vsel %vm286_vm0, %v1628_v56, %v13273_v58  ;;  %v1572_v28 = vsel %vm286_vm0, %v1566_v33, %v13275_v29 }
 0x120   : > { %v1635_v43 = vsel %vm13281_vm11, %v1622_v55, %v1634_v54  ;;  %v1573_v45 = vsel %vm13276_vm14, %v1560_v47, %v1572_v28  ;;  %v1744_v35 = vpop.permute.xlu1 %1743  ;;  %v10713_v51 = vpop.permute.xlu0 %1685  ;;  %vm1756_vm14 = vcmask 154624   ;;  %vm1880_vm11 = vcmask 138240  }
 0x121   : > { %1644 = vst [vmem:[#allocation3 + $0x13c] sm:$0x33] %v1635_v43  ;;  %1582 = vst [vmem:[#allocation3 + $0x120] sm:$0xcc] %v1573_v45  ;;  %v13278_v57 = vrot.slane %v10713_v51, 4  ;;  %v1751_v55 = vrot.slane %v1744_v35, 4 }
 0x123   : > { %v1696_v37 = vsel %vm286_vm0, %v1690_v48, %v13278_v57 }
 0x124   : > { %v1697_v56 = vsel %vm13277_vm13, %v1684_v36, %v1696_v37  ;;  %v1806_v58 = vpop.permute.xlu1 %1805  ;;  %v1746_v62 = vpop.permute.xlu0 %1745  ;;  %v9861_v33 = vld [vmem:[#allocation3 + $0x11c] ss:$28 sps:$4 sm:$0xff]   ;;  %vm1818_vm13 = vcmask 146432  }
 0x125   : > { %v9863_v29 = vld [vmem:[#allocation3 + $0x118] ss:$28 sps:$4 sm:$0xff]   ;;  %1706 = vst [vmem:[#allocation3 + $0x13c] sm:$0xcc] %v1697_v56  ;;  %v1752_v47 = vrot.slane %v1746_v62, 4  ;;  %2233 = vmatprep.subr.bf16.mxu0 %v9861_v33  ;;  %v1813_v48 = vrot.slane %v1806_v58, 4 }
 0x126   : > { %2234 = vmatpush1.bf16.msra.mxu0 %v9863_v29 }
 0x127   : > { %v1755_v54 = vsel %vm286_vm0, %v1751_v55, %v1752_v47 }
 0x128   : > { %v1757_v28 = vsel %vm1756_vm14, %v1744_v35, %v1755_v54  ;;  %v1868_v43 = vpop.permute.xlu1 %1867  ;;  %v10722_v45 = vpop.permute.xlu0 %1807 }
 0x129   : > { %1767 = vst [vmem:[#allocation3 + $0x150] sm:$0x33] %v1757_v28  ;;  %v1814_v36 = vrot.slane %v10722_v45, 4  ;;  %v1875_v55 = vrot.slane %v1868_v43, 4 }
 0x12b   : > { %v1817_v37 = vsel %vm286_vm0, %v1813_v48, %v1814_v36 }
 0x12c   : > { %v1819_v56 = vsel %vm1818_vm13, %v1806_v58, %v1817_v37  ;;  %v281_v57 = vpop.permute.xlu1 %280  ;;  %v1870_v25 = vpop.permute.xlu0 %1869  ;;  %v9864_v33 = vld [vmem:[#allocation3 + $0x124] ss:$28 sps:$4 sm:$0xff]  }
 0x12d   : > { %v9866_v38 = vld [vmem:[#allocation3 + $0x120] ss:$28 sps:$4 sm:$0xff]   ;;  %1829 = vst [vmem:[#allocation3 + $0x150] sm:$0xcc] %v1819_v56  ;;  %v285_v29 = vrot.slane %v281_v57, 4  ;;  %v1876_v35 = vrot.slane %v1870_v25, 4  ;;  %2274 = vmatprep.subr.bf16.mxu1 %v9864_v33 }
 0x12e   : > { %2275 = vmatpush1.bf16.msra.mxu1 %v9866_v38 }
 0x12f   : > { %v292_v54 = vsel %vm286_vm0, %v284_v7, %v285_v29  ;;  %v294_v28 = vsel %vm13289_vm3, %v281_v57, %v285_v29  ;;  %v1879_v48 = vsel %vm286_vm0, %v1875_v55, %v1876_v35 }
 0x130   : > { %v293_v58 = vsel %vm13289_vm3, %v10407_v50, %v292_v54  ;;  %302 = vst [vmem:[#allocation3 + $0x18] sm:$0x3] %v294_v28  ;;  %v1881_v37 = vsel %vm1880_vm11, %v1868_v43, %v1879_v48  ;;  %v406_v56 = vpop.permute.xlu1 %405  ;;  %v344_v42 = vpop.permute.xlu0 %343  ;;  %vm2197_vm3 = vcmask 883712  }
 0x131   : > { %301 = vst [vmem:[#allocation3 + $0x10] sm:$0x33] %v293_v58  ;;  %1891 = vst [vmem:[#allocation3 + $0x16c] sm:$0x33] %v1881_v37  ;;  %v410_v33 = vrot.slane %v406_v56, 4  ;;  %v348_v26 = vrot.slane %v344_v42, 4 }
 0x133   : > { %v416_v7 = vsel %vm286_vm0, %v409_v60, %v410_v33  ;;  %v418_v57 = vsel %vm13284_vm2, %v406_v56, %v410_v33  ;;  %v354_v38 = vsel %vm286_vm0, %v347_v8, %v348_v26  ;;  %v356_v50 = vsel %vm350_vm1, %v344_v42, %v348_v26 }
 0x134   : > { %v417_v43 = vsel %vm13284_vm2, %v10413_v52, %v416_v7  ;;  %426 = vst [vmem:[#allocation3 + $0x34] sm:$0x3] %v418_v57  ;;  %v355_v55 = vsel %vm350_vm1, %v10434_v3, %v354_v38  ;;  %364 = vst [vmem:[#allocation3 + $0x18] sm:$0xc] %v356_v50  ;;  %v10747_v29 = vpop.permute.xlu1 %1747  ;;  %v468_v54 = vpop.permute.xlu0 %467  ;;  %vm2201_vm2 = vcmask 1045504  }
 0x135   : > { %425 = vst [vmem:[#allocation3 + $0x2c] sm:$0x33] %v417_v43  ;;  %363 = vst [vmem:[#allocation3 + $0x10] sm:$0xcc] %v355_v55  ;;  %v1753_v60 = vrot.slane %v10747_v29, 4  ;;  %v472_v28 = vrot.slane %v468_v54, 4 }
 0x136   : > { %v10780_v43 = vld [vmem:[%s13254_s1] sm:$0x3] }
 0x137   : > { %v1758_v8 = vsel %vm286_vm0, %v1752_v47, %v1753_v60  ;;  %v478_v52 = vsel %vm286_vm0, %v471_v23, %v472_v28  ;;  %v480_v26 = vsel %vm474_vm4, %v468_v54, %v472_v28 }
 0x138   : > { %v1759_v3 = vsel %vm1756_vm14, %v1746_v62, %v1758_v8  ;;  %v479_v42 = vsel %vm474_vm4, %v10452_v20, %v478_v52  ;;  %488 = vst [vmem:[#allocation3 + $0x34] sm:$0xc] %v480_v26  ;;  %v10760_v48 = vpop.permute.xlu1 %1871  ;;  %v10762_v58 = vpop.permute.xlu0 %1809  ;;  %v9867_v37 = vld [vmem:[#allocation3 + $0x154] ss:$28 sps:$4 sm:$0x3f]  }
 0x139   : > { %1768 = vst [vmem:[#allocation3 + $0x158] sm:$0x33] %v1759_v3  ;;  %487 = vst [vmem:[#allocation3 + $0x2c] sm:$0xcc] %v479_v42  ;;  %v1877_v47 = vrot.slane %v10760_v48, 4  ;;  %v1815_v23 = vrot.slane %v10762_v58, 4  ;;  %9474 = vmatprep.subr.msk.bf16.mxu0 %vm2201_vm2, %v9867_v37 }
 0x13a   : > { %v9869_v56 = vld [vmem:[#allocation3 + $0x150] ss:$28 sps:$4 sm:$0x3f]  }
 0x13b   : > { %v1882_v62 = vsel %vm286_vm0, %v1876_v35, %v1877_v47  ;;  %v1820_v20 = vsel %vm286_vm0, %v1814_v36, %v1815_v23  ;;  %v2203_v33 = vsel %vm2201_vm2, %v9869_v56, 0 }
 0x13c   : > { %v1883_v7 = vsel %vm1880_vm11, %v1870_v25, %v1882_v62  ;;  %v1821_v57 = vsel %vm1818_vm13, %v10722_v45, %v1820_v20  ;;  %v592_v38 = vpop.permute.xlu1 %591  ;;  %2236 = vmatpush1.bf16.msra.mxu0 %v2203_v33  ;;  %v530_v50 = vpop.permute.xlu0 %529 }
 0x13d   : > { %1892 = vst [vmem:[#allocation3 + $0x174] sm:$0x33] %v1883_v7  ;;  %1830 = vst [vmem:[#allocation3 + $0x158] sm:$0xcc] %v1821_v57  ;;  %v596_v35 = vrot.slane %v592_v38, 4  ;;  %v534_v36 = vrot.slane %v530_v50, 4 }
 0x13f   : > { %v602_v25 = vsel %vm286_vm0, %v595_v6, %v596_v35  ;;  %v604_v55 = vsel %vm598_vm6, %v592_v38, %v596_v35  ;;  %v540_v45 = vsel %vm286_vm0, %v533_v9, %v534_v36  ;;  %v542_v54 = vsel %vm13292_vm5, %v530_v50, %v534_v36  ;;  %9475 = vmatmul.mubr.msk.bf16.vlgmr.msra.gmra.mrb[0].mxu0 %vm2197_vm3, %v10780_v43 }
 0x140   : > { %v603_v28 = vsel %vm598_vm6, %v10495_v2, %v602_v25  ;;  %612 = vst [vmem:[#allocation3 + $0x50] sm:$0xc] %v604_v55  ;;  %v541_v8 = vsel %vm13292_vm5, %v10497_v4, %v540_v45  ;;  %550 = vst [vmem:[#allocation3 + $0x50] sm:$0x3] %v542_v54  ;;  %v716_v6 = vpop.permute.xlu1 %715  ;;  %v654_v52 = vpop.permute.xlu0 %653  ;;  %v9870_v26 = vld [vmem:[#allocation3 + $0x14] ss:$28 sps:$4 sm:$0xff]   ;;  %2337 = vmatprep.mubr.bf16.mxu0 %v13306_v1 }
 0x141   : > { %v9872_v3 = vld [vmem:[#allocation3 + $0x10] ss:$28 sps:$4 sm:$0xff]   ;;  %611 = vst [vmem:[#allocation3 + $0x48] sm:$0xcc] %v603_v28  ;;  %549 = vst [vmem:[#allocation3 + $0x48] sm:$0x33] %v541_v8  ;;  %2305 = vmatprep.subr.bf16.mxu0 %v9870_v26 }
 0x142   : > { %v720_v9 = vrot.slane %v716_v6, 4  ;;  %v658_v42 = vrot.slane %v654_v52, 4  ;;  %2306 = vmatpush1.bf16.msra.mxu0 %v9872_v3  ;;  %vm13408_vm5 = vcmask 7168  }
 0x144   : > { %v726_v2 = vsel %vm286_vm0, %v719_v21, %v720_v9  ;;  %v728_v37 = vsel %vm722_vm8, %v716_v6, %v720_v9  ;;  %v664_v4 = vsel %vm286_vm0, %v657_v22, %v658_v42  ;;  %v666_v56 = vsel %vm13291_vm7, %v654_v52, %v658_v42  ;;  %v840_v33 = vpop.permute.xlu1 %839  ;;  %v778_v7 = vpop.permute.xlu0 %777  ;;  %v9873_v21 = vld [vmem:[#allocation3 + $0x15c] ss:$28 sps:$4 sm:$0x3f]  }
 0x145   : > { %v727_v62 = vsel %vm722_vm8, %v10514_v18, %v726_v2  ;;  %736 = vst [vmem:[#allocation3 + $0x6c] sm:$0xc] %v728_v37  ;;  %v665_v20 = vsel %vm13291_vm7, %v10516_v19, %v664_v4  ;;  %674 = vst [vmem:[#allocation3 + $0x6c] sm:$0x3] %v666_v56  ;;  %v844_v57 = vrot.slane %v840_v33, 4  ;;  %v782_v38 = vrot.slane %v778_v7, 4  ;;  %9476 = vmatprep.subr.msk.bf16.mxu1 %vm2201_vm2, %v9873_v21 }
 0x146   : > { %735 = vst [vmem:[#allocation3 + $0x64] sm:$0xcc] %v727_v62  ;;  %673 = vst [vmem:[#allocation3 + $0x64] sm:$0x33] %v665_v20  ;;  %v9876_v52 = vld [vmem:[#allocation3 + $0x18] ss:$28 sps:$4 sm:$0xff]  }
 0x147   : > { %v9875_v50 = vld [vmem:[#allocation3 + $0x158] ss:$28 sps:$4 sm:$0x3f]   ;;  %v850_v22 = vsel %vm286_vm0, %v843_v17, %v844_v57  ;;  %v852_v18 = vsel %vm846_vm10, %v840_v33, %v844_v57  ;;  %v788_v19 = vsel %vm286_vm0, %v781_v49, %v782_v38  ;;  %v790_v35 = vsel %vm13290_vm9, %v778_v7, %v782_v38 }
 0x148   : > { %v851_v36 = vsel %vm846_vm10, %v10564_v15, %v850_v22  ;;  %860 = vst [vmem:[#allocation3 + $0x88] sm:$0xc] %v852_v18  ;;  %v789_v25 = vsel %vm13290_vm9, %v10566_v16, %v788_v19  ;;  %798 = vst [vmem:[#allocation3 + $0x88] sm:$0x3] %v790_v35  ;;  %v964_v55 = vpop.permute.xlu1 %963  ;;  %v2209_v45 = vsel %vm2201_vm2, %v9875_v50, 0  ;;  %v902_v17 = vpop.permute.xlu0 %901  ;;  %v13304_v49 = vmov 0.0  }
 0x149   : > { %859 = vst [vmem:[#allocation3 + $0x80] sm:$0xcc] %v851_v36  ;;  %797 = vst [vmem:[#allocation3 + $0x80] sm:$0x33] %v789_v25  ;;  %v968_v54 = vrot.slane %v964_v55, 4  ;;  %2277 = vmatpush1.bf16.msra.mxu1 %v2209_v45  ;;  %v906_v28 = vrot.slane %v902_v17, 4 }
 0x14a   : > { %9710 = vmatprep.subr.bf16.mxu1 %v13304_v49  ;;  %vm13405_vm9 = vcmask 80896   ;;  %v13412_v38 = vrot.slane %v10637_v34, 4 }
 0x14b   : > { %v974_v15 = vsel %vm286_vm0, %v967_v39, %v968_v54  ;;  %v976_v8 = vsel %vm13293_vm12, %v964_v55, %v968_v54  ;;  %v912_v16 = vsel %vm286_vm0, %v905_v32, %v906_v28  ;;  %v914_v6 = vsel %vm13405_vm9, %v902_v17, %v906_v28  ;;  %vm13406_vm7 = vmmov %vm13405_vm9 }
 0x14c   : > { %v975_v26 = vsel %vm13293_vm12, %v10583_v30, %v974_v15  ;;  %984 = vst [vmem:[#allocation3 + $0xa4] sm:$0xc] %v976_v8  ;;  %v913_v3 = vsel %vm13406_vm7, %v10585_v31, %v912_v16  ;;  %922 = vst [vmem:[#allocation3 + $0xa4] sm:$0x3] %v914_v6  ;;  %v1130_v9 = vpop.permute.xlu1 %1129  ;;  %9477 = vmatmul.mubr.msk.bf16.vlgmr.msra.gmra.mrb[0].mxu1 %vm2197_vm3, %v10780_v43  ;;  %v1026_v39 = vpop.permute.xlu0 %1025  ;;  %vm13294_vm9 = vmmov 0   ;;  %vm13407_vm7 = vcmask 1039360  }
 0x14d   : > { %v9877_v42 = vld [vmem:[#allocation3 + $0x4c] ss:$28 sps:$4 sm:$0xff]   ;;  %983 = vst [vmem:[#allocation3 + $0x9c] sm:$0xcc] %v975_v26  ;;  %921 = vst [vmem:[#allocation3 + $0x9c] sm:$0x33] %v913_v3  ;;  %9711 = vmatpush3.bf16.msra.mxu1 %v9876_v52  ;;  %9724 = vmatprep.mubr.msk.bf16.mxu1 %vm13294_vm9, %v13304_v49 }
 0x14e   : > { %v9879_v2 = vld [vmem:[#allocation3 + $0x48] ss:$28 sps:$4 sm:$0xff]   ;;  %v1134_v32 = vrot.slane %v1130_v9, 4  ;;  %v1030_v37 = vrot.slane %v1026_v39, 4  ;;  %2307 = vmatprep.subr.bf16.mxu0 %v9877_v42  ;;  %9712 = vmatprep.subr.bf16.mxu1 %v13304_v49  ;;  %v9880_v62 = vld [vmem:[#allocation3 + $0x50] ss:$28 sps:$4 sm:$0xff]   ;;  %vm13409_vm12 = vmmov %vm13407_vm7 }
 0x14f   : > { %2308 = vmatpush1.bf16.msra.mxu0 %v9879_v2  ;;  %vm13410_vm9 = vmmov %vm13408_vm5  ;;  %v13416_v17 = vrot.slane %v10663_v53, 4  ;;  %v13423_v2 = vrot.slane %v10677_v59, 4 }
 0x150   : > { %v1140_v30 = vsel %vm286_vm0, %v1133_v27, %v1134_v32  ;;  %v1142_v31 = vsel %vm13407_vm7, %v1130_v9, %v1134_v32  ;;  %v1036_v4 = vsel %vm286_vm0, %v1029_v24, %v1030_v37  ;;  %v1038_v56 = vsel %vm13408_vm5, %v1026_v39, %v1030_v37  ;;  %v1254_v7 = vpop.permute.xlu1 %1253  ;;  %v1192_v27 = vpop.permute.xlu0 %1191 }
 0x151   : > { %v1141_v20 = vsel %vm13409_vm12, %v10619_v0, %v1140_v30  ;;  %1150 = vst [vmem:[#allocation3 + $0xdc] sm:$0x3] %v1142_v31  ;;  %v1037_v33 = vsel %vm13410_vm9, %v10621_v14, %v1036_v4  ;;  %1046 = vst [vmem:[#allocation3 + $0xc0] sm:$0x3] %v1038_v56  ;;  %v1258_v21 = vrot.slane %v1254_v7, 4  ;;  %9713 = vmatpush3.bf16.msra.mxu1 %v9880_v62  ;;  %v1196_v57 = vrot.slane %v1192_v27, 4 }
 0x152   : > { %1149 = vst [vmem:[#allocation3 + $0xd4] sm:$0x33] %v1141_v20  ;;  %1045 = vst [vmem:[#allocation3 + $0xb8] sm:$0x33] %v1037_v33  ;;  %9714 = vmatprep.subr.bf16.mxu1 %v13304_v49  ;;  %vm13411_vm5 = vcmask 965632   ;;  %vm13413_vm12 = vcmask 973824  }
 0x153   : > { %v1264_v24 = vsel %vm286_vm0, %v1257_v40, %v1258_v21  ;;  %v1266_v0 = vsel %vm13411_vm5, %v1254_v7, %v1258_v21  ;;  %v1202_v14 = vsel %vm286_vm0, %v13412_v38, %v1196_v57  ;;  %v1204_v50 = vsel %vm13413_vm12, %v1192_v27, %v1196_v57  ;;  %v9881_v22 = vld [vmem:[#allocation3 + $0x88] ss:$28 sps:$4 sm:$0xff]   ;;  %vm13414_vm9 = vmmov %vm13411_vm5 }
 0x154   : > { %v1265_v18 = vsel %vm13414_vm9, %v10654_v44, %v1264_v24  ;;  %1274 = vst [vmem:[#allocation3 + $0xf8] sm:$0x3] %v1266_v0  ;;  %vm13415_vm7 = vmmov %vm13413_vm12  ;;  %v1378_v35 = vpop.permute.xlu1 %1377  ;;  %v1316_v36 = vpop.permute.xlu0 %1315  ;;  %v9882_v40 = vld [vmem:[#allocation3 + $0x84] ss:$28 sps:$4 sm:$0xff]   ;;  %vm13417_vm5 = vcmask 318464   ;;  %vm13419_vm12 = vcmask 957440  }
 0x155   : > { %v1203_v19 = vsel %vm13415_vm7, %v10637_v34, %v1202_v14  ;;  %1212 = vst [vmem:[#allocation3 + $0xdc] sm:$0xc] %v1204_v50  ;;  %v9884_v25 = vld [vmem:[#allocation3 + $0x80] ss:$28 sps:$4 sm:$0xff]   ;;  %1273 = vst [vmem:[#allocation3 + $0xf0] sm:$0x33] %v1265_v18  ;;  %9715 = vmatpush3.bf16.msra.mxu1 %v9881_v22  ;;  %2309 = vmatprep.subr.bf16.mxu0 %v9882_v40 }
 0x156   : > { %1211 = vst [vmem:[#allocation3 + $0xd4] sm:$0xcc] %v1203_v19  ;;  %v1382_v55 = vrot.slane %v1378_v35, 4  ;;  %v1320_v45 = vrot.slane %v1316_v36, 4  ;;  %9716 = vmatprep.subr.bf16.mxu1 %v13304_v49  ;;  %v13418_v34 = vrot.slane %v10665_v41, 4  ;;  %2310 = vmatpush1.bf16.msra.mxu0 %v9884_v25  ;;  %vm13420_vm9 = vmmov %vm13417_vm5  ;;  %v13422_v9 = vrot.slane %v10690_v61, 4 }
 0x157   : > { %vm13421_vm7 = vmmov %vm13419_vm12  ;;  %v13426_v7 = vrot.slane %v10699_v46, 4 }
 0x158   : > { %v1388_v44 = vsel %vm286_vm0, %v13416_v17, %v1382_v55  ;;  %v1390_v54 = vsel %vm13417_vm5, %v1378_v35, %v1382_v55  ;;  %v1326_v28 = vsel %vm286_vm0, %v13418_v34, %v1320_v45  ;;  %v1328_v15 = vsel %vm13419_vm12, %v1316_v36, %v1320_v45  ;;  %v1502_v6 = vpop.permute.xlu1 %1501  ;;  %v1440_v52 = vpop.permute.xlu0 %1439 }
 0x159   : > { %v1389_v8 = vsel %vm13420_vm9, %v10663_v53, %v1388_v44  ;;  %1398 = vst [vmem:[#allocation3 + $0x114] sm:$0x3] %v1390_v54  ;;  %v1327_v16 = vsel %vm13421_vm7, %v10665_v41, %v1326_v28  ;;  %1336 = vst [vmem:[#allocation3 + $0xf8] sm:$0xc] %v1328_v15  ;;  %v1506_v26 = vrot.slane %v1502_v6, 4  ;;  %v1444_v3 = vrot.slane %v1440_v52, 4 }
 0x15a   : > { %1397 = vst [vmem:[#allocation3 + $0x10c] sm:$0x33] %v1389_v8  ;;  %1335 = vst [vmem:[#allocation3 + $0xf0] sm:$0xcc] %v1327_v16  ;;  %vm13424_vm5 = vcmask 310272   ;;  %vm13427_vm9 = vcmask 228352  }
 0x15b   : > { %v1512_v39 = vsel %vm286_vm0, %v13422_v9, %v1506_v26  ;;  %v1514_v42 = vsel %vm13343_vm15, %v1502_v6, %v1506_v26  ;;  %v1450_v53 = vsel %vm286_vm0, %v13423_v2, %v1444_v3  ;;  %v1452_v32 = vsel %vm13424_vm5, %v1440_v52, %v1444_v3  ;;  %vm13425_vm12 = vmmov %vm13424_vm5  ;;  %v172_v9 = vld [vmem:[%s13255_s2] sm:$0xff] }
 0x15c   : > { %v9885_v41 = vld [vmem:[#allocation3 + $0xc0] ss:$28 sps:$4 sm:$0xff]   ;;  %v1513_v37 = vsel %vm13343_vm15, %v10690_v61, %v1512_v39  ;;  %1522 = vst [vmem:[#allocation3 + $0x130] sm:$0x3] %v1514_v42  ;;  %v1451_v30 = vsel %vm13425_vm12, %v10677_v59, %v1450_v53  ;;  %1460 = vst [vmem:[#allocation3 + $0x114] sm:$0xc] %v1452_v32  ;;  %v1626_v31 = vpop.permute.xlu1 %1625  ;;  %v1564_v4 = vpop.permute.xlu0 %1563 }
 0x15d   : > { %v9886_v56 = vld [vmem:[#allocation3 + $0xbc] ss:$28 sps:$4 sm:$0xff]   ;;  %1521 = vst [vmem:[#allocation3 + $0x128] sm:$0x33] %v1513_v37  ;;  %1459 = vst [vmem:[#allocation3 + $0x10c] sm:$0xcc] %v1451_v30  ;;  %9717 = vmatpush3.bf16.msra.mxu1 %v9885_v41 }
 0x15e   : > { %v9888_v62 = vld [vmem:[#allocation3 + $0xb8] ss:$28 sps:$4 sm:$0xff]   ;;  %v1630_v20 = vrot.slane %v1626_v31, 4  ;;  %v1568_v33 = vrot.slane %v1564_v4, 4  ;;  %2311 = vmatprep.subr.bf16.mxu0 %v9886_v56  ;;  %9718 = vmatprep.subr.bf16.mxu1 %v13304_v49  ;;  %v13428_v59 = vrot.slane %v10701_v63, 4  ;;  %vm13429_vm7 = vcmask 236544   ;;  %vm13430_vm5 = vmmov %vm13427_vm9 }
 0x15f   : > { %2312 = vmatpush1.bf16.msra.mxu0 %v9888_v62  ;;  %vm13431_vm12 = vmmov %vm13429_vm7  ;;  %v13432_v35 = vrot.slane %v10713_v51, 4  ;;  %v2389_v3 = vsub.s32 0, %v10223_v5  ;;  %v2393_v39 = vsub.s32 1, %v10223_v5  ;;  %v2397_v62 = vsub.s32 2, %v10223_v5 }
 0x160   : > { %v1636_v61 = vsel %vm286_vm0, %v13426_v7, %v1630_v20  ;;  %v1638_v27 = vsel %vm13427_vm9, %v1626_v31, %v1630_v20  ;;  %v1574_v21 = vsel %vm286_vm0, %v13428_v59, %v1568_v33  ;;  %v1576_v57 = vsel %vm13429_vm7, %v1564_v4, %v1568_v33  ;;  %v1750_v38 = vpop.permute.xlu1 %1749  ;;  %v1688_v14 = vpop.permute.xlu0 %1687 }
 0x161   : > { %v1637_v24 = vsel %vm13430_vm5, %v10699_v46, %v1636_v61  ;;  %1646 = vst [vmem:[#allocation3 + $0x14c] sm:$0x3] %v1638_v27  ;;  %v1575_v0 = vsel %vm13431_vm12, %v10701_v63, %v1574_v21  ;;  %1584 = vst [vmem:[#allocation3 + $0x130] sm:$0xc] %v1576_v57  ;;  %v1754_v50 = vrot.slane %v1750_v38, 4  ;;  %v1692_v22 = vrot.slane %v1688_v14, 4 }
 0x162   : > { %1645 = vst [vmem:[#allocation3 + $0x144] sm:$0x33] %v1637_v24  ;;  %1583 = vst [vmem:[#allocation3 + $0x128] sm:$0xcc] %v1575_v0  ;;  %vm13433_vm9 = vcmask 220160   ;;  %v10944_v42 = vrot.slane %v172_v9, %v2389_v3  ;;  %v10946_v2 = vrot.slane %v172_v9, %v2393_v39  ;;  %v2401_v20 = vsub.s32 3, %v10223_v5 }
 0x163   : > { %v1760_v18 = vsel %vm286_vm0, %v1753_v60, %v1754_v50  ;;  %v1762_v19 = vsel %vm1756_vm14, %v1750_v38, %v1754_v50  ;;  %v1698_v46 = vsel %vm286_vm0, %v13432_v35, %v1692_v22  ;;  %v1700_v36 = vsel %vm13433_vm9, %v1688_v14, %v1692_v22  ;;  %v9889_v63 = vld [vmem:[#allocation3 + $0xf8] ss:$28 sps:$4 sm:$0xff]   ;;  %vm13434_vm7 = vmmov %vm13433_vm9 }
 0x164   : > { %v1761_v40 = vsel %vm1756_vm14, %v10747_v29, %v1760_v18  ;;  %1770 = vst [vmem:[#allocation3 + $0x168] sm:$0x3] %v1762_v19  ;;  %v1699_v25 = vsel %vm13434_vm7, %v10713_v51, %v1698_v46  ;;  %1708 = vst [vmem:[#allocation3 + $0x14c] sm:$0xc] %v1700_v36  ;;  %v1874_v55 = vpop.permute.xlu1 %1873  ;;  %v1812_v45 = vpop.permute.xlu0 %1811  ;;  %v9890_v60 = vld [vmem:[#allocation3 + $0xf4] ss:$28 sps:$4 sm:$0xff]   ;;  %9719 = vmatpush3.bf16.msra.mxu1 %v9889_v63  ;;  %v10954_v33 = vrot.slane %v172_v9, %v2397_v62 }
 0x165   : > { %v9892_v17 = vld [vmem:[#allocation3 + $0xf0] ss:$28 sps:$4 sm:$0xff]   ;;  %1769 = vst [vmem:[#allocation3 + $0x160] sm:$0x33] %v1761_v40  ;;  %1707 = vst [vmem:[#allocation3 + $0x144] sm:$0xcc] %v1699_v25  ;;  %2313 = vmatprep.subr.bf16.mxu0 %v9890_v60  ;;  %9720 = vmatprep.subr.bf16.mxu1 %v13304_v49  ;;  %v10956_v7 = vrot.slane %v172_v9, %v2401_v20 }
 0x166   : > { %v1878_v44 = vrot.slane %v1874_v55, 4  ;;  %v1816_v54 = vrot.slane %v1812_v45, 4  ;;  %2314 = vmatpush1.bf16.msra.mxu0 %v9892_v17  ;;  %13435 = vst [vmem:[#allocation9_spill] sm:$0xff] %v10944_v42  ;;  %13436 = vst [vmem:[#allocation10_spill] sm:$0xff] %v10946_v2  ;;  %v2405_v22 = vsub.s32 4, %v10223_v5  ;;  %v2413_v18 = vsub.s32 6, %v10223_v5 }
 0x167   : > { %13437 = vst [vmem:[#allocation11_spill] sm:$0xff] %v10954_v33  ;;  %13438 = vst [vmem:[#allocation12_spill] sm:$0xff] %v10956_v7  ;;  %v2409_v19 = vsub.s32 5, %v10223_v5  ;;  %vm13449_vm5 = vcmask 973824   ;;  %vm13450_vm12 = vcmask 72704   ;;  %vm13451_vm9 = vcmask 957440  }
 0x168   : > { %v1884_v29 = vsel %vm286_vm0, %v1877_v47, %v1878_v44  ;;  %v1886_v34 = vsel %vm1880_vm11, %v1874_v55, %v1878_v44  ;;  %v1822_v51 = vsel %vm286_vm0, %v1815_v23, %v1816_v54  ;;  %v1824_v28 = vsel %vm1818_vm13, %v1812_v45, %v1816_v54 }
 0x169   : > { %v1885_v15 = vsel %vm1880_vm11, %v10760_v48, %v1884_v29  ;;  %1894 = vst [vmem:[#allocation3 + $0x184] sm:$0x3] %v1886_v34  ;;  %v1823_v8 = vsel %vm1818_vm13, %v10762_v58, %v1822_v51  ;;  %1832 = vst [vmem:[#allocation3 + $0x168] sm:$0xc] %v1824_v28  ;;  %v10965_v35 = vrot.slane %v172_v9, %v2405_v22  ;;  %vm13452_vm7 = vcmask 310272  }
 0x16a   : > { %1893 = vst [vmem:[#allocation3 + $0x17c] sm:$0x33] %v1885_v15  ;;  %1831 = vst [vmem:[#allocation3 + $0x160] sm:$0xcc] %v1823_v8  ;;  %v10967_v46 = vrot.slane %v172_v9, %v2413_v18  ;;  %v10969_v36 = vrot.slane %v172_v9, %v2409_v19 }
 0x16b   : > { %v9893_v47 = vld [vmem:[#allocation3 + $0x130] ss:$28 sps:$4 sm:$0xff]   ;;  %13439 = vst [vmem:[#allocation13_spill] sm:$0xff] %v10965_v35 }
 0x16c   : > { %v9894_v16 = vld [vmem:[#allocation3 + $0x12c] ss:$28 sps:$4 sm:$0xff]   ;;  %9721 = vmatpush3.bf16.msra.mxu1 %v9893_v47  ;;  %13440 = vst [vmem:[#allocation14_spill] sm:$0xff] %v10967_v46  ;;  %13441 = vst [vmem:[#allocation15_spill] sm:$0xff] %v10969_v36 }
 0x16d   : > { %v9896_v6 = vld [vmem:[#allocation3 + $0x128] ss:$28 sps:$4 sm:$0xff]   ;;  %2315 = vmatprep.subr.bf16.mxu0 %v9894_v16  ;;  %9722 = vmatprep.subr.bf16.mxu1 %v13304_v49 }
 0x16e   : > { %2316 = vmatpush1.bf16.msra.mxu0 %v9896_v6 }
 0x170   : > { %v9899_v52 = vld [vmem:[#allocation3 + $0x168] ss:$28 sps:$4 sm:$0x3f]  }
 0x171   : > { %v9897_v23 = vld [vmem:[#allocation3 + $0x164] ss:$28 sps:$4 sm:$0x3f]   ;;  %v2221_v48 = vsel %vm2201_vm2, %v9899_v52, 0 }
 0x172   : > { %v9900_v26 = vld [vmem:[#allocation3 + $0x160] ss:$28 sps:$4 sm:$0x3f]   ;;  %9478 = vmatprep.subr.msk.bf16.mxu0 %vm2201_vm2, %v9897_v23  ;;  %9723 = vmatpush3.bf16.msra.mxu1 %v2221_v48 }
 0x173   : > { %v2215_v58 = vsel %vm2201_vm2, %v9900_v26, 0 }
 0x174   : > { %2318 = vmatpush1.bf16.msra.mxu0 %v2215_v58 }
 0x175   : > { %9725 = vmatmul.mubr.msk.bf16.vlgmr.msra.gmra.mrb[4].mxu1 %vm2197_vm3, %v10780_v43 }
 0x176   : > { %4585 = vmatprep.mubr.bf16.mxu1 %v13306_v1 }
 0x177   : > { %9479 = vmatmul.mubr.msk.bf16.vlgmr.msra.gmra.mrb[4].mxu0 %vm2197_vm3, %v10780_v43 }
 0x178   : > { %4544 = vmatprep.mubr.bf16.mxu0 %v13306_v1 }
 0x212   : > { %v2257_v53 = vpop.f32.mrb[0].mxu0 }
 0x213   : > { %v2422_v32 = vmul.f32 %v10944_v42, %v2257_v53  ;;  %v2259_v43 = vpop.f32.mrb[1].mxu0 }
 0x214   : > { %v2423_v41 = vmul.f32 %v10946_v2, %v2259_v43  ;;  %v2261_v37 = vpop.f32.mrb[2].mxu0 }
 0x215   : > { %v2430_v30 = vsel %vm286_vm0, %v2422_v32, 0.0  ;;  %v2262_v31 = vpop.f32.mrb[3].mxu0 }
 0x216   : > { %v2431_v4 = vsel %vm286_vm0, %v2423_v41, 0.0 }
 0x217   : > { %v2432_v56 = vadd.f32 %v2431_v4, %v2430_v30 }
 0x21f   : > { %v2298_v61 = vpop.f32.mrb[0].mxu1 }
 0x220   : > { %v2424_v27 = vmul.f32 %v10954_v33, %v2298_v61  ;;  %v2300_v59 = vpop.f32.mrb[1].mxu1 }
 0x221   : > { %v2425_v21 = vmul.f32 %v10956_v7, %v2300_v59  ;;  %v2302_v57 = vpop.f32.mrb[2].mxu1 }
 0x222   : > { %v2433_v24 = vsel %vm286_vm0, %v2424_v27, 0.0  ;;  %v2303_v0 = vpop.f32.mrb[3].mxu1 }
 0x223   : > { %v2434_v38 = vadd.f32 %v2433_v24, %v2432_v56  ;;  %v2435_v14 = vsel %vm286_vm0, %v2425_v21, 0.0 }
 0x225   : > { %v2436_v50 = vadd.f32 %v2435_v14, %v2434_v38 }
 0x248   : > { %v2380_v40 = vpop.f32.mrb[4].mxu1 }
 0x249   : > { %v2428_v45 = vmul.f32 %v10967_v46, %v2380_v40  ;;  %v9726_v60 = vpop.f32.mrb[5].mxu1 }
 0x24a   : > { %v2339_v63 = vpop.f32.mrb[4].mxu0  ;;  %v2383_v54 = vpop.f32.mrb[6].mxu1 }
 0x24b   : > { %v2426_v25 = vmul.f32 %v10965_v35, %v2339_v63  ;;  %v2341_v55 = vpop.f32.mrb[5].mxu0  ;;  %v9727_v34 = vpop.f32.mrb[7].mxu1  ;;  %v2441_v15 = vsel %vm286_vm0, %v2428_v45, 0.0 }
 0x24c   : > { %v2427_v17 = vmul.f32 %v10969_v36, %v2341_v55  ;;  %v2343_v44 = vpop.f32.mrb[6].mxu0 }
 0x24d   : > { %v2437_v5 = vsel %vm286_vm0, %v2426_v25, 0.0  ;;  %v2344_v29 = vpop.f32.mrb[7].mxu0 }
 0x24e   : > { %v2438_v51 = vadd.f32 %v2437_v5, %v2436_v50  ;;  %v2439_v28 = vsel %vm286_vm0, %v2427_v17, 0.0 }
 0x250   : > { %v2440_v8 = vadd.f32 %v2439_v28, %v2438_v51 }
 0x252   : > { %v2442_v47 = vadd.f32 %v2441_v15, %v2440_v8 }
 0x254   : > { %2443 = vadd.xlane.f32.xlu0 %v2442_v47 }
 0x2e1   : > { %v2444_v16 = vpop.xlane.xlu0 %2443 }
 0x2e2   : > { %v2445_v6 = vmul.f32 0.001953125, %v2444_v16 }
 0x2e4   : > { %v2446_v23 = vsub.f32 %v2257_v53, %v2445_v6  ;;  %v2447_v52 = vsub.f32 %v2259_v43, %v2445_v6  ;;  %v2448_v26 = vsub.f32 %v2298_v61, %v2445_v6  ;;  %v2449_v48 = vsub.f32 %v2300_v59, %v2445_v6 }
 0x2e5   : > { %v2450_v58 = vsub.f32 %v2339_v63, %v2445_v6  ;;  %v2451_v3 = vsub.f32 %v2341_v55, %v2445_v6  ;;  %v2452_v37 = vsub.f32 %v2380_v40, %v2445_v6 }
 0x2e6   : > { %v2453_v9 = vmul.f32 %v2446_v23, %v10944_v42  ;;  %v2454_v39 = vmul.f32 %v2447_v52, %v10946_v2  ;;  %v2455_v32 = vmul.f32 %v2448_v26, %v10954_v33  ;;  %v2456_v41 = vmul.f32 %v2449_v48, %v10956_v7 }
 0x2e7   : > { %v2457_v30 = vmul.f32 %v2450_v58, %v10965_v35  ;;  %v2458_v53 = vmul.f32 %v2451_v3, %v10969_v36  ;;  %v2459_v27 = vmul.f32 %v2452_v37, %v10967_v46 }
 0x2e8   : > { %v2460_v31 = vmul.f32 %v2453_v9, %v2453_v9  ;;  %v2461_v4 = vmul.f32 %v2454_v39, %v2454_v39  ;;  %v2462_v56 = vmul.f32 %v2455_v32, %v2455_v32  ;;  %v2463_v43 = vmul.f32 %v2456_v41, %v2456_v41 }
 0x2e9   : > { %v2464_v59 = vmul.f32 %v2457_v30, %v2457_v30  ;;  %v2465_v24 = vmul.f32 %v2458_v53, %v2458_v53  ;;  %v2466_v14 = vmul.f32 %v2459_v27, %v2459_v27 }
 0x2ea   : > { %v2467_v62 = vsel %vm286_vm0, %v2460_v31, 0.0  ;;  %v2468_v20 = vsel %vm286_vm0, %v2461_v4, 0.0  ;;  %v2470_v21 = vsel %vm286_vm0, %v2462_v56, 0.0  ;;  %v2472_v0 = vsel %vm286_vm0, %v2463_v43, 0.0 }
 0x2eb   : > { %v2469_v61 = vadd.f32 %v2468_v20, %v2467_v62  ;;  %v2474_v50 = vsel %vm286_vm0, %v2464_v59, 0.0  ;;  %v2476_v18 = vsel %vm286_vm0, %v2465_v24, 0.0  ;;  %v2478_v63 = vsel %vm286_vm0, %v2466_v14, 0.0 }
 0x2ed   : > { %v2471_v57 = vadd.f32 %v2470_v21, %v2469_v61 }
 0x2ef   : > { %v2473_v38 = vadd.f32 %v2472_v0, %v2471_v57 }
 0x2f1   : > { %v2475_v22 = vadd.f32 %v2474_v50, %v2473_v38 }
 0x2f3   : > { %v2477_v19 = vadd.f32 %v2476_v18, %v2475_v22 }
 0x2f5   : > { %v2479_v40 = vadd.f32 %v2478_v63, %v2477_v19 }
 0x2f7   : > { %2480 = vadd.xlane.f32.xlu1 %v2479_v40 }
 0x384   : > { %v2481_v25 = vpop.xlane.xlu1 %2480 }
 0x385   : > { %v2482_v55 = vmul.f32 0.001953125, %v2481_v25 }
 0x387   : > { %v2483_v45 = vadd.f32 1e-05, %v2482_v55 }
 0x389   : > { %10129 = vrsqrt.f32 %v2483_v45 }
 0x393   : > { %v10130_v60 = vpop.eup %10129 }
 0x394   : > { %v2485_v17 = vmul.f32 %v10130_v60, %v2446_v23  ;;  %v2486_v44 = vmul.f32 %v10130_v60, %v2447_v52  ;;  %v2487_v54 = vmul.f32 %v10130_v60, %v2448_v26  ;;  %v2488_v5 = vmul.f32 %v10130_v60, %v2449_v48 }
 0x395   : > { %v2489_v29 = vmul.f32 %v10130_v60, %v2450_v58  ;;  %v2490_v34 = vmul.f32 %v10130_v60, %v2451_v3  ;;  %v2491_v51 = vmul.f32 %v10130_v60, %v2452_v37 }
 0x396   : > { %v2492_v28 = vmax.f32 %v2485_v17, 0.0  ;;  %v2493_v15 = vmax.f32 %v2486_v44, 0.0  ;;  %v2494_v8 = vmax.f32 %v2487_v54, 0.0  ;;  %v2495_v47 = vmax.f32 %v2488_v5, 0.0 }
 0x397   : > { %v2496_v16 = vmax.f32 %v2489_v29, 0.0  ;;  %v2497_v6 = vmax.f32 %v2490_v34, 0.0  ;;  %v2498_v9 = vmax.f32 %v2491_v51, 0.0 }
 0x398   : > { %v2499_v39 = vmul.f32 %v2492_v28, %v10944_v42  ;;  %v2500_v32 = vmul.f32 %v2493_v15, %v10946_v2  ;;  %v2501_v41 = vmul.f32 %v2494_v8, %v10954_v33  ;;  %v2502_v23 = vmul.f32 %v2495_v47, %v10956_v7 }
 0x399   : > { %v2503_v52 = vmul.f32 %v2496_v16, %v10965_v35  ;;  %v2504_v26 = vmul.f32 %v2497_v6, %v10969_v36  ;;  %v2505_v48 = vmul.f32 %v2498_v9, %v10967_v46 }
 0x39a   : > { %v9481_v58 = vpack.c.bf16 %v2500_v32, %v2499_v39  ;;  %v9482_v3 = vpack.c.bf16 %v2502_v23, %v2501_v41 }
 0x39b   : > { %v2512_v37 = vpack.c.bf16 %v2505_v48, %v2505_v48  ;;  %v9483_v30 = vpack.c.bf16 %v2504_v26, %v2503_v52 }
 0x39c   : > { %v2528_v31 = vrot.slane %v9481_v58, %v10241_v13  ;;  %v11000_v4 = vrot.slane %v9482_v3, %v10241_v13 }
 0x39d   : > { %v2544_v56 = vrot.slane %v9483_v30, %v10241_v13  ;;  %v2551_v53 = vrot.slane %v2512_v37, %v10241_v13 }
 0x39e   : > { %v2536_v43 = vcombine.low %v2528_v31, %v11000_v4  ;;  %v11005_v20 = vcombine.low %v2528_v31, %v2528_v31  ;;  %v10144_v28 = vcombine.low %v11000_v4, %v11000_v4 }
 0x39f   : > { %v2552_v62 = vcombine.low %v2544_v56, %v2551_v53 }
 0x3a0   : > { %2555 = vst [vmem:[#allocation2 + $0x2] sm:$0xff] %v2536_v43  ;;  %9485 = vst.sshfl [vmem:[#allocation3 + $0xb0] sm:$0xf0 pattern:$0x76325410] %v2536_v43  ;;  %v3471_v0 = vrot.slane %v2536_v43, %v10241_v13  ;;  %v3464_v54 = vrot.slane %v11005_v20, %v10241_v13  ;;  %v3532_v47 = vrot.slane %v10144_v28, %v10241_v13 }
 0x3a1   : > { %2556 = vst [vmem:[#allocation2 + $0xa] sm:$0x3f] %v2552_v62  ;;  %9484 = vst.sshfl [vmem:[#allocation3 + $0xa8] sm:$0xf0 pattern:$0x76325410] %v11005_v20 }
 0x3a7   : > { %v11008_v61 = vld [vmem:[#allocation2] sm:$0xff] }
 0x3a8   : > { %v2636_v27 = vrot.slane %v11008_v61, %v10241_v13  ;;  %v3351_v59 = vld [vmem:[#allocation2 + $0xa] sm:$0x3f]  ;;  %v2561_v50 = vcombine.high %v11008_v61, %v11008_v61  ;;  %v2622_v18 = vcombine.low %v11008_v61, %v11008_v61 }
 0x3a9   : > { %9487 = vst.sshfl [vmem:[#allocation3 + $0xc0] sm:$0x30 pattern:$0x76325410] %v3351_v59  ;;  %v3369_v21 = vcombine.low %v3351_v59, %v3351_v59  ;;  %v11014_v57 = vld [vmem:[#allocation2 + $0x8] sm:$0xff] }
 0x3aa   : > { %2654 = vrot.lane.b32.xlu1 %v2636_v27, %s10159_s18  ;;  %2591 = vrot.lane.b32.xlu0 %v2636_v27, %s10160_s19  ;;  %v2583_v24 = vrot.slane %v11014_v57, %v10241_v13  ;;  %v11029_v38 = vld [vmem:[#allocation2 + $0xa] sm:$0xff]  ;;  %v2575_v22 = vrot.slane %v2561_v50, %v10241_v13  ;;  %v2629_v19 = vrot.slane %v2622_v18, %v10241_v13 }
 0x3ab   : > { %9486 = vst.sshfl [vmem:[#allocation3 + $0xb8] sm:$0xf0 pattern:$0x76325410] %v3369_v21  ;;  %v11035_v14 = vrot.slane %v11029_v38, %v10241_v13  ;;  %v2637_v63 = vcombine.low %v11014_v57, %v11014_v57  ;;  %v3472_v5 = vcombine.low %v11029_v38, %v11029_v38  ;;  %v2576_v43 = vcombine.high %v11014_v57, %v11014_v57 }
 0x3ac   : > { %v3411_v21 = vcombine.high %v11029_v38, %v11029_v38 }
 0x3ad   : > { %v2644_v40 = vrot.slane %v2637_v63, %v10241_v13  ;;  %v3479_v51 = vrot.slane %v3472_v5, %v10241_v13  ;;  %v2590_v61 = vrot.slane %v2576_v43, %v10241_v13 }
 0x3ae   : > { %2776 = vrot.lane.b32.xlu1 %v2636_v27, %s10161_s20  ;;  %2713 = vrot.lane.b32.xlu0 %v2636_v27, %s13376_s21 }
 0x3b2   : > { %2898 = vrot.lane.b32.xlu1 %v2636_v27, %s13346_s22  ;;  %2595 = vrot.lane.b32.xlu0 %v2583_v24, %s10160_s19 }
 0x3b6   : > { %3020 = vrot.lane.b32.xlu1 %v2636_v27, %s13300_s25  ;;  %2717 = vrot.lane.b32.xlu0 %v2583_v24, %s13376_s21 }
 0x3ba   : > { %3142 = vrot.lane.b32.xlu1 %v2636_v27, %s10168_s27  ;;  %2835 = vrot.lane.b32.xlu0 %v2636_v27, %s10164_s23 }
 0x3be   : > { %3264 = vrot.lane.b32.xlu1 %v2636_v27, %s10170_s29  ;;  %2957 = vrot.lane.b32.xlu0 %v2636_v27, %s13374_s24 }
 0x3c2   : > { %3489 = vrot.lane.b32.xlu1 %v3471_v0, %s13302_s5  ;;  %2839 = vrot.lane.b32.xlu0 %v2583_v24, %s10164_s23 }
 0x3c6   : > { %3430 = vrot.lane.b32.xlu1 %v11035_v14, %s13298_s4  ;;  %2961 = vrot.lane.b32.xlu0 %v2583_v24, %s13374_s24 }
 0x3ca   : > { %3548 = vrot.lane.b32.xlu1 %v3471_v0, %s13344_s6  ;;  %3079 = vrot.lane.b32.xlu0 %v2636_v27, %s10167_s26 }
 0x3ce   : > { %3670 = vrot.lane.b32.xlu1 %v3471_v0, %s13296_s8  ;;  %3201 = vrot.lane.b32.xlu0 %v2636_v27, %s10169_s28 }
 0x3d2   : > { %3552 = vrot.lane.b32.xlu1 %v11035_v14, %s13344_s6  ;;  %3083 = vrot.lane.b32.xlu0 %v2583_v24, %s10167_s26 }
 0x3d6   : > { %3674 = vrot.lane.b32.xlu1 %v11035_v14, %s13296_s8  ;;  %3205 = vrot.lane.b32.xlu0 %v2583_v24, %s10169_s28  ;;  %s13444_s8 = smov 17  }
 0x3da   : > { %3792 = vrot.lane.b32.xlu1 %v3471_v0, %s13372_s10  ;;  %3323 = vrot.lane.b32.xlu0 %v2636_v27, %s13370_s30 }
 0x3de   : > { %3914 = vrot.lane.b32.xlu1 %v3471_v0, %s13341_s14  ;;  %3426 = vrot.lane.b32.xlu0 %v3471_v0, %s13298_s4  ;;  %s13445_s4 = smov 18  }
 0x3e2   : > { %3796 = vrot.lane.b32.xlu1 %v11035_v14, %s13372_s10  ;;  %3327 = vrot.lane.b32.xlu0 %v2583_v24, %s13370_s30 }
 0x3e6   : > { %3918 = vrot.lane.b32.xlu1 %v11035_v14, %s13341_s14  ;;  %3611 = vrot.lane.b32.xlu0 %v3471_v0, %s13442_s11 }
 0x3ea   : > { %4036 = vrot.lane.b32.xlu1 %v3471_v0, %s13339_s16  ;;  %3733 = vrot.lane.b32.xlu0 %v3471_v0, %s13443_s15 }
 0x3ee   : > { %4158 = vrot.lane.b32.xlu1 %v3471_v0, %s13444_s8  ;;  %3855 = vrot.lane.b32.xlu0 %v3471_v0, %s13403_s7 }
 0x3f2   : > { %4040 = vrot.lane.b32.xlu1 %v11035_v14, %s13339_s16  ;;  %3977 = vrot.lane.b32.xlu0 %v3471_v0, %s13404_s9 }
 0x3f6   : > { %4162 = vrot.lane.b32.xlu1 %v11035_v14, %s13444_s8  ;;  %4099 = vrot.lane.b32.xlu0 %v3471_v0, %s13445_s4  ;;  %v3425_v0 = vrot.slane %v3411_v21, %v10241_v13 }
 0x3fa   : > { %2902 = vrot.lane.b32.xlu1 %v2583_v24, %s13346_s22  ;;  %2658 = vrot.lane.b32.xlu0 %v2583_v24, %s10159_s18 }
 0x3fe   : > { %3024 = vrot.lane.b32.xlu1 %v2583_v24, %s13300_s25  ;;  %2780 = vrot.lane.b32.xlu0 %v2583_v24, %s10161_s20 }
 0x402   : > { %3146 = vrot.lane.b32.xlu1 %v2583_v24, %s10168_s27  ;;  %3493 = vrot.lane.b32.xlu0 %v11035_v14, %s13302_s5 }
 0x406   : > { %3268 = vrot.lane.b32.xlu1 %v2583_v24, %s10170_s29  ;;  %3615 = vrot.lane.b32.xlu0 %v11035_v14, %s13442_s11 }
 0x40a   : > { %3737 = vrot.lane.b32.xlu0 %v11035_v14, %s13443_s15  ;;  %2593 = vrot.lane.b32.xlu1 %v2575_v22, %s10160_s19 }
 0x40e   : > { %2652 = vrot.lane.b32.xlu0 %v2629_v19, %s10159_s18  ;;  %2715 = vrot.lane.b32.xlu1 %v2575_v22, %s13376_s21 }
 0x412   : > { %2774 = vrot.lane.b32.xlu0 %v2629_v19, %s10161_s20  ;;  %2656 = vrot.lane.b32.xlu1 %v2644_v40, %s10159_s18 }
 0x416   : > { %2896 = vrot.lane.b32.xlu0 %v2629_v19, %s13346_s22  ;;  %2778 = vrot.lane.b32.xlu1 %v2644_v40, %s10161_s20 }
 0x41a   : > { %3018 = vrot.lane.b32.xlu0 %v2629_v19, %s13300_s25  ;;  %2837 = vrot.lane.b32.xlu1 %v2575_v22, %s10164_s23 }
 0x41c   : > { %v11100_v25 = vpop.permute.xlu1 %2654  ;;  %v11102_v55 = vpop.permute.xlu0 %2591 }
 0x41d   : > { %v2599_v12 = vrot.slane %v11102_v55, 4 }
 0x41e   : > { %3140 = vrot.lane.b32.xlu0 %v2629_v19, %s10168_s27  ;;  %2959 = vrot.lane.b32.xlu1 %v2575_v22, %s13374_s24 }
 0x420   : > { %v11106_v45 = vpop.permute.xlu1 %2776  ;;  %v11108_v60 = vpop.permute.xlu0 %2713 }
 0x421   : > { %v2721_v2 = vrot.slane %v11108_v60, 4 }
 0x422   : > { %3262 = vrot.lane.b32.xlu0 %v2629_v19, %s10170_s29  ;;  %2900 = vrot.lane.b32.xlu1 %v2644_v40, %s13346_s22 }
 0x424   : > { %v11112_v17 = vpop.permute.xlu1 %2898  ;;  %v11114_v44 = vpop.permute.xlu0 %2595 }
 0x425   : > { %v13336_v11 = vrot.slane %v11114_v44, 4 }
 0x426   : > { %3487 = vrot.lane.b32.xlu0 %v3464_v54, %s13302_s5  ;;  %3022 = vrot.lane.b32.xlu1 %v2644_v40, %s13300_s25  ;;  %s13447_s25 = smov 39  }
 0x428   : > { %v11122_v29 = vpop.permute.xlu1 %3020  ;;  %v11124_v34 = vpop.permute.xlu0 %2717 }
 0x429   : > { %13446 = vst [vmem:[#allocation16_spill] sm:$0xff] %v11124_v34 }
 0x42a   : > { %3491 = vrot.lane.b32.xlu0 %v3479_v51, %s13302_s5  ;;  %3081 = vrot.lane.b32.xlu1 %v2575_v22, %s10167_s26  ;;  %s13448_s5 = smov 127  }
 0x42c   : > { %v11131_v15 = vpop.permute.xlu1 %3142  ;;  %v11133_v8 = vpop.permute.xlu0 %2835 }
 0x42e   : > { %3550 = vrot.lane.b32.xlu0 %v3532_v47, %s13344_s6  ;;  %3203 = vrot.lane.b32.xlu1 %v2575_v22, %s10169_s28 }
 0x430   : > { %v11138_v16 = vpop.permute.xlu1 %3264  ;;  %v11140_v6 = vpop.permute.xlu0 %2957 }
 0x432   : > { %3672 = vrot.lane.b32.xlu0 %v3532_v47, %s13447_s25  ;;  %3144 = vrot.lane.b32.xlu1 %v2644_v40, %s10168_s27 }
 0x434   : > { %v11144_v9 = vpop.permute.xlu1 %3489  ;;  %v11146_v39 = vpop.permute.xlu0 %2839 }
 0x436   : > { %3613 = vrot.lane.b32.xlu0 %v3479_v51, %s13442_s11  ;;  %3266 = vrot.lane.b32.xlu1 %v2644_v40, %s10170_s29 }
 0x438   : > { %v11150_v32 = vpop.permute.xlu1 %3430  ;;  %v11152_v41 = vpop.permute.xlu0 %2961 }
 0x43a   : > { %3735 = vrot.lane.b32.xlu0 %v3479_v51, %s13443_s15  ;;  %3325 = vrot.lane.b32.xlu1 %v2575_v22, %s13370_s30 }
 0x43c   : > { %v11156_v23 = vpop.permute.xlu1 %3548  ;;  %v11158_v52 = vpop.permute.xlu0 %3079 }
 0x43e   : > { %3794 = vrot.lane.b32.xlu0 %v3532_v47, %s13372_s10  ;;  %3428 = vrot.lane.b32.xlu1 %v3532_v47, %s13448_s5 }
 0x440   : > { %v11162_v26 = vpop.permute.xlu1 %3670  ;;  %v11164_v48 = vpop.permute.xlu0 %3201 }
 0x442   : > { %3916 = vrot.lane.b32.xlu0 %v3532_v47, %s13341_s14  ;;  %3609 = vrot.lane.b32.xlu1 %v3464_v54, %s13442_s11 }
 0x444   : > { %v11168_v58 = vpop.permute.xlu1 %3552  ;;  %v11170_v3 = vpop.permute.xlu0 %3083 }
 0x446   : > { %3857 = vrot.lane.b32.xlu0 %v3479_v51, %s13403_s7  ;;  %3731 = vrot.lane.b32.xlu1 %v3464_v54, %s13443_s15 }
 0x448   : > { %v11174_v37 = vpop.permute.xlu1 %3674  ;;  %v11176_v30 = vpop.permute.xlu0 %3205 }
 0x44a   : > { %3979 = vrot.lane.b32.xlu0 %v3479_v51, %s13404_s9  ;;  %3853 = vrot.lane.b32.xlu1 %v3464_v54, %s13403_s7 }
 0x44c   : > { %v11180_v31 = vpop.permute.xlu1 %3792  ;;  %v11182_v4 = vpop.permute.xlu0 %3323 }
 0x44e   : > { %4038 = vrot.lane.b32.xlu0 %v3532_v47, %s13339_s16  ;;  %3975 = vrot.lane.b32.xlu1 %v3464_v54, %s13404_s9 }
 0x450   : > { %v11186_v56 = vpop.permute.xlu1 %3914  ;;  %v11188_v53 = vpop.permute.xlu0 %3426 }
 0x452   : > { %4160 = vrot.lane.b32.xlu0 %v3532_v47, %s13444_s8  ;;  %4097 = vrot.lane.b32.xlu1 %v3464_v54, %s13445_s4 }
 0x454   : > { %v11194_v62 = vpop.permute.xlu1 %3796  ;;  %v11196_v20 = vpop.permute.xlu0 %3327 }
 0x456   : > { %4101 = vrot.lane.b32.xlu0 %v3479_v51, %s13445_s4  ;;  %2597 = vrot.lane.b32.xlu1 %v2590_v61, %s10160_s19 }
 0x458   : > { %v11201_v27 = vpop.permute.xlu1 %3918  ;;  %v11203_v59 = vpop.permute.xlu0 %3611 }
 0x45a   : > { %2841 = vrot.lane.b32.xlu0 %v2590_v61, %s10164_s23  ;;  %2719 = vrot.lane.b32.xlu1 %v2590_v61, %s13376_s21 }
 0x45c   : > { %v11209_v57 = vpop.permute.xlu1 %4036  ;;  %v11211_v24 = vpop.permute.xlu0 %3733 }
 0x45e   : > { %2963 = vrot.lane.b32.xlu0 %v2590_v61, %s13374_s24  ;;  %3432 = vrot.lane.b32.xlu1 %v3425_v0, %s13448_s5 }
 0x460   : > { %v11216_v50 = vpop.permute.xlu1 %4158  ;;  %v11218_v22 = vpop.permute.xlu0 %3855 }
 0x462   : > { %3085 = vrot.lane.b32.xlu0 %v2590_v61, %s10167_s26  ;;  %3554 = vrot.lane.b32.xlu1 %v3425_v0, %s13344_s6 }
 0x464   : > { %v11222_v38 = vpop.permute.xlu1 %4040  ;;  %v11224_v18 = vpop.permute.xlu0 %3977 }
 0x466   : > { %3207 = vrot.lane.b32.xlu0 %v2590_v61, %s10169_s28  ;;  %3676 = vrot.lane.b32.xlu1 %v3425_v0, %s13447_s25 }
 0x468   : > { %v11228_v19 = vpop.permute.xlu1 %4162  ;;  %v11230_v63 = vpop.permute.xlu0 %4099 }
 0x46a   : > { %3329 = vrot.lane.b32.xlu0 %v2590_v61, %s13370_s30  ;;  %3798 = vrot.lane.b32.xlu1 %v3425_v0, %s13372_s10 }
 0x46c   : > { %v11234_v40 = vpop.permute.xlu1 %2902  ;;  %v11236_v54 = vpop.permute.xlu0 %2658 }
 0x46d   : > { %v13308_v5 = vrot.slane %v11234_v40, 4  ;;  %v13309_v51 = vrot.slane %v11236_v54, 4 }
 0x46e   : > { %3859 = vrot.lane.b32.xlu0 %v11035_v14, %s13403_s7  ;;  %3920 = vrot.lane.b32.xlu1 %v3425_v0, %s13341_s14  ;;  %s13543_s14 = smov 119  }
 0x46f   : > { %v2914_v28 = vsel %vm598_vm6, %v11234_v40, %v13308_v5  ;;  %v2670_v47 = vsel %vm350_vm1, %v11236_v54, %v13309_v51 }
 0x470   : > { %2922 = vst [vmem:[#allocation3 + $0x50] sm:$0xc] %v2914_v28  ;;  %2678 = vst [vmem:[#allocation3 + $0x18] sm:$0xc] %v2670_v47  ;;  %v11251_v43 = vpop.permute.xlu1 %3024  ;;  %v11253_v61 = vpop.permute.xlu0 %2780 }
 0x471   : > { %v13312_v21 = vrot.slane %v11251_v43, 4  ;;  %v13313_v49 = vrot.slane %v11253_v61, 4 }
 0x472   : > { %3981 = vrot.lane.b32.xlu0 %v11035_v14, %s13404_s9  ;;  %4042 = vrot.lane.b32.xlu1 %v3425_v0, %s13339_s16  ;;  %s13544_s16 = smov 28  }
 0x473   : > { %v3036_v1 = vsel %vm722_vm8, %v11251_v43, %v13312_v21  ;;  %v2792_v28 = vsel %vm474_vm4, %v11253_v61, %v13313_v49 }
 0x474   : > { %3044 = vst [vmem:[#allocation3 + $0x6c] sm:$0xc] %v3036_v1  ;;  %2800 = vst [vmem:[#allocation3 + $0x34] sm:$0xc] %v2792_v28  ;;  %v11268_v47 = vpop.permute.xlu1 %3146  ;;  %v11270_v5 = vpop.permute.xlu0 %3493 }
 0x475   : > { %v13314_v51 = vrot.slane %v11268_v47, 4  ;;  %v13315_v13 = vrot.slane %v11270_v5, 4 }
 0x476   : > { %4103 = vrot.lane.b32.xlu0 %v11035_v14, %s13445_s4  ;;  %4164 = vrot.lane.b32.xlu1 %v3425_v0, %s13444_s8 }
 0x477   : > { %v3158_v21 = vsel %vm846_vm10, %v11268_v47, %v13314_v51  ;;  %v3505_v1 = vsel %vm13449_vm5, %v11270_v5, %v13315_v13  ;;  %vm13453_vm5 = vcmask 908288  }
 0x478   : > { %3166 = vst [vmem:[#allocation3 + $0x88] sm:$0xc] %v3158_v21  ;;  %3513 = vst [vmem:[#allocation3 + $0xdc] sm:$0xc] %v3505_v1  ;;  %v11285_v28 = vpop.permute.xlu1 %3268  ;;  %v11287_v49 = vpop.permute.xlu0 %3615 }
 0x479   : > { %v13321_v14 = vrot.slane %v11285_v28, 4  ;;  %v13324_v0 = vrot.slane %v11287_v49, 4 }
 0x47b   : > { %v3280_v51 = vsel %vm13450_vm12, %v11285_v28, %v13321_v14  ;;  %v3627_v13 = vsel %vm13451_vm9, %v11287_v49, %v13324_v0  ;;  %vm13454_vm12 = vmmov %vm13453_vm5  ;;  %vm13455_vm9 = vcmask 891904  }
 0x47c   : > { %3288 = vst [vmem:[#allocation3 + $0xa4] sm:$0xc] %v3280_v51  ;;  %3635 = vst [vmem:[#allocation3 + $0xf8] sm:$0xc] %v3627_v13  ;;  %v11299_v21 = vpop.permute.xlu0 %3737  ;;  %v2594_v1 = vpop.permute.xlu1 %2593  ;;  %v2661_v51 = vrot.slane %v11100_v25, 4 }
 0x47d   : > { %v13333_v10 = vrot.slane %v11299_v21, 4  ;;  %v2600_v36 = vrot.slane %v2594_v1, 4 }
 0x47f   : > { %v3749_v14 = vsel %vm13452_vm7, %v11299_v21, %v13333_v10  ;;  %v2603_v46 = vsel %vm286_vm0, %v2599_v12, %v2600_v36  ;;  %v2605_v13 = vsel %vm286_vm0, %v2600_v36, %v13336_v11  ;;  %v2723_v10 = vrot.slane %v11124_v34, 4  ;;  %vm13456_vm7 = vmmov %vm13455_vm9 }
 0x480   : > { %3757 = vst [vmem:[#allocation3 + $0x114] sm:$0xc] %v3749_v14  ;;  %v2604_v0 = vsel %vm13453_vm5, %v11102_v55, %v2603_v46  ;;  %v2606_v35 = vsel %vm13454_vm12, %v2594_v1, %v2605_v13  ;;  %v2653_v7 = vpop.permute.xlu0 %2652  ;;  %v2716_v33 = vpop.permute.xlu1 %2715  ;;  %vm13459_vm5 = vcmask 818176  }
 0x481   : > { %2614 = vst [vmem:[#allocation3] sm:$0x33] %v2604_v0  ;;  %2615 = vst [vmem:[#allocation3 + $0x8] sm:$0x33] %v2606_v35  ;;  %v2660_v12 = vrot.slane %v2653_v7, 4  ;;  %v2722_v42 = vrot.slane %v2716_v33, 4 }
 0x482   : > { %v2783_v35 = vrot.slane %v11106_v45, 4  ;;  %vm13460_vm12 = vmmov %vm13459_vm5 }
 0x483   : > { %v2664_v36 = vsel %vm286_vm0, %v2660_v12, %v2661_v51  ;;  %v2725_v11 = vsel %vm286_vm0, %v2721_v2, %v2722_v42  ;;  %v2727_v46 = vsel %vm286_vm0, %v2722_v42, %v2723_v10 }
 0x484   : > { %v2665_v55 = vsel %vm350_vm1, %v2653_v7, %v2664_v36  ;;  %v2726_v14 = vsel %vm13455_vm9, %v11108_v60, %v2725_v11  ;;  %v2728_v1 = vsel %vm13456_vm7, %v2716_v33, %v2727_v46  ;;  %v2775_v13 = vpop.permute.xlu0 %2774  ;;  %v2657_v0 = vpop.permute.xlu1 %2656  ;;  %v13457_v7 = vrot.slane %v11236_v54, 4 }
 0x485   : > { %2675 = vst [vmem:[#allocation3] sm:$0xcc] %v2665_v55  ;;  %2736 = vst [vmem:[#allocation3 + $0x1c] sm:$0x33] %v2726_v14  ;;  %v2782_v12 = vrot.slane %v2775_v13, 4  ;;  %v2662_v2 = vrot.slane %v2657_v0, 4 }
 0x486   : > { %2737 = vst [vmem:[#allocation3 + $0x24] sm:$0x33] %v2728_v1  ;;  %v2905_v14 = vrot.slane %v11112_v17, 4  ;;  %vm13461_vm9 = vcmask 744448  }
 0x487   : > { %v2786_v34 = vsel %vm286_vm0, %v2782_v12, %v2783_v35  ;;  %v2666_v42 = vsel %vm286_vm0, %v2661_v51, %v2662_v2  ;;  %v2668_v36 = vsel %vm286_vm0, %v2662_v2, %v13457_v7  ;;  %vm13462_vm7 = vmmov %vm13461_vm9 }
 0x488   : > { %v2787_v11 = vsel %vm474_vm4, %v2775_v13, %v2786_v34  ;;  %v2667_v33 = vsel %vm350_vm1, %v11100_v25, %v2666_v42  ;;  %v2669_v60 = vsel %vm350_vm1, %v2657_v0, %v2668_v36  ;;  %v2897_v46 = vpop.permute.xlu0 %2896  ;;  %v2779_v55 = vpop.permute.xlu1 %2778  ;;  %v13458_v34 = vrot.slane %v11253_v61, 4 }
 0x489   : > { %2797 = vst [vmem:[#allocation3 + $0x1c] sm:$0xcc] %v2787_v11  ;;  %2676 = vst [vmem:[#allocation3 + $0x8] sm:$0xcc] %v2667_v33  ;;  %v2904_v1 = vrot.slane %v2897_v46, 4  ;;  %v2784_v51 = vrot.slane %v2779_v55, 4 }
 0x48a   : > { %2677 = vst [vmem:[#allocation3 + $0x10] sm:$0xcc] %v2669_v60  ;;  %v3027_v25 = vrot.slane %v11122_v29, 4  ;;  %v2843_v11 = vrot.slane %v11133_v8, 4  ;;  %v2845_v33 = vrot.slane %v11146_v39, 4 }
 0x48b   : > { %v2908_v54 = vsel %vm286_vm0, %v2904_v1, %v2905_v14  ;;  %v2788_v12 = vsel %vm286_vm0, %v2783_v35, %v2784_v51  ;;  %v2790_v13 = vsel %vm286_vm0, %v2784_v51, %v13458_v34 }
 0x48c   : > { %v2909_v0 = vsel %vm598_vm6, %v2897_v46, %v2908_v54  ;;  %v2789_v2 = vsel %vm474_vm4, %v11106_v45, %v2788_v12  ;;  %v2791_v42 = vsel %vm474_vm4, %v2779_v55, %v2790_v13  ;;  %v3019_v7 = vpop.permute.xlu0 %3018  ;;  %v2838_v36 = vpop.permute.xlu1 %2837  ;;  %v3149_v55 = vrot.slane %v11131_v15, 4 }
 0x48d   : > { %2919 = vst [vmem:[#allocation3 + $0x38] sm:$0xcc] %v2909_v0  ;;  %2798 = vst [vmem:[#allocation3 + $0x24] sm:$0xcc] %v2789_v2  ;;  %v3026_v61 = vrot.slane %v3019_v7, 4  ;;  %v2844_v35 = vrot.slane %v2838_v36, 4 }
 0x48e   : > { %2799 = vst [vmem:[#allocation3 + $0x2c] sm:$0xcc] %v2791_v42  ;;  %v2965_v2 = vrot.slane %v11140_v6, 4  ;;  %v2967_v42 = vrot.slane %v11152_v41, 4 }
 0x48f   : > { %v3030_v60 = vsel %vm286_vm0, %v3026_v61, %v3027_v25  ;;  %v2847_v46 = vsel %vm286_vm0, %v2843_v11, %v2844_v35  ;;  %v2849_v45 = vsel %vm286_vm0, %v2844_v35, %v2845_v33 }
 0x490   : > { %v3031_v1 = vsel %vm722_vm8, %v3019_v7, %v3030_v60  ;;  %v2848_v51 = vsel %vm13459_vm5, %v11133_v8, %v2847_v46  ;;  %v2850_v54 = vsel %vm13460_vm12, %v2838_v36, %v2849_v45  ;;  %v3141_v12 = vpop.permute.xlu0 %3140  ;;  %v2960_v34 = vpop.permute.xlu1 %2959  ;;  %v9905_v13 = vld [vmem:[#allocation3 + $0x4] ss:$28 sps:$4 sm:$0xff]   ;;  %vm13464_vm5 = vcmask 72704  }
 0x491   : > { %v9907_v0 = vld [vmem:[#allocation3] ss:$28 sps:$4 sm:$0xff]   ;;  %3041 = vst [vmem:[#allocation3 + $0x54] sm:$0xcc] %v3031_v1  ;;  %2858 = vst [vmem:[#allocation3 + $0x38] sm:$0x33] %v2848_v51  ;;  %4512 = vmatprep.subr.bf16.mxu0 %v9905_v13 }
 0x492   : > { %2859 = vst [vmem:[#allocation3 + $0x40] sm:$0x33] %v2850_v54  ;;  %v3148_v11 = vrot.slane %v3141_v12, 4  ;;  %v2966_v61 = vrot.slane %v2960_v34, 4  ;;  %4513 = vmatpush1.bf16.msra.mxu0 %v9907_v0  ;;  %v3271_v13 = vrot.slane %v11138_v16, 4  ;;  %vm13466_vm12 = vcmask 973824  }
 0x494   : > { %v3152_v8 = vsel %vm286_vm0, %v3148_v11, %v3149_v55  ;;  %v2969_v7 = vsel %vm286_vm0, %v2965_v2, %v2966_v61  ;;  %v2971_v36 = vsel %vm286_vm0, %v2966_v61, %v2967_v42  ;;  %v3263_v45 = vpop.permute.xlu0 %3262  ;;  %v2901_v1 = vpop.permute.xlu1 %2900  ;;  %v9908_v51 = vld [vmem:[#allocation3 + $0xc] ss:$28 sps:$4 sm:$0xff]  }
 0x495   : > { %v3153_v35 = vsel %vm846_vm10, %v3141_v12, %v3152_v8  ;;  %v2970_v60 = vsel %vm13461_vm9, %v11140_v6, %v2969_v7  ;;  %v2972_v46 = vsel %vm13462_vm7, %v2960_v34, %v2971_v36  ;;  %v9910_v54 = vld [vmem:[#allocation3 + $0x8] ss:$28 sps:$4 sm:$0xff]   ;;  %v3270_v2 = vrot.slane %v3263_v45, 4  ;;  %4553 = vmatprep.subr.bf16.mxu1 %v9908_v51  ;;  %vm13468_vm9 = vmmov %vm13466_vm12 }
 0x496   : > { %3163 = vst [vmem:[#allocation3 + $0x70] sm:$0xcc] %v3153_v35  ;;  %2980 = vst [vmem:[#allocation3 + $0x54] sm:$0x33] %v2970_v60  ;;  %v2906_v11 = vrot.slane %v2901_v1, 4  ;;  %v13463_v34 = vrot.slane %v11234_v40, 4  ;;  %4554 = vmatpush1.bf16.msra.mxu1 %v9910_v54 }
 0x497   : > { %2981 = vst [vmem:[#allocation3 + $0x5c] sm:$0x33] %v2972_v46  ;;  %v3274_v12 = vsel %vm286_vm0, %v3270_v2, %v3271_v13  ;;  %v3496_v60 = vrot.slane %v11144_v9, 4  ;;  %v13465_v51 = vrot.slane %v11251_v43, 4  ;;  %vm13469_vm7 = vmmov %vm13468_vm9 }
 0x498   : > { %v2910_v6 = vsel %vm286_vm0, %v2905_v14, %v2906_v11  ;;  %v2912_v0 = vsel %vm286_vm0, %v2906_v11, %v13463_v34  ;;  %v3275_v61 = vsel %vm13464_vm5, %v3263_v45, %v3274_v12  ;;  %v3488_v36 = vpop.permute.xlu0 %3487  ;;  %v3023_v35 = vpop.permute.xlu1 %3022  ;;  %vm13470_vm5 = vcmask 728064  }
 0x499   : > { %v2911_v8 = vsel %vm598_vm6, %v11112_v17, %v2910_v6  ;;  %v2913_v7 = vsel %vm598_vm6, %v2901_v1, %v2912_v0  ;;  %3285 = vst [vmem:[#allocation3 + $0x8c] sm:$0xcc] %v3275_v61  ;;  %v3495_v14 = vrot.slane %v3488_v36, 4  ;;  %v3028_v46 = vrot.slane %v3023_v35, 4 }
 0x49a   : > { %2920 = vst [vmem:[#allocation3 + $0x40] sm:$0xcc] %v2911_v8  ;;  %2921 = vst [vmem:[#allocation3 + $0x48] sm:$0xcc] %v2913_v7  ;;  %v3087_v0 = vrot.slane %v11158_v52, 4  ;;  %v3089_v61 = vrot.slane %v11170_v3, 4 }
 0x49b   : > { %v3499_v40 = vsel %vm286_vm0, %v3495_v14, %v3496_v60  ;;  %v3032_v45 = vsel %vm286_vm0, %v3027_v25, %v3028_v46  ;;  %v3034_v17 = vsel %vm286_vm0, %v3028_v46, %v13465_v51  ;;  %v3556_v8 = vrot.slane %v11156_v23, 4 }
 0x49c   : > { %v3500_v1 = vsel %vm13466_vm12, %v3488_v36, %v3499_v40  ;;  %v3033_v54 = vsel %vm722_vm8, %v11122_v29, %v3032_v45  ;;  %v3035_v2 = vsel %vm722_vm8, %v3023_v35, %v3034_v17  ;;  %v3492_v11 = vpop.permute.xlu0 %3491  ;;  %v3082_v12 = vpop.permute.xlu1 %3081  ;;  %v3209_v7 = vrot.slane %v11164_v48, 4  ;;  %vm13471_vm12 = vmmov %vm13470_vm5 }
 0x49d   : > { %v9911_v6 = vld [vmem:[#allocation3 + $0x3c] ss:$28 sps:$4 sm:$0xff]   ;;  %3510 = vst [vmem:[#allocation3 + $0xc4] sm:$0xcc] %v3500_v1  ;;  %3042 = vst [vmem:[#allocation3 + $0x5c] sm:$0xcc] %v3033_v54 }
 0x49e   : > { %v9913_v34 = vld [vmem:[#allocation3 + $0x38] ss:$28 sps:$4 sm:$0xff]   ;;  %3043 = vst [vmem:[#allocation3 + $0x64] sm:$0xcc] %v3035_v2  ;;  %v3497_v43 = vrot.slane %v3492_v11, 4  ;;  %v3088_v25 = vrot.slane %v3082_v12, 4  ;;  %4514 = vmatprep.subr.bf16.mxu0 %v9911_v6 }
 0x49f   : > { %v13467_v36 = vrot.slane %v11270_v5, 4  ;;  %4515 = vmatpush1.bf16.msra.mxu0 %v9913_v34  ;;  %v3558_v1 = vrot.slane %v11168_v58, 4  ;;  %v3211_v54 = vrot.slane %v11176_v30, 4 }
 0x4a0   : > { %v3501_v29 = vsel %vm286_vm0, %v3496_v60, %v3497_v43  ;;  %v3091_v14 = vsel %vm286_vm0, %v3087_v0, %v3088_v25  ;;  %v3093_v46 = vsel %vm286_vm0, %v3088_v25, %v3089_v61  ;;  %v3551_v5 = vpop.permute.xlu0 %3550  ;;  %v3204_v17 = vpop.permute.xlu1 %3203 }
 0x4a1   : > { %v3503_v35 = vsel %vm286_vm0, %v3497_v43, %v13467_v36  ;;  %v3502_v40 = vsel %vm13468_vm9, %v11144_v9, %v3501_v29  ;;  %v3092_v51 = vsel %vm13470_vm5, %v11158_v52, %v3091_v14  ;;  %v3094_v60 = vsel %vm13471_vm12, %v3082_v12, %v3093_v46 }
 0x4a2   : > { %v3504_v45 = vsel %vm13469_vm7, %v3492_v11, %v3503_v35  ;;  %3511 = vst [vmem:[#allocation3 + $0xcc] sm:$0xcc] %v3502_v40  ;;  %3102 = vst [vmem:[#allocation3 + $0x70] sm:$0x33] %v3092_v51  ;;  %v3557_v2 = vrot.slane %v3551_v5, 4  ;;  %v3210_v6 = vrot.slane %v3204_v17, 4 }
 0x4a3   : > { %3512 = vst [vmem:[#allocation3 + $0xd4] sm:$0xcc] %v3504_v45  ;;  %3103 = vst [vmem:[#allocation3 + $0x78] sm:$0x33] %v3094_v60  ;;  %vm13472_vm9 = vcmask 965632   ;;  %vm13474_vm5 = vcmask 80896  }
 0x4a4   : > { %v3560_v9 = vsel %vm286_vm0, %v3556_v8, %v3557_v2  ;;  %v3562_v52 = vsel %vm286_vm0, %v3557_v2, %v3558_v1  ;;  %v3213_v11 = vsel %vm286_vm0, %v3209_v7, %v3210_v6  ;;  %v3215_v12 = vsel %vm286_vm0, %v3210_v6, %v3211_v54  ;;  %vm13473_vm7 = vmmov %vm13472_vm9  ;;  %v3673_v8 = vpop.permute.xlu0 %3672  ;;  %v3145_v29 = vpop.permute.xlu1 %3144  ;;  %v9914_v36 = vld [vmem:[#allocation3 + $0x44] ss:$28 sps:$4 sm:$0xff]  }
 0x4a5   : > { %v3561_v34 = vsel %vm13472_vm9, %v11156_v23, %v3560_v9  ;;  %v3563_v0 = vsel %vm13473_vm7, %v3551_v5, %v3562_v52  ;;  %v3214_v43 = vsel %vm13474_vm5, %v11164_v48, %v3213_v11  ;;  %vm13475_vm12 = vmmov %vm13474_vm5  ;;  %v9916_v35 = vld [vmem:[#allocation3 + $0x40] ss:$28 sps:$4 sm:$0xff]   ;;  %v3678_v7 = vrot.slane %v11162_v26, 4  ;;  %4555 = vmatprep.subr.bf16.mxu1 %v9914_v36 }
 0x4a6   : > { %v3216_v25 = vsel %vm13475_vm12, %v3204_v17, %v3215_v12  ;;  %v3680_v14 = vrot.slane %v11174_v37, 4  ;;  %3571 = vst [vmem:[#allocation3 + $0xe0] sm:$0x33] %v3561_v34  ;;  %3572 = vst [vmem:[#allocation3 + $0xe8] sm:$0x33] %v3563_v0  ;;  %v3679_v23 = vrot.slane %v3673_v8, 4  ;;  %4556 = vmatpush1.bf16.msra.mxu1 %v9916_v35 }
 0x4a7   : > { %3224 = vst [vmem:[#allocation3 + $0x8c] sm:$0x33] %v3214_v43  ;;  %3225 = vst [vmem:[#allocation3 + $0x94] sm:$0x33] %v3216_v25  ;;  %v3150_v46 = vrot.slane %v3145_v29, 4  ;;  %v13476_v51 = vrot.slane %v11268_v47, 4 }
 0x4a8   : > { %v3682_v40 = vsel %vm286_vm0, %v3678_v7, %v3679_v23  ;;  %v3684_v48 = vsel %vm286_vm0, %v3679_v23, %v3680_v14  ;;  %vm13477_vm9 = vcmask 318464   ;;  %v3614_v9 = vpop.permute.xlu0 %3613  ;;  %v3267_v52 = vpop.permute.xlu1 %3266  ;;  %v3618_v11 = vrot.slane %v11203_v59, 4 }
 0x4a9   : > { %v3154_v45 = vsel %vm286_vm0, %v3149_v55, %v3150_v46  ;;  %v3156_v60 = vsel %vm286_vm0, %v3150_v46, %v13476_v51  ;;  %v3683_v5 = vsel %vm13477_vm9, %v11162_v26, %v3682_v40  ;;  %vm13478_vm7 = vmmov %vm13477_vm9  ;;  %v3619_v47 = vrot.slane %v3614_v9, 4 }
 0x4aa   : > { %v3685_v17 = vsel %vm13478_vm7, %v3673_v8, %v3684_v48  ;;  %v3155_v2 = vsel %vm846_vm10, %v11131_v15, %v3154_v45  ;;  %v3157_v6 = vsel %vm846_vm10, %v3145_v29, %v3156_v60  ;;  %3693 = vst [vmem:[#allocation3 + $0xfc] sm:$0x33] %v3683_v5  ;;  %v3272_v55 = vrot.slane %v3267_v52, 4 }
 0x4ab   : > { %3694 = vst [vmem:[#allocation3 + $0x104] sm:$0x33] %v3685_v17  ;;  %3164 = vst [vmem:[#allocation3 + $0x78] sm:$0xcc] %v3155_v2  ;;  %v3331_v12 = vrot.slane %v11182_v4, 4  ;;  %v3623_v26 = vsel %vm286_vm0, %v3618_v11, %v3619_v47  ;;  %v13479_v15 = vrot.slane %v11287_v49, 4 }
 0x4ac   : > { %3165 = vst [vmem:[#allocation3 + $0x80] sm:$0xcc] %v3157_v6  ;;  %v3276_v0 = vsel %vm286_vm0, %v3271_v13, %v3272_v55  ;;  %v13480_v43 = vrot.slane %v11285_v28, 4  ;;  %vm13481_vm5 = vcmask 957440   ;;  %vm13483_vm9 = vcmask 72704   ;;  %v3736_v35 = vpop.permute.xlu0 %3735  ;;  %v3326_v7 = vpop.permute.xlu1 %3325 }
 0x4ad   : > { %v3625_v34 = vsel %vm286_vm0, %v3619_v47, %v13479_v15  ;;  %v3624_v8 = vsel %vm13481_vm5, %v11203_v59, %v3623_v26  ;;  %vm13482_vm12 = vmmov %vm13481_vm5  ;;  %v3277_v36 = vsel %vm13483_vm9, %v11138_v16, %v3276_v0  ;;  %v3333_v13 = vrot.slane %v11196_v20, 4 }
 0x4ae   : > { %v3278_v25 = vsel %vm286_vm0, %v3272_v55, %v13480_v43  ;;  %v3626_v29 = vsel %vm13482_vm12, %v3614_v9, %v3625_v34  ;;  %vm13484_vm7 = vmmov %vm13483_vm9  ;;  %v9917_v23 = vld [vmem:[#allocation3 + $0x74] ss:$28 sps:$4 sm:$0xff]   ;;  %v3740_v28 = vrot.slane %v11211_v24, 4  ;;  %3633 = vst [vmem:[#allocation3 + $0xe8] sm:$0xcc] %v3624_v8  ;;  %v3741_v40 = vrot.slane %v3736_v35, 4 }
 0x4af   : > { %v3279_v49 = vsel %vm13484_vm7, %v3267_v52, %v3278_v25  ;;  %v9919_v46 = vld [vmem:[#allocation3 + $0x70] ss:$28 sps:$4 sm:$0xff]   ;;  %3634 = vst [vmem:[#allocation3 + $0xf0] sm:$0xcc] %v3626_v29  ;;  %3286 = vst [vmem:[#allocation3 + $0x94] sm:$0xcc] %v3277_v36  ;;  %4516 = vmatprep.subr.bf16.mxu0 %v9917_v23 }
 0x4b0   : > { %3287 = vst [vmem:[#allocation3 + $0x9c] sm:$0xcc] %v3279_v49  ;;  %v3332_v48 = vrot.slane %v3326_v7, 4  ;;  %v3436_v45 = vrot.slane %v11150_v32, 4  ;;  %v3800_v16 = vrot.slane %v11180_v31, 4  ;;  %v3745_v51 = vsel %vm286_vm0, %v3740_v28, %v3741_v40  ;;  %4517 = vmatpush1.bf16.msra.mxu0 %v9919_v46  ;;  %v3429_v55 = vpop.permute.xlu1 %3428 }
 0x4b1   : > { %v13485_v60 = vrot.slane %v11299_v21, 4  ;;  %vm13486_vm5 = vcmask 310272   ;;  %vm13488_vm9 = vcmask 7168   ;;  %v3795_v21 = vpop.permute.xlu0 %3794  ;;  %v3434_v26 = vrot.slane %v11188_v53, 4 }
 0x4b2   : > { %v3335_v17 = vsel %vm286_vm0, %v3331_v12, %v3332_v48  ;;  %v3337_v2 = vsel %vm286_vm0, %v3332_v48, %v3333_v13  ;;  %v3746_v6 = vsel %vm13486_vm5, %v11211_v24, %v3745_v51  ;;  %vm13487_vm12 = vmmov %vm13486_vm5  ;;  %v3802_v12 = vrot.slane %v11194_v62, 4 }
 0x4b3   : > { %v3747_v5 = vsel %vm286_vm0, %v3741_v40, %v13485_v60  ;;  %v3336_v52 = vsel %vm13488_vm9, %v11182_v4, %v3335_v17  ;;  %vm13489_vm7 = vmmov %vm13488_vm9  ;;  %3755 = vst [vmem:[#allocation3 + $0x104] sm:$0xcc] %v3746_v6  ;;  %v3801_v15 = vrot.slane %v3795_v21, 4  ;;  %v3435_v34 = vrot.slane %v3429_v55, 4 }
 0x4b4   : > { %v3748_v9 = vsel %vm13487_vm12, %v3736_v35, %v3747_v5  ;;  %v3338_v47 = vsel %vm13489_vm7, %v3326_v7, %v3337_v2  ;;  %3346 = vst [vmem:[#allocation3 + $0xa8] sm:$0x33] %v3336_v52  ;;  %vm13490_vm5 = vcmask 1039360   ;;  %v3610_v7 = vpop.permute.xlu1 %3609  ;;  %v3922_v40 = vrot.slane %v11186_v56, 4 }
 0x4b5   : > { %3756 = vst [vmem:[#allocation3 + $0x10c] sm:$0xcc] %v3748_v9  ;;  %3347 = vst [vmem:[#allocation3 + $0xb0] sm:$0x33] %v3338_v47  ;;  %v3804_v0 = vsel %vm286_vm0, %v3800_v16, %v3801_v15  ;;  %v3806_v4 = vsel %vm286_vm0, %v3801_v15, %v3802_v12  ;;  %v3438_v43 = vsel %vm286_vm0, %v3434_v26, %v3435_v34  ;;  %v3917_v35 = vpop.permute.xlu0 %3916  ;;  %v3924_v48 = vrot.slane %v11201_v27, 4 }
 0x4b6   : > { %v3440_v25 = vsel %vm286_vm0, %v3435_v34, %v3436_v45  ;;  %v3805_v8 = vsel %vm13343_vm15, %v11180_v31, %v3804_v0  ;;  %v3807_v29 = vsel %vm13343_vm15, %v3795_v21, %v3806_v4  ;;  %v3439_v36 = vsel %vm13490_vm5, %v11188_v53, %v3438_v43  ;;  %vm13491_vm12 = vmmov %vm13490_vm5  ;;  %v9920_v23 = vld [vmem:[#allocation3 + $0x7c] ss:$28 sps:$4 sm:$0xff]  }
 0x4b7   : > { %v3441_v49 = vsel %vm13491_vm12, %v3429_v55, %v3440_v25  ;;  %v9922_v46 = vld [vmem:[#allocation3 + $0x78] ss:$28 sps:$4 sm:$0xff]   ;;  %3815 = vst [vmem:[#allocation3 + $0x118] sm:$0x33] %v3805_v8  ;;  %3816 = vst [vmem:[#allocation3 + $0x120] sm:$0x33] %v3807_v29  ;;  %4557 = vmatprep.subr.bf16.mxu1 %v9920_v23 }
 0x4b8   : > { %3449 = vst [vmem:[#allocation3 + $0xc4] sm:$0x33] %v3439_v36  ;;  %3450 = vst [vmem:[#allocation3 + $0xcc] sm:$0x33] %v3441_v49  ;;  %v3923_v31 = vrot.slane %v3917_v35, 4  ;;  %v3617_v16 = vrot.slane %v3610_v7, 4  ;;  %4558 = vmatpush1.bf16.msra.mxu1 %v9922_v46  ;;  %v3732_v9 = vpop.permute.xlu1 %3731 }
 0x4b9   : > { %vm13492_vm9 = vcmask 228352   ;;  %vm13494_vm5 = vcmask 957440   ;;  %v11520_v6 = vpop.permute.xlu0 %3857  ;;  %v3862_v52 = vrot.slane %v11218_v22, 4  ;;  %v3739_v47 = vrot.slane %v3732_v9, 4 }
 0x4ba   : > { %v3926_v51 = vsel %vm286_vm0, %v3922_v40, %v3923_v31  ;;  %v3928_v53 = vsel %vm286_vm0, %v3923_v31, %v3924_v48  ;;  %v3621_v60 = vsel %vm286_vm0, %v3617_v16, %v3618_v11  ;;  %vm13493_vm7 = vmmov %vm13492_vm9  ;;  %v3863_v59 = vrot.slane %v11520_v6, 4  ;;  %v9929_v29 = vld [vmem:[#allocation3 + $0xec] ss:$28 sps:$4 sm:$0xff]  }
 0x4bb   : > { %v3927_v5 = vsel %vm13492_vm9, %v11186_v56, %v3926_v51  ;;  %v3929_v17 = vsel %vm13493_vm7, %v3917_v35, %v3928_v53  ;;  %v3622_v2 = vsel %vm13494_vm5, %v3610_v7, %v3621_v60  ;;  %v3743_v56 = vsel %vm286_vm0, %v3739_v47, %v3740_v28  ;;  %v9931_v16 = vld [vmem:[#allocation3 + $0xe8] ss:$28 sps:$4 sm:$0xff]  }
 0x4bc   : > { %3937 = vst [vmem:[#allocation3 + $0x134] sm:$0x33] %v3927_v5  ;;  %3938 = vst [vmem:[#allocation3 + $0x13c] sm:$0x33] %v3929_v17  ;;  %v3867_v11 = vsel %vm286_vm0, %v3862_v52, %v3863_v59  ;;  %v3984_v21 = vrot.slane %v11224_v18, 4  ;;  %vm13495_vm12 = vcmask 236544   ;;  %v3854_v34 = vpop.permute.xlu1 %3853 }
 0x4bd   : > { %3632 = vst [vmem:[#allocation3 + $0xe0] sm:$0xcc] %v3622_v2  ;;  %v3868_v55 = vsel %vm13495_vm12, %v11218_v22, %v3867_v11  ;;  %vm13496_vm9 = vcmask 310272   ;;  %v11534_v15 = vpop.permute.xlu0 %3979  ;;  %v3861_v43 = vrot.slane %v3854_v34, 4  ;;  %vm13497_vm7 = vcmask 220160   ;;  %vm13498_vm5 = vmmov %vm13495_vm12 }
 0x4be   : > { %v3744_v26 = vsel %vm13496_vm9, %v3732_v9, %v3743_v56  ;;  %3877 = vst [vmem:[#allocation3 + $0x120] sm:$0xcc] %v3868_v55  ;;  %v3985_v4 = vrot.slane %v11534_v15, 4  ;;  %v4044_v23 = vrot.slane %v11209_v57, 4  ;;  %v4046_v46 = vrot.slane %v11222_v38, 4  ;;  %vm13499_vm12 = vmmov %vm13497_vm7 }
 0x4bf   : > { %v9923_v0 = vld [vmem:[#allocation3 + $0xac] ss:$28 sps:$4 sm:$0xff]   ;;  %3754 = vst [vmem:[#allocation3 + $0xfc] sm:$0xcc] %v3744_v26  ;;  %v9925_v25 = vld [vmem:[#allocation3 + $0xb4] ss:$28 sps:$4 sm:$0xff]   ;;  %v3865_v22 = vsel %vm286_vm0, %v3861_v43, %v3862_v52 }
 0x4c0   : > { %v9927_v24 = vld [vmem:[#allocation3 + $0xa8] ss:$28 sps:$4 sm:$0xff]   ;;  %4518 = vmatprep.subr.bf16.mxu0 %v9923_v0  ;;  %v9928_v28 = vld [vmem:[#allocation3 + $0xb0] ss:$28 sps:$4 sm:$0xff]   ;;  %v3989_v8 = vsel %vm286_vm0, %v3984_v21, %v3985_v4  ;;  %4559 = vmatprep.subr.bf16.mxu1 %v9925_v25  ;;  %v3866_v49 = vsel %vm13498_vm5, %v3854_v34, %v3865_v22  ;;  %v3976_v7 = vpop.permute.xlu1 %3975  ;;  %v4166_v60 = vrot.slane %v11216_v50, 4  ;;  %v4168_v56 = vrot.slane %v11228_v19, 4 }
 0x4c1   : > { %4519 = vmatpush1.bf16.msra.mxu0 %v9927_v24  ;;  %v3990_v36 = vsel %vm13497_vm7, %v11224_v18, %v3989_v8  ;;  %v4039_v35 = vpop.permute.xlu0 %4038  ;;  %4560 = vmatpush1.bf16.msra.mxu1 %v9928_v28  ;;  %3876 = vst [vmem:[#allocation3 + $0x118] sm:$0xcc] %v3866_v49  ;;  %v3983_v31 = vrot.slane %v3976_v7, 4  ;;  %v4106_v55 = vrot.slane %v11230_v63, 4  ;;  %vm13501_vm9 = vcmask 908288  }
 0x4c2   : > { %3999 = vst [vmem:[#allocation3 + $0x13c] sm:$0xcc] %v3990_v36  ;;  %v4045_v40 = vrot.slane %v4039_v35, 4  ;;  %4561 = vmatprep.subr.bf16.mxu1 %v9929_v29  ;;  %vm13502_vm7 = vmmov %vm13501_vm9  ;;  %vm13503_vm5 = vcmask 818176  }
 0x4c3   : > { %v3987_v53 = vsel %vm286_vm0, %v3983_v31, %v3984_v21 }
 0x4c4   : > { %v4048_v51 = vsel %vm286_vm0, %v4044_v23, %v4045_v40  ;;  %v4050_v18 = vsel %vm286_vm0, %v4045_v40, %v4046_v46  ;;  %v3988_v2 = vsel %vm13499_vm12, %v3976_v7, %v3987_v53  ;;  %v4098_v52 = vpop.permute.xlu1 %4097  ;;  %vm13505_vm12 = vcmask 891904  }
 0x4c5   : > { %v4049_v5 = vsel %vm1756_vm14, %v11209_v57, %v4048_v51  ;;  %v4051_v17 = vsel %vm1756_vm14, %v4039_v35, %v4050_v18  ;;  %v4161_v9 = vpop.permute.xlu0 %4160  ;;  %4562 = vmatpush1.bf16.msra.mxu1 %v9931_v16  ;;  %3998 = vst [vmem:[#allocation3 + $0x134] sm:$0xcc] %v3988_v2  ;;  %v4105_v26 = vrot.slane %v4098_v52, 4  ;;  %v13500_v35 = vrot.slane %v11114_v44, 4 }
 0x4c6   : > { %v9932_v47 = vld [vmem:[#allocation3 + $0xe4] ss:$28 sps:$4 sm:$0xff]   ;;  %4059 = vst [vmem:[#allocation3 + $0x150] sm:$0x33] %v4049_v5  ;;  %4060 = vst [vmem:[#allocation3 + $0x158] sm:$0x33] %v4051_v17 }
 0x4c7   : > { %v9934_v11 = vld [vmem:[#allocation3 + $0xe0] ss:$28 sps:$4 sm:$0xff]   ;;  %v4167_v21 = vrot.slane %v4161_v9, 4  ;;  %4520 = vmatprep.subr.bf16.mxu0 %v9932_v47  ;;  %v4109_v0 = vsel %vm286_vm0, %v4105_v26, %v4106_v55 }
 0x4c8   : > { %4521 = vmatpush1.bf16.msra.mxu0 %v9934_v11  ;;  %v4110_v24 = vsel %vm1818_vm13, %v4098_v52, %v4109_v0  ;;  %v2598_v8 = vpop.permute.xlu1 %2597 }
 0x4c9   : > { %v4170_v57 = vsel %vm286_vm0, %v4166_v60, %v4167_v21  ;;  %v4172_v34 = vsel %vm286_vm0, %v4167_v21, %v4168_v56  ;;  %v11567_v28 = vpop.permute.xlu0 %4101  ;;  %v9935_v22 = vld [vmem:[#allocation3 + $0x124] ss:$28 sps:$4 sm:$0xff]   ;;  %4120 = vst [vmem:[#allocation3 + $0x150] sm:$0xcc] %v4110_v24  ;;  %v2602_v49 = vrot.slane %v2598_v8, 4 }
 0x4ca   : > { %v4171_v43 = vsel %vm1880_vm11, %v11216_v50, %v4170_v57  ;;  %v4173_v25 = vsel %vm1880_vm11, %v4161_v9, %v4172_v34  ;;  %v9937_v29 = vld [vmem:[#allocation3 + $0x120] ss:$28 sps:$4 sm:$0xff]   ;;  %v4107_v36 = vrot.slane %v11567_v28, 4  ;;  %4563 = vmatprep.subr.bf16.mxu1 %v9935_v22 }
 0x4cb   : > { %4181 = vst [vmem:[#allocation3 + $0x16c] sm:$0x33] %v4171_v43  ;;  %4182 = vst [vmem:[#allocation3 + $0x174] sm:$0x33] %v4173_v25  ;;  %v2607_v7 = vsel %vm286_vm0, %v13500_v35, %v2602_v49  ;;  %v2609_v23 = vsel %vm13501_vm9, %v2598_v8, %v2602_v49  ;;  %4564 = vmatpush1.bf16.msra.mxu1 %v9937_v29  ;;  %v11605_v43 = vld [vmem:[%s13254_s1 + $0x2] sm:$0x3] }
 0x4cc   : > { %v4111_v50 = vsel %vm286_vm0, %v4106_v55, %v4107_v36  ;;  %v2608_v31 = vsel %vm13502_vm7, %v11114_v44, %v2607_v7  ;;  %2617 = vst [vmem:[#allocation3 + $0x18] sm:$0x3] %v2609_v23  ;;  %v2720_v51 = vpop.permute.xlu1 %2719  ;;  %v9938_v18 = vld [vmem:[#allocation3 + $0x11c] ss:$28 sps:$4 sm:$0xff]   ;;  %vm13506_vm9 = vmmov %vm13503_vm5 }
 0x4cd   : > { %v4112_v40 = vsel %vm1818_vm13, %v11230_v63, %v4111_v50  ;;  %v2842_v16 = vpop.permute.xlu0 %2841  ;;  %v9940_v53 = vld [vmem:[#allocation3 + $0x118] ss:$28 sps:$4 sm:$0xff]   ;;  %2616 = vst [vmem:[#allocation3 + $0x10] sm:$0x33] %v2608_v31  ;;  %v2724_v5 = vrot.slane %v2720_v51, 4  ;;  %4522 = vmatprep.subr.bf16.mxu0 %v9938_v18  ;;  %v13504_v63 = vld [vmem:[#allocation16_spill] sm:$0xff]  ;;  %vm13507_vm7 = vmmov %vm13505_vm12 }
 0x4ce   : > { %4121 = vst [vmem:[#allocation3 + $0x158] sm:$0xcc] %v4112_v40  ;;  %v2846_v60 = vrot.slane %v2842_v16, 4  ;;  %4523 = vmatpush1.bf16.msra.mxu0 %v9940_v53 }
 0x4cf   : > { %v2729_v44 = vsel %vm286_vm0, %v2723_v10, %v2724_v5  ;;  %v2731_v9 = vsel %vm13505_vm12, %v2720_v51, %v2724_v5  ;;  %vm13509_vm12 = vcmask 1039360  }
 0x4d0   : > { %v2851_v17 = vsel %vm286_vm0, %v2845_v33, %v2846_v60  ;;  %v2853_v2 = vsel %vm13503_vm5, %v2842_v16, %v2846_v60  ;;  %v2730_v47 = vsel %vm13507_vm7, %v13504_v63, %v2729_v44  ;;  %2739 = vst [vmem:[#allocation3 + $0x34] sm:$0x3] %v2731_v9  ;;  %v3433_v55 = vpop.permute.xlu1 %3432  ;;  %vm13508_vm5 = vcmask 744448   ;;  %vm13511_vm7 = vmmov %vm13509_vm12 }
 0x4d1   : > { %v2852_v52 = vsel %vm13506_vm9, %v11146_v39, %v2851_v17  ;;  %2861 = vst [vmem:[#allocation3 + $0x50] sm:$0x3] %v2853_v2  ;;  %v2964_v11 = vpop.permute.xlu0 %2963  ;;  %2738 = vst [vmem:[#allocation3 + $0x2c] sm:$0x33] %v2730_v47  ;;  %v3437_v26 = vrot.slane %v3433_v55, 4  ;;  %v13517_v60 = vmov 0.0  }
 0x4d2   : > { %v9941_v33 = vld [vmem:[#allocation3 + $0x154] ss:$28 sps:$4 sm:$0x3f]   ;;  %2860 = vst [vmem:[#allocation3 + $0x48] sm:$0x33] %v2852_v52  ;;  %v2968_v21 = vrot.slane %v2964_v11, 4  ;;  %vm13510_vm9 = vmmov %vm13508_vm5 }
 0x4d3   : > { %v9943_v57 = vld [vmem:[#allocation3 + $0x150] ss:$28 sps:$4 sm:$0x3f]   ;;  %9538 = vmatprep.subr.msk.bf16.mxu0 %vm2201_vm2, %v9941_v33  ;;  %v3442_v34 = vsel %vm286_vm0, %v3436_v45, %v3437_v26  ;;  %v3444_v0 = vsel %vm13509_vm12, %v3433_v55, %v3437_v26  ;;  %vm13513_vm12 = vcmask 965632  }
 0x4d4   : > { %v2973_v10 = vsel %vm286_vm0, %v2967_v42, %v2968_v21  ;;  %v2975_v39 = vsel %vm13508_vm5, %v2964_v11, %v2968_v21  ;;  %v3443_v42 = vsel %vm13511_vm7, %v11150_v32, %v3442_v34  ;;  %3452 = vst [vmem:[#allocation3 + $0xdc] sm:$0x3] %v3444_v0  ;;  %v4492_v8 = vsel %vm2201_vm2, %v9943_v57, 0  ;;  %v3555_v22 = vpop.permute.xlu1 %3554  ;;  %vm13515_vm7 = vmmov %vm13513_vm12 }
 0x4d5   : > { %v2974_v25 = vsel %vm13510_vm9, %v11152_v41, %v2973_v10  ;;  %2983 = vst [vmem:[#allocation3 + $0x6c] sm:$0x3] %v2975_v39  ;;  %v3086_v24 = vpop.permute.xlu0 %3085  ;;  %v9944_v45 = vld [vmem:[#allocation3 + $0x15c] ss:$28 sps:$4 sm:$0x3f]   ;;  %4525 = vmatpush1.bf16.msra.mxu0 %v4492_v8  ;;  %v3559_v49 = vrot.slane %v3555_v22, 4 }
 0x4d6   : > { %2982 = vst [vmem:[#allocation3 + $0x64] sm:$0x33] %v2974_v25  ;;  %3451 = vst [vmem:[#allocation3 + $0xd4] sm:$0x33] %v3443_v42  ;;  %v3090_v29 = vrot.slane %v3086_v24, 4  ;;  %9540 = vmatprep.subr.msk.bf16.mxu1 %vm2201_vm2, %v9944_v45  ;;  %vm13512_vm5 = vcmask 728064  }
 0x4d7   : > { %v9946_v50 = vld [vmem:[#allocation3 + $0x158] ss:$28 sps:$4 sm:$0x3f]   ;;  %v3564_v35 = vsel %vm286_vm0, %v3558_v1, %v3559_v49  ;;  %v3566_v7 = vsel %vm13513_vm12, %v3555_v22, %v3559_v49  ;;  %vm13514_vm9 = vmmov %vm13512_vm5  ;;  %vm13519_vm12 = vcmask 318464  }
 0x4d8   : > { %v3095_v41 = vsel %vm286_vm0, %v3089_v61, %v3090_v29  ;;  %v3097_v32 = vsel %vm13512_vm5, %v3086_v24, %v3090_v29  ;;  %v3565_v40 = vsel %vm13515_vm7, %v11168_v58, %v3564_v35  ;;  %3574 = vst [vmem:[#allocation3 + $0xf8] sm:$0x3] %v3566_v7  ;;  %v4498_v16 = vsel %vm2201_vm2, %v9946_v50, 0  ;;  %v3677_v61 = vpop.permute.xlu1 %3676  ;;  %v9947_v51 = vld [vmem:[#allocation3 + $0x14] ss:$28 sps:$4 sm:$0xff]   ;;  %9539 = vmatmul.mubr.msk.bf16.vlgmr.msra.gmra.mrb[8].mxu0 %vm2197_vm3, %v11605_v43  ;;  %vm13521_vm7 = vmmov %vm13519_vm12 }
 0x4d9   : > { %v3096_v23 = vsel %vm13514_vm9, %v11170_v3, %v3095_v41  ;;  %3105 = vst [vmem:[#allocation3 + $0x88] sm:$0x3] %v3097_v32  ;;  %v3208_v31 = vpop.permute.xlu0 %3207  ;;  %v9949_v18 = vld [vmem:[#allocation3 + $0x10] ss:$28 sps:$4 sm:$0xff]   ;;  %3573 = vst [vmem:[#allocation3 + $0xf0] sm:$0x33] %v3565_v40  ;;  %4566 = vmatpush1.bf16.msra.mxu1 %v4498_v16  ;;  %4594 = vmatprep.subr.bf16.mxu0 %v9947_v51 }
 0x4da   : > { %3104 = vst [vmem:[#allocation3 + $0x80] sm:$0x33] %v3096_v23  ;;  %v3212_v1 = vrot.slane %v3208_v31, 4  ;;  %v3681_v53 = vrot.slane %v3677_v61, 4  ;;  %v13516_v3 = vmov 0   ;;  %9728 = vmatprep.subr.bf16.mxu1 %v13517_v60  ;;  %vm13518_vm5 = vcmask 80896   ;;  %4595 = vmatpush1.bf16.msra.mxu0 %v9949_v18 }
 0x4db   : > { %4626 = vmatprep.mubr.bf16.mxu0 %v13516_v3  ;;  %v9950_v63 = vld [vmem:[#allocation3 + $0x18] ss:$28 sps:$4 sm:$0xff]   ;;  %vm13520_vm9 = vmmov %vm13518_vm5 }
 0x4dc   : > { %v3217_v58 = vsel %vm286_vm0, %v3211_v54, %v3212_v1  ;;  %v3219_v5 = vsel %vm13518_vm5, %v3208_v31, %v3212_v1  ;;  %v3686_v17 = vsel %vm286_vm0, %v3680_v14, %v3681_v53  ;;  %v3688_v2 = vsel %vm13519_vm12, %v3677_v61, %v3681_v53  ;;  %9541 = vmatmul.mubr.msk.bf16.vlgmr.msra.gmra.mrb[8].mxu1 %vm2197_vm3, %v11605_v43  ;;  %v3799_v54 = vpop.permute.xlu1 %3798  ;;  %v9954_v26 = vld [vmem:[#allocation3 + $0x50] ss:$28 sps:$4 sm:$0xff]  }
 0x4dd   : > { %v3218_v44 = vsel %vm13520_vm9, %v11176_v30, %v3217_v58  ;;  %3227 = vst [vmem:[#allocation3 + $0xa4] sm:$0x3] %v3219_v5  ;;  %v3687_v9 = vsel %vm13521_vm7, %v11174_v37, %v3686_v17  ;;  %3696 = vst [vmem:[#allocation3 + $0x114] sm:$0x3] %v3688_v2  ;;  %v3330_v52 = vpop.permute.xlu0 %3329  ;;  %v9951_v47 = vld [vmem:[#allocation3 + $0x4c] ss:$28 sps:$4 sm:$0xff]   ;;  %9729 = vmatpush3.bf16.msra.mxu1 %v9950_v63 }
 0x4de   : > { %v9953_v11 = vld [vmem:[#allocation3 + $0x48] ss:$28 sps:$4 sm:$0xff]   ;;  %3226 = vst [vmem:[#allocation3 + $0x9c] sm:$0x33] %v3218_v44  ;;  %3695 = vst [vmem:[#allocation3 + $0x10c] sm:$0x33] %v3687_v9  ;;  %4596 = vmatprep.subr.bf16.mxu0 %v9951_v47  ;;  %9730 = vmatprep.subr.bf16.mxu1 %v13517_v60 }
 0x4df   : > { %v3334_v14 = vrot.slane %v3330_v52, 4  ;;  %v3803_v55 = vrot.slane %v3799_v54, 4  ;;  %vm13522_vm5 = vmmov 0   ;;  %vm13523_vm12 = vcmask 7168   ;;  %4597 = vmatpush1.bf16.msra.mxu0 %v9953_v11  ;;  %v13532_v11 = vld [vmem:[#allocation10_spill] sm:$0xff] }
 0x4e0   : > { %9742 = vmatprep.mubr.msk.bf16.mxu1 %vm13522_vm5, %v13517_v60  ;;  %vm13524_vm9 = vmmov %vm13523_vm12  ;;  %vm13525_vm7 = vcmask 236544  }
 0x4e1   : > { %v3339_v37 = vsel %vm286_vm0, %v3333_v13, %v3334_v14  ;;  %v3341_v30 = vsel %vm13523_vm12, %v3330_v52, %v3334_v14  ;;  %v3808_v33 = vsel %vm286_vm0, %v3802_v12, %v3803_v55  ;;  %v3810_v21 = vsel %vm13343_vm15, %v3799_v54, %v3803_v55  ;;  %v3860_v39 = vpop.permute.xlu0 %3859  ;;  %v3921_v13 = vpop.permute.xlu1 %3920  ;;  %9731 = vmatpush3.bf16.msra.mxu1 %v9954_v26  ;;  %v13531_v52 = vld [vmem:[#allocation9_spill] sm:$0xff] }
 0x4e2   : > { %v3340_v57 = vsel %vm13524_vm9, %v11196_v20, %v3339_v37  ;;  %3349 = vst [vmem:[#allocation3 + $0xc0] sm:$0x3] %v3341_v30  ;;  %v3809_v10 = vsel %vm13343_vm15, %v11194_v62, %v3808_v33  ;;  %3818 = vst [vmem:[#allocation3 + $0x130] sm:$0x3] %v3810_v21  ;;  %v3864_v34 = vrot.slane %v3860_v39, 4  ;;  %v3925_v0 = vrot.slane %v3921_v13, 4  ;;  %9732 = vmatprep.subr.bf16.mxu1 %v13517_v60 }
 0x4e3   : > { %3348 = vst [vmem:[#allocation3 + $0xb8] sm:$0x33] %v3340_v57  ;;  %3817 = vst [vmem:[#allocation3 + $0x128] sm:$0x33] %v3809_v10  ;;  %vm13526_vm12 = vcmask 228352   ;;  %v13533_v57 = vld [vmem:[#allocation11_spill] sm:$0xff] }
 0x4e4   : > { %v3869_v12 = vsel %vm286_vm0, %v3863_v59, %v3864_v34  ;;  %v3871_v20 = vsel %vm13525_vm7, %v3860_v39, %v3864_v34  ;;  %v3930_v62 = vsel %vm286_vm0, %v3924_v48, %v3925_v0  ;;  %v3932_v25 = vsel %vm13526_vm12, %v3921_v13, %v3925_v0  ;;  %v9955_v42 = vld [vmem:[#allocation3 + $0x88] ss:$28 sps:$4 sm:$0xff]   ;;  %vm13527_vm9 = vmmov %vm13525_vm7  ;;  %v9965_v1 = vld [vmem:[#allocation3 + $0xf8] ss:$28 sps:$4 sm:$0xff]  }
 0x4e5   : > { %v3870_v24 = vsel %vm13527_vm9, %v11520_v6, %v3869_v12  ;;  %3879 = vst [vmem:[#allocation3 + $0x130] sm:$0xc] %v3871_v20  ;;  %vm13528_vm15 = vmmov %vm13526_vm12  ;;  %v3982_v22 = vpop.permute.xlu0 %3981  ;;  %v4043_v45 = vpop.permute.xlu1 %4042  ;;  %v9956_v59 = vld [vmem:[#allocation3 + $0x84] ss:$28 sps:$4 sm:$0xff]   ;;  %9733 = vmatpush3.bf16.msra.mxu1 %v9955_v42  ;;  %vm13529_vm7 = vcmask 220160   ;;  %vm13548_vm12 = vcmask 973824  }
 0x4e6   : > { %v3931_v8 = vsel %vm13528_vm15, %v11201_v27, %v3930_v62  ;;  %3940 = vst [vmem:[#allocation3 + $0x14c] sm:$0x3] %v3932_v25  ;;  %v9958_v29 = vld [vmem:[#allocation3 + $0x80] ss:$28 sps:$4 sm:$0xff]   ;;  %3878 = vst [vmem:[#allocation3 + $0x128] sm:$0xcc] %v3870_v24  ;;  %4598 = vmatprep.subr.bf16.mxu0 %v9956_v59  ;;  %9734 = vmatprep.subr.bf16.mxu1 %v13517_v60 }
 0x4e7   : > { %3939 = vst [vmem:[#allocation3 + $0x144] sm:$0x33] %v3931_v8  ;;  %v3986_v49 = vrot.slane %v3982_v22, 4  ;;  %v4047_v50 = vrot.slane %v4043_v45, 4  ;;  %4599 = vmatpush1.bf16.msra.mxu0 %v9958_v29  ;;  %vm13530_vm15 = vmmov %vm13529_vm7  ;;  %v9963_v61 = vld [vmem:[#allocation3 + $0xf4] ss:$28 sps:$4 sm:$0xff]  }
 0x4e8   : > { %v13534_v39 = vld [vmem:[#allocation12_spill] sm:$0xff]  ;;  %v13535_v8 = vld [vmem:[#allocation13_spill] sm:$0xff]  ;;  %v13536_v59 = vld [vmem:[#allocation14_spill] sm:$0xff]  ;;  %vm13549_vm9 = vcmask 72704  }
 0x4e9   : > { %v3991_v48 = vsel %vm286_vm0, %v3985_v4, %v3986_v49  ;;  %v3993_v6 = vsel %vm13529_vm7, %v3982_v22, %v3986_v49  ;;  %v4052_v27 = vsel %vm286_vm0, %v4046_v46, %v4047_v50  ;;  %v4054_v41 = vsel %vm1756_vm14, %v4043_v45, %v4047_v50  ;;  %v9959_v32 = vld [vmem:[#allocation3 + $0xc0] ss:$28 sps:$4 sm:$0xff]   ;;  %v4104_v23 = vpop.permute.xlu0 %4103  ;;  %v4165_v4 = vpop.permute.xlu1 %4164  ;;  %v13537_v50 = vld [vmem:[#allocation15_spill] sm:$0xff] }
 0x4ea   : > { %v3992_v35 = vsel %vm13530_vm15, %v11534_v15, %v3991_v48  ;;  %4001 = vst [vmem:[#allocation3 + $0x14c] sm:$0xc] %v3993_v6  ;;  %v4053_v7 = vsel %vm1756_vm14, %v11222_v38, %v4052_v27  ;;  %4062 = vst [vmem:[#allocation3 + $0x168] sm:$0x3] %v4054_v41  ;;  %v9960_v40 = vld [vmem:[#allocation3 + $0xbc] ss:$28 sps:$4 sm:$0xff]   ;;  %9735 = vmatpush3.bf16.msra.mxu1 %v9959_v32 }
 0x4eb   : > { %v9962_v31 = vld [vmem:[#allocation3 + $0xb8] ss:$28 sps:$4 sm:$0xff]   ;;  %4000 = vst [vmem:[#allocation3 + $0x144] sm:$0xcc] %v3992_v35  ;;  %4061 = vst [vmem:[#allocation3 + $0x160] sm:$0x33] %v4053_v7  ;;  %4600 = vmatprep.subr.bf16.mxu0 %v9960_v40  ;;  %9736 = vmatprep.subr.bf16.mxu1 %v13517_v60 }
 0x4ec   : > { %v4108_v16 = vrot.slane %v4104_v23, 4  ;;  %v4169_v46 = vrot.slane %v4165_v4, 4  ;;  %4601 = vmatpush1.bf16.msra.mxu0 %v9962_v31  ;;  %vm13550_vm7 = vcmask 957440   ;;  %vm13551_vm15 = vcmask 310272  }
 0x4ed   : > { %4602 = vmatprep.subr.bf16.mxu0 %v9963_v61 }
 0x4ee   : > { %v4113_v15 = vsel %vm286_vm0, %v4107_v36, %v4108_v16  ;;  %v4115_v38 = vsel %vm1818_vm13, %v4104_v23, %v4108_v16  ;;  %v4174_v51 = vsel %vm286_vm0, %v4168_v56, %v4169_v46  ;;  %v4176_v18 = vsel %vm1880_vm11, %v4165_v4, %v4169_v46  ;;  %9737 = vmatpush3.bf16.msra.mxu1 %v9965_v1  ;;  %v9966_v36 = vld [vmem:[#allocation3 + $0xf0] ss:$28 sps:$4 sm:$0xff]  }
 0x4ef   : > { %v4114_v53 = vsel %vm1818_vm13, %v11567_v28, %v4113_v15  ;;  %4123 = vst [vmem:[#allocation3 + $0x168] sm:$0xc] %v4115_v38  ;;  %v4175_v58 = vsel %vm1880_vm11, %v11228_v19, %v4174_v51  ;;  %4184 = vst [vmem:[#allocation3 + $0x184] sm:$0x3] %v4176_v18  ;;  %9738 = vmatprep.subr.bf16.mxu1 %v13517_v60 }
 0x4f0   : > { %4122 = vst [vmem:[#allocation3 + $0x160] sm:$0xcc] %v4114_v53  ;;  %4183 = vst [vmem:[#allocation3 + $0x17c] sm:$0x33] %v4175_v58  ;;  %4603 = vmatpush1.bf16.msra.mxu0 %v9966_v36 }
 0x4f1   : > { %v9967_v56 = vld [vmem:[#allocation3 + $0x130] ss:$28 sps:$4 sm:$0xff]  }
 0x4f2   : > { %v9968_v5 = vld [vmem:[#allocation3 + $0x12c] ss:$28 sps:$4 sm:$0xff]   ;;  %9739 = vmatpush3.bf16.msra.mxu1 %v9967_v56 }
 0x4f3   : > { %v9970_v17 = vld [vmem:[#allocation3 + $0x128] ss:$28 sps:$4 sm:$0xff]   ;;  %4604 = vmatprep.subr.bf16.mxu0 %v9968_v5  ;;  %9740 = vmatprep.subr.bf16.mxu1 %v13517_v60 }
 0x4f4   : > { %4605 = vmatpush1.bf16.msra.mxu0 %v9970_v17 }
 0x4f6   : > { %v9973_v2 = vld [vmem:[#allocation3 + $0x168] ss:$28 sps:$4 sm:$0x3f]  }
 0x4f7   : > { %v9971_v28 = vld [vmem:[#allocation3 + $0x164] ss:$28 sps:$4 sm:$0x3f]   ;;  %v4510_v63 = vsel %vm2201_vm2, %v9973_v2, 0 }
 0x4f8   : > { %v9974_v19 = vld [vmem:[#allocation3 + $0x160] ss:$28 sps:$4 sm:$0x3f]   ;;  %9542 = vmatprep.subr.msk.bf16.mxu0 %vm2201_vm2, %v9971_v28  ;;  %9741 = vmatpush3.bf16.msra.mxu1 %v4510_v63 }
 0x4f9   : > { %v4504_v44 = vsel %vm2201_vm2, %v9974_v19, 0 }
 0x4fa   : > { %4607 = vmatpush1.bf16.msra.mxu0 %v4504_v44 }
 0x4fb   : > { %9743 = vmatmul.mubr.msk.bf16.vlgmr.msra.gmra.mrb[12].mxu1 %vm2197_vm3, %v11605_v43 }
 0x4fc   : > { %6860 = vmatprep.mubr.bf16.mxu1 %v13516_v3 }
 0x4fd   : > { %9543 = vmatmul.mubr.msk.bf16.vlgmr.msra.gmra.mrb[12].mxu0 %vm2197_vm3, %v11605_v43 }
 0x4fe   : > { %6819 = vmatprep.mubr.bf16.mxu0 %v13516_v3 }
 0x5ab   : > { %v4546_v9 = vpop.f32.mrb[8].mxu0 }
 0x5ac   : > { %v4675_v54 = vmul.f32 %v4546_v9, %v13531_v52  ;;  %v4548_v47 = vpop.f32.mrb[9].mxu0 }
 0x5ad   : > { %v4676_v14 = vmul.f32 %v4548_v47, %v13532_v11  ;;  %v4550_v55 = vpop.f32.mrb[10].mxu0 }
 0x5ae   : > { %v4682_v37 = vsel %vm286_vm0, %v4675_v54, 0.0  ;;  %v4551_v30 = vpop.f32.mrb[11].mxu0 }
 0x5af   : > { %v4683_v33 = vsel %vm286_vm0, %v4676_v14, 0.0  ;;  %v4587_v21 = vpop.f32.mrb[8].mxu1 }
 0x5b0   : > { %v4684_v26 = vadd.f32 %v4683_v33, %v4682_v37  ;;  %v4677_v43 = vmul.f32 %v4587_v21, %v13533_v57  ;;  %v4589_v10 = vpop.f32.mrb[9].mxu1 }
 0x5b1   : > { %v4678_v13 = vmul.f32 %v4589_v10, %v13534_v39  ;;  %v4591_v34 = vpop.f32.mrb[10].mxu1 }
 0x5b2   : > { %v4685_v0 = vsel %vm286_vm0, %v4677_v43, 0.0  ;;  %v4592_v12 = vpop.f32.mrb[11].mxu1 }
 0x5b3   : > { %v4686_v20 = vadd.f32 %v4685_v0, %v4684_v26  ;;  %v4687_v62 = vsel %vm286_vm0, %v4678_v13, 0.0 }
 0x5b5   : > { %v4688_v25 = vadd.f32 %v4687_v62, %v4686_v20 }
 0x5ce   : > { %v4669_v24 = vpop.f32.mrb[12].mxu1 }
 0x5cf   : > { %v4681_v29 = vmul.f32 %v4669_v24, %v13536_v59  ;;  %v9744_v49 = vpop.f32.mrb[13].mxu1 }
 0x5d0   : > { %v4628_v42 = vpop.f32.mrb[12].mxu0  ;;  %v4672_v27 = vpop.f32.mrb[14].mxu1 }
 0x5d1   : > { %v4679_v22 = vmul.f32 %v4628_v42, %v13535_v8  ;;  %v4630_v45 = vpop.f32.mrb[13].mxu0  ;;  %v9745_v35 = vpop.f32.mrb[15].mxu1  ;;  %v4693_v4 = vsel %vm286_vm0, %v4681_v29, 0.0 }
 0x5d2   : > { %v4680_v48 = vmul.f32 %v4630_v45, %v13537_v50  ;;  %v4632_v6 = vpop.f32.mrb[14].mxu0  ;;  %v13538_v35 = vld [vmem:[#allocation5_spill] sm:$0xff] }
 0x5d3   : > { %v4689_v41 = vsel %vm286_vm0, %v4679_v22, 0.0  ;;  %v4633_v32 = vpop.f32.mrb[15].mxu0 }
 0x5d4   : > { %v4690_v7 = vadd.f32 %v4689_v41, %v4688_v25  ;;  %v4691_v23 = vsel %vm286_vm0, %v4680_v48, 0.0  ;;  %v10137_v41 = vld [vmem:[%s10228_s17] sm:$0xff] }
 0x5d6   : > { %v4692_v40 = vadd.f32 %v4691_v23, %v4690_v7  ;;  %v10138_v23 = vld [vmem:[%s10228_s17 + $0x8] sm:$0xff] }
 0x5d8   : > { %v4694_v31 = vadd.f32 %v4693_v4, %v4692_v40  ;;  %v13539_v40 = vld [vmem:[#allocation6_spill] sm:$0xff] }
 0x5da   : > { %4695 = vadd.xlane.f32.xlu0 %v4694_v31 }
 0x667   : > { %v4696_v16 = vpop.xlane.xlu0 %4695 }
 0x668   : > { %v4697_v46 = vmul.f32 0.001953125, %v4696_v16  ;;  %v10139_v16 = vld [vmem:[%s10228_s17 + $0x10] sm:$0xff] }
 0x66a   : > { %v4698_v61 = vsub.f32 %v4546_v9, %v4697_v46  ;;  %v4699_v15 = vsub.f32 %v4548_v47, %v4697_v46  ;;  %v4700_v38 = vsub.f32 %v4587_v21, %v4697_v46  ;;  %v4701_v51 = vsub.f32 %v4589_v10, %v4697_v46 }
 0x66b   : > { %v4702_v18 = vsub.f32 %v4628_v42, %v4697_v46  ;;  %v4703_v1 = vsub.f32 %v4630_v45, %v4697_v46  ;;  %v4704_v5 = vsub.f32 %v4669_v24, %v4697_v46 }
 0x66c   : > { %v4705_v53 = vmul.f32 %v4698_v61, %v13531_v52  ;;  %v4706_v58 = vmul.f32 %v4699_v15, %v13532_v11  ;;  %v4707_v36 = vmul.f32 %v4700_v38, %v13533_v57  ;;  %v4708_v56 = vmul.f32 %v4701_v51, %v13534_v39 }
 0x66d   : > { %v4709_v17 = vmul.f32 %v4702_v18, %v13535_v8  ;;  %v4710_v63 = vmul.f32 %v4703_v1, %v13537_v50  ;;  %v4711_v14 = vmul.f32 %v4704_v5, %v13536_v59 }
 0x66e   : > { %v4712_v28 = vmul.f32 %v4705_v53, %v4705_v53  ;;  %v4713_v2 = vmul.f32 %v4706_v58, %v4706_v58  ;;  %v4714_v19 = vmul.f32 %v4707_v36, %v4707_v36  ;;  %v4715_v44 = vmul.f32 %v4708_v56, %v4708_v56  ;;  %v13540_v53 = vld [vmem:[#allocation7_spill] sm:$0xff] }
 0x66f   : > { %v4716_v55 = vmul.f32 %v4709_v17, %v4709_v17  ;;  %v4717_v33 = vmul.f32 %v4710_v63, %v4710_v63  ;;  %v4718_v43 = vmul.f32 %v4711_v14, %v4711_v14 }
 0x670   : > { %v4719_v9 = vsel %vm286_vm0, %v4712_v28, 0.0  ;;  %v4720_v54 = vsel %vm286_vm0, %v4713_v2, 0.0  ;;  %v4722_v37 = vsel %vm286_vm0, %v4714_v19, 0.0  ;;  %v4724_v21 = vsel %vm286_vm0, %v4715_v44, 0.0 }
 0x671   : > { %v4721_v47 = vadd.f32 %v4720_v54, %v4719_v9  ;;  %v4726_v10 = vsel %vm286_vm0, %v4716_v55, 0.0  ;;  %v4728_v34 = vsel %vm286_vm0, %v4717_v33, 0.0  ;;  %v4730_v12 = vsel %vm286_vm0, %v4718_v43, 0.0 }
 0x673   : > { %v4723_v30 = vadd.f32 %v4722_v37, %v4721_v47 }
 0x675   : > { %v4725_v26 = vadd.f32 %v4724_v21, %v4723_v30  ;;  %v13541_v21 = vld [vmem:[#allocation8_spill] sm:$0xff] }
 0x677   : > { %v4727_v13 = vadd.f32 %v4726_v10, %v4725_v26 }
 0x679   : > { %v4729_v0 = vadd.f32 %v4728_v34, %v4727_v13 }
 0x67b   : > { %v4731_v20 = vadd.f32 %v4730_v12, %v4729_v0 }
 0x67d   : > { %4732 = vadd.xlane.f32.xlu1 %v4731_v20 }
 0x70a   : > { %v4733_v62 = vpop.xlane.xlu1 %4732 }
 0x70b   : > { %v4734_v25 = vmul.f32 0.001953125, %v4733_v62 }
 0x70d   : > { %v4735_v42 = vadd.f32 1e-05, %v4734_v25 }
 0x70f   : > { %10131 = vrsqrt.f32 %v4735_v42 }
 0x719   : > { %v10132_v24 = vpop.eup %10131 }
 0x71a   : > { %v4737_v22 = vmul.f32 %v10132_v24, %v4698_v61  ;;  %v4738_v45 = vmul.f32 %v10132_v24, %v4699_v15  ;;  %v4739_v29 = vmul.f32 %v10132_v24, %v4700_v38  ;;  %v4740_v49 = vmul.f32 %v10132_v24, %v4701_v51  ;;  %v10140_v61 = vld [vmem:[%s10228_s17 + $0x18] sm:$0xf]  ;;  %s13542_s17 = smov 90  }
 0x71b   : > { %v4741_v48 = vmul.f32 %v10132_v24, %v4702_v18  ;;  %v4742_v6 = vmul.f32 %v10132_v24, %v4703_v1  ;;  %v4743_v27 = vmul.f32 %v10132_v24, %v4704_v5 }
 0x71c   : > { %v4744_v32 = vadd.f32 %v10137_v41, %v4737_v22  ;;  %v4745_v7 = vadd.f32 %v4738_v45, %v13538_v35  ;;  %v4746_v4 = vadd.f32 %v10138_v23, %v4739_v29  ;;  %v4747_v31 = vadd.f32 %v4740_v49, %v13539_v40 }
 0x71d   : > { %v4748_v46 = vadd.f32 %v10139_v16, %v4741_v48  ;;  %v4749_v58 = vadd.f32 %v4742_v6, %v13540_v53  ;;  %v4750_v36 = vadd.f32 %v10140_v61, %v4743_v27 }
 0x71e   : > { %v4751_v15 = vmax.f32 %v4744_v32, 0.0  ;;  %v4752_v38 = vmax.f32 %v4745_v7, 0.0  ;;  %v4753_v51 = vmax.f32 %v4746_v4, 0.0  ;;  %v4754_v18 = vmax.f32 %v4747_v31, 0.0 }
 0x71f   : > { %v4755_v1 = vmax.f32 %v4748_v46, 0.0  ;;  %v4756_v56 = vmax.f32 %v4749_v58, 0.0  ;;  %v4757_v5 = vmax.f32 %v4750_v36, 0.0 }
 0x720   : > { %v4758_v17 = vmul.f32 %v4751_v15, %v13531_v52  ;;  %v4759_v28 = vmul.f32 %v4752_v38, %v13532_v11  ;;  %v4760_v2 = vmul.f32 %v4753_v51, %v13533_v57  ;;  %v4761_v19 = vmul.f32 %v4754_v18, %v13534_v39 }
 0x721   : > { %v4762_v63 = vmul.f32 %v4755_v1, %v13535_v8  ;;  %v4763_v44 = vmul.f32 %v4756_v56, %v13537_v50  ;;  %v4764_v9 = vmul.f32 %v4757_v5, %v13536_v59 }
 0x722   : > { %v4771_v54 = vcombine.low %v4758_v17, %v4759_v28  ;;  %v4772_v47 = vcombine.low %v4760_v2, %v4761_v19  ;;  %v9545_v14 = vpack.c.bf16 %v4759_v28, %v4758_v17  ;;  %v9546_v55 = vpack.c.bf16 %v4761_v19, %v4760_v2 }
 0x723   : > { %v4773_v37 = vcombine.low %v4762_v63, %v4763_v44  ;;  %4780 = vst [vmem:[#allocation4 + $0x18] sm:$0xf] %v4764_v9  ;;  %v4787_v30 = vpack.c.bf16 %v4764_v9, %v4764_v9  ;;  %v9547_v33 = vpack.c.bf16 %v4763_v44, %v4762_v63 }
 0x724   : > { %4777 = vst [vmem:[#allocation4] sm:$0xff] %v4771_v54  ;;  %4778 = vst [vmem:[#allocation4 + $0x8] sm:$0xff] %v4772_v47  ;;  %v11752_v26 = vrot.slane %v9545_v14, %v13541_v21  ;;  %v11755_v43 = vrot.slane %v9546_v55, %v13541_v21 }
 0x725   : > { %4779 = vst [vmem:[#allocation4 + $0x10] sm:$0xff] %v4773_v37  ;;  %v4819_v10 = vrot.slane %v9547_v33, %v13541_v21  ;;  %v4826_v13 = vrot.slane %v4787_v30, %v13541_v21 }
 0x726   : > { %v4811_v34 = vcombine.low %v11752_v26, %v11755_v43  ;;  %v10145_v16 = vcombine.low %v11752_v26, %v11752_v26  ;;  %v10146_v51 = vcombine.low %v11755_v43, %v11755_v43 }
 0x727   : > { %v4827_v0 = vcombine.low %v4819_v10, %v4826_v13 }
 0x728   : > { %4830 = vst [vmem:[#allocation2 + $0x2] sm:$0xff] %v4811_v34  ;;  %v5746_v29 = vrot.slane %v4811_v34, %v13541_v21  ;;  %v5739_v58 = vrot.slane %v10145_v16, %v13541_v21  ;;  %v5807_v56 = vrot.slane %v10146_v51, %v13541_v21 }
 0x729   : > { %4831 = vst [vmem:[#allocation2 + $0xa] sm:$0x3f] %v4827_v0 }
 0x72f   : > { %v11761_v12 = vld [vmem:[#allocation2] sm:$0xff] }
 0x730   : > { %v5625_v20 = vld [vmem:[#allocation2 + $0x2] sm:$0xff]  ;;  %v4911_v62 = vrot.slane %v11761_v12, %v13541_v21  ;;  %v5626_v42 = vld [vmem:[#allocation2 + $0xa] sm:$0x3f]  ;;  %v4836_v6 = vcombine.high %v11761_v12, %v11761_v12  ;;  %v4897_v41 = vcombine.low %v11761_v12, %v11761_v12 }
 0x731   : > { %v5629_v25 = vcombine.low %v5625_v20, %v5625_v20  ;;  %9549 = vst.sshfl [vmem:[#allocation3 + $0xb0] sm:$0xf0 pattern:$0x76325410] %v5625_v20  ;;  %v5644_v24 = vcombine.low %v5626_v42, %v5626_v42  ;;  %v11767_v22 = vld [vmem:[#allocation2 + $0x8] sm:$0xff] }
 0x732   : > { %9551 = vst.sshfl [vmem:[#allocation3 + $0xc0] sm:$0x30 pattern:$0x76325410] %v5626_v42  ;;  %4929 = vrot.lane.b32.xlu1 %v4911_v62, %s10159_s18  ;;  %4866 = vrot.lane.b32.xlu0 %v4911_v62, %s10160_s19  ;;  %v4858_v45 = vrot.slane %v11767_v22, %v13541_v21  ;;  %v11782_v49 = vld [vmem:[#allocation2 + $0xa] sm:$0xff]  ;;  %v4850_v27 = vrot.slane %v4836_v6, %v13541_v21 }
 0x733   : > { %9548 = vst.sshfl [vmem:[#allocation3 + $0xa8] sm:$0xf0 pattern:$0x76325410] %v5629_v25  ;;  %v11788_v48 = vrot.slane %v11782_v49, %v13541_v21  ;;  %v4904_v32 = vrot.slane %v4897_v41, %v13541_v21  ;;  %v4912_v35 = vcombine.low %v11767_v22, %v11767_v22  ;;  %v5747_v61 = vcombine.low %v11782_v49, %v11782_v49 }
 0x734   : > { %9550 = vst.sshfl [vmem:[#allocation3 + $0xb8] sm:$0xf0 pattern:$0x76325410] %v5644_v24  ;;  %v4851_v13 = vcombine.high %v11767_v22, %v11767_v22  ;;  %v5686_v25 = vcombine.high %v11782_v49, %v11782_v49 }
 0x735   : > { %v4919_v7 = vrot.slane %v4912_v35, %v13541_v21  ;;  %v5754_v38 = vrot.slane %v5747_v61, %v13541_v21 }
 0x736   : > { %5051 = vrot.lane.b32.xlu1 %v4911_v62, %s10161_s20  ;;  %4988 = vrot.lane.b32.xlu0 %v4911_v62, %s13376_s21  ;;  %v4865_v12 = vrot.slane %v4851_v13, %v13541_v21  ;;  %v5700_v22 = vrot.slane %v5686_v25, %v13541_v21 }
 0x73a   : > { %5173 = vrot.lane.b32.xlu1 %v4911_v62, %s13346_s22  ;;  %4870 = vrot.lane.b32.xlu0 %v4858_v45, %s10160_s19 }
 0x73e   : > { %5295 = vrot.lane.b32.xlu1 %v4911_v62, %s13542_s17  ;;  %4992 = vrot.lane.b32.xlu0 %v4858_v45, %s13376_s21 }
 0x742   : > { %5417 = vrot.lane.b32.xlu1 %v4911_v62, %s10168_s27  ;;  %5110 = vrot.lane.b32.xlu0 %v4911_v62, %s10164_s23 }
 0x746   : > { %5539 = vrot.lane.b32.xlu1 %v4911_v62, %s10170_s29  ;;  %5232 = vrot.lane.b32.xlu0 %v4911_v62, %s13374_s24 }
 0x74a   : > { %5764 = vrot.lane.b32.xlu1 %v5746_v29, %s13543_s14  ;;  %5114 = vrot.lane.b32.xlu0 %v4858_v45, %s10164_s23 }
 0x74e   : > { %5705 = vrot.lane.b32.xlu1 %v11788_v48, %s13448_s5  ;;  %5236 = vrot.lane.b32.xlu0 %v4858_v45, %s13374_s24 }
 0x752   : > { %5823 = vrot.lane.b32.xlu1 %v5746_v29, %s13344_s6  ;;  %5354 = vrot.lane.b32.xlu0 %v4911_v62, %s10167_s26 }
 0x756   : > { %5945 = vrot.lane.b32.xlu1 %v5746_v29, %s13447_s25  ;;  %5476 = vrot.lane.b32.xlu0 %v4911_v62, %s10169_s28 }
 0x75a   : > { %5827 = vrot.lane.b32.xlu1 %v11788_v48, %s13344_s6  ;;  %5358 = vrot.lane.b32.xlu0 %v4858_v45, %s10167_s26  ;;  %s13545_s6 = smov 19  }
 0x75e   : > { %5949 = vrot.lane.b32.xlu1 %v11788_v48, %s13447_s25  ;;  %5480 = vrot.lane.b32.xlu0 %v4858_v45, %s10169_s28 }
 0x762   : > { %6067 = vrot.lane.b32.xlu1 %v5746_v29, %s13372_s10  ;;  %5598 = vrot.lane.b32.xlu0 %v4911_v62, %s13370_s30 }
 0x766   : > { %6189 = vrot.lane.b32.xlu1 %v5746_v29, %s13544_s16  ;;  %5701 = vrot.lane.b32.xlu0 %v5746_v29, %s13448_s5 }
 0x76a   : > { %6071 = vrot.lane.b32.xlu1 %v11788_v48, %s13372_s10  ;;  %5602 = vrot.lane.b32.xlu0 %v4858_v45, %s13370_s30 }
 0x76e   : > { %6193 = vrot.lane.b32.xlu1 %v11788_v48, %s13544_s16  ;;  %5886 = vrot.lane.b32.xlu0 %v5746_v29, %s13442_s11 }
 0x772   : > { %6311 = vrot.lane.b32.xlu1 %v5746_v29, %s13545_s6  ;;  %6008 = vrot.lane.b32.xlu0 %v5746_v29, %s13443_s15 }
 0x776   : > { %6433 = vrot.lane.b32.xlu1 %v5746_v29, %s13444_s8  ;;  %6130 = vrot.lane.b32.xlu0 %v5746_v29, %s13403_s7 }
 0x77a   : > { %6315 = vrot.lane.b32.xlu1 %v11788_v48, %s13545_s6  ;;  %6252 = vrot.lane.b32.xlu0 %v5746_v29, %s13404_s9 }
 0x77e   : > { %6437 = vrot.lane.b32.xlu1 %v11788_v48, %s13444_s8  ;;  %6374 = vrot.lane.b32.xlu0 %v5746_v29, %s13445_s4 }
 0x782   : > { %5177 = vrot.lane.b32.xlu1 %v4858_v45, %s13346_s22  ;;  %4933 = vrot.lane.b32.xlu0 %v4858_v45, %s10159_s18 }
 0x786   : > { %5299 = vrot.lane.b32.xlu1 %v4858_v45, %s13542_s17  ;;  %5055 = vrot.lane.b32.xlu0 %v4858_v45, %s10161_s20 }
 0x78a   : > { %5421 = vrot.lane.b32.xlu1 %v4858_v45, %s10168_s27  ;;  %5768 = vrot.lane.b32.xlu0 %v11788_v48, %s13543_s14 }
 0x78e   : > { %5543 = vrot.lane.b32.xlu1 %v4858_v45, %s10170_s29  ;;  %5890 = vrot.lane.b32.xlu0 %v11788_v48, %s13442_s11 }
 0x792   : > { %6012 = vrot.lane.b32.xlu0 %v11788_v48, %s13443_s15  ;;  %4868 = vrot.lane.b32.xlu1 %v4850_v27, %s10160_s19 }
 0x796   : > { %4927 = vrot.lane.b32.xlu0 %v4904_v32, %s10159_s18  ;;  %4990 = vrot.lane.b32.xlu1 %v4850_v27, %s13376_s21 }
 0x79a   : > { %5049 = vrot.lane.b32.xlu0 %v4904_v32, %s10161_s20  ;;  %4931 = vrot.lane.b32.xlu1 %v4919_v7, %s10159_s18 }
 0x79e   : > { %5171 = vrot.lane.b32.xlu0 %v4904_v32, %s13346_s22  ;;  %5053 = vrot.lane.b32.xlu1 %v4919_v7, %s10161_s20 }
 0x7a2   : > { %5293 = vrot.lane.b32.xlu0 %v4904_v32, %s13542_s17  ;;  %5112 = vrot.lane.b32.xlu1 %v4850_v27, %s10164_s23 }
 0x7a4   : > { %v11853_v23 = vpop.permute.xlu1 %4929  ;;  %v11855_v4 = vpop.permute.xlu0 %4866 }
 0x7a5   : > { %v4874_v21 = vrot.slane %v11855_v4, 4 }
 0x7a6   : > { %5415 = vrot.lane.b32.xlu0 %v4904_v32, %s10168_s27  ;;  %5234 = vrot.lane.b32.xlu1 %v4850_v27, %s13374_s24 }
 0x7a8   : > { %v11859_v40 = vpop.permute.xlu1 %5051  ;;  %v11861_v31 = vpop.permute.xlu0 %4988 }
 0x7a9   : > { %v4996_v60 = vrot.slane %v11861_v31, 4 }
 0x7aa   : > { %5537 = vrot.lane.b32.xlu0 %v4904_v32, %s10170_s29  ;;  %5175 = vrot.lane.b32.xlu1 %v4919_v7, %s13346_s22  ;;  %s13547_s22 = smov 118  }
 0x7ac   : > { %v11867_v46 = vpop.permute.xlu1 %5173  ;;  %v11869_v53 = vpop.permute.xlu0 %4870 }
 0x7ad   : > { %v13367_v50 = vrot.slane %v11869_v53, 4 }
 0x7ae   : > { %5762 = vrot.lane.b32.xlu0 %v5739_v58, %s13543_s14  ;;  %5297 = vrot.lane.b32.xlu1 %v4919_v7, %s13542_s17 }
 0x7b0   : > { %v11876_v36 = vpop.permute.xlu1 %5295  ;;  %v11878_v15 = vpop.permute.xlu0 %4992 }
 0x7b1   : > { %13546 = vst [vmem:[#allocation16_spill] sm:$0xff] %v11878_v15 }
 0x7b2   : > { %5766 = vrot.lane.b32.xlu0 %v5754_v38, %s13543_s14  ;;  %5356 = vrot.lane.b32.xlu1 %v4850_v27, %s10167_s26 }
 0x7b4   : > { %v11885_v18 = vpop.permute.xlu1 %5417  ;;  %v11887_v1 = vpop.permute.xlu0 %5110 }
 0x7b6   : > { %5825 = vrot.lane.b32.xlu0 %v5807_v56, %s13547_s22  ;;  %5478 = vrot.lane.b32.xlu1 %v4850_v27, %s10169_s28 }
 0x7b8   : > { %v11892_v5 = vpop.permute.xlu1 %5539  ;;  %v11894_v17 = vpop.permute.xlu0 %5232 }
 0x7ba   : > { %5947 = vrot.lane.b32.xlu0 %v5807_v56, %s13447_s25  ;;  %5419 = vrot.lane.b32.xlu1 %v4919_v7, %s10168_s27 }
 0x7bc   : > { %v11898_v28 = vpop.permute.xlu1 %5764  ;;  %v11900_v2 = vpop.permute.xlu0 %5114 }
 0x7be   : > { %5888 = vrot.lane.b32.xlu0 %v5754_v38, %s13442_s11  ;;  %5541 = vrot.lane.b32.xlu1 %v4919_v7, %s10170_s29 }
 0x7c0   : > { %v11904_v19 = vpop.permute.xlu1 %5705  ;;  %v11906_v63 = vpop.permute.xlu0 %5236 }
 0x7c2   : > { %6010 = vrot.lane.b32.xlu0 %v5754_v38, %s13443_s15  ;;  %5600 = vrot.lane.b32.xlu1 %v4850_v27, %s13370_s30 }
 0x7c4   : > { %v11910_v44 = vpop.permute.xlu1 %5823  ;;  %v11912_v9 = vpop.permute.xlu0 %5354 }
 0x7c6   : > { %6069 = vrot.lane.b32.xlu0 %v5807_v56, %s13372_s10  ;;  %5703 = vrot.lane.b32.xlu1 %v5807_v56, %s13448_s5 }
 0x7c8   : > { %v11916_v54 = vpop.permute.xlu1 %5945  ;;  %v11918_v47 = vpop.permute.xlu0 %5476 }
 0x7ca   : > { %6191 = vrot.lane.b32.xlu0 %v5807_v56, %s13544_s16  ;;  %5884 = vrot.lane.b32.xlu1 %v5739_v58, %s13442_s11 }
 0x7cc   : > { %v11922_v14 = vpop.permute.xlu1 %5827  ;;  %v11924_v55 = vpop.permute.xlu0 %5358 }
 0x7ce   : > { %6132 = vrot.lane.b32.xlu0 %v5754_v38, %s13403_s7  ;;  %6006 = vrot.lane.b32.xlu1 %v5739_v58, %s13443_s15 }
 0x7d0   : > { %v11928_v37 = vpop.permute.xlu1 %5949  ;;  %v11930_v30 = vpop.permute.xlu0 %5480 }
 0x7d2   : > { %6254 = vrot.lane.b32.xlu0 %v5754_v38, %s13404_s9  ;;  %6128 = vrot.lane.b32.xlu1 %v5739_v58, %s13403_s7 }
 0x7d4   : > { %v11934_v33 = vpop.permute.xlu1 %6067  ;;  %v11936_v26 = vpop.permute.xlu0 %5598 }
 0x7d6   : > { %6313 = vrot.lane.b32.xlu0 %v5807_v56, %s13545_s6  ;;  %6250 = vrot.lane.b32.xlu1 %v5739_v58, %s13404_s9 }
 0x7d8   : > { %v11940_v43 = vpop.permute.xlu1 %6189  ;;  %v11942_v10 = vpop.permute.xlu0 %5701 }
 0x7da   : > { %6435 = vrot.lane.b32.xlu0 %v5807_v56, %s13444_s8  ;;  %6372 = vrot.lane.b32.xlu1 %v5739_v58, %s13445_s4 }
 0x7dc   : > { %v11948_v34 = vpop.permute.xlu1 %6071  ;;  %v11950_v0 = vpop.permute.xlu0 %5602 }
 0x7de   : > { %6376 = vrot.lane.b32.xlu0 %v5754_v38, %s13445_s4  ;;  %4872 = vrot.lane.b32.xlu1 %v4865_v12, %s10160_s19 }
 0x7e0   : > { %v11955_v20 = vpop.permute.xlu1 %6193  ;;  %v11957_v62 = vpop.permute.xlu0 %5886 }
 0x7e2   : > { %5116 = vrot.lane.b32.xlu0 %v4865_v12, %s10164_s23  ;;  %4994 = vrot.lane.b32.xlu1 %v4865_v12, %s13376_s21 }
 0x7e4   : > { %v11963_v42 = vpop.permute.xlu1 %6311  ;;  %v11965_v24 = vpop.permute.xlu0 %6008 }
 0x7e6   : > { %5238 = vrot.lane.b32.xlu0 %v4865_v12, %s13374_s24  ;;  %5707 = vrot.lane.b32.xlu1 %v5700_v22, %s13448_s5 }
 0x7e8   : > { %v11970_v45 = vpop.permute.xlu1 %6433  ;;  %v11972_v29 = vpop.permute.xlu0 %6130 }
 0x7ea   : > { %5360 = vrot.lane.b32.xlu0 %v4865_v12, %s10167_s26  ;;  %5829 = vrot.lane.b32.xlu1 %v5700_v22, %s13547_s22 }
 0x7ec   : > { %v11976_v49 = vpop.permute.xlu1 %6315  ;;  %v11978_v6 = vpop.permute.xlu0 %6252 }
 0x7ee   : > { %5482 = vrot.lane.b32.xlu0 %v4865_v12, %s10169_s28  ;;  %5951 = vrot.lane.b32.xlu1 %v5700_v22, %s13447_s25 }
 0x7f0   : > { %v11982_v27 = vpop.permute.xlu1 %6437  ;;  %v11984_v41 = vpop.permute.xlu0 %6374 }
 0x7f2   : > { %5604 = vrot.lane.b32.xlu0 %v4865_v12, %s13370_s30  ;;  %6073 = vrot.lane.b32.xlu1 %v5700_v22, %s13372_s10  ;;  %s13641_s30 = smov 99   ;;  %s13642_s10 = smov 37  }
 0x7f4   : > { %v11988_v32 = vpop.permute.xlu1 %5177  ;;  %v11990_v35 = vpop.permute.xlu0 %4933 }
 0x7f5   : > { %v13348_v7 = vrot.slane %v11988_v32, 4  ;;  %v13349_v16 = vrot.slane %v11990_v35, 4 }
 0x7f6   : > { %6134 = vrot.lane.b32.xlu0 %v11788_v48, %s13403_s7  ;;  %6195 = vrot.lane.b32.xlu1 %v5700_v22, %s13544_s16 }
 0x7f7   : > { %v5189_v58 = vsel %vm598_vm6, %v11988_v32, %v13348_v7  ;;  %v4945_v61 = vsel %vm350_vm1, %v11990_v35, %v13349_v16 }
 0x7f8   : > { %5197 = vst [vmem:[#allocation3 + $0x50] sm:$0xc] %v5189_v58  ;;  %4953 = vst [vmem:[#allocation3 + $0x18] sm:$0xc] %v4945_v61  ;;  %v12005_v38 = vpop.permute.xlu1 %5299  ;;  %v12007_v51 = vpop.permute.xlu0 %5055 }
 0x7f9   : > { %v13350_v56 = vrot.slane %v12005_v38, 4  ;;  %v13351_v13 = vrot.slane %v12007_v51, 4 }
 0x7fa   : > { %6256 = vrot.lane.b32.xlu0 %v11788_v48, %s13404_s9  ;;  %6317 = vrot.lane.b32.xlu1 %v5700_v22, %s13545_s6 }
 0x7fb   : > { %v5311_v12 = vsel %vm722_vm8, %v12005_v38, %v13350_v56  ;;  %v5067_v25 = vsel %vm474_vm4, %v12007_v51, %v13351_v13 }
 0x7fc   : > { %5319 = vst [vmem:[#allocation3 + $0x6c] sm:$0xc] %v5311_v12  ;;  %5075 = vst [vmem:[#allocation3 + $0x34] sm:$0xc] %v5067_v25  ;;  %v12022_v58 = vpop.permute.xlu1 %5421  ;;  %v12024_v61 = vpop.permute.xlu0 %5768 }
 0x7fd   : > { %v13352_v7 = vrot.slane %v12022_v58, 4  ;;  %v13353_v16 = vrot.slane %v12024_v61, 4 }
 0x7fe   : > { %6378 = vrot.lane.b32.xlu0 %v11788_v48, %s13445_s4  ;;  %6439 = vrot.lane.b32.xlu1 %v5700_v22, %s13444_s8 }
 0x7ff   : > { %v5433_v56 = vsel %vm846_vm10, %v12022_v58, %v13352_v7  ;;  %v5780_v12 = vsel %vm13548_vm12, %v12024_v61, %v13353_v16  ;;  %vm13552_vm12 = vcmask 908288  }
 0x800   : > { %5441 = vst [vmem:[#allocation3 + $0x88] sm:$0xc] %v5433_v56  ;;  %5788 = vst [vmem:[#allocation3 + $0xdc] sm:$0xc] %v5780_v12  ;;  %v12039_v25 = vpop.permute.xlu1 %5543  ;;  %v12041_v13 = vpop.permute.xlu0 %5890 }
 0x801   : > { %v13358_v48 = vrot.slane %v12039_v25, 4  ;;  %v13360_v22 = vrot.slane %v12041_v13, 4 }
 0x803   : > { %v5555_v7 = vsel %vm13549_vm9, %v12039_v25, %v13358_v48  ;;  %v5902_v16 = vsel %vm13550_vm7, %v12041_v13, %v13360_v22  ;;  %vm13553_vm9 = vmmov %vm13552_vm12  ;;  %vm13554_vm7 = vcmask 891904  }
 0x804   : > { %5563 = vst [vmem:[#allocation3 + $0xa4] sm:$0xc] %v5555_v7  ;;  %5910 = vst [vmem:[#allocation3 + $0xf8] sm:$0xc] %v5902_v16  ;;  %v12053_v56 = vpop.permute.xlu0 %6012  ;;  %v4869_v12 = vpop.permute.xlu1 %4868  ;;  %v4936_v16 = vrot.slane %v11853_v23, 4 }
 0x805   : > { %v13365_v59 = vrot.slane %v12053_v56, 4  ;;  %v4875_v8 = vrot.slane %v4869_v12, 4 }
 0x807   : > { %v6024_v48 = vsel %vm13551_vm15, %v12053_v56, %v13365_v59  ;;  %v4878_v39 = vsel %vm286_vm0, %v4874_v21, %v4875_v8  ;;  %v4880_v7 = vsel %vm286_vm0, %v4875_v8, %v13367_v50  ;;  %v4998_v59 = vrot.slane %v11878_v15, 4  ;;  %vm13555_vm15 = vmmov %vm13554_vm7 }
 0x808   : > { %6032 = vst [vmem:[#allocation3 + $0x114] sm:$0xc] %v6024_v48  ;;  %v4879_v22 = vsel %vm13552_vm12, %v11855_v4, %v4878_v39  ;;  %v4881_v57 = vsel %vm13553_vm9, %v4869_v12, %v4880_v7  ;;  %v4928_v11 = vpop.permute.xlu0 %4927  ;;  %v4991_v52 = vpop.permute.xlu1 %4990  ;;  %vm13558_vm12 = vcmask 818176  }
 0x809   : > { %4889 = vst [vmem:[#allocation3] sm:$0x33] %v4879_v22  ;;  %4890 = vst [vmem:[#allocation3 + $0x8] sm:$0x33] %v4881_v57  ;;  %v4935_v21 = vrot.slane %v4928_v11, 4  ;;  %v4997_v3 = vrot.slane %v4991_v52, 4 }
 0x80a   : > { %v5058_v57 = vrot.slane %v11859_v40, 4  ;;  %vm13559_vm9 = vmmov %vm13558_vm12 }
 0x80b   : > { %v4939_v8 = vsel %vm286_vm0, %v4935_v21, %v4936_v16  ;;  %v5000_v50 = vsel %vm286_vm0, %v4996_v60, %v4997_v3  ;;  %v5002_v39 = vsel %vm286_vm0, %v4997_v3, %v4998_v59 }
 0x80c   : > { %v4940_v4 = vsel %vm350_vm1, %v4928_v11, %v4939_v8  ;;  %v5001_v48 = vsel %vm13554_vm7, %v11861_v31, %v5000_v50  ;;  %v5003_v12 = vsel %vm13555_vm15, %v4991_v52, %v5002_v39  ;;  %v5050_v7 = vpop.permute.xlu0 %5049  ;;  %v4932_v22 = vpop.permute.xlu1 %4931  ;;  %v13556_v11 = vrot.slane %v11990_v35, 4 }
 0x80d   : > { %4950 = vst [vmem:[#allocation3] sm:$0xcc] %v4940_v4  ;;  %5011 = vst [vmem:[#allocation3 + $0x1c] sm:$0x33] %v5001_v48  ;;  %v5057_v21 = vrot.slane %v5050_v7, 4  ;;  %v4937_v60 = vrot.slane %v4932_v22, 4 }
 0x80e   : > { %5012 = vst [vmem:[#allocation3 + $0x24] sm:$0x33] %v5003_v12  ;;  %v5180_v48 = vrot.slane %v11867_v46, 4  ;;  %vm13560_vm7 = vcmask 744448  }
 0x80f   : > { %v5061_v15 = vsel %vm286_vm0, %v5057_v21, %v5058_v57  ;;  %v4941_v3 = vsel %vm286_vm0, %v4936_v16, %v4937_v60  ;;  %v4943_v8 = vsel %vm286_vm0, %v4937_v60, %v13556_v11  ;;  %vm13561_vm15 = vmmov %vm13560_vm7 }
 0x810   : > { %v5062_v50 = vsel %vm474_vm4, %v5050_v7, %v5061_v15  ;;  %v4942_v52 = vsel %vm350_vm1, %v11853_v23, %v4941_v3  ;;  %v4944_v31 = vsel %vm350_vm1, %v4932_v22, %v4943_v8  ;;  %v5172_v39 = vpop.permute.xlu0 %5171  ;;  %v5054_v4 = vpop.permute.xlu1 %5053  ;;  %v13557_v15 = vrot.slane %v12007_v51, 4 }
 0x811   : > { %5072 = vst [vmem:[#allocation3 + $0x1c] sm:$0xcc] %v5062_v50  ;;  %4951 = vst [vmem:[#allocation3 + $0x8] sm:$0xcc] %v4942_v52  ;;  %v5179_v12 = vrot.slane %v5172_v39, 4  ;;  %v5059_v16 = vrot.slane %v5054_v4, 4 }
 0x812   : > { %4952 = vst [vmem:[#allocation3 + $0x10] sm:$0xcc] %v4944_v31  ;;  %v5302_v23 = vrot.slane %v11876_v36, 4  ;;  %v5118_v50 = vrot.slane %v11887_v1, 4  ;;  %v5120_v52 = vrot.slane %v11900_v2, 4 }
 0x813   : > { %v5183_v35 = vsel %vm286_vm0, %v5179_v12, %v5180_v48  ;;  %v5063_v21 = vsel %vm286_vm0, %v5058_v57, %v5059_v16  ;;  %v5065_v7 = vsel %vm286_vm0, %v5059_v16, %v13557_v15 }
 0x814   : > { %v5184_v22 = vsel %vm598_vm6, %v5172_v39, %v5183_v35  ;;  %v5064_v60 = vsel %vm474_vm4, %v11859_v40, %v5063_v21  ;;  %v5066_v3 = vsel %vm474_vm4, %v5054_v4, %v5065_v7  ;;  %v5294_v11 = vpop.permute.xlu0 %5293  ;;  %v5113_v8 = vpop.permute.xlu1 %5112  ;;  %v5424_v4 = vrot.slane %v11885_v18, 4 }
 0x815   : > { %5194 = vst [vmem:[#allocation3 + $0x38] sm:$0xcc] %v5184_v22  ;;  %5073 = vst [vmem:[#allocation3 + $0x24] sm:$0xcc] %v5064_v60  ;;  %v5301_v51 = vrot.slane %v5294_v11, 4  ;;  %v5119_v57 = vrot.slane %v5113_v8, 4 }
 0x816   : > { %5074 = vst [vmem:[#allocation3 + $0x2c] sm:$0xcc] %v5066_v3  ;;  %v5240_v60 = vrot.slane %v11894_v17, 4  ;;  %v5242_v3 = vrot.slane %v11906_v63, 4 }
 0x817   : > { %v5305_v31 = vsel %vm286_vm0, %v5301_v51, %v5302_v23  ;;  %v5122_v39 = vsel %vm286_vm0, %v5118_v50, %v5119_v57  ;;  %v5124_v40 = vsel %vm286_vm0, %v5119_v57, %v5120_v52 }
 0x818   : > { %v5306_v12 = vsel %vm722_vm8, %v5294_v11, %v5305_v31  ;;  %v5123_v16 = vsel %vm13558_vm12, %v11887_v1, %v5122_v39  ;;  %v5125_v35 = vsel %vm13559_vm9, %v5113_v8, %v5124_v40  ;;  %v5416_v21 = vpop.permute.xlu0 %5415  ;;  %v5235_v15 = vpop.permute.xlu1 %5234  ;;  %v9981_v7 = vld [vmem:[#allocation3 + $0x4] ss:$28 sps:$4 sm:$0xff]   ;;  %vm13563_vm12 = vcmask 72704  }
 0x819   : > { %v9983_v22 = vld [vmem:[#allocation3] ss:$28 sps:$4 sm:$0xff]   ;;  %5316 = vst [vmem:[#allocation3 + $0x54] sm:$0xcc] %v5306_v12  ;;  %5133 = vst [vmem:[#allocation3 + $0x38] sm:$0x33] %v5123_v16  ;;  %6787 = vmatprep.subr.bf16.mxu0 %v9981_v7 }
 0x81a   : > { %5134 = vst [vmem:[#allocation3 + $0x40] sm:$0x33] %v5125_v35  ;;  %v5423_v50 = vrot.slane %v5416_v21, 4  ;;  %v5241_v51 = vrot.slane %v5235_v15, 4  ;;  %6788 = vmatpush1.bf16.msra.mxu0 %v9983_v22  ;;  %v5546_v7 = vrot.slane %v11892_v5, 4  ;;  %vm13565_vm9 = vcmask 973824  }
 0x81c   : > { %v5427_v1 = vsel %vm286_vm0, %v5423_v50, %v5424_v4  ;;  %v5244_v11 = vsel %vm286_vm0, %v5240_v60, %v5241_v51  ;;  %v5246_v8 = vsel %vm286_vm0, %v5241_v51, %v5242_v3  ;;  %v5538_v40 = vpop.permute.xlu0 %5537  ;;  %v5176_v12 = vpop.permute.xlu1 %5175  ;;  %v9984_v16 = vld [vmem:[#allocation3 + $0xc] ss:$28 sps:$4 sm:$0xff]  }
 0x81d   : > { %v5428_v57 = vsel %vm846_vm10, %v5416_v21, %v5427_v1  ;;  %v5245_v31 = vsel %vm13560_vm7, %v11894_v17, %v5244_v11  ;;  %v5247_v39 = vsel %vm13561_vm15, %v5235_v15, %v5246_v8  ;;  %v9986_v35 = vld [vmem:[#allocation3 + $0x8] ss:$28 sps:$4 sm:$0xff]   ;;  %v5545_v60 = vrot.slane %v5538_v40, 4  ;;  %6828 = vmatprep.subr.bf16.mxu1 %v9984_v16  ;;  %vm13567_vm7 = vmmov %vm13565_vm9 }
 0x81e   : > { %5438 = vst [vmem:[#allocation3 + $0x70] sm:$0xcc] %v5428_v57  ;;  %5255 = vst [vmem:[#allocation3 + $0x54] sm:$0x33] %v5245_v31  ;;  %v5181_v50 = vrot.slane %v5176_v12, 4  ;;  %v13562_v15 = vrot.slane %v11988_v32, 4  ;;  %6829 = vmatpush1.bf16.msra.mxu1 %v9986_v35 }
 0x81f   : > { %5256 = vst [vmem:[#allocation3 + $0x5c] sm:$0x33] %v5247_v39  ;;  %v5549_v21 = vsel %vm286_vm0, %v5545_v60, %v5546_v7  ;;  %v5771_v31 = vrot.slane %v11898_v28, 4  ;;  %v13564_v16 = vrot.slane %v12005_v38, 4  ;;  %vm13568_vm15 = vmmov %vm13567_vm7 }
 0x820   : > { %v5185_v17 = vsel %vm286_vm0, %v5180_v48, %v5181_v50  ;;  %v5187_v22 = vsel %vm286_vm0, %v5181_v50, %v13562_v15  ;;  %v5550_v51 = vsel %vm13563_vm12, %v5538_v40, %v5549_v21  ;;  %v5763_v8 = vpop.permute.xlu0 %5762  ;;  %v5298_v57 = vpop.permute.xlu1 %5297  ;;  %vm13569_vm12 = vcmask 728064  }
 0x821   : > { %v5186_v1 = vsel %vm598_vm6, %v11867_v46, %v5185_v17  ;;  %v5188_v11 = vsel %vm598_vm6, %v5176_v12, %v5187_v22  ;;  %5560 = vst [vmem:[#allocation3 + $0x8c] sm:$0xcc] %v5550_v51  ;;  %v5770_v48 = vrot.slane %v5763_v8, 4  ;;  %v5303_v39 = vrot.slane %v5298_v57, 4 }
 0x822   : > { %5195 = vst [vmem:[#allocation3 + $0x40] sm:$0xcc] %v5186_v1  ;;  %5196 = vst [vmem:[#allocation3 + $0x48] sm:$0xcc] %v5188_v11  ;;  %v5362_v22 = vrot.slane %v11912_v9, 4  ;;  %v5364_v51 = vrot.slane %v11924_v55, 4 }
 0x823   : > { %v5774_v32 = vsel %vm286_vm0, %v5770_v48, %v5771_v31  ;;  %v5307_v40 = vsel %vm286_vm0, %v5302_v23, %v5303_v39  ;;  %v5309_v46 = vsel %vm286_vm0, %v5303_v39, %v13564_v16  ;;  %v5831_v1 = vrot.slane %v11910_v44, 4 }
 0x824   : > { %v5775_v12 = vsel %vm13565_vm9, %v5763_v8, %v5774_v32  ;;  %v5308_v35 = vsel %vm722_vm8, %v11876_v36, %v5307_v40  ;;  %v5310_v60 = vsel %vm722_vm8, %v5298_v57, %v5309_v46  ;;  %v5767_v50 = vpop.permute.xlu0 %5766  ;;  %v5357_v21 = vpop.permute.xlu1 %5356  ;;  %v5484_v11 = vrot.slane %v11918_v47, 4  ;;  %vm13570_vm9 = vmmov %vm13569_vm12 }
 0x825   : > { %v9987_v17 = vld [vmem:[#allocation3 + $0x3c] ss:$28 sps:$4 sm:$0xff]   ;;  %5785 = vst [vmem:[#allocation3 + $0xc4] sm:$0xcc] %v5775_v12  ;;  %5317 = vst [vmem:[#allocation3 + $0x5c] sm:$0xcc] %v5308_v35 }
 0x826   : > { %v9989_v15 = vld [vmem:[#allocation3 + $0x38] ss:$28 sps:$4 sm:$0xff]   ;;  %5318 = vst [vmem:[#allocation3 + $0x64] sm:$0xcc] %v5310_v60  ;;  %v5772_v38 = vrot.slane %v5767_v50, 4  ;;  %v5363_v23 = vrot.slane %v5357_v21, 4  ;;  %6789 = vmatprep.subr.bf16.mxu0 %v9987_v17 }
 0x827   : > { %v13566_v8 = vrot.slane %v12024_v61, 4  ;;  %6790 = vmatpush1.bf16.msra.mxu0 %v9989_v15  ;;  %v5833_v12 = vrot.slane %v11922_v14, 4  ;;  %v5486_v35 = vrot.slane %v11930_v30, 4 }
 0x828   : > { %v5776_v36 = vsel %vm286_vm0, %v5771_v31, %v5772_v38  ;;  %v5366_v48 = vsel %vm286_vm0, %v5362_v22, %v5363_v23  ;;  %v5368_v39 = vsel %vm286_vm0, %v5363_v23, %v5364_v51  ;;  %v5826_v61 = vpop.permute.xlu0 %5825  ;;  %v5479_v46 = vpop.permute.xlu1 %5478 }
 0x829   : > { %v5778_v57 = vsel %vm286_vm0, %v5772_v38, %v13566_v8  ;;  %v5777_v32 = vsel %vm13567_vm7, %v11898_v28, %v5776_v36  ;;  %v5367_v16 = vsel %vm13569_vm12, %v11912_v9, %v5366_v48  ;;  %v5369_v31 = vsel %vm13570_vm9, %v5357_v21, %v5368_v39 }
 0x82a   : > { %v5779_v40 = vsel %vm13568_vm15, %v5767_v50, %v5778_v57  ;;  %5786 = vst [vmem:[#allocation3 + $0xcc] sm:$0xcc] %v5777_v32  ;;  %5377 = vst [vmem:[#allocation3 + $0x70] sm:$0x33] %v5367_v16  ;;  %v5832_v60 = vrot.slane %v5826_v61, 4  ;;  %v5485_v17 = vrot.slane %v5479_v46, 4 }
 0x82b   : > { %5787 = vst [vmem:[#allocation3 + $0xd4] sm:$0xcc] %v5779_v40  ;;  %5378 = vst [vmem:[#allocation3 + $0x78] sm:$0x33] %v5369_v31  ;;  %vm13571_vm7 = vcmask 965632   ;;  %vm13573_vm12 = vcmask 80896  }
 0x82c   : > { %v5835_v28 = vsel %vm286_vm0, %v5831_v1, %v5832_v60  ;;  %v5837_v9 = vsel %vm286_vm0, %v5832_v60, %v5833_v12  ;;  %v5488_v50 = vsel %vm286_vm0, %v5484_v11, %v5485_v17  ;;  %v5490_v21 = vsel %vm286_vm0, %v5485_v17, %v5486_v35  ;;  %vm13572_vm15 = vmmov %vm13571_vm7  ;;  %v5948_v1 = vpop.permute.xlu0 %5947  ;;  %v5420_v36 = vpop.permute.xlu1 %5419  ;;  %v9990_v8 = vld [vmem:[#allocation3 + $0x44] ss:$28 sps:$4 sm:$0xff]  }
 0x82d   : > { %v5836_v15 = vsel %vm13571_vm7, %v11910_v44, %v5835_v28  ;;  %v5838_v22 = vsel %vm13572_vm15, %v5826_v61, %v5837_v9  ;;  %v5489_v38 = vsel %vm13573_vm12, %v11918_v47, %v5488_v50  ;;  %vm13574_vm9 = vmmov %vm13573_vm12  ;;  %v9992_v57 = vld [vmem:[#allocation3 + $0x40] ss:$28 sps:$4 sm:$0xff]   ;;  %v5953_v11 = vrot.slane %v11916_v54, 4  ;;  %6830 = vmatprep.subr.bf16.mxu1 %v9990_v8 }
 0x82e   : > { %v5491_v23 = vsel %vm13574_vm9, %v5479_v46, %v5490_v21  ;;  %v5955_v48 = vrot.slane %v11928_v37, 4  ;;  %5846 = vst [vmem:[#allocation3 + $0xe0] sm:$0x33] %v5836_v15  ;;  %5847 = vst [vmem:[#allocation3 + $0xe8] sm:$0x33] %v5838_v22  ;;  %v5954_v44 = vrot.slane %v5948_v1, 4  ;;  %6831 = vmatpush1.bf16.msra.mxu1 %v9992_v57 }
 0x82f   : > { %5499 = vst [vmem:[#allocation3 + $0x8c] sm:$0x33] %v5489_v38  ;;  %5500 = vst [vmem:[#allocation3 + $0x94] sm:$0x33] %v5491_v23  ;;  %v5425_v39 = vrot.slane %v5420_v36, 4  ;;  %v13575_v16 = vrot.slane %v12022_v58, 4 }
 0x830   : > { %v5957_v32 = vsel %vm286_vm0, %v5953_v11, %v5954_v44  ;;  %v5959_v47 = vsel %vm286_vm0, %v5954_v44, %v5955_v48  ;;  %vm13576_vm7 = vcmask 318464   ;;  %v5889_v28 = vpop.permute.xlu0 %5888  ;;  %v5542_v9 = vpop.permute.xlu1 %5541  ;;  %v5893_v50 = vrot.slane %v11957_v62, 4 }
 0x831   : > { %v5429_v40 = vsel %vm286_vm0, %v5424_v4, %v5425_v39  ;;  %v5431_v31 = vsel %vm286_vm0, %v5425_v39, %v13575_v16  ;;  %v5958_v61 = vsel %vm13576_vm7, %v11916_v54, %v5957_v32  ;;  %vm13577_vm15 = vmmov %vm13576_vm7  ;;  %v5894_v58 = vrot.slane %v5889_v28, 4 }
 0x832   : > { %v5960_v46 = vsel %vm13577_vm15, %v5948_v1, %v5959_v47  ;;  %v5430_v60 = vsel %vm846_vm10, %v11885_v18, %v5429_v40  ;;  %v5432_v17 = vsel %vm846_vm10, %v5420_v36, %v5431_v31  ;;  %5968 = vst [vmem:[#allocation3 + $0xfc] sm:$0x33] %v5958_v61  ;;  %v5547_v4 = vrot.slane %v5542_v9, 4 }
 0x833   : > { %5969 = vst [vmem:[#allocation3 + $0x104] sm:$0x33] %v5960_v46  ;;  %5439 = vst [vmem:[#allocation3 + $0x78] sm:$0xcc] %v5430_v60  ;;  %v5606_v21 = vrot.slane %v11936_v26, 4  ;;  %v5898_v54 = vsel %vm286_vm0, %v5893_v50, %v5894_v58  ;;  %v13578_v18 = vrot.slane %v12041_v13, 4 }
 0x834   : > { %5440 = vst [vmem:[#allocation3 + $0x80] sm:$0xcc] %v5432_v17  ;;  %v5551_v22 = vsel %vm286_vm0, %v5546_v7, %v5547_v4  ;;  %v13579_v38 = vrot.slane %v12039_v25, 4  ;;  %vm13580_vm12 = vcmask 957440   ;;  %vm13582_vm7 = vcmask 72704   ;;  %v6011_v57 = vpop.permute.xlu0 %6010  ;;  %v5601_v11 = vpop.permute.xlu1 %5600 }
 0x835   : > { %v5900_v15 = vsel %vm286_vm0, %v5894_v58, %v13578_v18  ;;  %v5899_v1 = vsel %vm13580_vm12, %v11957_v62, %v5898_v54  ;;  %vm13581_vm9 = vmmov %vm13580_vm12  ;;  %v5552_v8 = vsel %vm13582_vm7, %v11892_v5, %v5551_v22  ;;  %v5608_v7 = vrot.slane %v11950_v0, 4 }
 0x836   : > { %v5553_v23 = vsel %vm286_vm0, %v5547_v4, %v13579_v38  ;;  %v5901_v36 = vsel %vm13581_vm9, %v5889_v28, %v5900_v15  ;;  %vm13583_vm15 = vmmov %vm13582_vm7  ;;  %v9993_v44 = vld [vmem:[#allocation3 + $0x74] ss:$28 sps:$4 sm:$0xff]   ;;  %v6015_v25 = vrot.slane %v11965_v24, 4  ;;  %5908 = vst [vmem:[#allocation3 + $0xe8] sm:$0xcc] %v5899_v1  ;;  %v6016_v32 = vrot.slane %v6011_v57, 4 }
 0x837   : > { %v5554_v13 = vsel %vm13583_vm15, %v5542_v9, %v5553_v23  ;;  %v9995_v39 = vld [vmem:[#allocation3 + $0x70] ss:$28 sps:$4 sm:$0xff]   ;;  %5909 = vst [vmem:[#allocation3 + $0xf0] sm:$0xcc] %v5901_v36  ;;  %5561 = vst [vmem:[#allocation3 + $0x94] sm:$0xcc] %v5552_v8  ;;  %6791 = vmatprep.subr.bf16.mxu0 %v9993_v44 }
 0x838   : > { %5562 = vst [vmem:[#allocation3 + $0x9c] sm:$0xcc] %v5554_v13  ;;  %v5607_v47 = vrot.slane %v5601_v11, 4  ;;  %v5711_v40 = vrot.slane %v11904_v19, 4  ;;  %v6075_v5 = vrot.slane %v11934_v33, 4  ;;  %v6020_v16 = vsel %vm286_vm0, %v6015_v25, %v6016_v32  ;;  %6792 = vmatpush1.bf16.msra.mxu0 %v9995_v39  ;;  %v5704_v4 = vpop.permute.xlu1 %5703 }
 0x839   : > { %v13584_v31 = vrot.slane %v12053_v56, 4  ;;  %vm13585_vm12 = vcmask 310272   ;;  %vm13587_vm7 = vcmask 7168   ;;  %v6070_v56 = vpop.permute.xlu0 %6069  ;;  %v5709_v54 = vrot.slane %v11942_v10, 4 }
 0x83a   : > { %v5610_v46 = vsel %vm286_vm0, %v5606_v21, %v5607_v47  ;;  %v5612_v60 = vsel %vm286_vm0, %v5607_v47, %v5608_v7  ;;  %v6021_v17 = vsel %vm13585_vm12, %v11965_v24, %v6020_v16  ;;  %vm13586_vm9 = vmmov %vm13585_vm12  ;;  %v6077_v21 = vrot.slane %v11948_v34, 4 }
 0x83b   : > { %v6022_v61 = vsel %vm286_vm0, %v6016_v32, %v13584_v31  ;;  %v5611_v9 = vsel %vm13587_vm7, %v11936_v26, %v5610_v46  ;;  %vm13588_vm15 = vmmov %vm13587_vm7  ;;  %6030 = vst [vmem:[#allocation3 + $0x104] sm:$0xcc] %v6021_v17  ;;  %v6076_v18 = vrot.slane %v6070_v56, 4  ;;  %v5710_v15 = vrot.slane %v5704_v4, 4 }
 0x83c   : > { %v6023_v28 = vsel %vm13586_vm9, %v6011_v57, %v6022_v61  ;;  %v5613_v58 = vsel %vm13588_vm15, %v5601_v11, %v5612_v60  ;;  %5621 = vst [vmem:[#allocation3 + $0xa8] sm:$0x33] %v5611_v9  ;;  %vm13589_vm12 = vcmask 302080   ;;  %vm13591_vm7 = vcmask 1039360   ;;  %v5885_v11 = vpop.permute.xlu1 %5884 }
 0x83d   : > { %6031 = vst [vmem:[#allocation3 + $0x10c] sm:$0xcc] %v6023_v28  ;;  %5622 = vst [vmem:[#allocation3 + $0xb0] sm:$0x33] %v5613_v58  ;;  %v6079_v22 = vsel %vm286_vm0, %v6075_v5, %v6076_v18  ;;  %v6081_v26 = vsel %vm286_vm0, %v6076_v18, %v6077_v21  ;;  %v5713_v38 = vsel %vm286_vm0, %v5709_v54, %v5710_v15  ;;  %v6192_v57 = vpop.permute.xlu0 %6191  ;;  %v6197_v32 = vrot.slane %v11940_v43, 4 }
 0x83e   : > { %v5715_v23 = vsel %vm286_vm0, %v5710_v15, %v5711_v40  ;;  %v6080_v1 = vsel %vm13589_vm12, %v11934_v33, %v6079_v22  ;;  %vm13590_vm9 = vmmov %vm13589_vm12  ;;  %v5714_v8 = vsel %vm13591_vm7, %v11942_v10, %v5713_v38  ;;  %v9996_v44 = vld [vmem:[#allocation3 + $0x7c] ss:$28 sps:$4 sm:$0xff]   ;;  %v6199_v47 = vrot.slane %v11955_v20, 4 }
 0x83f   : > { %v6082_v36 = vsel %vm13590_vm9, %v6070_v56, %v6081_v26  ;;  %vm13592_vm15 = vmmov %vm13591_vm7  ;;  %v9998_v39 = vld [vmem:[#allocation3 + $0x78] ss:$28 sps:$4 sm:$0xff]   ;;  %6090 = vst [vmem:[#allocation3 + $0x118] sm:$0x33] %v6080_v1  ;;  %v6198_v33 = vrot.slane %v6192_v57, 4  ;;  %v5892_v5 = vrot.slane %v5885_v11, 4  ;;  %6832 = vmatprep.subr.bf16.mxu1 %v9996_v44 }
 0x840   : > { %v5716_v13 = vsel %vm13592_vm15, %v5704_v4, %v5715_v23  ;;  %6091 = vst [vmem:[#allocation3 + $0x120] sm:$0x33] %v6082_v36  ;;  %5724 = vst [vmem:[#allocation3 + $0xc4] sm:$0x33] %v5714_v8  ;;  %6833 = vmatpush1.bf16.msra.mxu1 %v9998_v39  ;;  %vm13593_vm12 = vcmask 228352   ;;  %vm13595_vm7 = vcmask 957440   ;;  %v6007_v28 = vpop.permute.xlu1 %6006 }
 0x841   : > { %5725 = vst [vmem:[#allocation3 + $0xcc] sm:$0x33] %v5716_v13  ;;  %v6201_v16 = vsel %vm286_vm0, %v6197_v32, %v6198_v33  ;;  %v6203_v10 = vsel %vm286_vm0, %v6198_v33, %v6199_v47  ;;  %v5896_v31 = vsel %vm286_vm0, %v5892_v5, %v5893_v50  ;;  %vm13594_vm9 = vmmov %vm13593_vm12  ;;  %v12274_v17 = vpop.permute.xlu0 %6132  ;;  %v6137_v9 = vrot.slane %v11972_v29, 4 }
 0x842   : > { %v6202_v61 = vsel %vm13593_vm12, %v11940_v43, %v6201_v16  ;;  %v6204_v46 = vsel %vm13594_vm9, %v6192_v57, %v6203_v10  ;;  %v5897_v60 = vsel %vm13595_vm7, %v5885_v11, %v5896_v31  ;;  %v6138_v62 = vrot.slane %v12274_v17, 4  ;;  %v10005_v13 = vld [vmem:[#allocation3 + $0xec] ss:$28 sps:$4 sm:$0xff]  }
 0x843   : > { %6212 = vst [vmem:[#allocation3 + $0x134] sm:$0x33] %v6202_v61  ;;  %6213 = vst [vmem:[#allocation3 + $0x13c] sm:$0x33] %v6204_v46  ;;  %v6014_v58 = vrot.slane %v6007_v28, 4  ;;  %v6486_v56 = vld [vmem:[#allocation3 + $0xa8] sm:$0xff] }
 0x844   : > { %5907 = vst [vmem:[#allocation3 + $0xe0] sm:$0xcc] %v5897_v60  ;;  %v6142_v50 = vsel %vm286_vm0, %v6137_v9, %v6138_v62  ;;  %v6259_v4 = vrot.slane %v11978_v6, 4  ;;  %vm13596_vm15 = vcmask 236544   ;;  %vm13597_vm12 = vcmask 310272   ;;  %v6129_v22 = vpop.permute.xlu1 %6128 }
 0x845   : > { %v6018_v43 = vsel %vm286_vm0, %v6014_v58, %v6015_v25  ;;  %v6143_v54 = vsel %vm13596_vm15, %v11972_v29, %v6142_v50  ;;  %v12288_v15 = vpop.permute.xlu0 %6254  ;;  %v6136_v24 = vrot.slane %v6129_v22, 4  ;;  %vm13598_vm9 = vcmask 220160   ;;  %vm13599_vm7 = vmmov %vm13596_vm15  ;;  %v10007_v10 = vld [vmem:[#allocation3 + $0xe8] ss:$28 sps:$4 sm:$0xff]  }
 0x846   : > { %v6019_v18 = vsel %vm13597_vm12, %v6007_v28, %v6018_v43  ;;  %6152 = vst [vmem:[#allocation3 + $0x120] sm:$0xcc] %v6143_v54  ;;  %v6260_v23 = vrot.slane %v12288_v15, 4  ;;  %v6319_v32 = vrot.slane %v11963_v42, 4  ;;  %v6321_v33 = vrot.slane %v11976_v49, 4  ;;  %vm13600_vm15 = vmmov %vm13598_vm9 }
 0x847   : > { %v6490_v26 = vld [vmem:[#allocation3 + $0xc4] sm:$0xff]  ;;  %6029 = vst [vmem:[#allocation3 + $0xfc] sm:$0xcc] %v6019_v18  ;;  %v6140_v8 = vsel %vm286_vm0, %v6136_v24, %v6137_v9  ;;  %v6441_v46 = vrot.slane %v11970_v45, 4  ;;  %v6443_v54 = vrot.slane %v11982_v27, 4  ;;  %v6381_v18 = vrot.slane %v11984_v41, 4 }
 0x848   : > { %v10000_v38 = vld [vmem:[#allocation3 + $0xac] ss:$28 sps:$4 sm:$0xff]   ;;  %v10002_v1 = vld [vmem:[#allocation3 + $0xb4] ss:$28 sps:$4 sm:$0xff]   ;;  %v9574_v25 = vcombine.low %v6486_v56, %v6490_v26  ;;  %v6264_v29 = vsel %vm286_vm0, %v6259_v4, %v6260_v23  ;;  %v6141_v11 = vsel %vm13599_vm7, %v6129_v22, %v6140_v8  ;;  %v6251_v39 = vpop.permute.xlu1 %6250  ;;  %vm13602_vm12 = vcmask 908288  }
 0x849   : > { %v10004_v36 = vld [vmem:[#allocation3 + $0xb0] ss:$28 sps:$4 sm:$0xff]   ;;  %6793 = vmatprep.subr.bf16.mxu0 %v10000_v38  ;;  %6834 = vmatprep.subr.bf16.mxu1 %v10002_v1  ;;  %v6265_v57 = vsel %vm13598_vm9, %v11978_v6, %v6264_v29  ;;  %v6314_v44 = vpop.permute.xlu0 %6313  ;;  %6151 = vst [vmem:[#allocation3 + $0x118] sm:$0xcc] %v6141_v11  ;;  %v6258_v16 = vrot.slane %v6251_v39, 4  ;;  %vm13603_vm9 = vmmov %vm13602_vm12  ;;  %vm13604_vm7 = vcmask 818176  }
 0x84a   : > { %6794 = vmatpush1.bf16.msra.mxu0 %v9574_v25  ;;  %6835 = vmatpush1.bf16.msra.mxu1 %v10004_v36  ;;  %6274 = vst [vmem:[#allocation3 + $0x13c] sm:$0xcc] %v6265_v57  ;;  %v6320_v5 = vrot.slane %v6314_v44, 4 }
 0x84b   : > { %6836 = vmatprep.subr.bf16.mxu1 %v10005_v13  ;;  %v6262_v61 = vsel %vm286_vm0, %v6258_v16, %v6259_v4 }
 0x84c   : > { %v6323_v31 = vsel %vm286_vm0, %v6319_v32, %v6320_v5  ;;  %v6325_v6 = vsel %vm286_vm0, %v6320_v5, %v6321_v33  ;;  %v6263_v9 = vsel %vm13600_vm15, %v6251_v39, %v6262_v61  ;;  %v6373_v50 = vpop.permute.xlu1 %6372  ;;  %vm13606_vm15 = vcmask 891904  }
 0x84d   : > { %v6324_v60 = vsel %vm1756_vm14, %v11963_v42, %v6323_v31  ;;  %v6326_v28 = vsel %vm1756_vm14, %v6314_v44, %v6325_v6  ;;  %v6436_v58 = vpop.permute.xlu0 %6435  ;;  %6273 = vst [vmem:[#allocation3 + $0x134] sm:$0xcc] %v6263_v9  ;;  %v6380_v22 = vrot.slane %v6373_v50, 4  ;;  %v13601_v44 = vrot.slane %v11869_v53, 4 }
 0x84e   : > { %6837 = vmatpush1.bf16.msra.mxu1 %v10007_v10  ;;  %v10008_v43 = vld [vmem:[#allocation3 + $0xe4] ss:$28 sps:$4 sm:$0xff]   ;;  %6334 = vst [vmem:[#allocation3 + $0x150] sm:$0x33] %v6324_v60  ;;  %6335 = vst [vmem:[#allocation3 + $0x158] sm:$0x33] %v6326_v28 }
 0x84f   : > { %v10010_v56 = vld [vmem:[#allocation3 + $0xe0] ss:$28 sps:$4 sm:$0xff]   ;;  %v6442_v4 = vrot.slane %v6436_v58, 4  ;;  %6795 = vmatprep.subr.bf16.mxu0 %v10008_v43  ;;  %v6384_v38 = vsel %vm286_vm0, %v6380_v22, %v6381_v18 }
 0x850   : > { %6796 = vmatpush1.bf16.msra.mxu0 %v10010_v56  ;;  %v6385_v25 = vsel %vm1818_vm13, %v6373_v50, %v6384_v38  ;;  %v4873_v29 = vpop.permute.xlu1 %4872 }
 0x851   : > { %v6445_v42 = vsel %vm286_vm0, %v6441_v46, %v6442_v4  ;;  %v6447_v26 = vsel %vm286_vm0, %v6442_v4, %v6443_v54  ;;  %v12321_v36 = vpop.permute.xlu0 %6376  ;;  %v10011_v8 = vld [vmem:[#allocation3 + $0x124] ss:$28 sps:$4 sm:$0xff]   ;;  %6395 = vst [vmem:[#allocation3 + $0x150] sm:$0xcc] %v6385_v25  ;;  %v4877_v11 = vrot.slane %v4873_v29, 4 }
 0x852   : > { %v6446_v24 = vsel %vm1880_vm11, %v11970_v45, %v6445_v42  ;;  %v6448_v1 = vsel %vm1880_vm11, %v6436_v58, %v6447_v26  ;;  %v10013_v13 = vld [vmem:[#allocation3 + $0x120] ss:$28 sps:$4 sm:$0xff]   ;;  %v6382_v57 = vrot.slane %v12321_v36, 4  ;;  %6838 = vmatprep.subr.bf16.mxu1 %v10011_v8 }
 0x853   : > { %6456 = vst [vmem:[#allocation3 + $0x16c] sm:$0x33] %v6446_v24  ;;  %6457 = vst [vmem:[#allocation3 + $0x174] sm:$0x33] %v6448_v1  ;;  %v4882_v39 = vsel %vm286_vm0, %v13601_v44, %v4877_v11  ;;  %v4884_v32 = vsel %vm13602_vm12, %v4873_v29, %v4877_v11  ;;  %6839 = vmatpush1.bf16.msra.mxu1 %v10013_v13  ;;  %v12359_v24 = vld [vmem:[%s13254_s1 + $0x4] sm:$0x3] }
 0x854   : > { %v6386_v45 = vsel %vm286_vm0, %v6381_v18, %v6382_v57  ;;  %v4883_v16 = vsel %vm13603_vm9, %v11869_v53, %v4882_v39  ;;  %4892 = vst [vmem:[#allocation3 + $0x18] sm:$0x3] %v4884_v32  ;;  %v4995_v31 = vpop.permute.xlu1 %4994  ;;  %v10014_v6 = vld [vmem:[#allocation3 + $0x11c] ss:$28 sps:$4 sm:$0xff]   ;;  %vm13607_vm12 = vmmov %vm13604_vm7 }
 0x855   : > { %v6387_v5 = vsel %vm1818_vm13, %v11984_v41, %v6386_v45  ;;  %v5117_v10 = vpop.permute.xlu0 %5116  ;;  %v10016_v61 = vld [vmem:[#allocation3 + $0x118] ss:$28 sps:$4 sm:$0xff]   ;;  %4891 = vst [vmem:[#allocation3 + $0x10] sm:$0x33] %v4883_v16  ;;  %v4999_v60 = vrot.slane %v4995_v31, 4  ;;  %6797 = vmatprep.subr.bf16.mxu0 %v10014_v6  ;;  %v13605_v41 = vld [vmem:[#allocation16_spill] sm:$0xff]  ;;  %vm13608_vm9 = vmmov %vm13606_vm15 }
 0x856   : > { %6396 = vst [vmem:[#allocation3 + $0x158] sm:$0xcc] %v6387_v5  ;;  %v5121_v46 = vrot.slane %v5117_v10, 4  ;;  %6798 = vmatpush1.bf16.msra.mxu0 %v10016_v61 }
 0x857   : > { %v5004_v53 = vsel %vm286_vm0, %v4998_v59, %v4999_v60  ;;  %v5006_v58 = vsel %vm13606_vm15, %v4995_v31, %v4999_v60  ;;  %vm13610_vm15 = vcmask 1039360  }
 0x858   : > { %v5126_v28 = vsel %vm286_vm0, %v5120_v52, %v5121_v46  ;;  %v5128_v9 = vsel %vm13604_vm7, %v5117_v10, %v5121_v46  ;;  %v5005_v43 = vsel %vm13608_vm9, %v13605_v41, %v5004_v53  ;;  %5014 = vst [vmem:[#allocation3 + $0x34] sm:$0x3] %v5006_v58  ;;  %v5708_v18 = vpop.permute.xlu1 %5707  ;;  %vm13609_vm7 = vcmask 744448   ;;  %vm13612_vm9 = vmmov %vm13610_vm15 }
 0x859   : > { %v5127_v50 = vsel %vm13607_vm12, %v11900_v2, %v5126_v28  ;;  %5136 = vst [vmem:[#allocation3 + $0x50] sm:$0x3] %v5128_v9  ;;  %v5239_v56 = vpop.permute.xlu0 %5238  ;;  %5013 = vst [vmem:[#allocation3 + $0x2c] sm:$0x33] %v5005_v43  ;;  %v5712_v22 = vrot.slane %v5708_v18, 4  ;;  %v13618_v46 = vmov 0.0  }
 0x85a   : > { %v10017_v52 = vld [vmem:[#allocation3 + $0x154] ss:$28 sps:$4 sm:$0x3f]   ;;  %5135 = vst [vmem:[#allocation3 + $0x48] sm:$0x33] %v5127_v50  ;;  %v5243_v4 = vrot.slane %v5239_v56, 4  ;;  %vm13611_vm12 = vmmov %vm13609_vm7 }
 0x85b   : > { %v10019_v42 = vld [vmem:[#allocation3 + $0x150] ss:$28 sps:$4 sm:$0x3f]   ;;  %9602 = vmatprep.subr.msk.bf16.mxu0 %vm2201_vm2, %v10017_v52  ;;  %v5717_v26 = vsel %vm286_vm0, %v5711_v40, %v5712_v22  ;;  %v5719_v38 = vsel %vm13610_vm15, %v5708_v18, %v5712_v22  ;;  %vm13614_vm15 = vcmask 965632  }
 0x85c   : > { %v5248_v59 = vsel %vm286_vm0, %v5242_v3, %v5243_v4  ;;  %v5250_v2 = vsel %vm13609_vm7, %v5239_v56, %v5243_v4  ;;  %v5718_v3 = vsel %vm13612_vm9, %v11904_v19, %v5717_v26  ;;  %5727 = vst [vmem:[#allocation3 + $0xdc] sm:$0x3] %v5719_v38  ;;  %v6767_v29 = vsel %vm2201_vm2, %v10019_v42, 0  ;;  %v5830_v8 = vpop.permute.xlu1 %5829  ;;  %vm13616_vm9 = vmmov %vm13614_vm15 }
 0x85d   : > { %v5249_v1 = vsel %vm13611_vm12, %v11906_v63, %v5248_v59  ;;  %5258 = vst [vmem:[#allocation3 + $0x6c] sm:$0x3] %v5250_v2  ;;  %v5361_v25 = vpop.permute.xlu0 %5360  ;;  %v10020_v40 = vld [vmem:[#allocation3 + $0x15c] ss:$28 sps:$4 sm:$0x3f]   ;;  %6800 = vmatpush1.bf16.msra.mxu0 %v6767_v29  ;;  %v5834_v11 = vrot.slane %v5830_v8, 4 }
 0x85e   : > { %5257 = vst [vmem:[#allocation3 + $0x64] sm:$0x33] %v5249_v1  ;;  %5726 = vst [vmem:[#allocation3 + $0xd4] sm:$0x33] %v5718_v3  ;;  %v5365_v13 = vrot.slane %v5361_v25, 4  ;;  %9604 = vmatprep.subr.msk.bf16.mxu1 %vm2201_vm2, %v10020_v40  ;;  %vm13613_vm7 = vcmask 728064  }
 0x85f   : > { %v10022_v45 = vld [vmem:[#allocation3 + $0x158] ss:$28 sps:$4 sm:$0x3f]   ;;  %v5839_v44 = vsel %vm286_vm0, %v5833_v12, %v5834_v11  ;;  %v5841_v39 = vsel %vm13614_vm15, %v5830_v8, %v5834_v11  ;;  %vm13615_vm12 = vmmov %vm13613_vm7  ;;  %vm13620_vm15 = vcmask 318464  }
 0x860   : > { %v5370_v63 = vsel %vm286_vm0, %v5364_v51, %v5365_v13  ;;  %v5372_v19 = vsel %vm13613_vm7, %v5361_v25, %v5365_v13  ;;  %v5840_v5 = vsel %vm13616_vm9, %v11922_v14, %v5839_v44  ;;  %5849 = vst [vmem:[#allocation3 + $0xf8] sm:$0x3] %v5841_v39  ;;  %v6773_v10 = vsel %vm2201_vm2, %v10022_v45, 0  ;;  %v5952_v51 = vpop.permute.xlu1 %5951  ;;  %v10023_v31 = vld [vmem:[#allocation3 + $0x14] ss:$28 sps:$4 sm:$0xff]   ;;  %9603 = vmatmul.mubr.msk.bf16.vlgmr.msra.gmra.mrb[16].mxu0 %vm2197_vm3, %v12359_v24  ;;  %vm13622_vm9 = vmmov %vm13620_vm15 }
 0x861   : > { %v5371_v32 = vsel %vm13615_vm12, %v11924_v55, %v5370_v63  ;;  %5380 = vst [vmem:[#allocation3 + $0x88] sm:$0x3] %v5372_v19  ;;  %v5483_v16 = vpop.permute.xlu0 %5482  ;;  %v10025_v6 = vld [vmem:[#allocation3 + $0x10] ss:$28 sps:$4 sm:$0xff]   ;;  %5848 = vst [vmem:[#allocation3 + $0xf0] sm:$0x33] %v5840_v5  ;;  %6841 = vmatpush1.bf16.msra.mxu1 %v6773_v10  ;;  %6869 = vmatprep.subr.bf16.mxu0 %v10023_v31 }
 0x862   : > { %5379 = vst [vmem:[#allocation3 + $0x80] sm:$0x33] %v5371_v32  ;;  %v5487_v12 = vrot.slane %v5483_v16, 4  ;;  %v5956_v61 = vrot.slane %v5952_v51, 4  ;;  %v13617_v55 = vmov 0   ;;  %9746 = vmatprep.subr.bf16.mxu1 %v13618_v46  ;;  %vm13619_vm7 = vcmask 80896   ;;  %6870 = vmatpush1.bf16.msra.mxu0 %v10025_v6 }
 0x863   : > { %6901 = vmatprep.mubr.bf16.mxu0 %v13617_v55  ;;  %v10026_v41 = vld [vmem:[#allocation3 + $0x18] ss:$28 sps:$4 sm:$0xff]   ;;  %vm13621_vm12 = vmmov %vm13619_vm7 }
 0x864   : > { %v5492_v14 = vsel %vm286_vm0, %v5486_v35, %v5487_v12  ;;  %v5494_v60 = vsel %vm13619_vm7, %v5483_v16, %v5487_v12  ;;  %v5961_v28 = vsel %vm286_vm0, %v5955_v48, %v5956_v61  ;;  %v5963_v9 = vsel %vm13620_vm15, %v5952_v51, %v5956_v61  ;;  %9605 = vmatmul.mubr.msk.bf16.vlgmr.msra.gmra.mrb[16].mxu1 %vm2197_vm3, %v12359_v24  ;;  %v6074_v35 = vpop.permute.xlu1 %6073  ;;  %v10030_v22 = vld [vmem:[#allocation3 + $0x50] ss:$28 sps:$4 sm:$0xff]  }
 0x865   : > { %v5493_v53 = vsel %vm13621_vm12, %v11930_v30, %v5492_v14  ;;  %5502 = vst [vmem:[#allocation3 + $0xa4] sm:$0x3] %v5494_v60  ;;  %v5962_v58 = vsel %vm13622_vm9, %v11928_v37, %v5961_v28  ;;  %5971 = vst [vmem:[#allocation3 + $0x114] sm:$0x3] %v5963_v9  ;;  %v5605_v50 = vpop.permute.xlu0 %5604  ;;  %v10027_v43 = vld [vmem:[#allocation3 + $0x4c] ss:$28 sps:$4 sm:$0xff]   ;;  %9747 = vmatpush3.bf16.msra.mxu1 %v10026_v41  ;;  %9760 = vmatprep.mubr.msk.bf16.mxu1 %vm13522_vm5, %v13618_v46 }
 0x866   : > { %v10029_v56 = vld [vmem:[#allocation3 + $0x48] ss:$28 sps:$4 sm:$0xff]   ;;  %5501 = vst [vmem:[#allocation3 + $0x9c] sm:$0x33] %v5493_v53  ;;  %5970 = vst [vmem:[#allocation3 + $0x10c] sm:$0x33] %v5962_v58  ;;  %6871 = vmatprep.subr.bf16.mxu0 %v10027_v43  ;;  %9748 = vmatprep.subr.bf16.mxu1 %v13618_v46 }
 0x867   : > { %v5609_v48 = vrot.slane %v5605_v50, 4  ;;  %v6078_v18 = vrot.slane %v6074_v35, 4  ;;  %vm13623_vm7 = vcmask 7168   ;;  %vm13624_vm15 = vcmask 302080   ;;  %6872 = vmatpush1.bf16.msra.mxu0 %v10029_v56  ;;  %v13634_v56 = vld [vmem:[#allocation10_spill] sm:$0xff] }
 0x868   : > { %vm13625_vm12 = vmmov %vm13623_vm7 }
 0x869   : > { %v5614_v37 = vsel %vm286_vm0, %v5608_v7, %v5609_v48  ;;  %v5616_v30 = vsel %vm13623_vm7, %v5605_v50, %v5609_v48  ;;  %v6083_v52 = vsel %vm286_vm0, %v6077_v21, %v6078_v18  ;;  %v6085_v4 = vsel %vm13624_vm15, %v6074_v35, %v6078_v18  ;;  %vm13626_vm9 = vmmov %vm13624_vm15  ;;  %v6135_v2 = vpop.permute.xlu0 %6134  ;;  %v6196_v7 = vpop.permute.xlu1 %6195  ;;  %9749 = vmatpush3.bf16.msra.mxu1 %v10030_v22  ;;  %v13633_v50 = vld [vmem:[#allocation9_spill] sm:$0xff] }
 0x86a   : > { %v5615_v42 = vsel %vm13625_vm12, %v11950_v0, %v5614_v37  ;;  %5624 = vst [vmem:[#allocation3 + $0xc0] sm:$0x3] %v5616_v30  ;;  %v6084_v59 = vsel %vm13626_vm9, %v11948_v34, %v6083_v52  ;;  %6093 = vst [vmem:[#allocation3 + $0x130] sm:$0x3] %v6085_v4  ;;  %v6139_v26 = vrot.slane %v6135_v2, 4  ;;  %v6200_v38 = vrot.slane %v6196_v7, 4  ;;  %9750 = vmatprep.subr.bf16.mxu1 %v13618_v46 }
 0x86b   : > { %5623 = vst [vmem:[#allocation3 + $0xb8] sm:$0x33] %v5615_v42  ;;  %6092 = vst [vmem:[#allocation3 + $0x128] sm:$0x33] %v6084_v59  ;;  %vm13627_vm7 = vcmask 236544   ;;  %vm13628_vm15 = vcmask 228352  }
 0x86c   : > { %v6144_v21 = vsel %vm286_vm0, %v6138_v62, %v6139_v26  ;;  %v6146_v0 = vsel %vm13627_vm7, %v6135_v2, %v6139_v26  ;;  %v6205_v34 = vsel %vm286_vm0, %v6199_v47, %v6200_v38  ;;  %v6207_v1 = vsel %vm13628_vm15, %v6196_v7, %v6200_v38  ;;  %v10031_v3 = vld [vmem:[#allocation3 + $0x88] ss:$28 sps:$4 sm:$0xff]   ;;  %vm13629_vm12 = vmmov %vm13627_vm7  ;;  %v10041_v12 = vld [vmem:[#allocation3 + $0xf8] ss:$28 sps:$4 sm:$0xff]  }
 0x86d   : > { %v6145_v25 = vsel %vm13629_vm12, %v12274_v17, %v6144_v21  ;;  %6154 = vst [vmem:[#allocation3 + $0x130] sm:$0xc] %v6146_v0  ;;  %vm13630_vm9 = vmmov %vm13628_vm15  ;;  %v6257_v8 = vpop.permute.xlu0 %6256  ;;  %v6318_v40 = vpop.permute.xlu1 %6317  ;;  %v10032_v62 = vld [vmem:[#allocation3 + $0x84] ss:$28 sps:$4 sm:$0xff]   ;;  %9751 = vmatpush3.bf16.msra.mxu1 %v10031_v3  ;;  %vm13631_vm7 = vcmask 220160   ;;  %v13635_v42 = vld [vmem:[#allocation11_spill] sm:$0xff] }
 0x86e   : > { %v6206_v29 = vsel %vm13630_vm9, %v11955_v20, %v6205_v34  ;;  %6215 = vst [vmem:[#allocation3 + $0x14c] sm:$0x3] %v6207_v1  ;;  %v10034_v13 = vld [vmem:[#allocation3 + $0x80] ss:$28 sps:$4 sm:$0xff]   ;;  %6153 = vst [vmem:[#allocation3 + $0x128] sm:$0xcc] %v6145_v25  ;;  %6873 = vmatprep.subr.bf16.mxu0 %v10032_v62  ;;  %9752 = vmatprep.subr.bf16.mxu1 %v13618_v46 }
 0x86f   : > { %6214 = vst [vmem:[#allocation3 + $0x144] sm:$0x33] %v6206_v29  ;;  %v6261_v11 = vrot.slane %v6257_v8, 4  ;;  %v6322_v45 = vrot.slane %v6318_v40, 4  ;;  %6874 = vmatpush1.bf16.msra.mxu0 %v10034_v13  ;;  %vm13632_vm15 = vmmov %vm13631_vm7  ;;  %v10039_v51 = vld [vmem:[#allocation3 + $0xf4] ss:$28 sps:$4 sm:$0xff]  }
 0x870   : > { %v13636_v2 = vld [vmem:[#allocation12_spill] sm:$0xff]  ;;  %v13637_v29 = vld [vmem:[#allocation13_spill] sm:$0xff]  ;;  %v13638_v62 = vld [vmem:[#allocation14_spill] sm:$0xff]  ;;  %vm13647_vm12 = vcmask 973824   ;;  %vm13648_vm9 = vcmask 72704  }
 0x871   : > { %v6266_v47 = vsel %vm286_vm0, %v6260_v23, %v6261_v11  ;;  %v6268_v17 = vsel %vm13631_vm7, %v6257_v8, %v6261_v11  ;;  %v6327_v20 = vsel %vm286_vm0, %v6321_v33, %v6322_v45  ;;  %v6329_v63 = vsel %vm1756_vm14, %v6318_v40, %v6322_v45  ;;  %v10035_v19 = vld [vmem:[#allocation3 + $0xc0] ss:$28 sps:$4 sm:$0xff]   ;;  %v6379_v32 = vpop.permute.xlu0 %6378  ;;  %v6440_v23 = vpop.permute.xlu1 %6439  ;;  %v13639_v45 = vld [vmem:[#allocation15_spill] sm:$0xff] }
 0x872   : > { %v6267_v44 = vsel %vm13632_vm15, %v12288_v15, %v6266_v47  ;;  %6276 = vst [vmem:[#allocation3 + $0x14c] sm:$0xc] %v6268_v17  ;;  %v6328_v39 = vsel %vm1756_vm14, %v11976_v49, %v6327_v20  ;;  %6337 = vst [vmem:[#allocation3 + $0x168] sm:$0x3] %v6329_v63  ;;  %v10036_v5 = vld [vmem:[#allocation3 + $0xbc] ss:$28 sps:$4 sm:$0xff]   ;;  %9753 = vmatpush3.bf16.msra.mxu1 %v10035_v19 }
 0x873   : > { %v10038_v16 = vld [vmem:[#allocation3 + $0xb8] ss:$28 sps:$4 sm:$0xff]   ;;  %6275 = vst [vmem:[#allocation3 + $0x144] sm:$0xcc] %v6267_v44  ;;  %6336 = vst [vmem:[#allocation3 + $0x160] sm:$0x33] %v6328_v39  ;;  %6875 = vmatprep.subr.bf16.mxu0 %v10036_v5  ;;  %9754 = vmatprep.subr.bf16.mxu1 %v13618_v46 }
 0x874   : > { %v6383_v10 = vrot.slane %v6379_v32, 4  ;;  %v6444_v33 = vrot.slane %v6440_v23, 4  ;;  %6876 = vmatpush1.bf16.msra.mxu0 %v10038_v16  ;;  %vm13649_vm7 = vcmask 957440   ;;  %vm13650_vm15 = vcmask 310272  }
 0x875   : > { %6877 = vmatprep.subr.bf16.mxu0 %v10039_v51 }
 0x876   : > { %v6388_v15 = vsel %vm286_vm0, %v6382_v57, %v6383_v10  ;;  %v6390_v49 = vsel %vm1818_vm13, %v6379_v32, %v6383_v10  ;;  %v6449_v31 = vsel %vm286_vm0, %v6443_v54, %v6444_v33  ;;  %v6451_v6 = vsel %vm1880_vm11, %v6440_v23, %v6444_v33  ;;  %9755 = vmatpush3.bf16.msra.mxu1 %v10041_v12  ;;  %v10042_v57 = vld [vmem:[#allocation3 + $0xf0] ss:$28 sps:$4 sm:$0xff]  }
 0x877   : > { %v6389_v61 = vsel %vm1818_vm13, %v12321_v36, %v6388_v15  ;;  %6398 = vst [vmem:[#allocation3 + $0x168] sm:$0xc] %v6390_v49  ;;  %v6450_v14 = vsel %vm1880_vm11, %v11982_v27, %v6449_v31  ;;  %6459 = vst [vmem:[#allocation3 + $0x184] sm:$0x3] %v6451_v6  ;;  %9756 = vmatprep.subr.bf16.mxu1 %v13618_v46 }
 0x878   : > { %6397 = vst [vmem:[#allocation3 + $0x160] sm:$0xcc] %v6389_v61  ;;  %6458 = vst [vmem:[#allocation3 + $0x17c] sm:$0x33] %v6450_v14  ;;  %6878 = vmatpush1.bf16.msra.mxu0 %v10042_v57 }
 0x879   : > { %v10043_v54 = vld [vmem:[#allocation3 + $0x130] ss:$28 sps:$4 sm:$0xff]  }
 0x87a   : > { %v10044_v60 = vld [vmem:[#allocation3 + $0x12c] ss:$28 sps:$4 sm:$0xff]   ;;  %9757 = vmatpush3.bf16.msra.mxu1 %v10043_v54 }
 0x87b   : > { %v10046_v28 = vld [vmem:[#allocation3 + $0x128] ss:$28 sps:$4 sm:$0xff]   ;;  %6879 = vmatprep.subr.bf16.mxu0 %v10044_v60  ;;  %9758 = vmatprep.subr.bf16.mxu1 %v13618_v46 }
 0x87c   : > { %6880 = vmatpush1.bf16.msra.mxu0 %v10046_v28 }
 0x87e   : > { %v10049_v9 = vld [vmem:[#allocation3 + $0x168] ss:$28 sps:$4 sm:$0x3f]  }
 0x87f   : > { %v10047_v36 = vld [vmem:[#allocation3 + $0x164] ss:$28 sps:$4 sm:$0x3f]   ;;  %v6785_v41 = vsel %vm2201_vm2, %v10049_v9, 0 }
 0x880   : > { %v10050_v27 = vld [vmem:[#allocation3 + $0x160] ss:$28 sps:$4 sm:$0x3f]   ;;  %9606 = vmatprep.subr.msk.bf16.mxu0 %vm2201_vm2, %v10047_v36  ;;  %9759 = vmatpush3.bf16.msra.mxu1 %v6785_v41 }
 0x881   : > { %v6779_v53 = vsel %vm2201_vm2, %v10050_v27, 0 }
 0x882   : > { %6882 = vmatpush1.bf16.msra.mxu0 %v6779_v53 }
 0x883   : > { %9761 = vmatmul.mubr.msk.bf16.vlgmr.msra.gmra.mrb[20].mxu1 %vm2197_vm3, %v12359_v24 }
 0x884   : > { %9116 = vmatprep.mubr.bf16.mxu1 %v13617_v55 }
 0x885   : > { %9607 = vmatmul.mubr.msk.bf16.vlgmr.msra.gmra.mrb[20].mxu0 %vm2197_vm3, %v12359_v24 }
 0x886   : > { %9075 = vmatprep.mubr.bf16.mxu0 %v13617_v55 }
 0x933   : > { %v6821_v58 = vpop.f32.mrb[16].mxu0 }
 0x934   : > { %v6950_v35 = vmul.f32 %v6821_v58, %v13633_v50  ;;  %v6823_v43 = vpop.f32.mrb[17].mxu0 }
 0x935   : > { %v6951_v48 = vmul.f32 %v6823_v43, %v13634_v56  ;;  %v6825_v18 = vpop.f32.mrb[18].mxu0 }
 0x936   : > { %v6957_v37 = vsel %vm286_vm0, %v6950_v35, 0.0  ;;  %v6826_v30 = vpop.f32.mrb[19].mxu0 }
 0x937   : > { %v6958_v52 = vsel %vm286_vm0, %v6951_v48, 0.0  ;;  %v6862_v4 = vpop.f32.mrb[16].mxu1 }
 0x938   : > { %v6959_v22 = vadd.f32 %v6958_v52, %v6957_v37  ;;  %v6952_v24 = vmul.f32 %v6862_v4, %v13635_v42  ;;  %v6864_v59 = vpop.f32.mrb[17].mxu1 }
 0x939   : > { %v6953_v7 = vmul.f32 %v6864_v59, %v13636_v2  ;;  %v6866_v26 = vpop.f32.mrb[18].mxu1 }
 0x93a   : > { %v6960_v38 = vsel %vm286_vm0, %v6952_v24, 0.0  ;;  %v6867_v21 = vpop.f32.mrb[19].mxu1 }
 0x93b   : > { %v6961_v0 = vadd.f32 %v6960_v38, %v6959_v22  ;;  %v6962_v34 = vsel %vm286_vm0, %v6953_v7, 0.0 }
 0x93d   : > { %v6963_v1 = vadd.f32 %v6962_v34, %v6961_v0 }
 0x956   : > { %v6944_v25 = vpop.f32.mrb[20].mxu1 }
 0x957   : > { %v6956_v13 = vmul.f32 %v6944_v25, %v13638_v62  ;;  %v9762_v11 = vpop.f32.mrb[21].mxu1 }
 0x958   : > { %v6903_v3 = vpop.f32.mrb[20].mxu0  ;;  %v6947_v20 = vpop.f32.mrb[22].mxu1 }
 0x959   : > { %v6954_v8 = vmul.f32 %v6903_v3, %v13637_v29  ;;  %v6905_v40 = vpop.f32.mrb[21].mxu0  ;;  %v9763_v44 = vpop.f32.mrb[23].mxu1  ;;  %v6968_v23 = vsel %vm286_vm0, %v6956_v13, 0.0 }
 0x95a   : > { %v6955_v47 = vmul.f32 %v6905_v40, %v13639_v45  ;;  %v6907_v17 = vpop.f32.mrb[22].mxu0 }
 0x95b   : > { %v6964_v63 = vsel %vm286_vm0, %v6954_v8, 0.0  ;;  %v6908_v19 = vpop.f32.mrb[23].mxu0 }
 0x95c   : > { %v6965_v39 = vadd.f32 %v6964_v63, %v6963_v1  ;;  %v6966_v32 = vsel %vm286_vm0, %v6955_v47, 0.0 }
 0x95e   : > { %v6967_v5 = vadd.f32 %v6966_v32, %v6965_v39 }
 0x960   : > { %v6969_v16 = vadd.f32 %v6968_v23, %v6967_v5 }
 0x962   : > { %6970 = vadd.xlane.f32.xlu0 %v6969_v16 }
 0x9ef   : > { %v6971_v10 = vpop.xlane.xlu0 %6970 }
 0x9f0   : > { %v6972_v33 = vmul.f32 0.001953125, %v6971_v10 }
 0x9f2   : > { %v6973_v51 = vsub.f32 %v6821_v58, %v6972_v33  ;;  %v6974_v15 = vsub.f32 %v6823_v43, %v6972_v33  ;;  %v6975_v49 = vsub.f32 %v6862_v4, %v6972_v33  ;;  %v6976_v31 = vsub.f32 %v6864_v59, %v6972_v33 }
 0x9f3   : > { %v6977_v6 = vsub.f32 %v6903_v3, %v6972_v33  ;;  %v6978_v12 = vsub.f32 %v6905_v40, %v6972_v33  ;;  %v6979_v60 = vsub.f32 %v6944_v25, %v6972_v33 }
 0x9f4   : > { %v6980_v61 = vmul.f32 %v6973_v51, %v13633_v50  ;;  %v6981_v14 = vmul.f32 %v6974_v15, %v13634_v56  ;;  %v6982_v57 = vmul.f32 %v6975_v49, %v13635_v42  ;;  %v6983_v54 = vmul.f32 %v6976_v31, %v13636_v2 }
 0x9f5   : > { %v6984_v28 = vmul.f32 %v6977_v6, %v13637_v29  ;;  %v6985_v41 = vmul.f32 %v6978_v12, %v13639_v45  ;;  %v6986_v48 = vmul.f32 %v6979_v60, %v13638_v62 }
 0x9f6   : > { %v6987_v36 = vmul.f32 %v6980_v61, %v6980_v61  ;;  %v6988_v9 = vmul.f32 %v6981_v14, %v6981_v14  ;;  %v6989_v27 = vmul.f32 %v6982_v57, %v6982_v57  ;;  %v6990_v53 = vmul.f32 %v6983_v54, %v6983_v54  ;;  %v13640_v57 = vld [vmem:[#allocation8_spill] sm:$0xff] }
 0x9f7   : > { %v6991_v18 = vmul.f32 %v6984_v28, %v6984_v28  ;;  %v6992_v52 = vmul.f32 %v6985_v41, %v6985_v41  ;;  %v6993_v24 = vmul.f32 %v6986_v48, %v6986_v48 }
 0x9f8   : > { %v6994_v58 = vsel %vm286_vm0, %v6987_v36, 0.0  ;;  %v6995_v35 = vsel %vm286_vm0, %v6988_v9, 0.0  ;;  %v6997_v37 = vsel %vm286_vm0, %v6989_v27, 0.0  ;;  %v6999_v4 = vsel %vm286_vm0, %v6990_v53, 0.0 }
 0x9f9   : > { %v6996_v43 = vadd.f32 %v6995_v35, %v6994_v58  ;;  %v7001_v59 = vsel %vm286_vm0, %v6991_v18, 0.0  ;;  %v7003_v26 = vsel %vm286_vm0, %v6992_v52, 0.0  ;;  %v7005_v21 = vsel %vm286_vm0, %v6993_v24, 0.0 }
 0x9fb   : > { %v6998_v30 = vadd.f32 %v6997_v37, %v6996_v43 }
 0x9fd   : > { %v7000_v22 = vadd.f32 %v6999_v4, %v6998_v30 }
 0x9ff   : > { %v7002_v7 = vadd.f32 %v7001_v59, %v7000_v22 }
 0xa01   : > { %v7004_v38 = vadd.f32 %v7003_v26, %v7002_v7 }
 0xa03   : > { %v7006_v0 = vadd.f32 %v7005_v21, %v7004_v38 }
 0xa05   : > { %7007 = vadd.xlane.f32.xlu1 %v7006_v0 }
 0xa92   : > { %v7008_v34 = vpop.xlane.xlu1 %7007 }
 0xa93   : > { %v7009_v1 = vmul.f32 0.001953125, %v7008_v34 }
 0xa95   : > { %v7010_v3 = vadd.f32 1e-05, %v7009_v1 }
 0xa97   : > { %10133 = vrsqrt.f32 %v7010_v3 }
 0xaa1   : > { %v10134_v25 = vpop.eup %10133 }
 0xaa2   : > { %v7012_v8 = vmul.f32 %v10134_v25, %v6973_v51  ;;  %v7013_v40 = vmul.f32 %v10134_v25, %v6974_v15  ;;  %v7014_v13 = vmul.f32 %v10134_v25, %v6975_v49  ;;  %v7015_v11 = vmul.f32 %v10134_v25, %v6976_v31 }
 0xaa3   : > { %v7016_v47 = vmul.f32 %v10134_v25, %v6977_v6  ;;  %v7017_v17 = vmul.f32 %v10134_v25, %v6978_v12  ;;  %v7018_v20 = vmul.f32 %v10134_v25, %v6979_v60 }
 0xaa4   : > { %v7019_v63 = vmax.f32 %v7012_v8, 0.0  ;;  %v7020_v19 = vmax.f32 %v7013_v40, 0.0  ;;  %v7021_v44 = vmax.f32 %v7014_v13, 0.0  ;;  %v7022_v39 = vmax.f32 %v7015_v11, 0.0 }
 0xaa5   : > { %v7023_v32 = vmax.f32 %v7016_v47, 0.0  ;;  %v7024_v23 = vmax.f32 %v7017_v17, 0.0  ;;  %v7025_v5 = vmax.f32 %v7018_v20, 0.0 }
 0xaa6   : > { %v7026_v16 = vmul.f32 %v7019_v63, %v13633_v50  ;;  %v7027_v10 = vmul.f32 %v7020_v19, %v13634_v56  ;;  %v7028_v33 = vmul.f32 %v7021_v44, %v13635_v42  ;;  %v7029_v51 = vmul.f32 %v7022_v39, %v13636_v2 }
 0xaa7   : > { %v7030_v15 = vmul.f32 %v7023_v32, %v13637_v29  ;;  %v7031_v49 = vmul.f32 %v7024_v23, %v13639_v45  ;;  %v7032_v31 = vmul.f32 %v7025_v5, %v13638_v62 }
 0xaa8   : > { %v9609_v6 = vpack.c.bf16 %v7027_v10, %v7026_v16  ;;  %v9610_v12 = vpack.c.bf16 %v7029_v51, %v7028_v33 }
 0xaa9   : > { %v7039_v61 = vpack.c.bf16 %v7032_v31, %v7032_v31  ;;  %v9611_v14 = vpack.c.bf16 %v7031_v49, %v7030_v15 }
 0xaaa   : > { %v7055_v54 = vrot.slane %v9609_v6, %v13640_v57  ;;  %v12500_v60 = vrot.slane %v9610_v12, %v13640_v57 }
 0xaab   : > { %v7071_v28 = vrot.slane %v9611_v14, %v13640_v57  ;;  %v7078_v36 = vrot.slane %v7039_v61, %v13640_v57 }
 0xaac   : > { %v7063_v9 = vcombine.low %v7055_v54, %v12500_v60  ;;  %v12505_v41 = vcombine.low %v7055_v54, %v7055_v54  ;;  %v10148_v47 = vcombine.low %v12500_v60, %v12500_v60 }
 0xaad   : > { %v7079_v27 = vcombine.low %v7071_v28, %v7078_v36 }
 0xaae   : > { %7082 = vst [vmem:[#allocation2 + $0x2] sm:$0xff] %v7063_v9  ;;  %9613 = vst.sshfl [vmem:[#allocation3 + $0xb0] sm:$0xf0 pattern:$0x76325410] %v7063_v9  ;;  %v8002_v37 = vrot.slane %v7063_v9, %v13640_v57  ;;  %v7995_v25 = vrot.slane %v12505_v41, %v13640_v57  ;;  %v8063_v63 = vrot.slane %v10148_v47, %v13640_v57 }
 0xaaf   : > { %7083 = vst [vmem:[#allocation2 + $0xa] sm:$0x3f] %v7079_v27  ;;  %9612 = vst.sshfl [vmem:[#allocation3 + $0xa8] sm:$0xf0 pattern:$0x76325410] %v12505_v41 }
 0xab5   : > { %v12508_v53 = vld [vmem:[#allocation2] sm:$0xff] }
 0xab6   : > { %v7167_v58 = vrot.slane %v12508_v53, %v13640_v57  ;;  %v7882_v35 = vld [vmem:[#allocation2 + $0xa] sm:$0x3f]  ;;  %v7092_v4 = vcombine.high %v12508_v53, %v12508_v53  ;;  %v7153_v24 = vcombine.low %v12508_v53, %v12508_v53 }
 0xab7   : > { %9615 = vst.sshfl [vmem:[#allocation3 + $0xc0] sm:$0x30 pattern:$0x76325410] %v7882_v35  ;;  %v7900_v43 = vcombine.low %v7882_v35, %v7882_v35  ;;  %v12514_v48 = vld [vmem:[#allocation2 + $0x8] sm:$0xff] }
 0xab8   : > { %7185 = vrot.lane.b32.xlu1 %v7167_v58, %s10159_s18  ;;  %7122 = vrot.lane.b32.xlu0 %v7167_v58, %s10160_s19  ;;  %v7114_v18 = vrot.slane %v12514_v48, %v13640_v57  ;;  %v12529_v30 = vld [vmem:[#allocation2 + $0xa] sm:$0xff]  ;;  %v7106_v22 = vrot.slane %v7092_v4, %v13640_v57  ;;  %v7160_v59 = vrot.slane %v7153_v24, %v13640_v57 }
 0xab9   : > { %9614 = vst.sshfl [vmem:[#allocation3 + $0xb8] sm:$0xf0 pattern:$0x76325410] %v7900_v43  ;;  %v12535_v52 = vrot.slane %v12529_v30, %v13640_v57  ;;  %v7168_v7 = vcombine.low %v12514_v48, %v12514_v48  ;;  %v8003_v8 = vcombine.low %v12529_v30, %v12529_v30  ;;  %v7107_v60 = vcombine.high %v12514_v48, %v12514_v48 }
 0xaba   : > { %v7942_v53 = vcombine.high %v12529_v30, %v12529_v30 }
 0xabb   : > { %v7175_v26 = vrot.slane %v7168_v7, %v13640_v57  ;;  %v8010_v11 = vrot.slane %v8003_v8, %v13640_v57  ;;  %v7121_v9 = vrot.slane %v7107_v60, %v13640_v57 }
 0xabc   : > { %7307 = vrot.lane.b32.xlu1 %v7167_v58, %s10161_s20  ;;  %7244 = vrot.lane.b32.xlu0 %v7167_v58, %s13376_s21  ;;  %v7956_v43 = vrot.slane %v7942_v53, %v13640_v57 }
 0xac0   : > { %7429 = vrot.lane.b32.xlu1 %v7167_v58, %s13641_s30  ;;  %7126 = vrot.lane.b32.xlu0 %v7114_v18, %s10160_s19 }
 0xac4   : > { %7551 = vrot.lane.b32.xlu1 %v7167_v58, %s13542_s17  ;;  %7248 = vrot.lane.b32.xlu0 %v7114_v18, %s13376_s21 }
 0xac8   : > { %7673 = vrot.lane.b32.xlu1 %v7167_v58, %s10168_s27  ;;  %7366 = vrot.lane.b32.xlu0 %v7167_v58, %s10164_s23 }
 0xacc   : > { %7795 = vrot.lane.b32.xlu1 %v7167_v58, %s10170_s29  ;;  %7488 = vrot.lane.b32.xlu0 %v7167_v58, %s13374_s24 }
 0xad0   : > { %8020 = vrot.lane.b32.xlu1 %v8002_v37, %s13543_s14  ;;  %7370 = vrot.lane.b32.xlu0 %v7114_v18, %s10164_s23 }
 0xad4   : > { %7961 = vrot.lane.b32.xlu1 %v12535_v52, %s13448_s5  ;;  %7492 = vrot.lane.b32.xlu0 %v7114_v18, %s13374_s24  ;;  %s13643_s24 = smov 1  }
 0xad8   : > { %8079 = vrot.lane.b32.xlu1 %v8002_v37, %s13547_s22  ;;  %7610 = vrot.lane.b32.xlu0 %v7167_v58, %s10167_s26 }
 0xadc   : > { %8201 = vrot.lane.b32.xlu1 %v8002_v37, %s13447_s25  ;;  %7732 = vrot.lane.b32.xlu0 %v7167_v58, %s10169_s28 }
 0xae0   : > { %8083 = vrot.lane.b32.xlu1 %v12535_v52, %s13547_s22  ;;  %7614 = vrot.lane.b32.xlu0 %v7114_v18, %s10167_s26 }
 0xae4   : > { %8205 = vrot.lane.b32.xlu1 %v12535_v52, %s13447_s25  ;;  %7736 = vrot.lane.b32.xlu0 %v7114_v18, %s10169_s28 }
 0xae8   : > { %8323 = vrot.lane.b32.xlu1 %v8002_v37, %s13642_s10  ;;  %7854 = vrot.lane.b32.xlu0 %v7167_v58, %s13643_s24 }
 0xaec   : > { %8445 = vrot.lane.b32.xlu1 %v8002_v37, %s13544_s16  ;;  %7957 = vrot.lane.b32.xlu0 %v8002_v37, %s13448_s5 }
 0xaf0   : > { %8327 = vrot.lane.b32.xlu1 %v12535_v52, %s13642_s10  ;;  %7858 = vrot.lane.b32.xlu0 %v7114_v18, %s13643_s24 }
 0xaf4   : > { %8449 = vrot.lane.b32.xlu1 %v12535_v52, %s13544_s16  ;;  %8142 = vrot.lane.b32.xlu0 %v8002_v37, %s13442_s11 }
 0xaf8   : > { %8567 = vrot.lane.b32.xlu1 %v8002_v37, %s13545_s6  ;;  %8264 = vrot.lane.b32.xlu0 %v8002_v37, %s13443_s15 }
 0xafc   : > { %8689 = vrot.lane.b32.xlu1 %v8002_v37, %s13444_s8  ;;  %8386 = vrot.lane.b32.xlu0 %v8002_v37, %s13403_s7 }
 0xb00   : > { %8571 = vrot.lane.b32.xlu1 %v12535_v52, %s13545_s6  ;;  %8508 = vrot.lane.b32.xlu0 %v8002_v37, %s13404_s9 }
 0xb04   : > { %8693 = vrot.lane.b32.xlu1 %v12535_v52, %s13444_s8  ;;  %8630 = vrot.lane.b32.xlu0 %v8002_v37, %s13445_s4 }
 0xb08   : > { %7433 = vrot.lane.b32.xlu1 %v7114_v18, %s13641_s30  ;;  %7189 = vrot.lane.b32.xlu0 %v7114_v18, %s10159_s18 }
 0xb0c   : > { %7555 = vrot.lane.b32.xlu1 %v7114_v18, %s13542_s17  ;;  %7311 = vrot.lane.b32.xlu0 %v7114_v18, %s10161_s20 }
 0xb10   : > { %7677 = vrot.lane.b32.xlu1 %v7114_v18, %s10168_s27  ;;  %8024 = vrot.lane.b32.xlu0 %v12535_v52, %s13543_s14 }
 0xb14   : > { %7799 = vrot.lane.b32.xlu1 %v7114_v18, %s10170_s29  ;;  %8146 = vrot.lane.b32.xlu0 %v12535_v52, %s13442_s11 }
 0xb18   : > { %8268 = vrot.lane.b32.xlu0 %v12535_v52, %s13443_s15  ;;  %7124 = vrot.lane.b32.xlu1 %v7106_v22, %s10160_s19 }
 0xb1c   : > { %7183 = vrot.lane.b32.xlu0 %v7160_v59, %s10159_s18  ;;  %7246 = vrot.lane.b32.xlu1 %v7106_v22, %s13376_s21  ;;  %s13644_s21 = smov 91  }
 0xb20   : > { %7305 = vrot.lane.b32.xlu0 %v7160_v59, %s10161_s20  ;;  %7187 = vrot.lane.b32.xlu1 %v7175_v26, %s10159_s18  ;;  %s13646_s18 = smov 109  }
 0xb24   : > { %7427 = vrot.lane.b32.xlu0 %v7160_v59, %s13641_s30  ;;  %7309 = vrot.lane.b32.xlu1 %v7175_v26, %s10161_s20 }
 0xb28   : > { %7549 = vrot.lane.b32.xlu0 %v7160_v59, %s13542_s17  ;;  %7368 = vrot.lane.b32.xlu1 %v7106_v22, %s10164_s23 }
 0xb2a   : > { %v12600_v38 = vpop.permute.xlu1 %7185  ;;  %v12602_v21 = vpop.permute.xlu0 %7122 }
 0xb2b   : > { %v7130_v57 = vrot.slane %v12602_v21, 4 }
 0xb2c   : > { %7671 = vrot.lane.b32.xlu0 %v7160_v59, %s10168_s27  ;;  %7490 = vrot.lane.b32.xlu1 %v7106_v22, %s13644_s21 }
 0xb2e   : > { %v12606_v0 = vpop.permute.xlu1 %7307  ;;  %v12608_v34 = vpop.permute.xlu0 %7244 }
 0xb2f   : > { %v7252_v46 = vrot.slane %v12608_v34, 4 }
 0xb30   : > { %7793 = vrot.lane.b32.xlu0 %v7160_v59, %s10170_s29  ;;  %7431 = vrot.lane.b32.xlu1 %v7175_v26, %s13641_s30 }
 0xb32   : > { %v12612_v1 = vpop.permute.xlu1 %7429  ;;  %v12614_v3 = vpop.permute.xlu0 %7126 }
 0xb33   : > { %v13396_v45 = vrot.slane %v12614_v3, 4 }
 0xb34   : > { %8018 = vrot.lane.b32.xlu0 %v7995_v25, %s13543_s14  ;;  %7553 = vrot.lane.b32.xlu1 %v7175_v26, %s13542_s17 }
 0xb36   : > { %v12622_v40 = vpop.permute.xlu1 %7551  ;;  %v12624_v13 = vpop.permute.xlu0 %7248 }
 0xb37   : > { %13645 = vst [vmem:[#allocation5_spill] sm:$0xff] %v12624_v13 }
 0xb38   : > { %8022 = vrot.lane.b32.xlu0 %v8010_v11, %s13543_s14  ;;  %7612 = vrot.lane.b32.xlu1 %v7106_v22, %s10167_s26 }
 0xb3a   : > { %v12631_v17 = vpop.permute.xlu1 %7673  ;;  %v12633_v20 = vpop.permute.xlu0 %7366 }
 0xb3c   : > { %8081 = vrot.lane.b32.xlu0 %v8063_v63, %s13547_s22  ;;  %7734 = vrot.lane.b32.xlu1 %v7106_v22, %s10169_s28 }
 0xb3e   : > { %v12638_v19 = vpop.permute.xlu1 %7795  ;;  %v12640_v44 = vpop.permute.xlu0 %7488 }
 0xb40   : > { %8203 = vrot.lane.b32.xlu0 %v8063_v63, %s13447_s25  ;;  %7675 = vrot.lane.b32.xlu1 %v7175_v26, %s10168_s27 }
 0xb42   : > { %v12644_v39 = vpop.permute.xlu1 %8020  ;;  %v12646_v32 = vpop.permute.xlu0 %7370 }
 0xb44   : > { %8144 = vrot.lane.b32.xlu0 %v8010_v11, %s13442_s11  ;;  %7797 = vrot.lane.b32.xlu1 %v7175_v26, %s10170_s29 }
 0xb46   : > { %v12650_v23 = vpop.permute.xlu1 %7961  ;;  %v12652_v5 = vpop.permute.xlu0 %7492 }
 0xb48   : > { %8266 = vrot.lane.b32.xlu0 %v8010_v11, %s13443_s15  ;;  %7856 = vrot.lane.b32.xlu1 %v7106_v22, %s13643_s24 }
 0xb4a   : > { %v12656_v16 = vpop.permute.xlu1 %8079  ;;  %v12658_v10 = vpop.permute.xlu0 %7610 }
 0xb4c   : > { %8325 = vrot.lane.b32.xlu0 %v8063_v63, %s13642_s10  ;;  %7959 = vrot.lane.b32.xlu1 %v8063_v63, %s13448_s5 }
 0xb4e   : > { %v12662_v33 = vpop.permute.xlu1 %8201  ;;  %v12664_v51 = vpop.permute.xlu0 %7732 }
 0xb50   : > { %8447 = vrot.lane.b32.xlu0 %v8063_v63, %s13544_s16  ;;  %8140 = vrot.lane.b32.xlu1 %v7995_v25, %s13442_s11 }
 0xb52   : > { %v12668_v15 = vpop.permute.xlu1 %8083  ;;  %v12670_v49 = vpop.permute.xlu0 %7614 }
 0xb54   : > { %8388 = vrot.lane.b32.xlu0 %v8010_v11, %s13403_s7  ;;  %8262 = vrot.lane.b32.xlu1 %v7995_v25, %s13443_s15 }
 0xb56   : > { %v12674_v31 = vpop.permute.xlu1 %8205  ;;  %v12676_v6 = vpop.permute.xlu0 %7736 }
 0xb58   : > { %8510 = vrot.lane.b32.xlu0 %v8010_v11, %s13404_s9  ;;  %8384 = vrot.lane.b32.xlu1 %v7995_v25, %s13403_s7 }
 0xb5a   : > { %v12680_v12 = vpop.permute.xlu1 %8323  ;;  %v12682_v61 = vpop.permute.xlu0 %7854 }
 0xb5c   : > { %8569 = vrot.lane.b32.xlu0 %v8063_v63, %s13545_s6  ;;  %8506 = vrot.lane.b32.xlu1 %v7995_v25, %s13404_s9 }
 0xb5e   : > { %v12686_v14 = vpop.permute.xlu1 %8445  ;;  %v12688_v54 = vpop.permute.xlu0 %7957 }
 0xb60   : > { %8691 = vrot.lane.b32.xlu0 %v8063_v63, %s13444_s8  ;;  %8628 = vrot.lane.b32.xlu1 %v7995_v25, %s13445_s4 }
 0xb62   : > { %v12694_v28 = vpop.permute.xlu1 %8327  ;;  %v12696_v36 = vpop.permute.xlu0 %7858 }
 0xb64   : > { %8632 = vrot.lane.b32.xlu0 %v8010_v11, %s13445_s4  ;;  %7128 = vrot.lane.b32.xlu1 %v7121_v9, %s10160_s19 }
 0xb66   : > { %v12701_v27 = vpop.permute.xlu1 %8449  ;;  %v12703_v41 = vpop.permute.xlu0 %8142 }
 0xb68   : > { %7372 = vrot.lane.b32.xlu0 %v7121_v9, %s10164_s23  ;;  %7250 = vrot.lane.b32.xlu1 %v7121_v9, %s13646_s18 }
 0xb6a   : > { %v12709_v58 = vpop.permute.xlu1 %8567  ;;  %v12711_v35 = vpop.permute.xlu0 %8264 }
 0xb6c   : > { %7494 = vrot.lane.b32.xlu0 %v7121_v9, %s13644_s21  ;;  %7963 = vrot.lane.b32.xlu1 %v7956_v43, %s13448_s5  ;;  %s9783_s21 = smul.u32 14, %s13741_s13 }
 0xb6e   : > { %v12716_v48 = vpop.permute.xlu1 %8689  ;;  %v12718_v18 = vpop.permute.xlu0 %8386 }
 0xb70   : > { %7616 = vrot.lane.b32.xlu0 %v7121_v9, %s10167_s26  ;;  %8085 = vrot.lane.b32.xlu1 %v7956_v43, %s13547_s22 }
 0xb72   : > { %v12722_v37 = vpop.permute.xlu1 %8571  ;;  %v12724_v30 = vpop.permute.xlu0 %8508 }
 0xb74   : > { %7738 = vrot.lane.b32.xlu0 %v7121_v9, %s10169_s28  ;;  %8207 = vrot.lane.b32.xlu1 %v7956_v43, %s13447_s25 }
 0xb76   : > { %v12728_v4 = vpop.permute.xlu1 %8693  ;;  %v12730_v22 = vpop.permute.xlu0 %8630 }
 0xb78   : > { %7860 = vrot.lane.b32.xlu0 %v7121_v9, %s13643_s24  ;;  %8329 = vrot.lane.b32.xlu1 %v7956_v43, %s13642_s10  ;;  %s170_s24 = scalar_lea.vmem %s13256_s3, %s9783_s21 }
 0xb7a   : > { %v12734_v24 = vpop.permute.xlu1 %7433  ;;  %v12736_v59 = vpop.permute.xlu0 %7189 }
 0xb7b   : > { %v13377_v7 = vrot.slane %v12734_v24, 4  ;;  %v13378_v26 = vrot.slane %v12736_v59, 4 }
 0xb7c   : > { %8390 = vrot.lane.b32.xlu0 %v12535_v52, %s13403_s7  ;;  %8451 = vrot.lane.b32.xlu1 %v7956_v43, %s13544_s16 }
 0xb7d   : > { %v7445_v25 = vsel %vm598_vm6, %v12734_v24, %v13377_v7  ;;  %v7201_v8 = vsel %vm350_vm1, %v12736_v59, %v13378_v26 }
 0xb7e   : > { %7453 = vst [vmem:[#allocation3 + $0x50] sm:$0xc] %v7445_v25  ;;  %7209 = vst [vmem:[#allocation3 + $0x18] sm:$0xc] %v7201_v8  ;;  %v12751_v11 = vpop.permute.xlu1 %7555  ;;  %v12753_v47 = vpop.permute.xlu0 %7311 }
 0xb7f   : > { %v13379_v63 = vrot.slane %v12751_v11, 4  ;;  %v13380_v60 = vrot.slane %v12753_v47, 4 }
 0xb80   : > { %8512 = vrot.lane.b32.xlu0 %v12535_v52, %s13404_s9  ;;  %8573 = vrot.lane.b32.xlu1 %v7956_v43, %s13545_s6 }
 0xb81   : > { %v7567_v9 = vsel %vm722_vm8, %v12751_v11, %v13379_v63  ;;  %v7323_v53 = vsel %vm474_vm4, %v12753_v47, %v13380_v60 }
 0xb82   : > { %7575 = vst [vmem:[#allocation3 + $0x6c] sm:$0xc] %v7567_v9  ;;  %7331 = vst [vmem:[#allocation3 + $0x34] sm:$0xc] %v7323_v53  ;;  %v12768_v25 = vpop.permute.xlu1 %7677  ;;  %v12770_v8 = vpop.permute.xlu0 %8024 }
 0xb83   : > { %v13381_v7 = vrot.slane %v12768_v25, 4  ;;  %v13382_v26 = vrot.slane %v12770_v8, 4 }
 0xb84   : > { %8634 = vrot.lane.b32.xlu0 %v12535_v52, %s13445_s4  ;;  %8695 = vrot.lane.b32.xlu1 %v7956_v43, %s13444_s8 }
 0xb85   : > { %v7689_v63 = vsel %vm846_vm10, %v12768_v25, %v13381_v7  ;;  %v8036_v9 = vsel %vm13647_vm12, %v12770_v8, %v13382_v26  ;;  %vm13651_vm12 = vcmask 908288  }
 0xb86   : > { %7697 = vst [vmem:[#allocation3 + $0x88] sm:$0xc] %v7689_v63  ;;  %8044 = vst [vmem:[#allocation3 + $0xdc] sm:$0xc] %v8036_v9  ;;  %v12785_v53 = vpop.permute.xlu1 %7799  ;;  %v12787_v60 = vpop.permute.xlu0 %8146 }
 0xb87   : > { %v13387_v52 = vrot.slane %v12785_v53, 4  ;;  %v13389_v43 = vrot.slane %v12787_v60, 4 }
 0xb89   : > { %v7811_v7 = vsel %vm13648_vm9, %v12785_v53, %v13387_v52  ;;  %v8158_v26 = vsel %vm13649_vm7, %v12787_v60, %v13389_v43  ;;  %vm13652_vm9 = vmmov %vm13651_vm12  ;;  %vm13653_vm7 = vcmask 891904  }
 0xb8a   : > { %7819 = vst [vmem:[#allocation3 + $0xa4] sm:$0xc] %v7811_v7  ;;  %8166 = vst [vmem:[#allocation3 + $0xf8] sm:$0xc] %v8158_v26  ;;  %v12799_v63 = vpop.permute.xlu0 %8268  ;;  %v7125_v9 = vpop.permute.xlu1 %7124  ;;  %v7192_v26 = vrot.slane %v12600_v38, 4 }
 0xb8b   : > { %v13394_v62 = vrot.slane %v12799_v63, 4  ;;  %v7131_v29 = vrot.slane %v7125_v9, 4 }
 0xb8d   : > { %v8280_v52 = vsel %vm13650_vm15, %v12799_v63, %v13394_v62  ;;  %v7134_v2 = vsel %vm286_vm0, %v7130_v57, %v7131_v29  ;;  %v7136_v7 = vsel %vm286_vm0, %v7131_v29, %v13396_v45  ;;  %v7254_v62 = vrot.slane %v12624_v13, 4  ;;  %vm13654_vm15 = vmmov %vm13653_vm7 }
 0xb8e   : > { %8288 = vst [vmem:[#allocation3 + $0x114] sm:$0xc] %v8280_v52  ;;  %v7135_v43 = vsel %vm13651_vm12, %v12602_v21, %v7134_v2  ;;  %v7137_v42 = vsel %vm13652_vm9, %v7125_v9, %v7136_v7  ;;  %v7184_v56 = vpop.permute.xlu0 %7183  ;;  %v7247_v50 = vpop.permute.xlu1 %7246  ;;  %vm13659_vm12 = vcmask 744448  }
 0xb8f   : > { %7145 = vst [vmem:[#allocation3] sm:$0x33] %v7135_v43  ;;  %7146 = vst [vmem:[#allocation3 + $0x8] sm:$0x33] %v7137_v42  ;;  %v7191_v57 = vrot.slane %v7184_v56, 4  ;;  %v7253_v55 = vrot.slane %v7247_v50, 4 }
 0xb90   : > { %v7314_v42 = vrot.slane %v12606_v0, 4  ;;  %vm13660_vm9 = vmmov %vm13659_vm12 }
 0xb91   : > { %v7195_v29 = vsel %vm286_vm0, %v7191_v57, %v7192_v26  ;;  %v7256_v45 = vsel %vm286_vm0, %v7252_v46, %v7253_v55  ;;  %v7258_v2 = vsel %vm286_vm0, %v7253_v55, %v7254_v62 }
 0xb92   : > { %v7196_v21 = vsel %vm350_vm1, %v7184_v56, %v7195_v29  ;;  %v7257_v52 = vsel %vm13653_vm7, %v12608_v34, %v7256_v45  ;;  %v7259_v9 = vsel %vm13654_vm15, %v7247_v50, %v7258_v2  ;;  %v7306_v7 = vpop.permute.xlu0 %7305  ;;  %v7188_v43 = vpop.permute.xlu1 %7187  ;;  %v13655_v56 = vrot.slane %v12736_v59, 4 }
 0xb93   : > { %7206 = vst [vmem:[#allocation3] sm:$0xcc] %v7196_v21  ;;  %7267 = vst [vmem:[#allocation3 + $0x1c] sm:$0x33] %v7257_v52  ;;  %v7313_v57 = vrot.slane %v7306_v7, 4  ;;  %v7193_v46 = vrot.slane %v7188_v43, 4 }
 0xb94   : > { %7268 = vst [vmem:[#allocation3 + $0x24] sm:$0x33] %v7259_v9  ;;  %v7436_v52 = vrot.slane %v12612_v1, 4  ;;  %vm13662_vm7 = vcmask 72704  }
 0xb95   : > { %v7317_v13 = vsel %vm286_vm0, %v7313_v57, %v7314_v42  ;;  %v7197_v55 = vsel %vm286_vm0, %v7192_v26, %v7193_v46  ;;  %v7199_v29 = vsel %vm286_vm0, %v7193_v46, %v13655_v56 }
 0xb96   : > { %v7318_v45 = vsel %vm474_vm4, %v7306_v7, %v7317_v13  ;;  %v7198_v50 = vsel %vm350_vm1, %v12600_v38, %v7197_v55  ;;  %v7200_v34 = vsel %vm350_vm1, %v7188_v43, %v7199_v29  ;;  %v7428_v2 = vpop.permute.xlu0 %7427  ;;  %v7310_v21 = vpop.permute.xlu1 %7309  ;;  %v13656_v13 = vrot.slane %v12753_v47, 4 }
 0xb97   : > { %7328 = vst [vmem:[#allocation3 + $0x1c] sm:$0xcc] %v7318_v45  ;;  %7207 = vst [vmem:[#allocation3 + $0x8] sm:$0xcc] %v7198_v50  ;;  %v7435_v9 = vrot.slane %v7428_v2, 4  ;;  %v7315_v26 = vrot.slane %v7310_v21, 4 }
 0xb98   : > { %7208 = vst [vmem:[#allocation3 + $0x10] sm:$0xcc] %v7200_v34  ;;  %v7558_v38 = vrot.slane %v12622_v40, 4  ;;  %v7374_v45 = vrot.slane %v12633_v20, 4  ;;  %v7376_v50 = vrot.slane %v12646_v32, 4  ;;  %vm13657_vm1 = vcmask 818176  }
 0xb99   : > { %v7439_v59 = vsel %vm286_vm0, %v7435_v9, %v7436_v52  ;;  %v7319_v57 = vsel %vm286_vm0, %v7314_v42, %v7315_v26  ;;  %v7321_v7 = vsel %vm286_vm0, %v7315_v26, %v13656_v13 }
 0xb9a   : > { %v7440_v43 = vsel %vm598_vm6, %v7428_v2, %v7439_v59  ;;  %v7320_v46 = vsel %vm474_vm4, %v12606_v0, %v7319_v57  ;;  %v7322_v55 = vsel %vm474_vm4, %v7310_v21, %v7321_v7  ;;  %v7550_v56 = vpop.permute.xlu0 %7549  ;;  %v7369_v29 = vpop.permute.xlu1 %7368  ;;  %v7680_v21 = vrot.slane %v12631_v17, 4  ;;  %vm13658_vm4 = vmmov %vm13657_vm1 }
 0xb9b   : > { %7450 = vst [vmem:[#allocation3 + $0x38] sm:$0xcc] %v7440_v43  ;;  %7329 = vst [vmem:[#allocation3 + $0x24] sm:$0xcc] %v7320_v46  ;;  %v7557_v47 = vrot.slane %v7550_v56, 4  ;;  %v7375_v42 = vrot.slane %v7369_v29, 4 }
 0xb9c   : > { %7330 = vst [vmem:[#allocation3 + $0x2c] sm:$0xcc] %v7322_v55  ;;  %v7496_v46 = vrot.slane %v12640_v44, 4  ;;  %v7498_v55 = vrot.slane %v12652_v5, 4 }
 0xb9d   : > { %v7561_v34 = vsel %vm286_vm0, %v7557_v47, %v7558_v38  ;;  %v7378_v2 = vsel %vm286_vm0, %v7374_v45, %v7375_v42  ;;  %v7380_v0 = vsel %vm286_vm0, %v7375_v42, %v7376_v50 }
 0xb9e   : > { %v7562_v9 = vsel %vm722_vm8, %v7550_v56, %v7561_v34  ;;  %v7379_v26 = vsel %vm13657_vm1, %v12633_v20, %v7378_v2  ;;  %v7381_v59 = vsel %vm13658_vm4, %v7369_v29, %v7380_v0  ;;  %v7672_v57 = vpop.permute.xlu0 %7671  ;;  %v7491_v13 = vpop.permute.xlu1 %7490  ;;  %v10055_v7 = vld [vmem:[#allocation3] ss:$28 sps:$4 sm:$0xff]   ;;  %vm13668_vm1 = vcmask 728064  }
 0xb9f   : > { %v10057_v43 = vld [vmem:[#allocation3 + $0x4] ss:$28 sps:$4 sm:$0xff]   ;;  %7572 = vst [vmem:[#allocation3 + $0x54] sm:$0xcc] %v7562_v9  ;;  %7389 = vst [vmem:[#allocation3 + $0x38] sm:$0x33] %v7379_v26 }
 0xba0   : > { %7390 = vst [vmem:[#allocation3 + $0x40] sm:$0x33] %v7381_v59  ;;  %v7679_v45 = vrot.slane %v7672_v57, 4  ;;  %v7497_v47 = vrot.slane %v7491_v13, 4  ;;  %9043 = vmatprep.subr.bf16.mxu0 %v10057_v43  ;;  %v7802_v43 = vrot.slane %v12638_v19, 4  ;;  %vm13669_vm4 = vmmov %vm13668_vm1 }
 0xba1   : > { %9044 = vmatpush1.bf16.msra.mxu0 %v10055_v7 }
 0xba2   : > { %v7683_v20 = vsel %vm286_vm0, %v7679_v45, %v7680_v21  ;;  %v7500_v56 = vsel %vm286_vm0, %v7496_v46, %v7497_v47  ;;  %v7502_v29 = vsel %vm286_vm0, %v7497_v47, %v7498_v55  ;;  %v7794_v0 = vpop.permute.xlu0 %7793  ;;  %v7432_v9 = vpop.permute.xlu1 %7431  ;;  %v10058_v26 = vld [vmem:[#allocation3 + $0x8] ss:$28 sps:$4 sm:$0xff]  }
 0xba3   : > { %v7684_v42 = vsel %vm846_vm10, %v7672_v57, %v7683_v20  ;;  %v7501_v34 = vsel %vm13659_vm12, %v12640_v44, %v7500_v56  ;;  %v7503_v2 = vsel %vm13660_vm9, %v7491_v13, %v7502_v29  ;;  %v10060_v59 = vld [vmem:[#allocation3 + $0xc] ss:$28 sps:$4 sm:$0xff]   ;;  %v7801_v46 = vrot.slane %v7794_v0, 4 }
 0xba4   : > { %7694 = vst [vmem:[#allocation3 + $0x70] sm:$0xcc] %v7684_v42  ;;  %7511 = vst [vmem:[#allocation3 + $0x54] sm:$0x33] %v7501_v34  ;;  %v7437_v45 = vrot.slane %v7432_v9, 4  ;;  %9084 = vmatprep.subr.bf16.mxu1 %v10060_v59  ;;  %v13661_v13 = vrot.slane %v12734_v24, 4 }
 0xba5   : > { %7512 = vst [vmem:[#allocation3 + $0x5c] sm:$0x33] %v7503_v2  ;;  %v7805_v57 = vsel %vm286_vm0, %v7801_v46, %v7802_v43  ;;  %9085 = vmatpush1.bf16.msra.mxu1 %v10058_v26  ;;  %v8027_v34 = vrot.slane %v12644_v39, 4  ;;  %v13663_v26 = vrot.slane %v12751_v11, 4  ;;  %vm13670_vm12 = vcmask 965632  }
 0xba6   : > { %v7441_v44 = vsel %vm286_vm0, %v7436_v52, %v7437_v45  ;;  %v7443_v7 = vsel %vm286_vm0, %v7437_v45, %v13661_v13  ;;  %v7806_v47 = vsel %vm13662_vm7, %v7794_v0, %v7805_v57  ;;  %v8019_v29 = vpop.permute.xlu0 %8018  ;;  %v7554_v42 = vpop.permute.xlu1 %7553  ;;  %vm13671_vm9 = vmmov %vm13670_vm12  ;;  %vm13672_vm7 = vcmask 80896  }
 0xba7   : > { %v7442_v20 = vsel %vm598_vm6, %v12612_v1, %v7441_v44  ;;  %v7444_v56 = vsel %vm598_vm6, %v7432_v9, %v7443_v7  ;;  %7816 = vst [vmem:[#allocation3 + $0x8c] sm:$0xcc] %v7806_v47  ;;  %v8026_v52 = vrot.slane %v8019_v29, 4  ;;  %v7559_v2 = vrot.slane %v7554_v42, 4 }
 0xba8   : > { %7451 = vst [vmem:[#allocation3 + $0x40] sm:$0xcc] %v7442_v20  ;;  %7452 = vst [vmem:[#allocation3 + $0x48] sm:$0xcc] %v7444_v56  ;;  %vm13664_vm6 = vcmask 973824   ;;  %v7618_v7 = vrot.slane %v12658_v10, 4 }
 0xba9   : > { %v8030_v24 = vsel %vm286_vm0, %v8026_v52, %v8027_v34  ;;  %v7563_v0 = vsel %vm286_vm0, %v7558_v38, %v7559_v2  ;;  %v7565_v1 = vsel %vm286_vm0, %v7559_v2, %v13663_v26  ;;  %v7620_v47 = vrot.slane %v12670_v49, 4  ;;  %vm13667_vm15 = vmmov %vm13664_vm6 }
 0xbaa   : > { %v8031_v9 = vsel %vm13664_vm6, %v8019_v29, %v8030_v24  ;;  %v7564_v59 = vsel %vm722_vm8, %v12622_v40, %v7563_v0  ;;  %v7566_v46 = vsel %vm722_vm8, %v7554_v42, %v7565_v1  ;;  %v8023_v45 = vpop.permute.xlu0 %8022  ;;  %v7613_v57 = vpop.permute.xlu1 %7612  ;;  %v8087_v20 = vrot.slane %v12656_v16, 4  ;;  %vm13666_vm8 = vmmov %vm13664_vm6 }
 0xbab   : > { %v10061_v44 = vld [vmem:[#allocation3 + $0x38] ss:$28 sps:$4 sm:$0xff]   ;;  %8041 = vst [vmem:[#allocation3 + $0xc4] sm:$0xcc] %v8031_v9  ;;  %7573 = vst [vmem:[#allocation3 + $0x5c] sm:$0xcc] %v7564_v59 }
 0xbac   : > { %v10063_v13 = vld [vmem:[#allocation3 + $0x3c] ss:$28 sps:$4 sm:$0xff]   ;;  %7574 = vst [vmem:[#allocation3 + $0x64] sm:$0xcc] %v7566_v46  ;;  %v8028_v11 = vrot.slane %v8023_v45, 4  ;;  %v7619_v38 = vrot.slane %v7613_v57, 4  ;;  %vm13673_vm6 = vmmov %vm13672_vm7 }
 0xbad   : > { %v7740_v56 = vrot.slane %v12664_v51, 4  ;;  %9045 = vmatprep.subr.bf16.mxu0 %v10063_v13  ;;  %v13665_v29 = vrot.slane %v12770_v8, 4  ;;  %v8089_v9 = vrot.slane %v12668_v15, 4  ;;  %v7742_v59 = vrot.slane %v12676_v6, 4 }
 0xbae   : > { %v8032_v40 = vsel %vm286_vm0, %v8027_v34, %v8028_v11  ;;  %v7622_v52 = vsel %vm286_vm0, %v7618_v7, %v7619_v38  ;;  %v7624_v2 = vsel %vm286_vm0, %v7619_v38, %v7620_v47  ;;  %9046 = vmatpush1.bf16.msra.mxu0 %v10061_v44  ;;  %v8082_v8 = vpop.permute.xlu0 %8081  ;;  %v7735_v1 = vpop.permute.xlu1 %7734 }
 0xbaf   : > { %v8034_v42 = vsel %vm286_vm0, %v8028_v11, %v13665_v29  ;;  %v8033_v24 = vsel %vm13666_vm8, %v12644_v39, %v8032_v40  ;;  %v7623_v26 = vsel %vm13668_vm1, %v12658_v10, %v7622_v52  ;;  %v7625_v34 = vsel %vm13669_vm4, %v7613_v57, %v7624_v2 }
 0xbb0   : > { %v8035_v0 = vsel %vm13667_vm15, %v8023_v45, %v8034_v42  ;;  %8042 = vst [vmem:[#allocation3 + $0xcc] sm:$0xcc] %v8033_v24  ;;  %7633 = vst [vmem:[#allocation3 + $0x70] sm:$0x33] %v7623_v26  ;;  %v8088_v46 = vrot.slane %v8082_v8, 4  ;;  %v7741_v44 = vrot.slane %v7735_v1, 4 }
 0xbb1   : > { %8043 = vst [vmem:[#allocation3 + $0xd4] sm:$0xcc] %v8035_v0  ;;  %7634 = vst [vmem:[#allocation3 + $0x78] sm:$0x33] %v7625_v34  ;;  %v8211_v52 = vrot.slane %v12674_v31, 4  ;;  %v13674_v26 = vrot.slane %v12768_v25, 4 }
 0xbb2   : > { %v8091_v39 = vsel %vm286_vm0, %v8087_v20, %v8088_v46  ;;  %v8093_v10 = vsel %vm286_vm0, %v8088_v46, %v8089_v9  ;;  %v7744_v45 = vsel %vm286_vm0, %v7740_v56, %v7741_v44  ;;  %v7746_v57 = vsel %vm286_vm0, %v7741_v44, %v7742_v59  ;;  %v8204_v20 = vpop.permute.xlu0 %8203  ;;  %v7676_v40 = vpop.permute.xlu1 %7675  ;;  %v10064_v29 = vld [vmem:[#allocation3 + $0x40] ss:$28 sps:$4 sm:$0xff]  }
 0xbb3   : > { %v8092_v13 = vsel %vm13670_vm12, %v12656_v16, %v8091_v39  ;;  %v8094_v7 = vsel %vm13671_vm9, %v8082_v8, %v8093_v10  ;;  %v7745_v11 = vsel %vm13672_vm7, %v12664_v51, %v7744_v45  ;;  %v7747_v38 = vsel %vm13673_vm6, %v7735_v1, %v7746_v57  ;;  %v10066_v42 = vld [vmem:[#allocation3 + $0x44] ss:$28 sps:$4 sm:$0xff]  }
 0xbb4   : > { %v8209_v56 = vrot.slane %v12662_v33, 4  ;;  %8102 = vst [vmem:[#allocation3 + $0xe0] sm:$0x33] %v8092_v13  ;;  %8103 = vst [vmem:[#allocation3 + $0xe8] sm:$0x33] %v8094_v7  ;;  %v8210_v16 = vrot.slane %v8204_v20, 4  ;;  %9086 = vmatprep.subr.bf16.mxu1 %v10066_v42 }
 0xbb5   : > { %7755 = vst [vmem:[#allocation3 + $0x8c] sm:$0x33] %v7745_v11  ;;  %7756 = vst [vmem:[#allocation3 + $0x94] sm:$0x33] %v7747_v38  ;;  %v7681_v2 = vrot.slane %v7676_v40, 4  ;;  %9087 = vmatpush1.bf16.msra.mxu1 %v10064_v29  ;;  %vm13675_vm8 = vcmask 318464  }
 0xbb6   : > { %v8213_v24 = vsel %vm286_vm0, %v8209_v56, %v8210_v16  ;;  %v8215_v51 = vsel %vm286_vm0, %v8210_v16, %v8211_v52  ;;  %vm13676_vm15 = vmmov %vm13675_vm8  ;;  %v8145_v39 = vpop.permute.xlu0 %8144  ;;  %v7798_v10 = vpop.permute.xlu1 %7797  ;;  %v8149_v45 = vrot.slane %v12703_v41, 4  ;;  %v7862_v57 = vrot.slane %v12682_v61, 4 }
 0xbb7   : > { %v7685_v0 = vsel %vm286_vm0, %v7680_v21, %v7681_v2  ;;  %v7687_v34 = vsel %vm286_vm0, %v7681_v2, %v13674_v26  ;;  %v8214_v8 = vsel %vm13675_vm8, %v12662_v33, %v8213_v24  ;;  %v8216_v1 = vsel %vm13676_vm15, %v8204_v20, %v8215_v51 }
 0xbb8   : > { %v7686_v46 = vsel %vm846_vm10, %v12631_v17, %v7685_v0  ;;  %v7688_v44 = vsel %vm846_vm10, %v7676_v40, %v7687_v34  ;;  %8224 = vst [vmem:[#allocation3 + $0xfc] sm:$0x33] %v8214_v8  ;;  %8225 = vst [vmem:[#allocation3 + $0x104] sm:$0x33] %v8216_v1  ;;  %v8150_v25 = vrot.slane %v8145_v39, 4  ;;  %v7803_v21 = vrot.slane %v7798_v10, 4 }
 0xbb9   : > { %7695 = vst [vmem:[#allocation3 + $0x78] sm:$0xcc] %v7686_v46  ;;  %7696 = vst [vmem:[#allocation3 + $0x80] sm:$0xcc] %v7688_v44  ;;  %v13677_v17 = vrot.slane %v12787_v60, 4  ;;  %v13678_v11 = vrot.slane %v12785_v53, 4 }
 0xbba   : > { %v8154_v33 = vsel %vm286_vm0, %v8149_v45, %v8150_v25  ;;  %v7807_v7 = vsel %vm286_vm0, %v7802_v43, %v7803_v21  ;;  %vm13679_vm10 = vcmask 957440   ;;  %vm13681_vm4 = vcmask 72704   ;;  %v8267_v42 = vpop.permute.xlu0 %8266  ;;  %v7857_v56 = vpop.permute.xlu1 %7856 }
 0xbbb   : > { %v8156_v13 = vsel %vm286_vm0, %v8150_v25, %v13677_v17  ;;  %v7809_v38 = vsel %vm286_vm0, %v7803_v21, %v13678_v11  ;;  %v8155_v20 = vsel %vm13679_vm10, %v12703_v41, %v8154_v33  ;;  %vm13680_vm1 = vmmov %vm13679_vm10  ;;  %v7808_v29 = vsel %vm13681_vm4, %v12638_v19, %v7807_v7 }
 0xbbc   : > { %v8157_v40 = vsel %vm13680_vm1, %v8145_v39, %v8156_v13  ;;  %vm13682_vm12 = vmmov %vm13681_vm4  ;;  %v10067_v16 = vld [vmem:[#allocation3 + $0x70] ss:$28 sps:$4 sm:$0xff]   ;;  %v7864_v43 = vrot.slane %v12696_v36, 4  ;;  %v8271_v53 = vrot.slane %v12711_v35, 4  ;;  %8164 = vst [vmem:[#allocation3 + $0xe8] sm:$0xcc] %v8155_v20 }
 0xbbd   : > { %v7810_v60 = vsel %vm13682_vm12, %v7798_v10, %v7809_v38  ;;  %v10069_v2 = vld [vmem:[#allocation3 + $0x74] ss:$28 sps:$4 sm:$0xff]   ;;  %8165 = vst [vmem:[#allocation3 + $0xf0] sm:$0xcc] %v8157_v40  ;;  %7817 = vst [vmem:[#allocation3 + $0x94] sm:$0xcc] %v7808_v29 }
 0xbbe   : > { %7818 = vst [vmem:[#allocation3 + $0x9c] sm:$0xcc] %v7810_v60  ;;  %v8272_v24 = vrot.slane %v8267_v42, 4  ;;  %v7863_v51 = vrot.slane %v7857_v56, 4  ;;  %v7967_v0 = vrot.slane %v12650_v23, 4  ;;  %v8331_v19 = vrot.slane %v12680_v12, 4  ;;  %9047 = vmatprep.subr.bf16.mxu0 %v10069_v2  ;;  %v7960_v21 = vpop.permute.xlu1 %7959 }
 0xbbf   : > { %v13683_v34 = vrot.slane %v12799_v63, 4  ;;  %9048 = vmatpush1.bf16.msra.mxu0 %v10067_v16  ;;  %vm13684_vm9 = vcmask 310272   ;;  %vm13686_vm6 = vcmask 7168   ;;  %v8326_v63 = vpop.permute.xlu0 %8325  ;;  %v7965_v33 = vrot.slane %v12688_v54, 4 }
 0xbc0   : > { %v8276_v26 = vsel %vm286_vm0, %v8271_v53, %v8272_v24  ;;  %v7866_v1 = vsel %vm286_vm0, %v7862_v57, %v7863_v51  ;;  %v7868_v46 = vsel %vm286_vm0, %v7863_v51, %v7864_v43  ;;  %vm13685_vm7 = vmmov %vm13684_vm9  ;;  %v8333_v57 = vrot.slane %v12694_v28, 4 }
 0xbc1   : > { %v8278_v8 = vsel %vm286_vm0, %v8272_v24, %v13683_v34  ;;  %v8277_v44 = vsel %vm13684_vm9, %v12711_v35, %v8276_v26  ;;  %v7867_v10 = vsel %vm13686_vm6, %v12682_v61, %v7866_v1  ;;  %vm13687_vm8 = vmmov %vm13686_vm6  ;;  %v8332_v17 = vrot.slane %v8326_v63, 4 }
 0xbc2   : > { %v8279_v39 = vsel %vm13685_vm7, %v8267_v42, %v8278_v8  ;;  %v7869_v25 = vsel %vm13687_vm8, %v7857_v56, %v7868_v46  ;;  %8286 = vst [vmem:[#allocation3 + $0x104] sm:$0xcc] %v8277_v44  ;;  %7877 = vst [vmem:[#allocation3 + $0xa8] sm:$0x33] %v7867_v10  ;;  %v7966_v13 = vrot.slane %v7960_v21, 4  ;;  %vm13688_vm15 = vcmask 302080   ;;  %v8141_v56 = vpop.permute.xlu1 %8140 }
 0xbc3   : > { %8287 = vst [vmem:[#allocation3 + $0x10c] sm:$0xcc] %v8279_v39  ;;  %7878 = vst [vmem:[#allocation3 + $0xb0] sm:$0x33] %v7869_v25  ;;  %v8335_v7 = vsel %vm286_vm0, %v8331_v19, %v8332_v17  ;;  %v8337_v61 = vsel %vm286_vm0, %v8332_v17, %v8333_v57  ;;  %vm13690_vm1 = vcmask 1039360   ;;  %v8448_v42 = vpop.permute.xlu0 %8447  ;;  %v8453_v24 = vrot.slane %v12686_v14, 4 }
 0xbc4   : > { %v7969_v11 = vsel %vm286_vm0, %v7965_v33, %v7966_v13  ;;  %v7971_v38 = vsel %vm286_vm0, %v7966_v13, %v7967_v0  ;;  %v8336_v20 = vsel %vm13688_vm15, %v12680_v12, %v8335_v7  ;;  %vm13689_vm10 = vmmov %vm13688_vm15  ;;  %v10070_v16 = vld [vmem:[#allocation3 + $0x78] ss:$28 sps:$4 sm:$0xff]   ;;  %v8455_v51 = vrot.slane %v12701_v27, 4 }
 0xbc5   : > { %v8338_v40 = vsel %vm13689_vm10, %v8326_v63, %v8337_v61  ;;  %v7970_v29 = vsel %vm13690_vm1, %v12688_v54, %v7969_v11  ;;  %vm13691_vm4 = vmmov %vm13690_vm1  ;;  %v10072_v2 = vld [vmem:[#allocation3 + $0x7c] ss:$28 sps:$4 sm:$0xff]   ;;  %8346 = vst [vmem:[#allocation3 + $0x118] sm:$0x33] %v8336_v20  ;;  %v8454_v12 = vrot.slane %v8448_v42, 4  ;;  %v8148_v19 = vrot.slane %v8141_v56, 4 }
 0xbc6   : > { %v7972_v60 = vsel %vm13691_vm4, %v7960_v21, %v7971_v38  ;;  %8347 = vst [vmem:[#allocation3 + $0x120] sm:$0x33] %v8338_v40  ;;  %7980 = vst [vmem:[#allocation3 + $0xc4] sm:$0x33] %v7970_v29  ;;  %9088 = vmatprep.subr.bf16.mxu1 %v10072_v2  ;;  %vm13692_vm12 = vcmask 228352   ;;  %vm13694_vm7 = vcmask 957440   ;;  %v8263_v39 = vpop.permute.xlu1 %8262 }
 0xbc7   : > { %7981 = vst [vmem:[#allocation3 + $0xcc] sm:$0x33] %v7972_v60  ;;  %v8457_v26 = vsel %vm286_vm0, %v8453_v24, %v8454_v12  ;;  %v8459_v54 = vsel %vm286_vm0, %v8454_v12, %v8455_v51  ;;  %v8152_v34 = vsel %vm286_vm0, %v8148_v19, %v8149_v45  ;;  %9089 = vmatpush1.bf16.msra.mxu1 %v10070_v16  ;;  %vm13693_vm9 = vmmov %vm13692_vm12  ;;  %v13020_v44 = vpop.permute.xlu0 %8388  ;;  %v8393_v10 = vrot.slane %v12718_v18, 4 }
 0xbc8   : > { %v8458_v8 = vsel %vm13692_vm12, %v12686_v14, %v8457_v26  ;;  %v8460_v1 = vsel %vm13693_vm9, %v8448_v42, %v8459_v54  ;;  %v8153_v46 = vsel %vm13694_vm7, %v8141_v56, %v8152_v34  ;;  %v8394_v41 = vrot.slane %v13020_v44, 4 }
 0xbc9   : > { %8468 = vst [vmem:[#allocation3 + $0x134] sm:$0x33] %v8458_v8  ;;  %8469 = vst [vmem:[#allocation3 + $0x13c] sm:$0x33] %v8460_v1  ;;  %v8270_v25 = vrot.slane %v8263_v39, 4  ;;  %vm13695_vm6 = vcmask 236544  }
 0xbca   : > { %8163 = vst [vmem:[#allocation3 + $0xe0] sm:$0xcc] %v8153_v46  ;;  %v8398_v45 = vsel %vm286_vm0, %v8393_v10, %v8394_v41  ;;  %vm13696_vm8 = vcmask 310272   ;;  %v8385_v17 = vpop.permute.xlu1 %8384  ;;  %v8515_v61 = vrot.slane %v12724_v30, 4  ;;  %vm13697_vm15 = vcmask 220160   ;;  %vm13698_vm10 = vmmov %vm13695_vm6 }
 0xbcb   : > { %v8274_v14 = vsel %vm286_vm0, %v8270_v25, %v8271_v53  ;;  %v8399_v63 = vsel %vm13695_vm6, %v12718_v18, %v8398_v45  ;;  %v13033_v33 = vpop.permute.xlu0 %8510  ;;  %v8392_v38 = vrot.slane %v8385_v17, 4  ;;  %v10081_v56 = vld [vmem:[#allocation3 + $0xec] ss:$28 sps:$4 sm:$0xff]   ;;  %v8575_v16 = vrot.slane %v12709_v58, 4  ;;  %vm13699_vm1 = vmmov %vm13697_vm15 }
 0xbcc   : > { %v8275_v21 = vsel %vm13696_vm8, %v8263_v39, %v8274_v14  ;;  %8408 = vst [vmem:[#allocation3 + $0x120] sm:$0xcc] %v8399_v63  ;;  %v8516_v11 = vrot.slane %v13033_v33, 4  ;;  %v8577_v2 = vrot.slane %v12722_v37, 4  ;;  %v10079_v54 = vld [vmem:[#allocation3 + $0xe8] ss:$28 sps:$4 sm:$0xff]  }
 0xbcd   : > { %v10073_v13 = vld [vmem:[#allocation3 + $0xa8] ss:$28 sps:$4 sm:$0xff]   ;;  %8285 = vst [vmem:[#allocation3 + $0xfc] sm:$0xcc] %v8275_v21  ;;  %v8396_v20 = vsel %vm286_vm0, %v8392_v38, %v8393_v10  ;;  %v8697_v34 = vrot.slane %v12716_v48, 4  ;;  %v8699_v14 = vrot.slane %v12728_v4, 4 }
 0xbce   : > { %v10075_v7 = vld [vmem:[#allocation3 + $0xac] ss:$28 sps:$4 sm:$0xff]   ;;  %v10078_v53 = vld [vmem:[#allocation3 + $0xb4] ss:$28 sps:$4 sm:$0xff]   ;;  %v8520_v18 = vsel %vm286_vm0, %v8515_v61, %v8516_v11  ;;  %v8397_v29 = vsel %vm13698_vm10, %v8385_v17, %v8396_v20  ;;  %v8507_v42 = vpop.permute.xlu1 %8506  ;;  %v8637_v63 = vrot.slane %v12730_v22, 4  ;;  %vm13701_vm4 = vcmask 908288  }
 0xbcf   : > { %v10076_v35 = vld [vmem:[#allocation3 + $0xb0] ss:$28 sps:$4 sm:$0xff]   ;;  %9049 = vmatprep.subr.bf16.mxu0 %v10075_v7  ;;  %v8521_v40 = vsel %vm13697_vm15, %v12724_v30, %v8520_v18  ;;  %9090 = vmatprep.subr.bf16.mxu1 %v10078_v53  ;;  %v8570_v60 = vpop.permute.xlu0 %8569  ;;  %8407 = vst [vmem:[#allocation3 + $0x118] sm:$0xcc] %v8397_v29  ;;  %v8514_v12 = vrot.slane %v8507_v42, 4  ;;  %vm13702_vm12 = vmmov %vm13701_vm4  ;;  %vm13703_vm9 = vcmask 818176  }
 0xbd0   : > { %9050 = vmatpush1.bf16.msra.mxu0 %v10073_v13  ;;  %8530 = vst [vmem:[#allocation3 + $0x13c] sm:$0xcc] %v8521_v40  ;;  %v8576_v24 = vrot.slane %v8570_v60, 4  ;;  %9091 = vmatpush1.bf16.msra.mxu1 %v10076_v35  ;;  %vm13705_vm7 = vcmask 891904   ;;  %vm13706_vm6 = vmmov %vm13703_vm9  ;;  %vm13708_vm15 = vcmask 744448   ;;  %vm13709_vm10 = vcmask 1039360  }
 0xbd1   : > { %9092 = vmatprep.subr.bf16.mxu1 %v10081_v56  ;;  %v8518_v26 = vsel %vm286_vm0, %v8514_v12, %v8515_v61  ;;  %vm13707_vm8 = vmmov %vm13705_vm7 }
 0xbd2   : > { %v8579_v19 = vsel %vm286_vm0, %v8575_v16, %v8576_v24  ;;  %v8581_v30 = vsel %vm286_vm0, %v8576_v24, %v8577_v2  ;;  %v8519_v46 = vsel %vm13699_vm1, %v8507_v42, %v8518_v26  ;;  %v8629_v10 = vpop.permute.xlu1 %8628  ;;  %v13700_v42 = vrot.slane %v12614_v3, 4  ;;  %vm13710_vm1 = vmmov %vm13708_vm15 }
 0xbd3   : > { %v8580_v8 = vsel %vm1756_vm14, %v12709_v58, %v8579_v19  ;;  %v8582_v1 = vsel %vm1756_vm14, %v8570_v60, %v8581_v30  ;;  %v8692_v39 = vpop.permute.xlu0 %8691  ;;  %8529 = vst [vmem:[#allocation3 + $0x134] sm:$0xcc] %v8519_v46  ;;  %v8636_v17 = vrot.slane %v8629_v10, 4 }
 0xbd4   : > { %v10082_v25 = vld [vmem:[#allocation3 + $0xe0] ss:$28 sps:$4 sm:$0xff]   ;;  %8590 = vst [vmem:[#allocation3 + $0x150] sm:$0x33] %v8580_v8  ;;  %8591 = vst [vmem:[#allocation3 + $0x158] sm:$0x33] %v8582_v1  ;;  %9093 = vmatpush1.bf16.msra.mxu1 %v10079_v54 }
 0xbd5   : > { %v10084_v45 = vld [vmem:[#allocation3 + $0xe4] ss:$28 sps:$4 sm:$0xff]   ;;  %v8698_v21 = vrot.slane %v8692_v39, 4  ;;  %v8640_v7 = vsel %vm286_vm0, %v8636_v17, %v8637_v63 }
 0xbd6   : > { %9051 = vmatprep.subr.bf16.mxu0 %v10084_v45  ;;  %v8641_v35 = vsel %vm1818_vm13, %v8629_v10, %v8640_v7  ;;  %v7129_v18 = vpop.permute.xlu1 %7128 }
 0xbd7   : > { %v8701_v58 = vsel %vm286_vm0, %v8697_v34, %v8698_v21  ;;  %v8703_v13 = vsel %vm286_vm0, %v8698_v21, %v8699_v14  ;;  %9052 = vmatpush1.bf16.msra.mxu0 %v10082_v25  ;;  %v13067_v53 = vpop.permute.xlu0 %8632  ;;  %v10085_v20 = vld [vmem:[#allocation3 + $0x120] ss:$28 sps:$4 sm:$0xff]   ;;  %8651 = vst [vmem:[#allocation3 + $0x150] sm:$0xcc] %v8641_v35  ;;  %v7133_v60 = vrot.slane %v7129_v18, 4 }
 0xbd8   : > { %v8702_v61 = vsel %vm1880_vm11, %v12716_v48, %v8701_v58  ;;  %v8704_v38 = vsel %vm1880_vm11, %v8692_v39, %v8703_v13  ;;  %v10087_v40 = vld [vmem:[#allocation3 + $0x124] ss:$28 sps:$4 sm:$0xff]   ;;  %v8638_v29 = vrot.slane %v13067_v53, 4 }
 0xbd9   : > { %8712 = vst [vmem:[#allocation3 + $0x16c] sm:$0x33] %v8702_v61  ;;  %8713 = vst [vmem:[#allocation3 + $0x174] sm:$0x33] %v8704_v38  ;;  %9094 = vmatprep.subr.bf16.mxu1 %v10087_v40  ;;  %v7138_v56 = vsel %vm286_vm0, %v13700_v42, %v7133_v60  ;;  %v7140_v16 = vsel %vm13701_vm4, %v7129_v18, %v7133_v60  ;;  %v13105_v61 = vld [vmem:[%s13254_s1 + $0x6] sm:$0x3] }
 0xbda   : > { %v8642_v48 = vsel %vm286_vm0, %v8637_v63, %v8638_v29  ;;  %9095 = vmatpush1.bf16.msra.mxu1 %v10085_v20  ;;  %v7139_v12 = vsel %vm13702_vm12, %v12614_v3, %v7138_v56  ;;  %7148 = vst [vmem:[#allocation3 + $0x18] sm:$0x3] %v7140_v16  ;;  %v7251_v30 = vpop.permute.xlu1 %7250  ;;  %v10088_v26 = vld [vmem:[#allocation3 + $0x118] ss:$28 sps:$4 sm:$0xff]   ;;  %vm13711_vm4 = vmmov %vm13709_vm10  ;;  %vm13712_vm12 = vcmask 728064  }
 0xbdb   : > { %v8643_v24 = vsel %vm1818_vm13, %v12730_v22, %v8642_v48  ;;  %v7373_v19 = vpop.permute.xlu0 %7372  ;;  %v10090_v54 = vld [vmem:[#allocation3 + $0x11c] ss:$28 sps:$4 sm:$0xff]   ;;  %7147 = vst [vmem:[#allocation3 + $0x10] sm:$0x33] %v7139_v12  ;;  %v7255_v8 = vrot.slane %v7251_v30, 4  ;;  %v13704_v22 = vld [vmem:[#allocation5_spill] sm:$0xff] }
 0xbdc   : > { %8652 = vst [vmem:[#allocation3 + $0x158] sm:$0xcc] %v8643_v24  ;;  %v7377_v34 = vrot.slane %v7373_v19, 4  ;;  %9053 = vmatprep.subr.bf16.mxu0 %v10090_v54 }
 0xbdd   : > { %v7260_v3 = vsel %vm286_vm0, %v7254_v62, %v7255_v8  ;;  %v7262_v39 = vsel %vm13705_vm7, %v7251_v30, %v7255_v8  ;;  %9054 = vmatpush1.bf16.msra.mxu0 %v10088_v26  ;;  %vm13714_vm7 = vmmov %vm13712_vm12 }
 0xbde   : > { %v7382_v1 = vsel %vm286_vm0, %v7376_v50, %v7377_v34  ;;  %v7384_v46 = vsel %vm13703_vm9, %v7373_v19, %v7377_v34  ;;  %v7261_v25 = vsel %vm13707_vm8, %v13704_v22, %v7260_v3  ;;  %7270 = vst [vmem:[#allocation3 + $0x34] sm:$0x3] %v7262_v39  ;;  %v7964_v63 = vpop.permute.xlu1 %7963  ;;  %vm13713_vm9 = vcmask 965632  }
 0xbdf   : > { %v7383_v10 = vsel %vm13706_vm6, %v12646_v32, %v7382_v1  ;;  %7392 = vst [vmem:[#allocation3 + $0x50] sm:$0x3] %v7384_v46  ;;  %v7495_v45 = vpop.permute.xlu0 %7494  ;;  %7269 = vst [vmem:[#allocation3 + $0x2c] sm:$0x33] %v7261_v25  ;;  %v7968_v17 = vrot.slane %v7964_v63, 4  ;;  %v13717_v34 = vmov 0.0  }
 0xbe0   : > { %v10091_v50 = vld [vmem:[#allocation3 + $0x154] ss:$28 sps:$4 sm:$0x3f]   ;;  %7391 = vst [vmem:[#allocation3 + $0x48] sm:$0x33] %v7383_v10  ;;  %v7499_v21 = vrot.slane %v7495_v45, 4  ;;  %vm13715_vm6 = vmmov %vm13713_vm9 }
 0xbe1   : > { %v10093_v58 = vld [vmem:[#allocation3 + $0x150] ss:$28 sps:$4 sm:$0x3f]   ;;  %9666 = vmatprep.subr.msk.bf16.mxu0 %vm2201_vm2, %v10091_v50  ;;  %v7973_v13 = vsel %vm286_vm0, %v7967_v0, %v7968_v17  ;;  %v7975_v7 = vsel %vm13709_vm10, %v7964_v63, %v7968_v17  ;;  %vm13718_vm8 = vcmask 80896  }
 0xbe2   : > { %v7504_v62 = vsel %vm286_vm0, %v7498_v55, %v7499_v21  ;;  %v7506_v32 = vsel %vm13708_vm15, %v7495_v45, %v7499_v21  ;;  %v7974_v55 = vsel %vm13711_vm4, %v12650_v23, %v7973_v13  ;;  %7983 = vst [vmem:[#allocation3 + $0xdc] sm:$0x3] %v7975_v7  ;;  %v9023_v18 = vsel %vm2201_vm2, %v10093_v58, 0  ;;  %v8086_v20 = vpop.permute.xlu1 %8085  ;;  %vm13720_vm10 = vmmov %vm13718_vm8 }
 0xbe3   : > { %v7505_v38 = vsel %vm13710_vm1, %v12652_v5, %v7504_v62  ;;  %7514 = vst [vmem:[#allocation3 + $0x6c] sm:$0x3] %v7506_v32  ;;  %v7617_v35 = vpop.permute.xlu0 %7616  ;;  %v10094_v0 = vld [vmem:[#allocation3 + $0x15c] ss:$28 sps:$4 sm:$0x3f]   ;;  %9056 = vmatpush1.bf16.msra.mxu0 %v9023_v18  ;;  %v8090_v60 = vrot.slane %v8086_v20, 4 }
 0xbe4   : > { %7513 = vst [vmem:[#allocation3 + $0x64] sm:$0x33] %v7505_v38  ;;  %7982 = vst [vmem:[#allocation3 + $0xd4] sm:$0x33] %v7974_v55  ;;  %v7621_v40 = vrot.slane %v7617_v35, 4  ;;  %9668 = vmatprep.subr.msk.bf16.mxu1 %vm2201_vm2, %v10094_v0  ;;  %vm13719_vm15 = vcmask 318464  }
 0xbe5   : > { %v10096_v48 = vld [vmem:[#allocation3 + $0x158] ss:$28 sps:$4 sm:$0x3f]   ;;  %v8095_v42 = vsel %vm286_vm0, %v8089_v9, %v8090_v60  ;;  %v8097_v56 = vsel %vm13713_vm9, %v8086_v20, %v8090_v60  ;;  %vm13721_vm1 = vmmov %vm13719_vm15  ;;  %vm13722_vm4 = vcmask 7168  }
 0xbe6   : > { %v7626_v5 = vsel %vm286_vm0, %v7620_v47, %v7621_v40  ;;  %v7628_v23 = vsel %vm13712_vm12, %v7617_v35, %v7621_v40  ;;  %v8096_v24 = vsel %vm13715_vm6, %v12668_v15, %v8095_v42  ;;  %8105 = vst [vmem:[#allocation3 + $0xf8] sm:$0x3] %v8097_v56  ;;  %v9029_v19 = vsel %vm2201_vm2, %v10096_v48, 0  ;;  %v8208_v47 = vpop.permute.xlu1 %8207  ;;  %v10097_v30 = vld [vmem:[#allocation3 + $0x10] ss:$28 sps:$4 sm:$0xff]   ;;  %9667 = vmatmul.mubr.msk.bf16.vlgmr.msra.gmra.mrb[24].mxu0 %vm2197_vm3, %v13105_v61  ;;  %vm13724_vm9 = vmmov %vm13722_vm4 }
 0xbe7   : > { %v7627_v16 = vsel %vm13714_vm7, %v12670_v49, %v7626_v5  ;;  %7636 = vst [vmem:[#allocation3 + $0x88] sm:$0x3] %v7628_v23  ;;  %v7739_v12 = vpop.permute.xlu0 %7738  ;;  %v10099_v26 = vld [vmem:[#allocation3 + $0x14] ss:$28 sps:$4 sm:$0xff]   ;;  %8104 = vst [vmem:[#allocation3 + $0xf0] sm:$0x33] %v8096_v24  ;;  %9097 = vmatpush1.bf16.msra.mxu1 %v9029_v19 }
 0xbe8   : > { %7635 = vst [vmem:[#allocation3 + $0x80] sm:$0x33] %v7627_v16  ;;  %v7743_v9 = vrot.slane %v7739_v12, 4  ;;  %v8212_v54 = vrot.slane %v8208_v47, 4  ;;  %v13716_v49 = vmov 0   ;;  %9125 = vmatprep.subr.bf16.mxu0 %v10099_v26  ;;  %9764 = vmatprep.subr.bf16.mxu1 %v13717_v34  ;;  %vm13723_vm12 = vcmask 302080  }
 0xbe9   : > { %9157 = vmatprep.mubr.bf16.mxu0 %v13716_v49  ;;  %9126 = vmatpush1.bf16.msra.mxu0 %v10097_v30  ;;  %v10100_v22 = vld [vmem:[#allocation3 + $0x18] ss:$28 sps:$4 sm:$0xff]   ;;  %vm13726_vm7 = vcmask 236544   ;;  %vm13727_vm6 = vcmask 228352  }
 0xbea   : > { %v7748_v15 = vsel %vm286_vm0, %v7742_v59, %v7743_v9  ;;  %v7750_v8 = vsel %vm13718_vm8, %v7739_v12, %v7743_v9  ;;  %v8217_v1 = vsel %vm286_vm0, %v8211_v52, %v8212_v54  ;;  %v8219_v46 = vsel %vm13719_vm15, %v8208_v47, %v8212_v54  ;;  %9669 = vmatmul.mubr.msk.bf16.vlgmr.msra.gmra.mrb[24].mxu1 %vm2197_vm3, %v13105_v61  ;;  %v8330_v59 = vpop.permute.xlu1 %8329  ;;  %v10104_v17 = vld [vmem:[#allocation3 + $0x50] ss:$28 sps:$4 sm:$0xff]   ;;  %vm13728_vm8 = vmmov %vm13726_vm7 }
 0xbeb   : > { %v7749_v3 = vsel %vm13720_vm10, %v12676_v6, %v7748_v15  ;;  %7758 = vst [vmem:[#allocation3 + $0xa4] sm:$0x3] %v7750_v8  ;;  %v8218_v39 = vsel %vm13721_vm1, %v12674_v31, %v8217_v1  ;;  %8227 = vst [vmem:[#allocation3 + $0x114] sm:$0x3] %v8219_v46  ;;  %v7861_v10 = vpop.permute.xlu0 %7860  ;;  %v10101_v25 = vld [vmem:[#allocation3 + $0x48] ss:$28 sps:$4 sm:$0xff]   ;;  %9765 = vmatpush3.bf16.msra.mxu1 %v10100_v22  ;;  %9778 = vmatprep.mubr.msk.bf16.mxu1 %vm13522_vm5, %v13717_v34 }
 0xbec   : > { %v10103_v45 = vld [vmem:[#allocation3 + $0x4c] ss:$28 sps:$4 sm:$0xff]   ;;  %7757 = vst [vmem:[#allocation3 + $0x9c] sm:$0x33] %v7749_v3  ;;  %8226 = vst [vmem:[#allocation3 + $0x10c] sm:$0x33] %v8218_v39  ;;  %9766 = vmatprep.subr.bf16.mxu1 %v13717_v34 }
 0xbed   : > { %v7865_v52 = vrot.slane %v7861_v10, 4  ;;  %v8334_v63 = vrot.slane %v8330_v59, 4  ;;  %9127 = vmatprep.subr.bf16.mxu0 %v10103_v45  ;;  %vm13725_vm5 = vmmov %vm13723_vm12  ;;  %vm13730_vm10 = vcmask 220160  }
 0xbee   : > { %9128 = vmatpush1.bf16.msra.mxu0 %v10101_v25  ;;  %vm13729_vm15 = vmmov %vm13727_vm6 }
 0xbef   : > { %v7870_v31 = vsel %vm286_vm0, %v7864_v43, %v7865_v52  ;;  %v7872_v6 = vsel %vm13722_vm4, %v7861_v10, %v7865_v52  ;;  %v8339_v50 = vsel %vm286_vm0, %v8333_v57, %v8334_v63  ;;  %v8341_v21 = vsel %vm13723_vm12, %v8330_v59, %v8334_v63  ;;  %v8391_v32 = vpop.permute.xlu0 %8390  ;;  %v8452_v43 = vpop.permute.xlu1 %8451  ;;  %9767 = vmatpush3.bf16.msra.mxu1 %v10104_v17  ;;  %vm13731_vm1 = vmmov %vm13730_vm10  ;;  %v13733_v59 = vld [vmem:[#allocation10_spill] sm:$0xff] }
 0xbf0   : > { %v7871_v58 = vsel %vm13724_vm9, %v12696_v36, %v7870_v31  ;;  %7880 = vst [vmem:[#allocation3 + $0xc0] sm:$0x3] %v7872_v6  ;;  %v8340_v62 = vsel %vm13725_vm5, %v12694_v28, %v8339_v50  ;;  %8349 = vst [vmem:[#allocation3 + $0x130] sm:$0x3] %v8341_v21  ;;  %v8395_v13 = vrot.slane %v8391_v32, 4  ;;  %v8456_v7 = vrot.slane %v8452_v43, 4  ;;  %9768 = vmatprep.subr.bf16.mxu1 %v13717_v34 }
 0xbf1   : > { %7879 = vst [vmem:[#allocation3 + $0xb8] sm:$0x33] %v7871_v58  ;;  %8348 = vst [vmem:[#allocation3 + $0x128] sm:$0x33] %v8340_v62  ;;  %v13734_v21 = vld [vmem:[#allocation11_spill] sm:$0xff]  ;;  %v13735_v62 = vld [vmem:[#allocation12_spill] sm:$0xff] }
 0xbf2   : > { %v8400_v57 = vsel %vm286_vm0, %v8394_v41, %v8395_v13  ;;  %v8402_v36 = vsel %vm13726_vm7, %v8391_v32, %v8395_v13  ;;  %v8461_v28 = vsel %vm286_vm0, %v8455_v51, %v8456_v7  ;;  %v8463_v38 = vsel %vm13727_vm6, %v8452_v43, %v8456_v7  ;;  %v10105_v55 = vld [vmem:[#allocation3 + $0x88] ss:$28 sps:$4 sm:$0xff]   ;;  %v10117_v9 = vld [vmem:[#allocation3 + $0xf8] ss:$28 sps:$4 sm:$0xff]  }
 0xbf3   : > { %v8401_v35 = vsel %vm13728_vm8, %v13020_v44, %v8400_v57  ;;  %8410 = vst [vmem:[#allocation3 + $0x130] sm:$0xc] %v8402_v36  ;;  %v8462_v18 = vsel %vm13729_vm15, %v12701_v27, %v8461_v28  ;;  %8471 = vst [vmem:[#allocation3 + $0x14c] sm:$0x3] %v8463_v38  ;;  %v8513_v20 = vpop.permute.xlu0 %8512  ;;  %v8574_v0 = vpop.permute.xlu1 %8573  ;;  %v10106_v41 = vld [vmem:[#allocation3 + $0x80] ss:$28 sps:$4 sm:$0xff]   ;;  %9769 = vmatpush3.bf16.msra.mxu1 %v10105_v55 }
 0xbf4   : > { %v10108_v40 = vld [vmem:[#allocation3 + $0x84] ss:$28 sps:$4 sm:$0xff]   ;;  %8409 = vst [vmem:[#allocation3 + $0x128] sm:$0xcc] %v8401_v35  ;;  %8470 = vst [vmem:[#allocation3 + $0x144] sm:$0x33] %v8462_v18  ;;  %9770 = vmatprep.subr.bf16.mxu1 %v13717_v34 }
 0xbf5   : > { %v8517_v60 = vrot.slane %v8513_v20, 4  ;;  %v8578_v48 = vrot.slane %v8574_v0, 4  ;;  %9129 = vmatprep.subr.bf16.mxu0 %v10108_v40  ;;  %v10116_v47 = vld [vmem:[#allocation3 + $0xf4] ss:$28 sps:$4 sm:$0xff]   ;;  %v13736_v55 = vld [vmem:[#allocation13_spill] sm:$0xff] }
 0xbf6   : > { %9130 = vmatpush1.bf16.msra.mxu0 %v10106_v41  ;;  %v13738_v40 = vld [vmem:[#allocation15_spill] sm:$0xff] }
 0xbf7   : > { %v8522_v51 = vsel %vm286_vm0, %v8516_v11, %v8517_v60  ;;  %v8524_v44 = vsel %vm13730_vm10, %v8513_v20, %v8517_v60  ;;  %v8583_v27 = vsel %vm286_vm0, %v8577_v2, %v8578_v48  ;;  %v8585_v5 = vsel %vm1756_vm14, %v8574_v0, %v8578_v48  ;;  %v10110_v23 = vld [vmem:[#allocation3 + $0xc0] ss:$28 sps:$4 sm:$0xff]   ;;  %v8635_v16 = vpop.permute.xlu0 %8634  ;;  %v8696_v11 = vpop.permute.xlu1 %8695  ;;  %v13737_v20 = vld [vmem:[#allocation14_spill] sm:$0xff] }
 0xbf8   : > { %v8523_v42 = vsel %vm13731_vm1, %v13033_v33, %v8522_v51  ;;  %8532 = vst [vmem:[#allocation3 + $0x14c] sm:$0xc] %v8524_v44  ;;  %v8584_v56 = vsel %vm1756_vm14, %v12722_v37, %v8583_v27  ;;  %8593 = vst [vmem:[#allocation3 + $0x168] sm:$0x3] %v8585_v5  ;;  %v10111_v24 = vld [vmem:[#allocation3 + $0xb8] ss:$28 sps:$4 sm:$0xff]   ;;  %9771 = vmatpush3.bf16.msra.mxu1 %v10110_v23 }
 0xbf9   : > { %v10113_v12 = vld [vmem:[#allocation3 + $0xbc] ss:$28 sps:$4 sm:$0xff]   ;;  %8531 = vst [vmem:[#allocation3 + $0x144] sm:$0xcc] %v8523_v42  ;;  %8592 = vst [vmem:[#allocation3 + $0x160] sm:$0x33] %v8584_v56  ;;  %9772 = vmatprep.subr.bf16.mxu1 %v13717_v34 }
 0xbfa   : > { %v8639_v19 = vrot.slane %v8635_v16, 4  ;;  %v8700_v2 = vrot.slane %v8696_v11, 4  ;;  %9131 = vmatprep.subr.bf16.mxu0 %v10113_v12 }
 0xbfb   : > { %9132 = vmatpush1.bf16.msra.mxu0 %v10111_v24 }
 0xbfc   : > { %v8644_v33 = vsel %vm286_vm0, %v8638_v29, %v8639_v19  ;;  %v8646_v37 = vsel %vm1818_vm13, %v8635_v16, %v8639_v19  ;;  %v8705_v30 = vsel %vm286_vm0, %v8699_v14, %v8700_v2  ;;  %v8707_v26 = vsel %vm1880_vm11, %v8696_v11, %v8700_v2  ;;  %9133 = vmatprep.subr.bf16.mxu0 %v10116_v47  ;;  %v10114_v29 = vld [vmem:[#allocation3 + $0xf0] ss:$28 sps:$4 sm:$0xff]  }
 0xbfd   : > { %v8645_v54 = vsel %vm1818_vm13, %v13067_v53, %v8644_v33  ;;  %8654 = vst [vmem:[#allocation3 + $0x168] sm:$0xc] %v8646_v37  ;;  %v8706_v49 = vsel %vm1880_vm11, %v12728_v4, %v8705_v30  ;;  %8715 = vst [vmem:[#allocation3 + $0x184] sm:$0x3] %v8707_v26  ;;  %9773 = vmatpush3.bf16.msra.mxu1 %v10117_v9 }
 0xbfe   : > { %8653 = vst [vmem:[#allocation3 + $0x160] sm:$0xcc] %v8645_v54  ;;  %8714 = vst [vmem:[#allocation3 + $0x17c] sm:$0x33] %v8706_v49  ;;  %9774 = vmatprep.subr.bf16.mxu1 %v13717_v34 }
 0xbff   : > { %9134 = vmatpush1.bf16.msra.mxu0 %v10114_v29  ;;  %v10118_v14 = vld [vmem:[#allocation3 + $0x130] ss:$28 sps:$4 sm:$0xff]  }
 0xc00   : > { %v10119_v15 = vld [vmem:[#allocation3 + $0x128] ss:$28 sps:$4 sm:$0xff]  }
 0xc01   : > { %v10121_v8 = vld [vmem:[#allocation3 + $0x12c] ss:$28 sps:$4 sm:$0xff]   ;;  %9775 = vmatpush3.bf16.msra.mxu1 %v10118_v14 }
 0xc02   : > { %9135 = vmatprep.subr.bf16.mxu0 %v10121_v8  ;;  %9776 = vmatprep.subr.bf16.mxu1 %v13717_v34  ;;  %v13732_v34 = vld [vmem:[#allocation9_spill] sm:$0xff] }
 0xc03   : > { %9136 = vmatpush1.bf16.msra.mxu0 %v10119_v15 }
 0xc04   : > { %v10124_v1 = vld [vmem:[#allocation3 + $0x168] ss:$28 sps:$4 sm:$0x3f]  }
 0xc05   : > { %v10122_v53 = vld [vmem:[#allocation3 + $0x164] ss:$28 sps:$4 sm:$0x3f]   ;;  %v9041_v46 = vsel %vm2201_vm2, %v10124_v1, 0 }
 0xc06   : > { %v10125_v4 = vld [vmem:[#allocation3 + $0x160] ss:$28 sps:$4 sm:$0x3f]   ;;  %9670 = vmatprep.subr.msk.bf16.mxu0 %vm2201_vm2, %v10122_v53  ;;  %9777 = vmatpush3.bf16.msra.mxu1 %v9041_v46 }
 0xc07   : > { %v9035_v22 = vsel %vm2201_vm2, %v10125_v4, 0 }
 0xc08   : > { %9138 = vmatpush1.bf16.msra.mxu0 %v9035_v22 }
 0xc09   : > { %9779 = vmatmul.mubr.msk.bf16.vlgmr.msra.gmra.mrb[28].mxu1 %vm2197_vm3, %v13105_v61 }
 0xc0b   : > { %9671 = vmatmul.mubr.msk.bf16.vlgmr.msra.gmra.mrb[28].mxu0 %vm2197_vm3, %v13105_v61 }
 0xcb9   : > { %v9077_v3 = vpop.f32.mrb[24].mxu0 }
 0xcba   : > { %v9206_v39 = vmul.f32 %v9077_v3, %v13732_v34  ;;  %v9079_v10 = vpop.f32.mrb[25].mxu0 }
 0xcbb   : > { %v9207_v25 = vmul.f32 %v9079_v10, %v13733_v59  ;;  %v9081_v45 = vpop.f32.mrb[26].mxu0 }
 0xcbc   : > { %v9213_v52 = vsel %vm286_vm0, %v9206_v39, 0.0  ;;  %v9082_v63 = vpop.f32.mrb[27].mxu0 }
 0xcbd   : > { %v9214_v31 = vsel %vm286_vm0, %v9207_v25, 0.0  ;;  %v9118_v6 = vpop.f32.mrb[24].mxu1 }
 0xcbe   : > { %v9215_v50 = vadd.f32 %v9214_v31, %v9213_v52  ;;  %v9208_v17 = vmul.f32 %v9118_v6, %v13734_v21  ;;  %v9120_v58 = vpop.f32.mrb[25].mxu1 }
 0xcbf   : > { %v9209_v32 = vmul.f32 %v9120_v58, %v13735_v62  ;;  %v9122_v61 = vpop.f32.mrb[26].mxu1 }
 0xcc0   : > { %v9216_v43 = vsel %vm286_vm0, %v9208_v17, 0.0  ;;  %v9123_v13 = vpop.f32.mrb[27].mxu1 }
 0xcc1   : > { %v9217_v7 = vadd.f32 %v9216_v43, %v9215_v50  ;;  %v9218_v57 = vsel %vm286_vm0, %v9209_v32, 0.0 }
 0xcc3   : > { %v9219_v36 = vadd.f32 %v9218_v57, %v9217_v7 }
 0xcdc   : > { %v9200_v38 = vpop.f32.mrb[28].mxu1 }
 0xcdd   : > { %v9212_v0 = vmul.f32 %v9200_v38, %v13737_v20  ;;  %v9780_v41 = vpop.f32.mrb[29].mxu1 }
 0xcde   : > { %v9159_v28 = vpop.f32.mrb[28].mxu0  ;;  %v9203_v51 = vpop.f32.mrb[30].mxu1 }
 0xcdf   : > { %v9210_v35 = vmul.f32 %v9159_v28, %v13736_v55  ;;  %v9161_v18 = vpop.f32.mrb[29].mxu0  ;;  %v9781_v5 = vpop.f32.mrb[31].mxu1  ;;  %v9224_v56 = vsel %vm286_vm0, %v9212_v0, 0.0 }
 0xce0   : > { %v9211_v60 = vmul.f32 %v9161_v18, %v13738_v40  ;;  %v9163_v48 = vpop.f32.mrb[30].mxu0 }
 0xce1   : > { %v9220_v44 = vsel %vm286_vm0, %v9210_v35, 0.0  ;;  %v9164_v27 = vpop.f32.mrb[31].mxu0 }
 0xce2   : > { %v9221_v23 = vadd.f32 %v9220_v44, %v9219_v36  ;;  %v9222_v42 = vsel %vm286_vm0, %v9211_v60, 0.0  ;;  %v7084_v36 = vld [vmem:[#allocation4] sm:$0xff] }
 0xce4   : > { %v9223_v16 = vadd.f32 %v9222_v42, %v9221_v23  ;;  %v7087_v42 = vld [vmem:[#allocation4 + $0x18] sm:$0xf] }
 0xce6   : > { %v9225_v11 = vadd.f32 %v9224_v56, %v9223_v16 }
 0xce8   : > { %9226 = vadd.xlane.f32.xlu0 %v9225_v11 }
 0xd75   : > { %v9227_v24 = vpop.xlane.xlu0 %9226 }
 0xd76   : > { %v9228_v12 = vmul.f32 0.001953125, %v9227_v24 }
 0xd78   : > { %v9229_v19 = vsub.f32 %v9077_v3, %v9228_v12  ;;  %v9230_v2 = vsub.f32 %v9079_v10, %v9228_v12  ;;  %v9231_v47 = vsub.f32 %v9118_v6, %v9228_v12  ;;  %v9232_v33 = vsub.f32 %v9120_v58, %v9228_v12 }
 0xd79   : > { %v9233_v37 = vsub.f32 %v9159_v28, %v9228_v12  ;;  %v9234_v30 = vsub.f32 %v9161_v18, %v9228_v12  ;;  %v9235_v29 = vsub.f32 %v9200_v38, %v9228_v12  ;;  %v7085_v28 = vld [vmem:[#allocation4 + $0x8] sm:$0xff]  ;;  %v7086_v38 = vld [vmem:[#allocation4 + $0x10] sm:$0xff]  ;;  %v9278_v18 = vcombine.high %v7084_v36, %v7084_v36 }
 0xd7a   : > { %v9236_v26 = vmul.f32 %v9229_v19, %v13732_v34  ;;  %v9237_v9 = vmul.f32 %v9230_v2, %v13733_v59  ;;  %v9238_v54 = vmul.f32 %v9231_v47, %v13734_v21  ;;  %v9239_v49 = vmul.f32 %v9232_v33, %v13735_v62 }
 0xd7b   : > { %v9240_v14 = vmul.f32 %v9233_v37, %v13736_v55  ;;  %v9241_v1 = vmul.f32 %v9234_v30, %v13738_v40  ;;  %v9242_v39 = vmul.f32 %v9235_v29, %v13737_v20  ;;  %v9279_v0 = vcombine.high %v7085_v28, %v7085_v28 }
 0xd7c   : > { %v9243_v15 = vmul.f32 %v9236_v26, %v9236_v26  ;;  %v9244_v8 = vmul.f32 %v9237_v9, %v9237_v9  ;;  %v9245_v53 = vmul.f32 %v9238_v54, %v9238_v54  ;;  %v9246_v4 = vmul.f32 %v9239_v49, %v9239_v49 }
 0xd7d   : > { %v9247_v10 = vmul.f32 %v9240_v14, %v9240_v14  ;;  %v9248_v52 = vmul.f32 %v9241_v1, %v9241_v1  ;;  %v9249_v6 = vmul.f32 %v9242_v39, %v9242_v39  ;;  %v9280_v44 = vcombine.high %v7086_v38, %v7086_v38  ;;  %v13739_v39 = vld [vmem:[#allocation8_spill] sm:$0xff] }
 0xd7e   : > { %v9250_v46 = vsel %vm286_vm0, %v9243_v15, 0.0  ;;  %v9251_v22 = vsel %vm286_vm0, %v9244_v8, 0.0  ;;  %v9253_v25 = vsel %vm286_vm0, %v9245_v53, 0.0  ;;  %v9255_v63 = vsel %vm286_vm0, %v9246_v4, 0.0 }
 0xd7f   : > { %v9252_v3 = vadd.f32 %v9251_v22, %v9250_v46  ;;  %v9257_v50 = vsel %vm286_vm0, %v9247_v10, 0.0  ;;  %v9259_v58 = vsel %vm286_vm0, %v9248_v52, 0.0  ;;  %v9261_v61 = vsel %vm286_vm0, %v9249_v6, 0.0 }
 0xd81   : > { %v9254_v45 = vadd.f32 %v9253_v25, %v9252_v3 }
 0xd83   : > { %v9256_v31 = vadd.f32 %v9255_v63, %v9254_v45 }
 0xd85   : > { %v9258_v17 = vadd.f32 %v9257_v50, %v9256_v31 }
 0xd87   : > { %v9260_v32 = vadd.f32 %v9259_v58, %v9258_v17 }
 0xd89   : > { %v9262_v43 = vadd.f32 %v9261_v61, %v9260_v32 }
 0xd8b   : > { %9263 = vadd.xlane.f32.xlu1 %v9262_v43 }
 0xe18   : > { %v9264_v13 = vpop.xlane.xlu1 %9263 }
 0xe19   : > { %v9265_v7 = vmul.f32 0.001953125, %v9264_v13 }
 0xe1b   : > { %v9266_v57 = vadd.f32 1e-05, %v9265_v7 }
 0xe1d   : > { %10135 = vrsqrt.f32 %v9266_v57 }
 0xe27   : > { %v10136_v35 = vpop.eup %10135 }
 0xe28   : > { %v9268_v41 = vmul.f32 %v10136_v35, %v9229_v19  ;;  %v9269_v60 = vmul.f32 %v10136_v35, %v9230_v2  ;;  %v9270_v48 = vmul.f32 %v10136_v35, %v9231_v47  ;;  %v9271_v51 = vmul.f32 %v10136_v35, %v9232_v33 }
 0xe29   : > { %v9272_v27 = vmul.f32 %v10136_v35, %v9233_v37  ;;  %v9273_v5 = vmul.f32 %v10136_v35, %v9234_v30  ;;  %v9274_v23 = vmul.f32 %v10136_v35, %v9235_v29 }
 0xe2a   : > { %v9284_v56 = vadd.f32 %v9268_v41, %v7084_v36  ;;  %v9285_v16 = vadd.f32 %v9278_v18, %v9269_v60  ;;  %v9286_v11 = vadd.f32 %v9270_v48, %v7085_v28  ;;  %v9287_v24 = vadd.f32 %v9279_v0, %v9271_v51 }
 0xe2b   : > { %v9288_v12 = vadd.f32 %v9272_v27, %v7086_v38  ;;  %v9289_v26 = vadd.f32 %v9280_v44, %v9273_v5  ;;  %v9290_v9 = vadd.f32 %v9274_v23, %v7087_v42 }
 0xe2c   : > { %v9291_v54 = vmax.f32 %v9284_v56, 0.0  ;;  %v9292_v49 = vmax.f32 %v9285_v16, 0.0  ;;  %v9293_v14 = vmax.f32 %v9286_v11, 0.0  ;;  %v9294_v19 = vmax.f32 %v9287_v24, 0.0 }
 0xe2d   : > { %v9295_v2 = vmax.f32 %v9288_v12, 0.0  ;;  %v9296_v47 = vmax.f32 %v9289_v26, 0.0  ;;  %v9297_v33 = vmax.f32 %v9290_v9, 0.0 }
 0xe2e   : > { %v9298_v37 = vmul.f32 %v9291_v54, %v13732_v34  ;;  %v9299_v30 = vmul.f32 %v9292_v49, %v13733_v59  ;;  %v9300_v29 = vmul.f32 %v9293_v14, %v13734_v21  ;;  %v9301_v15 = vmul.f32 %v9294_v19, %v13735_v62 }
 0xe2f   : > { %v9302_v8 = vmul.f32 %v9295_v2, %v13736_v55  ;;  %v9303_v53 = vmul.f32 %v9296_v47, %v13738_v40  ;;  %v9304_v1 = vmul.f32 %v9297_v33, %v13737_v20 }
 0xe30   : > { %v9673_v4 = vpack.c.bf16 %v9299_v30, %v9298_v37  ;;  %v9674_v46 = vpack.c.bf16 %v9301_v15, %v9300_v29 }
 0xe31   : > { %v9311_v22 = vpack.c.bf16 %v9304_v1, %v9304_v1  ;;  %v9675_v3 = vpack.c.bf16 %v9303_v53, %v9302_v8 }
 0xe32   : > { %v9327_v10 = vrot.slane %v9673_v4, %v13739_v39  ;;  %v9334_v34 = vrot.slane %v9674_v46, %v13739_v39 }
 0xe33   : > { %v9343_v59 = vrot.slane %v9675_v3, %v13739_v39  ;;  %v9350_v21 = vrot.slane %v9311_v22, %v13739_v39 }
 0xe34   : > { %v9335_v62 = vcombine.low %v9327_v10, %v9334_v34 }
 0xe35   : > { %v9351_v55 = vcombine.low %v9343_v59, %v9350_v21 }
 0xe36   : > { %9354 = vst [vmem:[%s170_s24] sm:$0xff] %v9335_v62 }
 0xe37   : > { %9355 = vst [vmem:[%s170_s24 + $0x8] sm:$0x3f] %v9351_v55 }
 0xe38 PF: > { %s13_s12 = sadd.s32 1, %s10155_s12  }
 0xe39   : > { %p10_p4 = scmp.ge.s32.totalorder %s13_s12, 4  }
 0xe3b   :  { %12 = sbr.rel (!%p10_p4) target bundleno = 1 (0x1), region = 65 }

</bundles_post_ra>
